<compile_context>
chip_gen: v7x
topology: tpu7x:2x2x1
jax: 0.10.0
libtpu: 0.0.40
codegen_flags: <defaults>
</compile_context>

<pallas_src>
import jax
import jax.numpy as jnp
from jax.experimental import pallas as pl
from jax.experimental.pallas import tpu as pltpu

INP = 384
HID1 = 256
HID2 = 256
OUTP = 554
OUTP_PAD = 640  # 5 * 128, lane-dense padded output width


def _elu(x):
    # F.elu with alpha=1.0 (exp clamped so the inactive branch can't overflow).
    return jnp.where(x > 0, x, jnp.exp(jnp.minimum(x, 0.0)) - 1.0)


def _linear_bf16(h, w_bf16, b_f32):
    # bf16 MXU matmul with f32 accumulation, f32 bias add.
    return jnp.dot(h.astype(jnp.bfloat16), w_bf16,
                   preferred_element_type=jnp.float32) + b_f32


def net_kernel_blend(c_ref, x_ref, w1_ref, b1_ref, w2_ref, b2_ref,
                     w3_ref, b3_ref, out_ref):
    """Single-batch-tile path: blend the 4 stacked bf16 weight sets in-kernel.

    c_ref : (4,) f32 SMEM   -- blend coefficients in canonical network order.
    x_ref : (B, INP) f32
    wN_ref: (4, K, N) bf16  (pre-transposed)
    bN_ref: (4, 1, N) f32
    """
    c0 = c_ref[0]
    c1 = c_ref[1]
    c2 = c_ref[2]
    c3 = c_ref[3]

    def blend_w(w_ref):
        # Blend in f32 (accuracy), cast once to bf16 for the MXU.
        W = (c0 * w_ref[0].astype(jnp.float32)
             + c1 * w_ref[1].astype(jnp.float32)
             + c2 * w_ref[2].astype(jnp.float32)
             + c3 * w_ref[3].astype(jnp.float32))
        return W.astype(jnp.bfloat16)

    def blend_b(b_ref):
        return c0 * b_ref[0] + c1 * b_ref[1] + c2 * b_ref[2] + c3 * b_ref[3]

    x = x_ref[...]
    h1 = _elu(_linear_bf16(x, blend_w(w1_ref), blend_b(b1_ref)))
    h2 = _elu(_linear_bf16(h1, blend_w(w2_ref), blend_b(b2_ref)))
    out_ref[...] = _linear_bf16(h2, blend_w(w3_ref), blend_b(b3_ref))


def net_kernel_preblended(x_ref, w1_ref, b1_ref, w2_ref, b2_ref,
                          w3_ref, b3_ref, out_ref):
    """Multi-tile path: weights already blended in the wrapper; 3 bf16 matmuls."""
    x = x_ref[...]
    h1 = _elu(_linear_bf16(x, w1_ref[...], b1_ref[...]))
    h2 = _elu(_linear_bf16(h1, w2_ref[...], b2_ref[...]))
    out_ref[...] = _linear_bf16(h2, w3_ref[...], b3_ref[...])


def init_params(key):
    """Deterministic parameter init (PyTorch-Linear-like uniform bounds)."""
    params = {}
    layer_dims = {1: (INP, HID1), 2: (HID1, HID2), 3: (HID2, OUTP)}
    for net in range(4):          # fc0x, fc1x, fc2x, fc3x
        for layer, (fan_in, fan_out) in layer_dims.items():
            key, kw, kb = jax.random.split(key, 3)
            bound = 1.0 / (fan_in ** 0.5)
            params[f"fc{net}{layer}_w"] = jax.random.uniform(
                kw, (fan_out, fan_in), jnp.float32, -bound, bound)
            params[f"fc{net}{layer}_b"] = jax.random.uniform(
                kb, (fan_out,), jnp.float32, -bound, bound)
    return params


def prepack_params(params):
    """One-time packing (module-init analog): stack the 4 networks in canonical
    order, pre-transpose weights to [K, N], pad layer-3 width to 640 lanes, and
    store weights in bf16 (halves the weight DMA, which dominates small-batch)."""
    packed = {}
    for layer in (1, 2, 3):
        W = jnp.stack([params[f"fc{n}{layer}_w"].T for n in range(4)], axis=0)
        b = jnp.stack([params[f"fc{n}{layer}_b"] for n in range(4)],
                      axis=0)[:, None, :]
        if layer == 3:
            W = jnp.pad(W, ((0, 0), (0, 0), (0, OUTP_PAD - OUTP)))
            b = jnp.pad(b, ((0, 0), (0, 0), (0, OUTP_PAD - OUTP)))
        packed[layer] = (W.astype(jnp.bfloat16), b.astype(jnp.float32))
    return packed


def _blend_coeffs(phase):
    """Exact PyTorch scalar arithmetic -> 4 coefficients in canonical net order."""
    w = phase * 4.0 % 1
    k = -int(phase * -4.0)
    w2 = w * w
    w3 = w2 * w
    # Coefficients of a1..a4 (networks (k+0..3) % 4) in the blend expression.
    per_pos = (1.0 - 2.5 * w2 + 1.5 * w3,
               0.5 * w + 2.0 * w2 - 1.5 * w3,
               -0.5 * w2 + 0.5 * w3,
               -0.5 * w + w2 - 0.5 * w3)
    coeffs = [0.0, 0.0, 0.0, 0.0]
    for i in range(4):
        coeffs[(k + i) % 4] = per_pos[i]
    return coeffs


def net_forward(packed, x, phase):
    """phase is a Python float (scalar), matching the PyTorch module usage."""
    coeffs = _blend_coeffs(phase)
    B = x.shape[0]

    # Batch tiling: single tile up to 256 rows; 256-row tiles above that so the
    # "parallel" axis can shard across TensorCores (v7x megacore).
    if B <= 256:
        tile_b, Bp = B, B
    else:
        tile_b = 256
        Bp = pl.cdiv(B, tile_b) * tile_b
    xp = x if Bp == B else jnp.pad(x, ((0, Bp - B), (0, 0)))
    num_tiles = Bp // tile_b

    W1, b1 = packed[1]
    W2, b2 = packed[2]
    W3, b3 = packed[3]

    def full_spec(shape):
        n = len(shape)
        return pl.BlockSpec(shape, lambda i, _n=n: (0,) * _n)

    x_spec = pl.BlockSpec((tile_b, INP), lambda i: (i, 0))
    out_spec = pl.BlockSpec((tile_b, OUTP_PAD), lambda i: (i, 0))
    out_shape = jax.ShapeDtypeStruct((Bp, OUTP_PAD), jnp.float32)
    cparams = pltpu.CompilerParams(
        dimension_semantics=("parallel",),
        vmem_limit_bytes=32 * 1024 * 1024,
    )

    if num_tiles == 1:
        # Small batch: weight-DMA bound; ship the bf16 4-stack once and blend
        # in-kernel (no extra HBM round trip for a blended copy).
        c = jnp.asarray(coeffs, dtype=jnp.float32)
        smem = pl.BlockSpec(memory_space=pltpu.MemorySpace.SMEM)
        out = pl.pallas_call(
            net_kernel_blend,
            out_shape=out_shape,
            grid=(1,),
            in_specs=[
                smem, x_spec,
                full_spec(W1.shape), full_spec(b1.shape),
                full_spec(W2.shape), full_spec(b2.shape),
                full_spec(W3.shape), full_spec(b3.shape),
            ],
            out_specs=out_spec,
            compiler_params=cparams,
        )(c, xp, W1, b1, W2, b2, W3, b3)
    else:
        # Large batch: hoist the 4-way blend out of the per-tile body — blend
        # once in the wrapper (f32), cast to bf16, and run a pure 3-matmul
        # kernel per tile.
        c = jnp.asarray(coeffs, dtype=jnp.float32)

        def blend(W, b):
            Wb = jnp.einsum("nko,n->ko", W.astype(jnp.float32),
                            c).astype(jnp.bfloat16)
            bb = jnp.einsum("nro,n->ro", b, c)
            return Wb, bb

        W1b, b1b = blend(W1, b1)
        W2b, b2b = blend(W2, b2)
        W3b, b3b = blend(W3, b3)
        out = pl.pallas_call(
            net_kernel_preblended,
            out_shape=out_shape,
            grid=(num_tiles,),
            in_specs=[
                x_spec,
                full_spec(W1b.shape), full_spec(b1b.shape),
                full_spec(W2b.shape), full_spec(b2b.shape),
                full_spec(W3b.shape), full_spec(b3b.shape),
            ],
            out_specs=out_spec,
            compiler_params=cparams,
        )(xp, W1b, b1b, W2b, b2b, W3b, b3b)

    out = out[:, :OUTP]
    return out if Bp == B else out[:B]


def net_reference(params, x, phase):
    """Plain-JAX transliteration of the PyTorch forward (4 matmuls per layer)."""
    w = phase * 4.0 % 1
    k = -int(phase * -4.0)
    order = [(k + i) % 4 for i in range(4)]

    def lin(n, layer, h):
        return h @ params[f"fc{n}{layer}_w"].T + params[f"fc{n}{layer}_b"]

    def blend(layer, h):
        y1, y2, y3, y4 = [lin(n, layer, h) for n in order]
        return (y1 + w * (y2 / 2.0 - y4 / 2.0)
                + w ** 2.0 * (y4 - y1 * 5.0 / 2.0 + 2.0 * y2 - y3 / 2.0)
                + w ** 3.0 * (y1 * 3.0 / 2.0 - y2 * 3.0 / 2.0
                              + y3 / 2.0 - y4 / 2.0))

    h1 = _elu(blend(1, x))
    h2 = _elu(blend(2, h1))
    return blend(3, h2)


if __name__ == "__main__":
    key = jax.random.PRNGKey(0)
    pkey, xkey = jax.random.split(key)
    params = init_params(pkey)
    packed = prepack_params(params)   # one-time stacking/padding/bf16, not per-forward

    # Reference uses the same bf16-rounded weights the kernel stores, so the
    # comparison isolates kernel math from the intentional bf16 storage cast.
    params_q = {k: (v.astype(jnp.bfloat16).astype(jnp.float32)
                    if k.endswith("_w") else v)
                for k, v in params.items()}

    phase = 0.37  # scalar phase, as in the PyTorch forward

    # Small batch: single-tile, in-kernel blend path.
    B = 8
    x = jax.random.normal(xkey, (B, INP), dtype=jnp.float32)
    out = jax.block_until_ready(net_forward(packed, x, phase))
    ref = net_reference(params_q, x, phase)
    assert out.shape == (B, OUTP), out.shape
    err = float(jnp.max(jnp.abs(out - ref)))
    # bf16 matmul inputs -> allow a tolerance above pure-f32 round-off; genuine
    # bugs (wrong blend order / coefficients) produce O(0.1) errors.
    assert err < 2e-2, f"small-batch max abs err {err}"

    # Larger batch: exercises the multi-tile, wrapper-preblended path.
    B2 = 300
    x2 = jax.random.normal(jax.random.PRNGKey(1), (B2, INP), dtype=jnp.float32)
    out2 = jax.block_until_ready(net_forward(packed, x2, phase))
    ref2 = net_reference(params_q, x2, phase)
    assert out2.shape == (B2, OUTP), out2.shape
    err2 = float(jnp.max(jnp.abs(out2 - ref2)))
    assert err2 < 2e-2, f"multi-tile max abs err {err2}"

    print("KERNEL_OK")
</pallas_src>

<mosaic_0001>
module attributes {stable_mosaic.version = 11 : i64} {
  func.func @net_kernel_blend(%arg0: i32, %arg1: memref<4xf32, #tpu.memory_space<smem>>, %arg2: memref<8x384xf32, #tpu.memory_space<vmem>>, %arg3: memref<4x384x256xbf16, #tpu.memory_space<vmem>>, %arg4: memref<4x1x256xf32, #tpu.memory_space<vmem>>, %arg5: memref<4x256x256xbf16, #tpu.memory_space<vmem>>, %arg6: memref<4x1x256xf32, #tpu.memory_space<vmem>>, %arg7: memref<4x256x640xbf16, #tpu.memory_space<vmem>>, %arg8: memref<4x1x640xf32, #tpu.memory_space<vmem>>, %arg9: memref<8x640xf32, #tpu.memory_space<vmem>>) attributes {dimension_semantics = [#tpu.dimension_semantics<parallel>], iteration_bounds = array<i64: 1>, scalar_prefetch = 0 : i64, scratch_operands = 0 : i64, tpu.core_type = #tpu.core_type<tc>, window_params = [{transform_indices = @transform_0, window_bounds = array<i64: 4>}, {transform_indices = @transform_1, window_bounds = array<i64: 8, 384>}, {pipeline_mode = #tpu.pipeline_mode<synchronous>, transform_indices = @transform_2, window_bounds = array<i64: 4, 384, 256>}, {pipeline_mode = #tpu.pipeline_mode<synchronous>, transform_indices = @transform_3, window_bounds = array<i64: 4, 1, 256>}, {pipeline_mode = #tpu.pipeline_mode<synchronous>, transform_indices = @transform_4, window_bounds = array<i64: 4, 256, 256>}, {pipeline_mode = #tpu.pipeline_mode<synchronous>, transform_indices = @transform_5, window_bounds = array<i64: 4, 1, 256>}, {pipeline_mode = #tpu.pipeline_mode<synchronous>, transform_indices = @transform_6, window_bounds = array<i64: 4, 256, 640>}, {pipeline_mode = #tpu.pipeline_mode<synchronous>, transform_indices = @transform_7, window_bounds = array<i64: 4, 1, 640>}, {transform_indices = @transform_8, window_bounds = array<i64: 8, 640>}]} {
    %c0 = arith.constant 0 : index
    %0 = memref.load %arg1[%c0] : memref<4xf32, #tpu.memory_space<smem>>
    %c1 = arith.constant 1 : index
    %1 = memref.load %arg1[%c1] : memref<4xf32, #tpu.memory_space<smem>>
    %c2 = arith.constant 2 : index
    %2 = memref.load %arg1[%c2] : memref<4xf32, #tpu.memory_space<smem>>
    %c3 = arith.constant 3 : index
    %3 = memref.load %arg1[%c3] : memref<4xf32, #tpu.memory_space<smem>>
    %c0_0 = arith.constant 0 : index
    %c0_1 = arith.constant 0 : index
    %4 = vector.load %arg2[%c0_0, %c0_1] : memref<8x384xf32, #tpu.memory_space<vmem>>, vector<8x384xf32>
    %c0_2 = arith.constant 0 : index
    %c0_3 = arith.constant 0 : index
    %c0_4 = arith.constant 0 : index
    %5 = vector.load %arg3[%c0_2, %c0_3, %c0_4] : memref<4x384x256xbf16, #tpu.memory_space<vmem>>, vector<1x384x256xbf16>
    %6 = vector.shape_cast %5 : vector<1x384x256xbf16> to vector<384x256xbf16>
    %7 = arith.extf %6 : vector<384x256xbf16> to vector<384x256xf32>
    %8 = vector.broadcast %0 : f32 to vector<384x256xf32>
    %9 = arith.mulf %8, %7 : vector<384x256xf32>
    %c1_5 = arith.constant 1 : index
    %c0_6 = arith.constant 0 : index
    %c0_7 = arith.constant 0 : index
    %10 = vector.load %arg3[%c1_5, %c0_6, %c0_7] : memref<4x384x256xbf16, #tpu.memory_space<vmem>>, vector<1x384x256xbf16>
    %11 = vector.shape_cast %10 : vector<1x384x256xbf16> to vector<384x256xbf16>
    %12 = arith.extf %11 : vector<384x256xbf16> to vector<384x256xf32>
    %13 = vector.broadcast %1 : f32 to vector<384x256xf32>
    %14 = arith.mulf %13, %12 : vector<384x256xf32>
    %15 = arith.addf %9, %14 : vector<384x256xf32>
    %c2_8 = arith.constant 2 : index
    %c0_9 = arith.constant 0 : index
    %c0_10 = arith.constant 0 : index
    %16 = vector.load %arg3[%c2_8, %c0_9, %c0_10] : memref<4x384x256xbf16, #tpu.memory_space<vmem>>, vector<1x384x256xbf16>
    %17 = vector.shape_cast %16 : vector<1x384x256xbf16> to vector<384x256xbf16>
    %18 = arith.extf %17 : vector<384x256xbf16> to vector<384x256xf32>
    %19 = vector.broadcast %2 : f32 to vector<384x256xf32>
    %20 = arith.mulf %19, %18 : vector<384x256xf32>
    %21 = arith.addf %15, %20 : vector<384x256xf32>
    %c3_11 = arith.constant 3 : index
    %c0_12 = arith.constant 0 : index
    %c0_13 = arith.constant 0 : index
    %22 = vector.load %arg3[%c3_11, %c0_12, %c0_13] : memref<4x384x256xbf16, #tpu.memory_space<vmem>>, vector<1x384x256xbf16>
    %23 = vector.shape_cast %22 : vector<1x384x256xbf16> to vector<384x256xbf16>
    %24 = arith.extf %23 : vector<384x256xbf16> to vector<384x256xf32>
    %25 = vector.broadcast %3 : f32 to vector<384x256xf32>
    %26 = arith.mulf %25, %24 : vector<384x256xf32>
    %27 = arith.addf %21, %26 : vector<384x256xf32>
    %28 = arith.truncf %27 : vector<384x256xf32> to vector<384x256xbf16>
    %c0_14 = arith.constant 0 : index
    %c0_15 = arith.constant 0 : index
    %c0_16 = arith.constant 0 : index
    %29 = vector.load %arg4[%c0_14, %c0_15, %c0_16] : memref<4x1x256xf32, #tpu.memory_space<vmem>>, vector<1x1x256xf32>
    %30 = vector.shape_cast %29 : vector<1x1x256xf32> to vector<1x256xf32>
    %31 = vector.broadcast %0 : f32 to vector<1x256xf32>
    %32 = arith.mulf %31, %30 : vector<1x256xf32>
    %c1_17 = arith.constant 1 : index
    %c0_18 = arith.constant 0 : index
    %c0_19 = arith.constant 0 : index
    %33 = vector.load %arg4[%c1_17, %c0_18, %c0_19] : memref<4x1x256xf32, #tpu.memory_space<vmem>>, vector<1x1x256xf32>
    %34 = vector.shape_cast %33 : vector<1x1x256xf32> to vector<1x256xf32>
    %35 = vector.broadcast %1 : f32 to vector<1x256xf32>
    %36 = arith.mulf %35, %34 : vector<1x256xf32>
    %37 = arith.addf %32, %36 : vector<1x256xf32>
    %c2_20 = arith.constant 2 : index
    %c0_21 = arith.constant 0 : index
    %c0_22 = arith.constant 0 : index
    %38 = vector.load %arg4[%c2_20, %c0_21, %c0_22] : memref<4x1x256xf32, #tpu.memory_space<vmem>>, vector<1x1x256xf32>
    %39 = vector.shape_cast %38 : vector<1x1x256xf32> to vector<1x256xf32>
    %40 = vector.broadcast %2 : f32 to vector<1x256xf32>
    %41 = arith.mulf %40, %39 : vector<1x256xf32>
    %42 = arith.addf %37, %41 : vector<1x256xf32>
    %c3_23 = arith.constant 3 : index
    %c0_24 = arith.constant 0 : index
    %c0_25 = arith.constant 0 : index
    %43 = vector.load %arg4[%c3_23, %c0_24, %c0_25] : memref<4x1x256xf32, #tpu.memory_space<vmem>>, vector<1x1x256xf32>
    %44 = vector.shape_cast %43 : vector<1x1x256xf32> to vector<1x256xf32>
    %45 = vector.broadcast %3 : f32 to vector<1x256xf32>
    %46 = arith.mulf %45, %44 : vector<1x256xf32>
    %47 = arith.addf %42, %46 : vector<1x256xf32>
    %48 = arith.truncf %4 : vector<8x384xf32> to vector<8x384xbf16>
    %cst = arith.constant dense<0.000000e+00> : vector<8x256xf32>
    %49 = tpu.matmul %48, %28, %cst {dimension_numbers = #tpu.dot_dimension_numbers<[1], [0], [0], [1], [0, 0, 1, 1], [], []>} : vector<8x384xbf16>, vector<384x256xbf16>, vector<8x256xf32> -> vector<8x256xf32>
    %50 = vector.broadcast %47 : vector<1x256xf32> to vector<8x256xf32>
    %51 = arith.addf %49, %50 : vector<8x256xf32>
    %cst_26 = arith.constant 0.000000e+00 : f32
    %52 = vector.broadcast %cst_26 : f32 to vector<8x256xf32>
    %53 = arith.cmpf ogt, %51, %52 : vector<8x256xf32>
    %cst_27 = arith.constant 0.000000e+00 : f32
    %54 = vector.broadcast %cst_27 : f32 to vector<8x256xf32>
    %55 = arith.minimumf %51, %54 : vector<8x256xf32>
    %56 = math.exp %55 : vector<8x256xf32>
    %cst_28 = arith.constant 1.000000e+00 : f32
    %57 = vector.broadcast %cst_28 : f32 to vector<8x256xf32>
    %58 = arith.subf %56, %57 : vector<8x256xf32>
    %59 = arith.select %53, %51, %58 : vector<8x256xi1>, vector<8x256xf32>
    %c0_29 = arith.constant 0 : index
    %c0_30 = arith.constant 0 : index
    %c0_31 = arith.constant 0 : index
    %60 = vector.load %arg5[%c0_29, %c0_30, %c0_31] : memref<4x256x256xbf16, #tpu.memory_space<vmem>>, vector<1x256x256xbf16>
    %61 = vector.shape_cast %60 : vector<1x256x256xbf16> to vector<256x256xbf16>
    %62 = arith.extf %61 : vector<256x256xbf16> to vector<256x256xf32>
    %63 = vector.broadcast %0 : f32 to vector<256x256xf32>
    %64 = arith.mulf %63, %62 : vector<256x256xf32>
    %c1_32 = arith.constant 1 : index
    %c0_33 = arith.constant 0 : index
    %c0_34 = arith.constant 0 : index
    %65 = vector.load %arg5[%c1_32, %c0_33, %c0_34] : memref<4x256x256xbf16, #tpu.memory_space<vmem>>, vector<1x256x256xbf16>
    %66 = vector.shape_cast %65 : vector<1x256x256xbf16> to vector<256x256xbf16>
    %67 = arith.extf %66 : vector<256x256xbf16> to vector<256x256xf32>
    %68 = vector.broadcast %1 : f32 to vector<256x256xf32>
    %69 = arith.mulf %68, %67 : vector<256x256xf32>
    %70 = arith.addf %64, %69 : vector<256x256xf32>
    %c2_35 = arith.constant 2 : index
    %c0_36 = arith.constant 0 : index
    %c0_37 = arith.constant 0 : index
    %71 = vector.load %arg5[%c2_35, %c0_36, %c0_37] : memref<4x256x256xbf16, #tpu.memory_space<vmem>>, vector<1x256x256xbf16>
    %72 = vector.shape_cast %71 : vector<1x256x256xbf16> to vector<256x256xbf16>
    %73 = arith.extf %72 : vector<256x256xbf16> to vector<256x256xf32>
    %74 = vector.broadcast %2 : f32 to vector<256x256xf32>
    %75 = arith.mulf %74, %73 : vector<256x256xf32>
    %76 = arith.addf %70, %75 : vector<256x256xf32>
    %c3_38 = arith.constant 3 : index
    %c0_39 = arith.constant 0 : index
    %c0_40 = arith.constant 0 : index
    %77 = vector.load %arg5[%c3_38, %c0_39, %c0_40] : memref<4x256x256xbf16, #tpu.memory_space<vmem>>, vector<1x256x256xbf16>
    %78 = vector.shape_cast %77 : vector<1x256x256xbf16> to vector<256x256xbf16>
    %79 = arith.extf %78 : vector<256x256xbf16> to vector<256x256xf32>
    %80 = vector.broadcast %3 : f32 to vector<256x256xf32>
    %81 = arith.mulf %80, %79 : vector<256x256xf32>
    %82 = arith.addf %76, %81 : vector<256x256xf32>
    %83 = arith.truncf %82 : vector<256x256xf32> to vector<256x256xbf16>
    %c0_41 = arith.constant 0 : index
    %c0_42 = arith.constant 0 : index
    %c0_43 = arith.constant 0 : index
    %84 = vector.load %arg6[%c0_41, %c0_42, %c0_43] : memref<4x1x256xf32, #tpu.memory_space<vmem>>, vector<1x1x256xf32>
    %85 = vector.shape_cast %84 : vector<1x1x256xf32> to vector<1x256xf32>
    %86 = vector.broadcast %0 : f32 to vector<1x256xf32>
    %87 = arith.mulf %86, %85 : vector<1x256xf32>
    %c1_44 = arith.constant 1 : index
    %c0_45 = arith.constant 0 : index
    %c0_46 = arith.constant 0 : index
    %88 = vector.load %arg6[%c1_44, %c0_45, %c0_46] : memref<4x1x256xf32, #tpu.memory_space<vmem>>, vector<1x1x256xf32>
    %89 = vector.shape_cast %88 : vector<1x1x256xf32> to vector<1x256xf32>
    %90 = vector.broadcast %1 : f32 to vector<1x256xf32>
    %91 = arith.mulf %90, %89 : vector<1x256xf32>
    %92 = arith.addf %87, %91 : vector<1x256xf32>
    %c2_47 = arith.constant 2 : index
    %c0_48 = arith.constant 0 : index
    %c0_49 = arith.constant 0 : index
    %93 = vector.load %arg6[%c2_47, %c0_48, %c0_49] : memref<4x1x256xf32, #tpu.memory_space<vmem>>, vector<1x1x256xf32>
    %94 = vector.shape_cast %93 : vector<1x1x256xf32> to vector<1x256xf32>
    %95 = vector.broadcast %2 : f32 to vector<1x256xf32>
    %96 = arith.mulf %95, %94 : vector<1x256xf32>
    %97 = arith.addf %92, %96 : vector<1x256xf32>
    %c3_50 = arith.constant 3 : index
    %c0_51 = arith.constant 0 : index
    %c0_52 = arith.constant 0 : index
    %98 = vector.load %arg6[%c3_50, %c0_51, %c0_52] : memref<4x1x256xf32, #tpu.memory_space<vmem>>, vector<1x1x256xf32>
    %99 = vector.shape_cast %98 : vector<1x1x256xf32> to vector<1x256xf32>
    %100 = vector.broadcast %3 : f32 to vector<1x256xf32>
    %101 = arith.mulf %100, %99 : vector<1x256xf32>
    %102 = arith.addf %97, %101 : vector<1x256xf32>
    %103 = arith.truncf %59 : vector<8x256xf32> to vector<8x256xbf16>
    %cst_53 = arith.constant dense<0.000000e+00> : vector<8x256xf32>
    %104 = tpu.matmul %103, %83, %cst_53 {dimension_numbers = #tpu.dot_dimension_numbers<[1], [0], [0], [1], [0, 0, 1, 1], [], []>} : vector<8x256xbf16>, vector<256x256xbf16>, vector<8x256xf32> -> vector<8x256xf32>
    %105 = vector.broadcast %102 : vector<1x256xf32> to vector<8x256xf32>
    %106 = arith.addf %104, %105 : vector<8x256xf32>
    %cst_54 = arith.constant 0.000000e+00 : f32
    %107 = vector.broadcast %cst_54 : f32 to vector<8x256xf32>
    %108 = arith.cmpf ogt, %106, %107 : vector<8x256xf32>
    %cst_55 = arith.constant 0.000000e+00 : f32
    %109 = vector.broadcast %cst_55 : f32 to vector<8x256xf32>
    %110 = arith.minimumf %106, %109 : vector<8x256xf32>
    %111 = math.exp %110 : vector<8x256xf32>
    %cst_56 = arith.constant 1.000000e+00 : f32
    %112 = vector.broadcast %cst_56 : f32 to vector<8x256xf32>
    %113 = arith.subf %111, %112 : vector<8x256xf32>
    %114 = arith.select %108, %106, %113 : vector<8x256xi1>, vector<8x256xf32>
    %c0_57 = arith.constant 0 : index
    %c0_58 = arith.constant 0 : index
    %c0_59 = arith.constant 0 : index
    %115 = vector.load %arg7[%c0_57, %c0_58, %c0_59] : memref<4x256x640xbf16, #tpu.memory_space<vmem>>, vector<1x256x640xbf16>
    %116 = vector.shape_cast %115 : vector<1x256x640xbf16> to vector<256x640xbf16>
    %117 = arith.extf %116 : vector<256x640xbf16> to vector<256x640xf32>
    %118 = vector.broadcast %0 : f32 to vector<256x640xf32>
    %119 = arith.mulf %118, %117 : vector<256x640xf32>
    %c1_60 = arith.constant 1 : index
    %c0_61 = arith.constant 0 : index
    %c0_62 = arith.constant 0 : index
    %120 = vector.load %arg7[%c1_60, %c0_61, %c0_62] : memref<4x256x640xbf16, #tpu.memory_space<vmem>>, vector<1x256x640xbf16>
    %121 = vector.shape_cast %120 : vector<1x256x640xbf16> to vector<256x640xbf16>
    %122 = arith.extf %121 : vector<256x640xbf16> to vector<256x640xf32>
    %123 = vector.broadcast %1 : f32 to vector<256x640xf32>
    %124 = arith.mulf %123, %122 : vector<256x640xf32>
    %125 = arith.addf %119, %124 : vector<256x640xf32>
    %c2_63 = arith.constant 2 : index
    %c0_64 = arith.constant 0 : index
    %c0_65 = arith.constant 0 : index
    %126 = vector.load %arg7[%c2_63, %c0_64, %c0_65] : memref<4x256x640xbf16, #tpu.memory_space<vmem>>, vector<1x256x640xbf16>
    %127 = vector.shape_cast %126 : vector<1x256x640xbf16> to vector<256x640xbf16>
    %128 = arith.extf %127 : vector<256x640xbf16> to vector<256x640xf32>
    %129 = vector.broadcast %2 : f32 to vector<256x640xf32>
    %130 = arith.mulf %129, %128 : vector<256x640xf32>
    %131 = arith.addf %125, %130 : vector<256x640xf32>
    %c3_66 = arith.constant 3 : index
    %c0_67 = arith.constant 0 : index
    %c0_68 = arith.constant 0 : index
    %132 = vector.load %arg7[%c3_66, %c0_67, %c0_68] : memref<4x256x640xbf16, #tpu.memory_space<vmem>>, vector<1x256x640xbf16>
    %133 = vector.shape_cast %132 : vector<1x256x640xbf16> to vector<256x640xbf16>
    %134 = arith.extf %133 : vector<256x640xbf16> to vector<256x640xf32>
    %135 = vector.broadcast %3 : f32 to vector<256x640xf32>
    %136 = arith.mulf %135, %134 : vector<256x640xf32>
    %137 = arith.addf %131, %136 : vector<256x640xf32>
    %138 = arith.truncf %137 : vector<256x640xf32> to vector<256x640xbf16>
    %c0_69 = arith.constant 0 : index
    %c0_70 = arith.constant 0 : index
    %c0_71 = arith.constant 0 : index
    %139 = vector.load %arg8[%c0_69, %c0_70, %c0_71] : memref<4x1x640xf32, #tpu.memory_space<vmem>>, vector<1x1x640xf32>
    %140 = vector.shape_cast %139 : vector<1x1x640xf32> to vector<1x640xf32>
    %141 = vector.broadcast %0 : f32 to vector<1x640xf32>
    %142 = arith.mulf %141, %140 : vector<1x640xf32>
    %c1_72 = arith.constant 1 : index
    %c0_73 = arith.constant 0 : index
    %c0_74 = arith.constant 0 : index
    %143 = vector.load %arg8[%c1_72, %c0_73, %c0_74] : memref<4x1x640xf32, #tpu.memory_space<vmem>>, vector<1x1x640xf32>
    %144 = vector.shape_cast %143 : vector<1x1x640xf32> to vector<1x640xf32>
    %145 = vector.broadcast %1 : f32 to vector<1x640xf32>
    %146 = arith.mulf %145, %144 : vector<1x640xf32>
    %147 = arith.addf %142, %146 : vector<1x640xf32>
    %c2_75 = arith.constant 2 : index
    %c0_76 = arith.constant 0 : index
    %c0_77 = arith.constant 0 : index
    %148 = vector.load %arg8[%c2_75, %c0_76, %c0_77] : memref<4x1x640xf32, #tpu.memory_space<vmem>>, vector<1x1x640xf32>
    %149 = vector.shape_cast %148 : vector<1x1x640xf32> to vector<1x640xf32>
    %150 = vector.broadcast %2 : f32 to vector<1x640xf32>
    %151 = arith.mulf %150, %149 : vector<1x640xf32>
    %152 = arith.addf %147, %151 : vector<1x640xf32>
    %c3_78 = arith.constant 3 : index
    %c0_79 = arith.constant 0 : index
    %c0_80 = arith.constant 0 : index
    %153 = vector.load %arg8[%c3_78, %c0_79, %c0_80] : memref<4x1x640xf32, #tpu.memory_space<vmem>>, vector<1x1x640xf32>
    %154 = vector.shape_cast %153 : vector<1x1x640xf32> to vector<1x640xf32>
    %155 = vector.broadcast %3 : f32 to vector<1x640xf32>
    %156 = arith.mulf %155, %154 : vector<1x640xf32>
    %157 = arith.addf %152, %156 : vector<1x640xf32>
    %158 = arith.truncf %114 : vector<8x256xf32> to vector<8x256xbf16>
    %cst_81 = arith.constant dense<0.000000e+00> : vector<8x640xf32>
    %159 = tpu.matmul %158, %138, %cst_81 {dimension_numbers = #tpu.dot_dimension_numbers<[1], [0], [0], [1], [0, 0, 1, 1], [], []>} : vector<8x256xbf16>, vector<256x640xbf16>, vector<8x640xf32> -> vector<8x640xf32>
    %160 = vector.broadcast %157 : vector<1x640xf32> to vector<8x640xf32>
    %161 = arith.addf %159, %160 : vector<8x640xf32>
    %c0_82 = arith.constant 0 : index
    %c0_83 = arith.constant 0 : index
    %162 = vector.load %arg9[%c0_82, %c0_83] : memref<8x640xf32, #tpu.memory_space<vmem>>, vector<8x640xf32>
    tpu.vector_store %arg9[%c0_82, %c0_83], %161 {strides = array<i32>} : memref<8x640xf32, #tpu.memory_space<vmem>>, vector<8x640xf32>,
    return
  }
  func.func @transform_0(%arg0: i32) -> i32 {
    %c0_i32 = arith.constant 0 : i32
    %c0_i32_0 = arith.constant 0 : i32
    return %c0_i32 : i32
  }
  func.func @transform_1(%arg0: i32) -> (i32, i32) {
    %c0_i32 = arith.constant 0 : i32
    %c0_i32_0 = arith.constant 0 : i32
    return %arg0, %c0_i32 : i32, i32
  }
  func.func @transform_2(%arg0: i32) -> (i32, i32, i32) {
    %c0_i32 = arith.constant 0 : i32
    %c0_i32_0 = arith.constant 0 : i32
    %c0_i32_1 = arith.constant 0 : i32
    %c0_i32_2 = arith.constant 0 : i32
    return %c0_i32, %c0_i32_0, %c0_i32_1 : i32, i32, i32
  }
  func.func @transform_3(%arg0: i32) -> (i32, i32, i32) {
    %c0_i32 = arith.constant 0 : i32
    %c0_i32_0 = arith.constant 0 : i32
    %c0_i32_1 = arith.constant 0 : i32
    %c0_i32_2 = arith.constant 0 : i32
    return %c0_i32, %c0_i32_0, %c0_i32_1 : i32, i32, i32
  }
  func.func @transform_4(%arg0: i32) -> (i32, i32, i32) {
    %c0_i32 = arith.constant 0 : i32
    %c0_i32_0 = arith.constant 0 : i32
    %c0_i32_1 = arith.constant 0 : i32
    %c0_i32_2 = arith.constant 0 : i32
    return %c0_i32, %c0_i32_0, %c0_i32_1 : i32, i32, i32
  }
  func.func @transform_5(%arg0: i32) -> (i32, i32, i32) {
    %c0_i32 = arith.constant 0 : i32
    %c0_i32_0 = arith.constant 0 : i32
    %c0_i32_1 = arith.constant 0 : i32
    %c0_i32_2 = arith.constant 0 : i32
    return %c0_i32, %c0_i32_0, %c0_i32_1 : i32, i32, i32
  }
  func.func @transform_6(%arg0: i32) -> (i32, i32, i32) {
    %c0_i32 = arith.constant 0 : i32
    %c0_i32_0 = arith.constant 0 : i32
    %c0_i32_1 = arith.constant 0 : i32
    %c0_i32_2 = arith.constant 0 : i32
    return %c0_i32, %c0_i32_0, %c0_i32_1 : i32, i32, i32
  }
  func.func @transform_7(%arg0: i32) -> (i32, i32, i32) {
    %c0_i32 = arith.constant 0 : i32
    %c0_i32_0 = arith.constant 0 : i32
    %c0_i32_1 = arith.constant 0 : i32
    %c0_i32_2 = arith.constant 0 : i32
    return %c0_i32, %c0_i32_0, %c0_i32_1 : i32, i32, i32
  }
  func.func @transform_8(%arg0: i32) -> (i32, i32) {
    %c0_i32 = arith.constant 0 : i32
    %c0_i32_0 = arith.constant 0 : i32
    return %arg0, %c0_i32 : i32, i32
  }
}

</mosaic_0001>

<bundles_post_ra>
// kernel: tpu_custom_call.1
= control target key start
LH: loop header
LB: loop body
LE: loop exit
PB: predicated region body
PF: predicated region fallthrough
CT: control target
= control target key end

     0   :  { %13 = vsyncpa [#allocation5], 0  ;;  %s6817_s0 = inlined_call_operand.hbm [shape: f32[4], index: 0, kind: input, shape index: {}]   ;;  %s6818_s1 = inlined_call_operand.hbm [shape: f32[8,384], index: 1, kind: input, shape index: {}]   ;;  %s6819_s2 = inlined_call_operand.hbm [shape: bf16[4,384,256], index: 2, kind: input, shape index: {}]   ;;  %s6820_s3 = inlined_call_operand.hbm [shape: f32[4,1,256], index: 3, kind: input, shape index: {}]   ;;  %s6821_s4 = inlined_call_operand.hbm [shape: bf16[4,256,256], index: 4, kind: input, shape index: {}]   ;;  %s6822_s5 = inlined_call_operand.hbm [shape: f32[4,1,256], index: 5, kind: input, shape index: {}]   ;;  %s6823_s6 = inlined_call_operand.hbm [shape: bf16[4,256,640], index: 6, kind: input, shape index: {}]   ;;  %s6824_s7 = inlined_call_operand.hbm [shape: f32[4,1,640], index: 7, kind: input, shape index: {}]   ;;  %s6825_s8 = inlined_call_operand.hbm [shape: f32[8,640], index: 8, kind: output, shape index: {}]  }
   0x1   :  { %14 = vsyncpa [#allocation3], 0 }
   0x2   :  { %15 = vsyncpa [#allocation8], 0 }
   0x3   :  { %16 = vsyncpa [#allocation11], 0 }
   0x4   :  { %17 = vsyncpa [#allocation14], 0 }
   0x5   :  { %18 = vsyncpa [#allocation4], 0  ;;  %s5188_s27 = smov [#allocation7]   ;;  %s4990_s9 = scalar_lea.hbm %s6819_s2, 24576 }
   0x6   :  { %s42_s28 = sshll.u32 %s5188_s27, 4  ;;  %p4991_p0 = scmp.ne.s32.totalorder %s6819_s2, %s4990_s9  ;;  %s43_s28 = int_to_ptr.vmem [resolvable:$true] %s42_s28 }
   0x7   :  { %p4994_p1 = scmp.lt.u32.totalorder %s4990_s9, %s6819_s2 }
   0x9   :  { %p4996_p2 = pnand %p4994_p1, %p4991_p0 }
   0xb   :  { %4999 = shalt.err (!%p4996_p2)
}
   0xc   :  { %s5000_s14 = scalar_lea.vmem %s43_s28, 24576  ;;  %p5005_p4 = scmp.lt.s32.totalorder %s43_s28, %s43_s28 }
   0xd   :  { %p5001_p3 = scmp.ne.s32.totalorder %s43_s28, %s5000_s14  ;;  %p5006_p5 = scmp.lt.s32.totalorder %s5000_s14, %s5000_s14 }
   0xf   :  { %p5007_p6 = por %p5006_p5, %p5005_p4 }
  0x11   :  { %p5008_p7 = pnand %p5007_p6, %p5001_p3 }
  0x13   :  { %5011 = shalt.err (!%p5008_p7)
}
  0x14   :  { %s5189_s15 = smov 128   ;;  %s5190_s16 = smov 8  }
  0x15   :  { %48 = dma.hbm_to_vmem [thread:$0]  %s6819_s2, 24576, %s43_s28, [#allocation8], %s5189_s15, %s5189_s15, %s5190_s16  }
  0x16   :  { %s5191_s19 = smov [#allocation10]   ;;  %s5192_s21 = smov [#allocation13]  }
  0x17   :  { %s66_s20 = sshll.u32 %s5191_s19, 4  ;;  %s90_s22 = sshll.u32 %s5192_s21, 4  ;;  %s67_s20 = int_to_ptr.vmem [resolvable:$true] %s66_s20  ;;  %s91_s22 = int_to_ptr.vmem [resolvable:$true] %s90_s22 }
  0x18   :  { %s5012_s25 = scalar_lea.hbm %s6821_s4, 16384 }
  0x19   :  { %p5013_p8 = scmp.ne.s32.totalorder %s6821_s4, %s5012_s25  ;;  %p5016_p9 = scmp.lt.u32.totalorder %s5012_s25, %s6821_s4 }
  0x1b   :  { %p5018_p10 = pnand %p5016_p9, %p5013_p8 }
  0x1d   :  { %5021 = shalt.err (!%p5018_p10)
}
  0x1e   :  { %s5022_s2 = scalar_lea.vmem %s67_s20, 16384  ;;  %p5027_p12 = scmp.lt.s32.totalorder %s67_s20, %s67_s20 }
  0x1f   :  { %p5023_p11 = scmp.ne.s32.totalorder %s67_s20, %s5022_s2  ;;  %p5028_p13 = scmp.lt.s32.totalorder %s5022_s2, %s5022_s2 }
  0x21   :  { %p5029_p0 = por %p5028_p13, %p5027_p12 }
  0x23   :  { %p5030_p1 = pnand %p5029_p0, %p5023_p11 }
  0x25   :  { %5033 = shalt.err (!%p5030_p1)
}
  0x26   :  { %72 = dma.hbm_to_vmem [thread:$0]  %s6821_s4, 16384, %s67_s20, [#allocation11], %s5189_s15, %s5189_s15, %s5190_s16  }
  0x27   :  { %s5034_s12 = scalar_lea.hbm %s6823_s6, 40960 }
  0x28   :  { %p5035_p2 = scmp.ne.s32.totalorder %s6823_s6, %s5034_s12  ;;  %p5038_p3 = scmp.lt.u32.totalorder %s5034_s12, %s6823_s6 }
  0x2a   :  { %p5040_p4 = pnand %p5038_p3, %p5035_p2 }
  0x2c   :  { %5043 = shalt.err (!%p5040_p4)
}
  0x2d   :  { %s5044_s19 = scalar_lea.vmem %s91_s22, 40960  ;;  %p5049_p6 = scmp.lt.s32.totalorder %s91_s22, %s91_s22 }
  0x2e   :  { %p5045_p5 = scmp.ne.s32.totalorder %s91_s22, %s5044_s19  ;;  %p5050_p7 = scmp.lt.s32.totalorder %s5044_s19, %s5044_s19 }
  0x30   :  { %p5051_p8 = por %p5050_p7, %p5049_p6 }
  0x32   :  { %p5052_p9 = pnand %p5051_p8, %p5045_p5 }
  0x34   :  { %5055 = shalt.err (!%p5052_p9)
}
  0x35   :  { %s5193_s4 = smov 320   ;;  %s5194_s15 = smov 20  }
  0x36   :  { %96 = dma.hbm_to_vmem [thread:$0]  %s6823_s6, 40960, %s91_s22, [#allocation14], %s5193_s4, %s5193_s4, %s5194_s15  }
  0x37   :  { %s5056_s24 = scalar_lea.hbm %s6817_s0, 16 }
  0x38   :  { %p5057_p10 = scmp.ne.s32.totalorder %s6817_s0, %s5056_s24  ;;  %p5060_p11 = scmp.lt.u32.totalorder %s5056_s24, %s6817_s0 }
  0x3a   :  { %p5062_p12 = pnand %p5060_p11, %p5057_p10 }
  0x3c   :  { %5065 = shalt.err (!%p5062_p12)
}
  0x3d   :  { %s5195_s30 = smov [#allocation2]   ;;  %s5196_s6 = smov [#allocation6]  }
  0x3e   :  { %26 = dma.hbm_to_smem %s6817_s0, 16, %s5195_s30, [#allocation5]  }
  0x3f   :  { %s33_s22 = sshll.u32 %s5196_s6, 4  ;;  %s5197_s9 = smov [#allocation9]   ;;  %s34_s22 = int_to_ptr.vmem [resolvable:$true] %s33_s22 }
  0x40   :  { %s54_s10 = sshll.u32 %s5197_s9, 4  ;;  %s5066_s13 = scalar_lea.hbm %s6818_s1, 384  ;;  %s5299_s10 = int_to_ptr.vmem [resolvable:$true] %s54_s10 }
  0x41   :  { %p5067_p13 = scmp.ne.s32.totalorder %s6818_s1, %s5066_s13  ;;  %p5070_p0 = scmp.lt.u32.totalorder %s5066_s13, %s6818_s1 }
  0x43   :  { %p5072_p1 = pnand %p5070_p0, %p5067_p13 }
  0x45   :  { %5075 = shalt.err (!%p5072_p1)
}
  0x46   :  { %s5076_s0 = scalar_lea.vmem %s34_s22, 384  ;;  %p5081_p3 = scmp.lt.s32.totalorder %s34_s22, %s34_s22 }
  0x47   :  { %p5077_p2 = scmp.ne.s32.totalorder %s34_s22, %s5076_s0  ;;  %p5082_p4 = scmp.lt.s32.totalorder %s5076_s0, %s5076_s0 }
  0x49   :  { %p5083_p5 = por %p5082_p4, %p5081_p3 }
  0x4b   :  { %p5084_p6 = pnand %p5083_p5, %p5077_p2 }
  0x4d   :  { %5087 = shalt.err (!%p5084_p6)
}
  0x4e   :  { %36 = dma.hbm_to_vmem [thread:$0]  %s6818_s1, 384, %s34_s22, [#allocation3]  }
  0x4f   :  { %s5088_s21 = scalar_lea.hbm %s6820_s3, 128 }
  0x50   :  { %p5089_p7 = scmp.ne.s32.totalorder %s6820_s3, %s5088_s21  ;;  %p5092_p8 = scmp.lt.u32.totalorder %s5088_s21, %s6820_s3 }
  0x52   :  { %p5094_p9 = pnand %p5092_p8, %p5089_p7 }
  0x54   :  { %5097 = shalt.err (!%p5094_p9)
}
  0x55   :  { %s5098_s27 = scalar_lea.vmem %s5299_s10, 128  ;;  %p5103_p11 = scmp.lt.s32.totalorder %s5299_s10, %s5299_s10 }
  0x56   :  { %p5099_p10 = scmp.ne.s32.totalorder %s5299_s10, %s5098_s27  ;;  %p5104_p12 = scmp.lt.s32.totalorder %s5098_s27, %s5098_s27 }
  0x58   :  { %p5105_p13 = por %p5104_p12, %p5103_p11 }
  0x5a   :  { %p5106_p0 = pnand %p5105_p13, %p5099_p10 }
  0x5c   :  { %5109 = shalt.err (!%p5106_p0)
}
  0x5d   :  { %s5198_s1 = smov 32   ;;  %s5199_s29 = smov 2  }
  0x5e   :  { %60 = dma.hbm_to_vmem [thread:$0]  %s6820_s3, 128, %s5299_s10, [#allocation8], %s5198_s1, %s5198_s1, %s5199_s29  }
  0x5f   :  { %s5200_s28 = smov [#allocation12]   ;;  %s5201_s22 = smov [#allocation15]  }
  0x60   :  { %s78_s6 = sshll.u32 %s5200_s28, 4  ;;  %s102_s9 = sshll.u32 %s5201_s22, 4  ;;  %s79_s6 = int_to_ptr.vmem [resolvable:$true] %s78_s6  ;;  %s5330_s9 = int_to_ptr.vmem [resolvable:$true] %s102_s9 }
  0x61   :  { %s5110_s13 = scalar_lea.hbm %s6822_s5, 128 }
  0x62   :  { %p5111_p1 = scmp.ne.s32.totalorder %s6822_s5, %s5110_s13  ;;  %p5114_p2 = scmp.lt.u32.totalorder %s5110_s13, %s6822_s5 }
  0x64   :  { %p5116_p3 = pnand %p5114_p2, %p5111_p1 }
  0x66   :  { %5119 = shalt.err (!%p5116_p3)
}
  0x67   :  { %s5120_s3 = scalar_lea.vmem %s79_s6, 128  ;;  %p5125_p5 = scmp.lt.s32.totalorder %s79_s6, %s79_s6 }
  0x68   :  { %p5121_p4 = scmp.ne.s32.totalorder %s79_s6, %s5120_s3  ;;  %p5126_p6 = scmp.lt.s32.totalorder %s5120_s3, %s5120_s3 }
  0x6a   :  { %p5127_p7 = por %p5126_p6, %p5125_p5 }
  0x6c   :  { %p5128_p8 = pnand %p5127_p7, %p5121_p4 }
  0x6e   :  { %5131 = shalt.err (!%p5128_p8)
}
  0x6f   :  { %84 = dma.hbm_to_vmem [thread:$0]  %s6822_s5, 128, %s79_s6, [#allocation11], %s5198_s1, %s5198_s1, %s5199_s29  }
  0x70   :  { %s5132_s16 = scalar_lea.hbm %s6824_s7, 320 }
  0x71   :  { %p5133_p9 = scmp.ne.s32.totalorder %s6824_s7, %s5132_s16  ;;  %p5136_p10 = scmp.lt.u32.totalorder %s5132_s16, %s6824_s7 }
  0x73   :  { %p5138_p11 = pnand %p5136_p10, %p5133_p9 }
  0x75   :  { %5141 = shalt.err (!%p5138_p11)
}
  0x76   :  { %s5142_s25 = scalar_lea.vmem %s5330_s9, 320  ;;  %p5147_p13 = scmp.lt.s32.totalorder %s5330_s9, %s5330_s9 }
  0x77   :  { %p5143_p12 = scmp.ne.s32.totalorder %s5330_s9, %s5142_s25  ;;  %p5148_p0 = scmp.lt.s32.totalorder %s5142_s25, %s5142_s25 }
  0x79   :  { %p5149_p1 = por %p5148_p0, %p5147_p13 }
  0x7b   :  { %p5150_p2 = pnand %p5149_p1, %p5143_p12 }
  0x7d   :  { %5153 = shalt.err (!%p5150_p2)
}
  0x7e   :  { %s5202_s5 = smov 80   ;;  %s5203_s26 = smov 5  }
  0x7f   :  { %108 = dma.hbm_to_vmem [thread:$0]  %s6824_s7, 320, %s5330_s9, [#allocation14], %s5202_s5, %s5202_s5, %s5203_s26  }
  0x80   :  { %5176 = dma.done.wait [#allocation5], 16  }
  0x81   :  { %5177 = vsyncadd [#allocation5], 4294967280 }
  0x82   :  { %5178 = dma.done.wait [#allocation3], 384  }
  0x83   :  { %5179 = vsyncadd [#allocation3], 4294966912 }
  0x84   :  { %5180 = dma.done.wait [#allocation8], 24704  }
  0x85   :  { %5181 = vsyncadd [#allocation8], 4294942592 }
  0x86   :  { %5182 = dma.done.wait [#allocation11], 16512  }
  0x87   :  { %5183 = vsyncadd [#allocation11], 4294950784 }
  0x88   :  { %5184 = dma.done.wait [#allocation14], 41280  }
  0x89   :  { %5185 = vsyncadd [#allocation14], 4294926016 }
  0x8a   :  { %133 = sfence }
  0x8b   :  { %s5361_s29 = sld [smem:[#allocation2]]  ;;  %s5363_s30 = sld [smem:[#allocation2 + $0x1]]  ;;  %v142_v0 = vld [vmem:[#allocation7] sm:$0xff]  ;;  %v143_v1 = vld [vmem:[#allocation7 + $0x8] sm:$0xff]  ;;  %v5369_v20 = vld [vmem:[#allocation7 + $0x10] sm:$0xff] }
  0x8c   :  { %s5365_s2 = sld [smem:[#allocation2 + $0x2]]  ;;  %s5367_s7 = sld [smem:[#allocation2 + $0x3]]  ;;  %v191_v2 = vunpack.c.h.bf16 %v142_v0  ;;  %v193_v3 = vunpack.c.h.bf16 %v143_v1  ;;  %v384_v4 = vld [vmem:[#allocation7 + $0x180] sm:$0xff]  ;;  %v385_v5 = vld [vmem:[#allocation7 + $0x188] sm:$0xff]  ;;  %v190_v6 = vunpack.c.l.bf16 %v142_v0  ;;  %v192_v7 = vunpack.c.l.bf16 %v143_v1  ;;  %v5371_v21 = vld [vmem:[#allocation7 + $0x18] sm:$0xff] }
  0x8d   :  { %v433_v8 = vunpack.c.h.bf16 %v384_v4  ;;  %v435_v9 = vunpack.c.h.bf16 %v385_v5  ;;  %v722_v10 = vld [vmem:[#allocation7 + $0x300] sm:$0xff]  ;;  %v723_v11 = vld [vmem:[#allocation7 + $0x308] sm:$0xff]  ;;  %v432_v13 = vunpack.c.l.bf16 %v384_v4  ;;  %v434_v14 = vunpack.c.l.bf16 %v385_v5  ;;  %v5373_v26 = vld [vmem:[#allocation7 + $0x190] sm:$0xff]  ;;  %s5205_s28 = smov [#allocation16]  }
  0x8e   :  { %v1060_v12 = vld [vmem:[#allocation7 + $0x480] sm:$0xff]  ;;  %v771_v15 = vunpack.c.h.bf16 %v722_v10  ;;  %v773_v16 = vunpack.c.h.bf16 %v723_v11  ;;  %v1061_v17 = vld [vmem:[#allocation7 + $0x488] sm:$0xff]  ;;  %v770_v19 = vunpack.c.l.bf16 %v722_v10  ;;  %v772_v23 = vunpack.c.l.bf16 %v723_v11  ;;  %v5375_v27 = vld [vmem:[#allocation7 + $0x198] sm:$0xff]  ;;  %s4916_s6 = sshll.u32 %s5205_s28, 4  ;;  %s4917_s6 = int_to_ptr.vmem [resolvable:$true] %s4916_s6 }
  0x8f   :  { %v1109_v18 = vunpack.c.h.bf16 %v1060_v12  ;;  %v1111_v22 = vunpack.c.h.bf16 %v1061_v17  ;;  %v1108_v24 = vunpack.c.l.bf16 %v1060_v12  ;;  %v1110_v25 = vunpack.c.l.bf16 %v1061_v17  ;;  %v5377_v28 = vld [vmem:[#allocation7 + $0x310] sm:$0xff]  ;;  %v5383_v33 = vld [vmem:[#allocation7 + $0x318] sm:$0xff]  ;;  %s5154_s22 = scalar_lea.vmem %s4917_s6, 640  ;;  %p5159_p4 = scmp.lt.s32.totalorder %s4917_s6, %s4917_s6 }
  0x90   :  { %v195_v29 = vunpack.c.h.bf16 %v5369_v20  ;;  %v197_v30 = vunpack.c.h.bf16 %v5371_v21  ;;  %v437_v31 = vunpack.c.h.bf16 %v5373_v26  ;;  %v439_v32 = vunpack.c.h.bf16 %v5375_v27  ;;  %v1062_v62 = vld [vmem:[#allocation7 + $0x490] sm:$0xff]  ;;  %p5155_p3 = scmp.ne.s32.totalorder %s4917_s6, %s5154_s22  ;;  %p5160_p5 = scmp.lt.s32.totalorder %s5154_s22, %s5154_s22 }
  0x91   :  { %v5386_v34 = vstv %s5361_s29  ;;  %v5389_v35 = vstv %s5363_s30  ;;  %v775_v36 = vunpack.c.h.bf16 %v5377_v28  ;;  %v777_v37 = vunpack.c.h.bf16 %v5383_v33 }
  0x92   :  { %v288_v38 = vmul.f32 %v5386_v34, %v191_v2  ;;  %v290_v39 = vmul.f32 %v5386_v34, %v193_v3  ;;  %v530_v40 = vmul.f32 %v5389_v35, %v433_v8  ;;  %v532_v41 = vmul.f32 %v5389_v35, %v435_v9  ;;  %p5161_p6 = por %p5160_p5, %p5159_p4 }
  0x93   :  { %v5398_v42 = vstv %s5365_s2  ;;  %v5401_v43 = vstv %s5367_s7  ;;  %v287_v44 = vmul.f32 %v5386_v34, %v190_v6  ;;  %v289_v45 = vmul.f32 %v5386_v34, %v192_v7  ;;  %v1063_v7 = vld [vmem:[#allocation7 + $0x498] sm:$0xff] }
  0x94   :  { %v626_v46 = vadd.f32 %v530_v40, %v288_v38  ;;  %v628_v47 = vadd.f32 %v532_v41, %v290_v39  ;;  %v868_v48 = vmul.f32 %v5398_v42, %v771_v15  ;;  %v870_v49 = vmul.f32 %v5398_v42, %v773_v16  ;;  %p5162_p7 = pnand %p5161_p6, %p5155_p3 }
  0x95   :  { %v1206_v50 = vmul.f32 %v5401_v43, %v1109_v18  ;;  %v1208_v51 = vmul.f32 %v5401_v43, %v1111_v22  ;;  %v529_v52 = vmul.f32 %v5389_v35, %v432_v13  ;;  %v531_v53 = vmul.f32 %v5389_v35, %v434_v14 }
  0x96   :  { %v964_v54 = vadd.f32 %v868_v48, %v626_v46  ;;  %v966_v55 = vadd.f32 %v870_v49, %v628_v47  ;;  %v867_v56 = vmul.f32 %v5398_v42, %v770_v19  ;;  %v869_v57 = vmul.f32 %v5398_v42, %v772_v23  ;;  %v389_v49 = vld [vmem:[#allocation7 + $0x1a8] sm:$0xff] }
  0x97   :  { %v625_v58 = vadd.f32 %v529_v52, %v287_v44  ;;  %v627_v59 = vadd.f32 %v531_v53, %v289_v45  ;;  %v1205_v60 = vmul.f32 %v5401_v43, %v1108_v24  ;;  %v1207_v61 = vmul.f32 %v5401_v43, %v1110_v25  ;;  %v147_v44 = vld [vmem:[#allocation7 + $0x28] sm:$0xff]  ;;  %v388_v45 = vld [vmem:[#allocation7 + $0x1a0] sm:$0xff] }
  0x98   :  { %v1302_v63 = vadd.f32 %v1206_v50, %v964_v54  ;;  %v1304_v0 = vadd.f32 %v1208_v51, %v966_v55  ;;  %v292_v1 = vmul.f32 %v5386_v34, %v195_v29  ;;  %v294_v2 = vmul.f32 %v5386_v34, %v197_v30  ;;  %v726_v50 = vld [vmem:[#allocation7 + $0x320] sm:$0xff]  ;;  %v727_v51 = vld [vmem:[#allocation7 + $0x328] sm:$0xff] }
  0x99   :  { %v963_v3 = vadd.f32 %v867_v56, %v625_v58  ;;  %v965_v4 = vadd.f32 %v869_v57, %v627_v59  ;;  %v534_v5 = vmul.f32 %v5389_v35, %v437_v31  ;;  %v536_v6 = vmul.f32 %v5389_v35, %v439_v32  ;;  %v1064_v54 = vld [vmem:[#allocation7 + $0x4a0] sm:$0xff] }
  0x9a   :  { %v1398_v8 = vpack.c.bf16 %v1304_v0, %v1302_v63  ;;  %v872_v9 = vmul.f32 %v5398_v42, %v775_v36  ;;  %v874_v10 = vmul.f32 %v5398_v42, %v777_v37  ;;  %v1113_v11 = vunpack.c.h.bf16 %v1062_v62  ;;  %v146_v36 = vld [vmem:[#allocation7 + $0x20] sm:$0xff]  ;;  %v1065_v63 = vld [vmem:[#allocation7 + $0x4a8] sm:$0xff] }
  0x9b   :  { %v1301_v12 = vadd.f32 %v1205_v60, %v963_v3  ;;  %v1303_v13 = vadd.f32 %v1207_v61, %v965_v4  ;;  %v630_v14 = vadd.f32 %v534_v5, %v292_v1  ;;  %v632_v15 = vadd.f32 %v536_v6, %v294_v2 }
  0x9c   :  { %1473 = vmatprep.subr.bf16.mxu0 %v1398_v8  ;;  %v1115_v16 = vunpack.c.h.bf16 %v1063_v7  ;;  %v1210_v17 = vmul.f32 %v5401_v43, %v1113_v11  ;;  %v194_v18 = vunpack.c.l.bf16 %v5369_v20  ;;  %v196_v19 = vunpack.c.l.bf16 %v5371_v21 }
  0x9d   :  { %v1397_v22 = vpack.c.bf16 %v1303_v13, %v1301_v12  ;;  %v968_v23 = vadd.f32 %v872_v9, %v630_v14  ;;  %v970_v24 = vadd.f32 %v874_v10, %v632_v15  ;;  %v436_v25 = vunpack.c.l.bf16 %v5373_v26 }
  0x9e   :  { %v1212_v29 = vmul.f32 %v5401_v43, %v1115_v16  ;;  %v291_v30 = vmul.f32 %v5386_v34, %v194_v18  ;;  %v293_v31 = vmul.f32 %v5386_v34, %v196_v19  ;;  %v438_v32 = vunpack.c.l.bf16 %v5375_v27 }
  0x9f   :  { %1474 = vmatpush1.bf16.msra.mxu0 %v1397_v22  ;;  %v1306_v37 = vadd.f32 %v1210_v17, %v968_v23  ;;  %v533_v20 = vmul.f32 %v5389_v35, %v436_v25  ;;  %v774_v21 = vunpack.c.l.bf16 %v5377_v28  ;;  %v776_v38 = vunpack.c.l.bf16 %v5383_v33 }
  0xa0   :  { %v1308_v39 = vadd.f32 %v1212_v29, %v970_v24  ;;  %v535_v26 = vmul.f32 %v5389_v35, %v438_v32  ;;  %v1112_v40 = vunpack.c.l.bf16 %v1062_v62  ;;  %v1114_v41 = vunpack.c.l.bf16 %v1063_v7  ;;  %v148_v29 = vld [vmem:[#allocation7 + $0x30] sm:$0xff] }
  0xa1   :  { %v629_v46 = vadd.f32 %v533_v20, %v291_v30  ;;  %v871_v47 = vmul.f32 %v5398_v42, %v774_v21  ;;  %v873_v27 = vmul.f32 %v5398_v42, %v776_v38  ;;  %v199_v48 = vunpack.c.h.bf16 %v146_v36 }
  0xa2   :  { %v1400_v52 = vpack.c.bf16 %v1308_v39, %v1306_v37  ;;  %v631_v28 = vadd.f32 %v535_v26, %v293_v31  ;;  %v1209_v33 = vmul.f32 %v5401_v43, %v1112_v40  ;;  %v1211_v53 = vmul.f32 %v5401_v43, %v1114_v41  ;;  %v149_v37 = vld [vmem:[#allocation7 + $0x38] sm:$0xff]  ;;  %v390_v26 = vld [vmem:[#allocation7 + $0x1b0] sm:$0xff] }
  0xa3   :  { %v967_v55 = vadd.f32 %v871_v47, %v629_v46  ;;  %v201_v56 = vunpack.c.h.bf16 %v147_v44  ;;  %v296_v57 = vmul.f32 %v5386_v34, %v199_v48  ;;  %v441_v58 = vunpack.c.h.bf16 %v388_v45  ;;  %v391_v40 = vld [vmem:[#allocation7 + $0x1b8] sm:$0xff]  ;;  %v728_v47 = vld [vmem:[#allocation7 + $0x330] sm:$0xff] }
  0xa4   :  { %1475 = vmatprep.subr.bf16.mxu0 %v1400_v52  ;;  %v969_v59 = vadd.f32 %v873_v27, %v631_v28  ;;  %v443_v60 = vunpack.c.h.bf16 %v389_v49  ;;  %v779_v61 = vunpack.c.h.bf16 %v726_v50  ;;  %v781_v62 = vunpack.c.h.bf16 %v727_v51  ;;  %v729_v27 = vld [vmem:[#allocation7 + $0x338] sm:$0xff]  ;;  %v1066_v52 = vld [vmem:[#allocation7 + $0x4b0] sm:$0xff] }
  0xa5   :  { %v1305_v0 = vadd.f32 %v1209_v33, %v967_v55  ;;  %v298_v1 = vmul.f32 %v5386_v34, %v201_v56  ;;  %v538_v2 = vmul.f32 %v5389_v35, %v441_v58  ;;  %v1117_v3 = vunpack.c.h.bf16 %v1064_v54  ;;  %v1067_v55 = vld [vmem:[#allocation7 + $0x4b8] sm:$0xff] }
  0xa6   :  { %v1307_v4 = vadd.f32 %v1211_v53, %v969_v59  ;;  %v540_v5 = vmul.f32 %v5389_v35, %v443_v60  ;;  %v876_v6 = vmul.f32 %v5398_v42, %v779_v61  ;;  %v878_v7 = vmul.f32 %v5398_v42, %v781_v62 }
  0xa7   :  { %v634_v8 = vadd.f32 %v538_v2, %v296_v57  ;;  %v1119_v9 = vunpack.c.h.bf16 %v1065_v63  ;;  %v1214_v10 = vmul.f32 %v5401_v43, %v1117_v3  ;;  %v198_v11 = vunpack.c.l.bf16 %v146_v36 }
  0xa8   :  { %v1399_v12 = vpack.c.bf16 %v1307_v4, %v1305_v0  ;;  %v636_v13 = vadd.f32 %v540_v5, %v298_v1  ;;  %v200_v14 = vunpack.c.l.bf16 %v147_v44  ;;  %v440_v15 = vunpack.c.l.bf16 %v388_v45 }
  0xa9   :  { %v972_v16 = vadd.f32 %v876_v6, %v634_v8  ;;  %v1216_v17 = vmul.f32 %v5401_v43, %v1119_v9  ;;  %v295_v18 = vmul.f32 %v5386_v34, %v198_v11  ;;  %v442_v19 = vunpack.c.l.bf16 %v389_v49 }
  0xaa   :  { %1476 = vmatpush1.bf16.msra.mxu0 %v1399_v12  ;;  %v974_v22 = vadd.f32 %v878_v7, %v636_v13  ;;  %v297_v23 = vmul.f32 %v5386_v34, %v200_v14  ;;  %v537_v24 = vmul.f32 %v5389_v35, %v440_v15  ;;  %v778_v25 = vunpack.c.l.bf16 %v726_v50 }
  0xab   :  { %v1310_v30 = vadd.f32 %v1214_v10, %v972_v16  ;;  %v539_v31 = vmul.f32 %v5389_v35, %v442_v19  ;;  %v780_v32 = vunpack.c.l.bf16 %v727_v51  ;;  %v1116_v36 = vunpack.c.l.bf16 %v1064_v54 }
  0xac   :  { %v1312_v20 = vadd.f32 %v1216_v17, %v974_v22  ;;  %v633_v21 = vadd.f32 %v537_v24, %v295_v18  ;;  %v875_v38 = vmul.f32 %v5398_v42, %v778_v25  ;;  %v1118_v39 = vunpack.c.l.bf16 %v1065_v63  ;;  %v150_v22 = vld [vmem:[#allocation7 + $0x40] sm:$0xff] }
  0xad   :  { %v635_v41 = vadd.f32 %v539_v31, %v297_v23  ;;  %v877_v44 = vmul.f32 %v5398_v42, %v780_v32  ;;  %v1213_v45 = vmul.f32 %v5401_v43, %v1116_v36  ;;  %v203_v46 = vunpack.c.h.bf16 %v148_v29  ;;  %v151_v23 = vld [vmem:[#allocation7 + $0x48] sm:$0xff]  ;;  %v392_v31 = vld [vmem:[#allocation7 + $0x1c0] sm:$0xff] }
  0xae   :  { %v1402_v48 = vpack.c.bf16 %v1312_v20, %v1310_v30  ;;  %v971_v49 = vadd.f32 %v875_v38, %v633_v21  ;;  %v1215_v50 = vmul.f32 %v5401_v43, %v1118_v39  ;;  %v205_v51 = vunpack.c.h.bf16 %v149_v37  ;;  %v393_v32 = vld [vmem:[#allocation7 + $0x1c8] sm:$0xff]  ;;  %v730_v38 = vld [vmem:[#allocation7 + $0x340] sm:$0xff] }
  0xaf   :  { %v973_v28 = vadd.f32 %v877_v44, %v635_v41  ;;  %v300_v33 = vmul.f32 %v5386_v34, %v203_v46  ;;  %v445_v53 = vunpack.c.h.bf16 %v390_v26  ;;  %v447_v54 = vunpack.c.h.bf16 %v391_v40  ;;  %v731_v44 = vld [vmem:[#allocation7 + $0x348] sm:$0xff] }
  0xb0   :  { %1477 = vmatprep.subr.bf16.mxu0 %v1402_v48  ;;  %v1309_v56 = vadd.f32 %v1213_v45, %v971_v49  ;;  %v302_v57 = vmul.f32 %v5386_v34, %v205_v51  ;;  %v783_v58 = vunpack.c.h.bf16 %v728_v47  ;;  %v785_v59 = vunpack.c.h.bf16 %v729_v27  ;;  %v1068_v48 = vld [vmem:[#allocation7 + $0x4c0] sm:$0xff]  ;;  %v1069_v49 = vld [vmem:[#allocation7 + $0x4c8] sm:$0xff] }
  0xb1   :  { %v1311_v60 = vadd.f32 %v1215_v50, %v973_v28  ;;  %v542_v61 = vmul.f32 %v5389_v35, %v445_v53  ;;  %v544_v62 = vmul.f32 %v5389_v35, %v447_v54  ;;  %v1121_v63 = vunpack.c.h.bf16 %v1066_v52 }
  0xb2   :  { %v880_v0 = vmul.f32 %v5398_v42, %v783_v58  ;;  %v882_v1 = vmul.f32 %v5398_v42, %v785_v59  ;;  %v1123_v2 = vunpack.c.h.bf16 %v1067_v55  ;;  %v202_v3 = vunpack.c.l.bf16 %v148_v29 }
  0xb3   :  { %v1401_v4 = vpack.c.bf16 %v1311_v60, %v1309_v56  ;;  %v638_v5 = vadd.f32 %v542_v61, %v300_v33  ;;  %v640_v6 = vadd.f32 %v544_v62, %v302_v57  ;;  %v1218_v7 = vmul.f32 %v5401_v43, %v1121_v63 }
  0xb4   :  { %v1220_v8 = vmul.f32 %v5401_v43, %v1123_v2  ;;  %v204_v9 = vunpack.c.l.bf16 %v149_v37  ;;  %v299_v10 = vmul.f32 %v5386_v34, %v202_v3  ;;  %v444_v11 = vunpack.c.l.bf16 %v390_v26 }
  0xb5   :  { %1478 = vmatpush1.bf16.msra.mxu0 %v1401_v4  ;;  %v976_v12 = vadd.f32 %v880_v0, %v638_v5  ;;  %v978_v13 = vadd.f32 %v882_v1, %v640_v6  ;;  %v446_v14 = vunpack.c.l.bf16 %v391_v40  ;;  %v782_v15 = vunpack.c.l.bf16 %v728_v47 }
  0xb6   :  { %v301_v16 = vmul.f32 %v5386_v34, %v204_v9  ;;  %v541_v17 = vmul.f32 %v5389_v35, %v444_v11  ;;  %v784_v18 = vunpack.c.l.bf16 %v729_v27  ;;  %v1120_v19 = vunpack.c.l.bf16 %v1066_v52 }
  0xb7   :  { %v1314_v24 = vadd.f32 %v1218_v7, %v976_v12  ;;  %v1316_v25 = vadd.f32 %v1220_v8, %v978_v13  ;;  %v543_v29 = vmul.f32 %v5389_v35, %v446_v14  ;;  %v879_v30 = vmul.f32 %v5398_v42, %v782_v15  ;;  %v152_v12 = vld [vmem:[#allocation7 + $0x50] sm:$0xff] }
  0xb8   :  { %v637_v36 = vadd.f32 %v541_v17, %v299_v10  ;;  %v881_v37 = vmul.f32 %v5398_v42, %v784_v18  ;;  %v1122_v20 = vunpack.c.l.bf16 %v1067_v55  ;;  %v1217_v21 = vmul.f32 %v5401_v43, %v1120_v19  ;;  %v153_v17 = vld [vmem:[#allocation7 + $0x58] sm:$0xff]  ;;  %v394_v18 = vld [vmem:[#allocation7 + $0x1d0] sm:$0xff] }
  0xb9   :  { %v1404_v39 = vpack.c.bf16 %v1316_v25, %v1314_v24  ;;  %v639_v26 = vadd.f32 %v543_v29, %v301_v16  ;;  %v207_v40 = vunpack.c.h.bf16 %v150_v22  ;;  %v209_v41 = vunpack.c.h.bf16 %v151_v23  ;;  %v395_v25 = vld [vmem:[#allocation7 + $0x1d8] sm:$0xff]  ;;  %v732_v29 = vld [vmem:[#allocation7 + $0x350] sm:$0xff] }
  0xba   :  { %v975_v45 = vadd.f32 %v879_v30, %v637_v36  ;;  %v1219_v46 = vmul.f32 %v5401_v43, %v1122_v20  ;;  %v449_v47 = vunpack.c.h.bf16 %v392_v31  ;;  %v451_v27 = vunpack.c.h.bf16 %v393_v32 }
  0xbb   :  { %1479 = vmatprep.subr.bf16.mxu0 %v1404_v39  ;;  %v977_v50 = vadd.f32 %v881_v37, %v639_v26  ;;  %v304_v51 = vmul.f32 %v5386_v34, %v207_v40  ;;  %v306_v52 = vmul.f32 %v5386_v34, %v209_v41  ;;  %v787_v28 = vunpack.c.h.bf16 %v730_v38  ;;  %v733_v37 = vld [vmem:[#allocation7 + $0x358] sm:$0xff]  ;;  %v1070_v26 = vld [vmem:[#allocation7 + $0x4d0] sm:$0xff] }
  0xbc   :  { %v1313_v33 = vadd.f32 %v1217_v21, %v975_v45  ;;  %v546_v53 = vmul.f32 %v5389_v35, %v449_v47  ;;  %v548_v54 = vmul.f32 %v5389_v35, %v451_v27  ;;  %v789_v55 = vunpack.c.h.bf16 %v731_v44 }
  0xbd   :  { %v1315_v56 = vadd.f32 %v1219_v46, %v977_v50  ;;  %v884_v57 = vmul.f32 %v5398_v42, %v787_v28  ;;  %v1125_v58 = vunpack.c.h.bf16 %v1068_v48  ;;  %v1127_v59 = vunpack.c.h.bf16 %v1069_v49  ;;  %v1071_v46 = vld [vmem:[#allocation7 + $0x4d8] sm:$0xff] }
  0xbe   :  { %v642_v60 = vadd.f32 %v546_v53, %v304_v51  ;;  %v644_v61 = vadd.f32 %v548_v54, %v306_v52  ;;  %v886_v62 = vmul.f32 %v5398_v42, %v789_v55  ;;  %v206_v63 = vunpack.c.l.bf16 %v150_v22 }
  0xbf   :  { %v1403_v0 = vpack.c.bf16 %v1315_v56, %v1313_v33  ;;  %v1222_v1 = vmul.f32 %v5401_v43, %v1125_v58  ;;  %v1224_v2 = vmul.f32 %v5401_v43, %v1127_v59  ;;  %v208_v3 = vunpack.c.l.bf16 %v151_v23 }
  0xc0   :  { %v980_v4 = vadd.f32 %v884_v57, %v642_v60  ;;  %v982_v5 = vadd.f32 %v886_v62, %v644_v61  ;;  %v303_v6 = vmul.f32 %v5386_v34, %v206_v63  ;;  %v448_v7 = vunpack.c.l.bf16 %v392_v31 }
  0xc1   :  { %1480 = vmatpush1.bf16.msra.mxu0 %v1403_v0  ;;  %v305_v8 = vmul.f32 %v5386_v34, %v208_v3  ;;  %v450_v9 = vunpack.c.l.bf16 %v393_v32  ;;  %v786_v10 = vunpack.c.l.bf16 %v730_v38  ;;  %v788_v11 = vunpack.c.l.bf16 %v731_v44 }
  0xc2   :  { %v1318_v13 = vadd.f32 %v1222_v1, %v980_v4  ;;  %v1320_v14 = vadd.f32 %v1224_v2, %v982_v5  ;;  %v545_v15 = vmul.f32 %v5389_v35, %v448_v7  ;;  %v1124_v16 = vunpack.c.l.bf16 %v1068_v48  ;;  %v154_v4 = vld [vmem:[#allocation7 + $0x60] sm:$0xff] }
  0xc3   :  { %v547_v19 = vmul.f32 %v5389_v35, %v450_v9  ;;  %v883_v22 = vmul.f32 %v5398_v42, %v786_v10  ;;  %v885_v23 = vmul.f32 %v5398_v42, %v788_v11  ;;  %v1126_v24 = vunpack.c.l.bf16 %v1069_v49 }
  0xc4   :  { %v1406_v30 = vpack.c.bf16 %v1320_v14, %v1318_v13  ;;  %v641_v31 = vadd.f32 %v545_v15, %v303_v6  ;;  %v1221_v32 = vmul.f32 %v5401_v43, %v1124_v16  ;;  %v211_v36 = vunpack.c.h.bf16 %v152_v12  ;;  %v155_v13 = vld [vmem:[#allocation7 + $0x68] sm:$0xff]  ;;  %v396_v14 = vld [vmem:[#allocation7 + $0x1e0] sm:$0xff] }
  0xc5   :  { %v643_v20 = vadd.f32 %v547_v19, %v305_v8  ;;  %v1223_v21 = vmul.f32 %v5401_v43, %v1126_v24  ;;  %v213_v38 = vunpack.c.h.bf16 %v153_v17  ;;  %v453_v39 = vunpack.c.h.bf16 %v394_v18  ;;  %v397_v19 = vld [vmem:[#allocation7 + $0x1e8] sm:$0xff] }
  0xc6   :  { %1481 = vmatprep.subr.bf16.mxu0 %v1406_v30  ;;  %v979_v40 = vadd.f32 %v883_v22, %v641_v31  ;;  %v308_v41 = vmul.f32 %v5386_v34, %v211_v36  ;;  %v455_v44 = vunpack.c.h.bf16 %v395_v25  ;;  %v791_v45 = vunpack.c.h.bf16 %v732_v29  ;;  %v734_v22 = vld [vmem:[#allocation7 + $0x360] sm:$0xff] }
  0xc7   :  { %v981_v47 = vadd.f32 %v885_v23, %v643_v20  ;;  %v310_v27 = vmul.f32 %v5386_v34, %v213_v38  ;;  %v550_v48 = vmul.f32 %v5389_v35, %v453_v39  ;;  %v793_v49 = vunpack.c.h.bf16 %v733_v37  ;;  %v735_v23 = vld [vmem:[#allocation7 + $0x368] sm:$0xff]  ;;  %v1072_v31 = vld [vmem:[#allocation7 + $0x4e0] sm:$0xff] }
  0xc8   :  { %v1317_v50 = vadd.f32 %v1221_v32, %v979_v40  ;;  %v552_v51 = vmul.f32 %v5389_v35, %v455_v44  ;;  %v888_v52 = vmul.f32 %v5398_v42, %v791_v45  ;;  %v1129_v28 = vunpack.c.h.bf16 %v1070_v26  ;;  %v1073_v40 = vld [vmem:[#allocation7 + $0x4e8] sm:$0xff] }
  0xc9   :  { %v1319_v33 = vadd.f32 %v1223_v21, %v981_v47  ;;  %v646_v53 = vadd.f32 %v550_v48, %v308_v41  ;;  %v890_v54 = vmul.f32 %v5398_v42, %v793_v49  ;;  %v1131_v55 = vunpack.c.h.bf16 %v1071_v46 }
  0xca   :  { %v648_v56 = vadd.f32 %v552_v51, %v310_v27  ;;  %v1226_v57 = vmul.f32 %v5401_v43, %v1129_v28  ;;  %v210_v58 = vunpack.c.l.bf16 %v152_v12  ;;  %v212_v59 = vunpack.c.l.bf16 %v153_v17 }
  0xcb   :  { %v1405_v60 = vpack.c.bf16 %v1319_v33, %v1317_v50  ;;  %v984_v61 = vadd.f32 %v888_v52, %v646_v53  ;;  %v1228_v62 = vmul.f32 %v5401_v43, %v1131_v55  ;;  %v452_v63 = vunpack.c.l.bf16 %v394_v18 }
  0xcc   :  { %v986_v0 = vadd.f32 %v890_v54, %v648_v56  ;;  %v307_v1 = vmul.f32 %v5386_v34, %v210_v58  ;;  %v309_v2 = vmul.f32 %v5386_v34, %v212_v59  ;;  %v454_v3 = vunpack.c.l.bf16 %v395_v25 }
  0xcd   :  { %1482 = vmatpush1.bf16.msra.mxu0 %v1405_v60  ;;  %v1322_v5 = vadd.f32 %v1226_v57, %v984_v61  ;;  %v549_v6 = vmul.f32 %v5389_v35, %v452_v63  ;;  %v790_v7 = vunpack.c.l.bf16 %v732_v29  ;;  %v792_v8 = vunpack.c.l.bf16 %v733_v37 }
  0xce   :  { %v1324_v9 = vadd.f32 %v1228_v62, %v986_v0  ;;  %v551_v10 = vmul.f32 %v5389_v35, %v454_v3  ;;  %v1128_v11 = vunpack.c.l.bf16 %v1070_v26  ;;  %v1130_v12 = vunpack.c.l.bf16 %v1071_v46  ;;  %v156_v0 = vld [vmem:[#allocation7 + $0x70] sm:$0xff] }
  0xcf   :  { %v645_v15 = vadd.f32 %v549_v6, %v307_v1  ;;  %v887_v16 = vmul.f32 %v5398_v42, %v790_v7  ;;  %v889_v17 = vmul.f32 %v5398_v42, %v792_v8  ;;  %v215_v18 = vunpack.c.h.bf16 %v154_v4 }
  0xd0   :  { %v1408_v24 = vpack.c.bf16 %v1324_v9, %v1322_v5  ;;  %v647_v25 = vadd.f32 %v551_v10, %v309_v2  ;;  %v1225_v29 = vmul.f32 %v5401_v43, %v1128_v11  ;;  %v1227_v30 = vmul.f32 %v5401_v43, %v1130_v12  ;;  %v157_v5 = vld [vmem:[#allocation7 + $0x78] sm:$0xff]  ;;  %v398_v10 = vld [vmem:[#allocation7 + $0x1f0] sm:$0xff] }
  0xd1   :  { %v983_v32 = vadd.f32 %v887_v16, %v645_v15  ;;  %v217_v36 = vunpack.c.h.bf16 %v155_v13  ;;  %v312_v37 = vmul.f32 %v5386_v34, %v215_v18  ;;  %v457_v20 = vunpack.c.h.bf16 %v396_v14  ;;  %v399_v11 = vld [vmem:[#allocation7 + $0x1f8] sm:$0xff]  ;;  %v736_v16 = vld [vmem:[#allocation7 + $0x370] sm:$0xff] }
  0xd2   :  { %1483 = vmatprep.subr.bf16.mxu0 %v1408_v24  ;;  %v985_v21 = vadd.f32 %v889_v17, %v647_v25  ;;  %v459_v38 = vunpack.c.h.bf16 %v397_v19  ;;  %v795_v39 = vunpack.c.h.bf16 %v734_v22  ;;  %v797_v26 = vunpack.c.h.bf16 %v735_v23  ;;  %v737_v17 = vld [vmem:[#allocation7 + $0x378] sm:$0xff]  ;;  %v1074_v24 = vld [vmem:[#allocation7 + $0x4f0] sm:$0xff] }
  0xd3   :  { %v1321_v41 = vadd.f32 %v1225_v29, %v983_v32  ;;  %v314_v44 = vmul.f32 %v5386_v34, %v217_v36  ;;  %v554_v45 = vmul.f32 %v5389_v35, %v457_v20  ;;  %v1133_v46 = vunpack.c.h.bf16 %v1072_v31  ;;  %v1075_v32 = vld [vmem:[#allocation7 + $0x4f8] sm:$0xff] }
  0xd4   :  { %v1323_v47 = vadd.f32 %v1227_v30, %v985_v21  ;;  %v556_v27 = vmul.f32 %v5389_v35, %v459_v38  ;;  %v892_v48 = vmul.f32 %v5398_v42, %v795_v39  ;;  %v894_v49 = vmul.f32 %v5398_v42, %v797_v26 }
  0xd5   :  { %v650_v50 = vadd.f32 %v554_v45, %v312_v37  ;;  %v1135_v51 = vunpack.c.h.bf16 %v1073_v40  ;;  %v1230_v52 = vmul.f32 %v5401_v43, %v1133_v46  ;;  %v214_v28 = vunpack.c.l.bf16 %v154_v4 }
  0xd6   :  { %v1407_v33 = vpack.c.bf16 %v1323_v47, %v1321_v41  ;;  %v652_v53 = vadd.f32 %v556_v27, %v314_v44  ;;  %v216_v54 = vunpack.c.l.bf16 %v155_v13  ;;  %v456_v55 = vunpack.c.l.bf16 %v396_v14 }
  0xd7   :  { %v988_v56 = vadd.f32 %v892_v48, %v650_v50  ;;  %v1232_v57 = vmul.f32 %v5401_v43, %v1135_v51  ;;  %v311_v58 = vmul.f32 %v5386_v34, %v214_v28  ;;  %v458_v59 = vunpack.c.l.bf16 %v397_v19 }
  0xd8   :  { %1484 = vmatpush1.bf16.msra.mxu0 %v1407_v33  ;;  %v990_v60 = vadd.f32 %v894_v49, %v652_v53  ;;  %v313_v61 = vmul.f32 %v5386_v34, %v216_v54  ;;  %v553_v62 = vmul.f32 %v5389_v35, %v456_v55  ;;  %v794_v63 = vunpack.c.l.bf16 %v734_v22 }
  0xd9   :  { %v1326_v1 = vadd.f32 %v1230_v52, %v988_v56  ;;  %v555_v2 = vmul.f32 %v5389_v35, %v458_v59  ;;  %v796_v3 = vunpack.c.l.bf16 %v735_v23  ;;  %v1132_v4 = vunpack.c.l.bf16 %v1072_v31 }
  0xda   :  { %v1328_v6 = vadd.f32 %v1232_v57, %v990_v60  ;;  %v649_v7 = vadd.f32 %v553_v62, %v311_v58  ;;  %v891_v8 = vmul.f32 %v5398_v42, %v794_v63  ;;  %v1134_v9 = vunpack.c.l.bf16 %v1073_v40  ;;  %v158_v60 = vld [vmem:[#allocation7 + $0x80] sm:$0xff] }
  0xdb   :  { %v651_v12 = vadd.f32 %v555_v2, %v313_v61  ;;  %v893_v13 = vmul.f32 %v5398_v42, %v796_v3  ;;  %v1229_v14 = vmul.f32 %v5401_v43, %v1132_v4  ;;  %v219_v15 = vunpack.c.h.bf16 %v156_v0  ;;  %v159_v61 = vld [vmem:[#allocation7 + $0x88] sm:$0xff]  ;;  %v400_v2 = vld [vmem:[#allocation7 + $0x200] sm:$0xff] }
  0xdc   :  { %v1410_v18 = vpack.c.bf16 %v1328_v6, %v1326_v1  ;;  %v987_v19 = vadd.f32 %v891_v8, %v649_v7  ;;  %v1231_v22 = vmul.f32 %v5401_v43, %v1134_v9  ;;  %v221_v23 = vunpack.c.h.bf16 %v157_v5  ;;  %v401_v3 = vld [vmem:[#allocation7 + $0x208] sm:$0xff]  ;;  %v738_v8 = vld [vmem:[#allocation7 + $0x380] sm:$0xff] }
  0xdd   :  { %v989_v25 = vadd.f32 %v893_v13, %v651_v12  ;;  %v316_v29 = vmul.f32 %v5386_v34, %v219_v15  ;;  %v461_v30 = vunpack.c.h.bf16 %v398_v10  ;;  %v463_v31 = vunpack.c.h.bf16 %v399_v11  ;;  %v739_v13 = vld [vmem:[#allocation7 + $0x388] sm:$0xff] }
  0xde   :  { %1485 = vmatprep.subr.bf16.mxu0 %v1410_v18  ;;  %v1325_v36 = vadd.f32 %v1229_v14, %v987_v19  ;;  %v318_v37 = vmul.f32 %v5386_v34, %v221_v23  ;;  %v799_v20 = vunpack.c.h.bf16 %v736_v16  ;;  %v801_v21 = vunpack.c.h.bf16 %v737_v17  ;;  %v1076_v18 = vld [vmem:[#allocation7 + $0x500] sm:$0xff]  ;;  %v1077_v19 = vld [vmem:[#allocation7 + $0x508] sm:$0xff] }
  0xdf   :  { %v1327_v38 = vadd.f32 %v1231_v22, %v989_v25  ;;  %v558_v39 = vmul.f32 %v5389_v35, %v461_v30  ;;  %v560_v26 = vmul.f32 %v5389_v35, %v463_v31  ;;  %v1137_v40 = vunpack.c.h.bf16 %v1074_v24 }
  0xe0   :  { %v896_v41 = vmul.f32 %v5398_v42, %v799_v20  ;;  %v898_v44 = vmul.f32 %v5398_v42, %v801_v21  ;;  %v1139_v45 = vunpack.c.h.bf16 %v1075_v32  ;;  %v218_v46 = vunpack.c.l.bf16 %v156_v0 }
  0xe1   :  { %v1409_v47 = vpack.c.bf16 %v1327_v38, %v1325_v36  ;;  %v654_v27 = vadd.f32 %v558_v39, %v316_v29  ;;  %v656_v48 = vadd.f32 %v560_v26, %v318_v37  ;;  %v1234_v49 = vmul.f32 %v5401_v43, %v1137_v40 }
  0xe2   :  { %v1236_v50 = vmul.f32 %v5401_v43, %v1139_v45  ;;  %v220_v51 = vunpack.c.l.bf16 %v157_v5  ;;  %v315_v52 = vmul.f32 %v5386_v34, %v218_v46  ;;  %v460_v28 = vunpack.c.l.bf16 %v398_v10 }
  0xe3   :  { %1486 = vmatpush1.bf16.msra.mxu0 %v1409_v47  ;;  %v992_v33 = vadd.f32 %v896_v41, %v654_v27  ;;  %v994_v53 = vadd.f32 %v898_v44, %v656_v48  ;;  %v462_v54 = vunpack.c.l.bf16 %v399_v11  ;;  %v798_v55 = vunpack.c.l.bf16 %v736_v16 }
  0xe4   :  { %v317_v56 = vmul.f32 %v5386_v34, %v220_v51  ;;  %v557_v57 = vmul.f32 %v5389_v35, %v460_v28  ;;  %v800_v58 = vunpack.c.l.bf16 %v737_v17  ;;  %v1136_v59 = vunpack.c.l.bf16 %v1074_v24 }
  0xe5   :  { %v1330_v62 = vadd.f32 %v1234_v49, %v992_v33  ;;  %v1332_v63 = vadd.f32 %v1236_v50, %v994_v53  ;;  %v559_v0 = vmul.f32 %v5389_v35, %v462_v54  ;;  %v895_v1 = vmul.f32 %v5398_v42, %v798_v55  ;;  %v160_v33 = vld [vmem:[#allocation7 + $0x90] sm:$0xff] }
  0xe6   :  { %v653_v4 = vadd.f32 %v557_v57, %v315_v52  ;;  %v897_v5 = vmul.f32 %v5398_v42, %v800_v58  ;;  %v1138_v6 = vunpack.c.l.bf16 %v1075_v32  ;;  %v1233_v7 = vmul.f32 %v5401_v43, %v1136_v59  ;;  %v161_v57 = vld [vmem:[#allocation7 + $0x98] sm:$0xff]  ;;  %v402_v58 = vld [vmem:[#allocation7 + $0x210] sm:$0xff] }
  0xe7   :  { %v1412_v9 = vpack.c.bf16 %v1332_v63, %v1330_v62  ;;  %v655_v10 = vadd.f32 %v559_v0, %v317_v56  ;;  %v223_v11 = vunpack.c.h.bf16 %v158_v60  ;;  %v225_v12 = vunpack.c.h.bf16 %v159_v61  ;;  %v403_v63 = vld [vmem:[#allocation7 + $0x218] sm:$0xff]  ;;  %v740_v0 = vld [vmem:[#allocation7 + $0x390] sm:$0xff] }
  0xe8   :  { %v991_v14 = vadd.f32 %v895_v1, %v653_v4  ;;  %v1235_v15 = vmul.f32 %v5401_v43, %v1138_v6  ;;  %v465_v16 = vunpack.c.h.bf16 %v400_v2  ;;  %v467_v17 = vunpack.c.h.bf16 %v401_v3 }
  0xe9   :  { %1487 = vmatprep.subr.bf16.mxu0 %v1412_v9  ;;  %v993_v22 = vadd.f32 %v897_v5, %v655_v10  ;;  %v320_v23 = vmul.f32 %v5386_v34, %v223_v11  ;;  %v322_v24 = vmul.f32 %v5386_v34, %v225_v12  ;;  %v803_v25 = vunpack.c.h.bf16 %v738_v8  ;;  %v741_v5 = vld [vmem:[#allocation7 + $0x398] sm:$0xff]  ;;  %v1078_v10 = vld [vmem:[#allocation7 + $0x510] sm:$0xff] }
  0xea   :  { %v1329_v29 = vadd.f32 %v1233_v7, %v991_v14  ;;  %v562_v30 = vmul.f32 %v5389_v35, %v465_v16  ;;  %v564_v31 = vmul.f32 %v5389_v35, %v467_v17  ;;  %v805_v32 = vunpack.c.h.bf16 %v739_v13 }
  0xeb   :  { %v1331_v36 = vadd.f32 %v1235_v15, %v993_v22  ;;  %v900_v37 = vmul.f32 %v5398_v42, %v803_v25  ;;  %v1141_v20 = vunpack.c.h.bf16 %v1076_v18  ;;  %v1143_v21 = vunpack.c.h.bf16 %v1077_v19  ;;  %v1079_v15 = vld [vmem:[#allocation7 + $0x518] sm:$0xff] }
  0xec   :  { %v658_v38 = vadd.f32 %v562_v30, %v320_v23  ;;  %v660_v39 = vadd.f32 %v564_v31, %v322_v24  ;;  %v902_v26 = vmul.f32 %v5398_v42, %v805_v32  ;;  %v222_v40 = vunpack.c.l.bf16 %v158_v60 }
  0xed   :  { %v1411_v41 = vpack.c.bf16 %v1331_v36, %v1329_v29  ;;  %v1238_v44 = vmul.f32 %v5401_v43, %v1141_v20  ;;  %v1240_v45 = vmul.f32 %v5401_v43, %v1143_v21  ;;  %v224_v46 = vunpack.c.l.bf16 %v159_v61 }
  0xee   :  { %v996_v47 = vadd.f32 %v900_v37, %v658_v38  ;;  %v998_v27 = vadd.f32 %v902_v26, %v660_v39  ;;  %v319_v48 = vmul.f32 %v5386_v34, %v222_v40  ;;  %v464_v49 = vunpack.c.l.bf16 %v400_v2 }
  0xef   :  { %1488 = vmatpush1.bf16.msra.mxu0 %v1411_v41  ;;  %v321_v50 = vmul.f32 %v5386_v34, %v224_v46  ;;  %v466_v51 = vunpack.c.l.bf16 %v401_v3  ;;  %v802_v52 = vunpack.c.l.bf16 %v738_v8  ;;  %v804_v28 = vunpack.c.l.bf16 %v739_v13 }
  0xf0   :  { %v1334_v53 = vadd.f32 %v1238_v44, %v996_v47  ;;  %v1336_v54 = vadd.f32 %v1240_v45, %v998_v27  ;;  %v561_v55 = vmul.f32 %v5389_v35, %v464_v49  ;;  %v1140_v56 = vunpack.c.l.bf16 %v1076_v18  ;;  %v162_v47 = vld [vmem:[#allocation7 + $0xa0] sm:$0xff] }
  0xf1   :  { %v563_v59 = vmul.f32 %v5389_v35, %v466_v51  ;;  %v899_v60 = vmul.f32 %v5398_v42, %v802_v52  ;;  %v901_v61 = vmul.f32 %v5398_v42, %v804_v28  ;;  %v1142_v62 = vunpack.c.l.bf16 %v1077_v19 }
  0xf2   :  { %v1414_v1 = vpack.c.bf16 %v1336_v54, %v1334_v53  ;;  %v657_v2 = vadd.f32 %v561_v55, %v319_v48  ;;  %v1237_v3 = vmul.f32 %v5401_v43, %v1140_v56  ;;  %v227_v4 = vunpack.c.h.bf16 %v160_v33  ;;  %v163_v53 = vld [vmem:[#allocation7 + $0xa8] sm:$0xff]  ;;  %v404_v54 = vld [vmem:[#allocation7 + $0x220] sm:$0xff] }
  0xf3   :  { %v659_v6 = vadd.f32 %v563_v59, %v321_v50  ;;  %v1239_v7 = vmul.f32 %v5401_v43, %v1142_v62  ;;  %v229_v8 = vunpack.c.h.bf16 %v161_v57  ;;  %v469_v9 = vunpack.c.h.bf16 %v402_v58  ;;  %v405_v59 = vld [vmem:[#allocation7 + $0x228] sm:$0xff] }
  0xf4   :  { %1489 = vmatprep.subr.bf16.mxu0 %v1414_v1  ;;  %v995_v11 = vadd.f32 %v899_v60, %v657_v2  ;;  %v324_v12 = vmul.f32 %v5386_v34, %v227_v4  ;;  %v471_v13 = vunpack.c.h.bf16 %v403_v63  ;;  %v807_v14 = vunpack.c.h.bf16 %v740_v0  ;;  %v742_v60 = vld [vmem:[#allocation7 + $0x3a0] sm:$0xff] }
  0xf5   :  { %v997_v16 = vadd.f32 %v901_v61, %v659_v6  ;;  %v326_v17 = vmul.f32 %v5386_v34, %v229_v8  ;;  %v566_v18 = vmul.f32 %v5389_v35, %v469_v9  ;;  %v809_v19 = vunpack.c.h.bf16 %v741_v5  ;;  %v743_v61 = vld [vmem:[#allocation7 + $0x3a8] sm:$0xff]  ;;  %v1080_v2 = vld [vmem:[#allocation7 + $0x520] sm:$0xff] }
  0xf6   :  { %v1333_v22 = vadd.f32 %v1237_v3, %v995_v11  ;;  %v568_v23 = vmul.f32 %v5389_v35, %v471_v13  ;;  %v904_v24 = vmul.f32 %v5398_v42, %v807_v14  ;;  %v1145_v25 = vunpack.c.h.bf16 %v1078_v10  ;;  %v1081_v11 = vld [vmem:[#allocation7 + $0x528] sm:$0xff] }
  0xf7   :  { %v1335_v29 = vadd.f32 %v1239_v7, %v997_v16  ;;  %v662_v30 = vadd.f32 %v566_v18, %v324_v12  ;;  %v906_v31 = vmul.f32 %v5398_v42, %v809_v19  ;;  %v1147_v32 = vunpack.c.h.bf16 %v1079_v15 }
  0xf8   :  { %v664_v36 = vadd.f32 %v568_v23, %v326_v17  ;;  %v1242_v37 = vmul.f32 %v5401_v43, %v1145_v25  ;;  %v226_v20 = vunpack.c.l.bf16 %v160_v33  ;;  %v228_v21 = vunpack.c.l.bf16 %v161_v57 }
  0xf9   :  { %v1413_v38 = vpack.c.bf16 %v1335_v29, %v1333_v22  ;;  %v1000_v39 = vadd.f32 %v904_v24, %v662_v30  ;;  %v1244_v26 = vmul.f32 %v5401_v43, %v1147_v32  ;;  %v468_v40 = vunpack.c.l.bf16 %v402_v58 }
  0xfa   :  { %v1002_v41 = vadd.f32 %v906_v31, %v664_v36  ;;  %v323_v44 = vmul.f32 %v5386_v34, %v226_v20  ;;  %v325_v45 = vmul.f32 %v5386_v34, %v228_v21  ;;  %v470_v46 = vunpack.c.l.bf16 %v403_v63 }
  0xfb   :  { %1490 = vmatpush1.bf16.msra.mxu0 %v1413_v38  ;;  %v1338_v27 = vadd.f32 %v1242_v37, %v1000_v39  ;;  %v565_v48 = vmul.f32 %v5389_v35, %v468_v40  ;;  %v806_v49 = vunpack.c.l.bf16 %v740_v0  ;;  %v808_v50 = vunpack.c.l.bf16 %v741_v5 }
  0xfc   :  { %v1340_v51 = vadd.f32 %v1244_v26, %v1002_v41  ;;  %v567_v52 = vmul.f32 %v5389_v35, %v470_v46  ;;  %v1144_v28 = vunpack.c.l.bf16 %v1078_v10  ;;  %v1146_v33 = vunpack.c.l.bf16 %v1079_v15  ;;  %v164_v41 = vld [vmem:[#allocation7 + $0xb0] sm:$0xff] }
  0xfd   :  { %v661_v55 = vadd.f32 %v565_v48, %v323_v44  ;;  %v903_v56 = vmul.f32 %v5398_v42, %v806_v49  ;;  %v905_v57 = vmul.f32 %v5398_v42, %v808_v50  ;;  %v231_v58 = vunpack.c.h.bf16 %v162_v47 }
  0xfe   :  { %v1416_v62 = vpack.c.bf16 %v1340_v51, %v1338_v27  ;;  %v663_v63 = vadd.f32 %v567_v52, %v325_v45  ;;  %v1241_v0 = vmul.f32 %v5401_v43, %v1144_v28  ;;  %v1243_v1 = vmul.f32 %v5401_v43, %v1146_v33  ;;  %v165_v27 = vld [vmem:[#allocation7 + $0xb8] sm:$0xff]  ;;  %v406_v52 = vld [vmem:[#allocation7 + $0x230] sm:$0xff] }
  0xff   :  { %v999_v3 = vadd.f32 %v903_v56, %v661_v55  ;;  %v233_v4 = vunpack.c.h.bf16 %v163_v53  ;;  %v328_v5 = vmul.f32 %v5386_v34, %v231_v58  ;;  %v473_v6 = vunpack.c.h.bf16 %v404_v54  ;;  %v407_v28 = vld [vmem:[#allocation7 + $0x238] sm:$0xff]  ;;  %v744_v56 = vld [vmem:[#allocation7 + $0x3b0] sm:$0xff] }
 0x100   :  { %1491 = vmatprep.subr.bf16.mxu0 %v1416_v62  ;;  %v1001_v7 = vadd.f32 %v905_v57, %v663_v63  ;;  %v475_v8 = vunpack.c.h.bf16 %v405_v59  ;;  %v811_v9 = vunpack.c.h.bf16 %v742_v60  ;;  %v813_v10 = vunpack.c.h.bf16 %v743_v61  ;;  %v745_v57 = vld [vmem:[#allocation7 + $0x3b8] sm:$0xff]  ;;  %v1082_v62 = vld [vmem:[#allocation7 + $0x530] sm:$0xff] }
 0x101   :  { %v1337_v12 = vadd.f32 %v1241_v0, %v999_v3  ;;  %v330_v13 = vmul.f32 %v5386_v34, %v233_v4  ;;  %v570_v14 = vmul.f32 %v5389_v35, %v473_v6  ;;  %v1149_v15 = vunpack.c.h.bf16 %v1080_v2  ;;  %v1083_v3 = vld [vmem:[#allocation7 + $0x538] sm:$0xff] }
 0x102   :  { %v1339_v16 = vadd.f32 %v1243_v1, %v1001_v7  ;;  %v572_v17 = vmul.f32 %v5389_v35, %v475_v8  ;;  %v908_v18 = vmul.f32 %v5398_v42, %v811_v9  ;;  %v910_v19 = vmul.f32 %v5398_v42, %v813_v10 }
 0x103   :  { %v666_v22 = vadd.f32 %v570_v14, %v328_v5  ;;  %v1151_v23 = vunpack.c.h.bf16 %v1081_v11  ;;  %v1246_v24 = vmul.f32 %v5401_v43, %v1149_v15  ;;  %v230_v25 = vunpack.c.l.bf16 %v162_v47 }
 0x104   :  { %v1415_v29 = vpack.c.bf16 %v1339_v16, %v1337_v12  ;;  %v668_v30 = vadd.f32 %v572_v17, %v330_v13  ;;  %v232_v31 = vunpack.c.l.bf16 %v163_v53  ;;  %v472_v32 = vunpack.c.l.bf16 %v404_v54 }
 0x105   :  { %v1004_v36 = vadd.f32 %v908_v18, %v666_v22  ;;  %v1248_v37 = vmul.f32 %v5401_v43, %v1151_v23  ;;  %v327_v20 = vmul.f32 %v5386_v34, %v230_v25  ;;  %v474_v21 = vunpack.c.l.bf16 %v405_v59 }
 0x106   :  { %1492 = vmatpush1.bf16.msra.mxu0 %v1415_v29  ;;  %v1006_v38 = vadd.f32 %v910_v19, %v668_v30  ;;  %v329_v39 = vmul.f32 %v5386_v34, %v232_v31  ;;  %v569_v26 = vmul.f32 %v5389_v35, %v472_v32  ;;  %v810_v40 = vunpack.c.l.bf16 %v742_v60 }
 0x107   :  { %v1342_v44 = vadd.f32 %v1246_v24, %v1004_v36  ;;  %v571_v45 = vmul.f32 %v5389_v35, %v474_v21  ;;  %v812_v46 = vunpack.c.l.bf16 %v743_v61  ;;  %v1148_v47 = vunpack.c.l.bf16 %v1080_v2 }
 0x108   :  { %v1344_v48 = vadd.f32 %v1248_v37, %v1006_v38  ;;  %v665_v49 = vadd.f32 %v569_v26, %v327_v20  ;;  %v907_v50 = vmul.f32 %v5398_v42, %v810_v40  ;;  %v1150_v51 = vunpack.c.l.bf16 %v1081_v11  ;;  %v166_v38 = vld [vmem:[#allocation7 + $0xc0] sm:$0xff] }
 0x109   :  { %v667_v33 = vadd.f32 %v571_v45, %v329_v39  ;;  %v909_v53 = vmul.f32 %v5398_v42, %v812_v46  ;;  %v1245_v54 = vmul.f32 %v5401_v43, %v1148_v47  ;;  %v235_v55 = vunpack.c.h.bf16 %v164_v41  ;;  %v167_v39 = vld [vmem:[#allocation7 + $0xc8] sm:$0xff]  ;;  %v408_v45 = vld [vmem:[#allocation7 + $0x240] sm:$0xff] }
 0x10a   :  { %v1418_v58 = vpack.c.bf16 %v1344_v48, %v1342_v44  ;;  %v1003_v59 = vadd.f32 %v907_v50, %v665_v49  ;;  %v1247_v60 = vmul.f32 %v5401_v43, %v1150_v51  ;;  %v237_v61 = vunpack.c.h.bf16 %v165_v27  ;;  %v409_v46 = vld [vmem:[#allocation7 + $0x248] sm:$0xff]  ;;  %v746_v50 = vld [vmem:[#allocation7 + $0x3c0] sm:$0xff] }
 0x10b   :  { %v1005_v63 = vadd.f32 %v909_v53, %v667_v33  ;;  %v332_v0 = vmul.f32 %v5386_v34, %v235_v55  ;;  %v477_v1 = vunpack.c.h.bf16 %v406_v52  ;;  %v479_v2 = vunpack.c.h.bf16 %v407_v28  ;;  %v747_v53 = vld [vmem:[#allocation7 + $0x3c8] sm:$0xff] }
 0x10c   :  { %1493 = vmatprep.subr.bf16.mxu0 %v1418_v58  ;;  %v1341_v4 = vadd.f32 %v1245_v54, %v1003_v59  ;;  %v334_v5 = vmul.f32 %v5386_v34, %v237_v61  ;;  %v815_v6 = vunpack.c.h.bf16 %v744_v56  ;;  %v817_v7 = vunpack.c.h.bf16 %v745_v57  ;;  %v1084_v58 = vld [vmem:[#allocation7 + $0x540] sm:$0xff]  ;;  %v1085_v59 = vld [vmem:[#allocation7 + $0x548] sm:$0xff] }
 0x10d   :  { %v1343_v8 = vadd.f32 %v1247_v60, %v1005_v63  ;;  %v574_v9 = vmul.f32 %v5389_v35, %v477_v1  ;;  %v576_v10 = vmul.f32 %v5389_v35, %v479_v2  ;;  %v1153_v11 = vunpack.c.h.bf16 %v1082_v62 }
 0x10e   :  { %v912_v12 = vmul.f32 %v5398_v42, %v815_v6  ;;  %v914_v13 = vmul.f32 %v5398_v42, %v817_v7  ;;  %v1155_v14 = vunpack.c.h.bf16 %v1083_v3  ;;  %v234_v15 = vunpack.c.l.bf16 %v164_v41 }
 0x10f   :  { %v1417_v16 = vpack.c.bf16 %v1343_v8, %v1341_v4  ;;  %v670_v17 = vadd.f32 %v574_v9, %v332_v0  ;;  %v672_v18 = vadd.f32 %v576_v10, %v334_v5  ;;  %v1250_v19 = vmul.f32 %v5401_v43, %v1153_v11 }
 0x110   :  { %v1252_v22 = vmul.f32 %v5401_v43, %v1155_v14  ;;  %v236_v23 = vunpack.c.l.bf16 %v165_v27  ;;  %v331_v24 = vmul.f32 %v5386_v34, %v234_v15  ;;  %v476_v25 = vunpack.c.l.bf16 %v406_v52 }
 0x111   :  { %1494 = vmatpush1.bf16.msra.mxu0 %v1417_v16  ;;  %v1008_v29 = vadd.f32 %v912_v12, %v670_v17  ;;  %v1010_v30 = vadd.f32 %v914_v13, %v672_v18  ;;  %v478_v31 = vunpack.c.l.bf16 %v407_v28  ;;  %v814_v32 = vunpack.c.l.bf16 %v744_v56 }
 0x112   :  { %v333_v36 = vmul.f32 %v5386_v34, %v236_v23  ;;  %v573_v37 = vmul.f32 %v5389_v35, %v476_v25  ;;  %v816_v20 = vunpack.c.l.bf16 %v745_v57  ;;  %v1152_v21 = vunpack.c.l.bf16 %v1082_v62 }
 0x113   :  { %v1346_v26 = vadd.f32 %v1250_v19, %v1008_v29  ;;  %v1348_v40 = vadd.f32 %v1252_v22, %v1010_v30  ;;  %v575_v41 = vmul.f32 %v5389_v35, %v478_v31  ;;  %v911_v44 = vmul.f32 %v5398_v42, %v814_v32  ;;  %v168_v29 = vld [vmem:[#allocation7 + $0xd0] sm:$0xff] }
 0x114   :  { %v669_v47 = vadd.f32 %v573_v37, %v331_v24  ;;  %v913_v27 = vmul.f32 %v5398_v42, %v816_v20  ;;  %v1154_v48 = vunpack.c.l.bf16 %v1083_v3  ;;  %v1249_v49 = vmul.f32 %v5401_v43, %v1152_v21  ;;  %v169_v37 = vld [vmem:[#allocation7 + $0xd8] sm:$0xff]  ;;  %v410_v20 = vld [vmem:[#allocation7 + $0x250] sm:$0xff] }
 0x115   :  { %v1420_v51 = vpack.c.bf16 %v1348_v40, %v1346_v26  ;;  %v671_v52 = vadd.f32 %v575_v41, %v333_v36  ;;  %v239_v28 = vunpack.c.h.bf16 %v166_v38  ;;  %v241_v33 = vunpack.c.h.bf16 %v167_v39  ;;  %v411_v40 = vld [vmem:[#allocation7 + $0x258] sm:$0xff]  ;;  %v748_v41 = vld [vmem:[#allocation7 + $0x3d0] sm:$0xff] }
 0x116   :  { %v1007_v54 = vadd.f32 %v911_v44, %v669_v47  ;;  %v1251_v55 = vmul.f32 %v5401_v43, %v1154_v48  ;;  %v481_v56 = vunpack.c.h.bf16 %v408_v45  ;;  %v483_v57 = vunpack.c.h.bf16 %v409_v46 }
 0x117   :  { %1495 = vmatprep.subr.bf16.mxu0 %v1420_v51  ;;  %v1009_v60 = vadd.f32 %v913_v27, %v671_v52  ;;  %v336_v61 = vmul.f32 %v5386_v34, %v239_v28  ;;  %v338_v62 = vmul.f32 %v5386_v34, %v241_v33  ;;  %v819_v63 = vunpack.c.h.bf16 %v746_v50  ;;  %v749_v27 = vld [vmem:[#allocation7 + $0x3d8] sm:$0xff]  ;;  %v1086_v52 = vld [vmem:[#allocation7 + $0x550] sm:$0xff] }
 0x118   :  { %v1345_v0 = vadd.f32 %v1249_v49, %v1007_v54  ;;  %v578_v1 = vmul.f32 %v5389_v35, %v481_v56  ;;  %v580_v2 = vmul.f32 %v5389_v35, %v483_v57  ;;  %v821_v3 = vunpack.c.h.bf16 %v747_v53 }
 0x119   :  { %v1347_v4 = vadd.f32 %v1251_v55, %v1009_v60  ;;  %v916_v5 = vmul.f32 %v5398_v42, %v819_v63  ;;  %v1157_v6 = vunpack.c.h.bf16 %v1084_v58  ;;  %v1159_v7 = vunpack.c.h.bf16 %v1085_v59  ;;  %v1087_v55 = vld [vmem:[#allocation7 + $0x558] sm:$0xff] }
 0x11a   :  { %v674_v8 = vadd.f32 %v578_v1, %v336_v61  ;;  %v676_v9 = vadd.f32 %v580_v2, %v338_v62  ;;  %v918_v10 = vmul.f32 %v5398_v42, %v821_v3  ;;  %v238_v11 = vunpack.c.l.bf16 %v166_v38 }
 0x11b   :  { %v1419_v12 = vpack.c.bf16 %v1347_v4, %v1345_v0  ;;  %v1254_v13 = vmul.f32 %v5401_v43, %v1157_v6  ;;  %v1256_v14 = vmul.f32 %v5401_v43, %v1159_v7  ;;  %v240_v15 = vunpack.c.l.bf16 %v167_v39 }
 0x11c   :  { %v1012_v16 = vadd.f32 %v916_v5, %v674_v8  ;;  %v1014_v17 = vadd.f32 %v918_v10, %v676_v9  ;;  %v335_v18 = vmul.f32 %v5386_v34, %v238_v11  ;;  %v480_v19 = vunpack.c.l.bf16 %v408_v45 }
 0x11d   :  { %1496 = vmatpush1.bf16.msra.mxu0 %v1419_v12  ;;  %v337_v22 = vmul.f32 %v5386_v34, %v240_v15  ;;  %v482_v23 = vunpack.c.l.bf16 %v409_v46  ;;  %v818_v24 = vunpack.c.l.bf16 %v746_v50  ;;  %v820_v25 = vunpack.c.l.bf16 %v747_v53 }
 0x11e   :  { %v1350_v30 = vadd.f32 %v1254_v13, %v1012_v16  ;;  %v1352_v31 = vadd.f32 %v1256_v14, %v1014_v17  ;;  %v577_v32 = vmul.f32 %v5389_v35, %v480_v19  ;;  %v1156_v36 = vunpack.c.l.bf16 %v1084_v58  ;;  %v170_v16 = vld [vmem:[#allocation7 + $0xe0] sm:$0xff] }
 0x11f   :  { %v579_v21 = vmul.f32 %v5389_v35, %v482_v23  ;;  %v915_v38 = vmul.f32 %v5398_v42, %v818_v24  ;;  %v917_v39 = vmul.f32 %v5398_v42, %v820_v25  ;;  %v1158_v26 = vunpack.c.l.bf16 %v1085_v59 }
 0x120   :  { %v1422_v44 = vpack.c.bf16 %v1352_v31, %v1350_v30  ;;  %v673_v45 = vadd.f32 %v577_v32, %v335_v18  ;;  %v1253_v46 = vmul.f32 %v5401_v43, %v1156_v36  ;;  %v243_v47 = vunpack.c.h.bf16 %v168_v29  ;;  %v171_v30 = vld [vmem:[#allocation7 + $0xe8] sm:$0xff]  ;;  %v412_v31 = vld [vmem:[#allocation7 + $0x260] sm:$0xff] }
 0x121   :  { %v675_v48 = vadd.f32 %v579_v21, %v337_v22  ;;  %v1255_v49 = vmul.f32 %v5401_v43, %v1158_v26  ;;  %v245_v50 = vunpack.c.h.bf16 %v169_v37  ;;  %v485_v51 = vunpack.c.h.bf16 %v410_v20  ;;  %v413_v21 = vld [vmem:[#allocation7 + $0x268] sm:$0xff] }
 0x122   :  { %1497 = vmatprep.subr.bf16.mxu0 %v1422_v44  ;;  %v1011_v28 = vadd.f32 %v915_v38, %v673_v45  ;;  %v340_v33 = vmul.f32 %v5386_v34, %v243_v47  ;;  %v487_v53 = vunpack.c.h.bf16 %v411_v40  ;;  %v823_v54 = vunpack.c.h.bf16 %v748_v41  ;;  %v750_v38 = vld [vmem:[#allocation7 + $0x3e0] sm:$0xff] }
 0x123   :  { %v1013_v56 = vadd.f32 %v917_v39, %v675_v48  ;;  %v342_v57 = vmul.f32 %v5386_v34, %v245_v50  ;;  %v582_v58 = vmul.f32 %v5389_v35, %v485_v51  ;;  %v825_v59 = vunpack.c.h.bf16 %v749_v27  ;;  %v751_v39 = vld [vmem:[#allocation7 + $0x3e8] sm:$0xff]  ;;  %v1088_v45 = vld [vmem:[#allocation7 + $0x560] sm:$0xff] }
 0x124   :  { %v1349_v60 = vadd.f32 %v1253_v46, %v1011_v28  ;;  %v584_v61 = vmul.f32 %v5389_v35, %v487_v53  ;;  %v920_v62 = vmul.f32 %v5398_v42, %v823_v54  ;;  %v1161_v63 = vunpack.c.h.bf16 %v1086_v52  ;;  %v1089_v28 = vld [vmem:[#allocation7 + $0x568] sm:$0xff] }
 0x125   :  { %v1351_v0 = vadd.f32 %v1255_v49, %v1013_v56  ;;  %v678_v1 = vadd.f32 %v582_v58, %v340_v33  ;;  %v922_v2 = vmul.f32 %v5398_v42, %v825_v59  ;;  %v1163_v3 = vunpack.c.h.bf16 %v1087_v55 }
 0x126   :  { %v680_v4 = vadd.f32 %v584_v61, %v342_v57  ;;  %v1258_v5 = vmul.f32 %v5401_v43, %v1161_v63  ;;  %v242_v6 = vunpack.c.l.bf16 %v168_v29  ;;  %v244_v7 = vunpack.c.l.bf16 %v169_v37 }
 0x127   :  { %v1421_v8 = vpack.c.bf16 %v1351_v0, %v1349_v60  ;;  %v1016_v9 = vadd.f32 %v920_v62, %v678_v1  ;;  %v1260_v10 = vmul.f32 %v5401_v43, %v1163_v3  ;;  %v484_v11 = vunpack.c.l.bf16 %v410_v20 }
 0x128   :  { %v1018_v12 = vadd.f32 %v922_v2, %v680_v4  ;;  %v339_v13 = vmul.f32 %v5386_v34, %v242_v6  ;;  %v341_v14 = vmul.f32 %v5386_v34, %v244_v7  ;;  %v486_v15 = vunpack.c.l.bf16 %v411_v40 }
 0x129   :  { %1498 = vmatpush1.bf16.msra.mxu0 %v1421_v8  ;;  %v1354_v17 = vadd.f32 %v1258_v5, %v1016_v9  ;;  %v581_v18 = vmul.f32 %v5389_v35, %v484_v11  ;;  %v822_v19 = vunpack.c.l.bf16 %v748_v41  ;;  %v824_v22 = vunpack.c.l.bf16 %v749_v27 }
 0x12a   :  { %v1356_v23 = vadd.f32 %v1260_v10, %v1018_v12  ;;  %v583_v24 = vmul.f32 %v5389_v35, %v486_v15  ;;  %v1160_v25 = vunpack.c.l.bf16 %v1086_v52  ;;  %v1162_v29 = vunpack.c.l.bf16 %v1087_v55  ;;  %v172_v12 = vld [vmem:[#allocation7 + $0xf0] sm:$0xff] }
 0x12b   :  { %v677_v32 = vadd.f32 %v581_v18, %v339_v13  ;;  %v919_v36 = vmul.f32 %v5398_v42, %v822_v19  ;;  %v921_v37 = vmul.f32 %v5398_v42, %v824_v22  ;;  %v247_v20 = vunpack.c.h.bf16 %v170_v16 }
 0x12c   :  { %v1424_v26 = vpack.c.bf16 %v1356_v23, %v1354_v17  ;;  %v679_v40 = vadd.f32 %v583_v24, %v341_v14  ;;  %v1257_v41 = vmul.f32 %v5401_v43, %v1160_v25  ;;  %v1259_v44 = vmul.f32 %v5401_v43, %v1162_v29  ;;  %v173_v17 = vld [vmem:[#allocation7 + $0xf8] sm:$0xff]  ;;  %v414_v24 = vld [vmem:[#allocation7 + $0x270] sm:$0xff] }
 0x12d   :  { %v1015_v46 = vadd.f32 %v919_v36, %v677_v32  ;;  %v249_v47 = vunpack.c.h.bf16 %v171_v30  ;;  %v344_v27 = vmul.f32 %v5386_v34, %v247_v20  ;;  %v489_v48 = vunpack.c.h.bf16 %v412_v31  ;;  %v415_v25 = vld [vmem:[#allocation7 + $0x278] sm:$0xff]  ;;  %v752_v36 = vld [vmem:[#allocation7 + $0x3f0] sm:$0xff] }
 0x12e   :  { %1499 = vmatprep.subr.bf16.mxu0 %v1424_v26  ;;  %v1017_v49 = vadd.f32 %v921_v37, %v679_v40  ;;  %v491_v50 = vunpack.c.h.bf16 %v413_v21  ;;  %v827_v51 = vunpack.c.h.bf16 %v750_v38  ;;  %v829_v52 = vunpack.c.h.bf16 %v751_v39  ;;  %v753_v37 = vld [vmem:[#allocation7 + $0x3f8] sm:$0xff]  ;;  %v1090_v26 = vld [vmem:[#allocation7 + $0x570] sm:$0xff] }
 0x12f   :  { %v1353_v33 = vadd.f32 %v1257_v41, %v1015_v46  ;;  %v346_v53 = vmul.f32 %v5386_v34, %v249_v47  ;;  %v586_v54 = vmul.f32 %v5389_v35, %v489_v48  ;;  %v1165_v55 = vunpack.c.h.bf16 %v1088_v45  ;;  %v1091_v46 = vld [vmem:[#allocation7 + $0x578] sm:$0xff] }
 0x130   :  { %v1355_v56 = vadd.f32 %v1259_v44, %v1017_v49  ;;  %v588_v57 = vmul.f32 %v5389_v35, %v491_v50  ;;  %v924_v58 = vmul.f32 %v5398_v42, %v827_v51  ;;  %v926_v59 = vmul.f32 %v5398_v42, %v829_v52 }
 0x131   :  { %v682_v60 = vadd.f32 %v586_v54, %v344_v27  ;;  %v1167_v61 = vunpack.c.h.bf16 %v1089_v28  ;;  %v1262_v62 = vmul.f32 %v5401_v43, %v1165_v55  ;;  %v246_v63 = vunpack.c.l.bf16 %v170_v16 }
 0x132   :  { %v1423_v0 = vpack.c.bf16 %v1355_v56, %v1353_v33  ;;  %v684_v1 = vadd.f32 %v588_v57, %v346_v53  ;;  %v248_v2 = vunpack.c.l.bf16 %v171_v30  ;;  %v488_v3 = vunpack.c.l.bf16 %v412_v31 }
 0x133   :  { %v1020_v4 = vadd.f32 %v924_v58, %v682_v60  ;;  %v1264_v5 = vmul.f32 %v5401_v43, %v1167_v61  ;;  %v343_v6 = vmul.f32 %v5386_v34, %v246_v63  ;;  %v490_v7 = vunpack.c.l.bf16 %v413_v21 }
 0x134   :  { %1500 = vmatpush1.bf16.msra.mxu0 %v1423_v0  ;;  %v1022_v8 = vadd.f32 %v926_v59, %v684_v1  ;;  %v345_v9 = vmul.f32 %v5386_v34, %v248_v2  ;;  %v585_v10 = vmul.f32 %v5389_v35, %v488_v3  ;;  %v826_v11 = vunpack.c.l.bf16 %v750_v38 }
 0x135   :  { %v1358_v13 = vadd.f32 %v1262_v62, %v1020_v4  ;;  %v587_v14 = vmul.f32 %v5389_v35, %v490_v7  ;;  %v828_v15 = vunpack.c.l.bf16 %v751_v39  ;;  %v1164_v16 = vunpack.c.l.bf16 %v1088_v45 }
 0x136   :  { %v1360_v18 = vadd.f32 %v1264_v5, %v1022_v8  ;;  %v681_v19 = vadd.f32 %v585_v10, %v343_v6  ;;  %v923_v22 = vmul.f32 %v5398_v42, %v826_v11  ;;  %v1166_v23 = vunpack.c.l.bf16 %v1089_v28  ;;  %v140_v8 = vld [vmem:[#allocation6 + $0x8] sm:$0xff] }
 0x137   :  { %v683_v29 = vadd.f32 %v587_v14, %v345_v9  ;;  %v925_v30 = vmul.f32 %v5398_v42, %v828_v15  ;;  %v1261_v31 = vmul.f32 %v5401_v43, %v1164_v16  ;;  %v251_v32 = vunpack.c.h.bf16 %v172_v12  ;;  %v174_v9 = vld [vmem:[#allocation7 + $0x100] sm:$0xff]  ;;  %v175_v14 = vld [vmem:[#allocation7 + $0x108] sm:$0xff] }
 0x138   :  { %v1426_v20 = vpack.c.bf16 %v1360_v18, %v1358_v13  ;;  %v1019_v21 = vadd.f32 %v923_v22, %v681_v19  ;;  %v1263_v38 = vmul.f32 %v5401_v43, %v1166_v23  ;;  %v253_v39 = vunpack.c.h.bf16 %v173_v17  ;;  %v416_v19 = vld [vmem:[#allocation7 + $0x280] sm:$0xff] }
 0x139   :  { %v1021_v40 = vadd.f32 %v925_v30, %v683_v29  ;;  %v348_v41 = vmul.f32 %v5386_v34, %v251_v32  ;;  %v493_v44 = vunpack.c.h.bf16 %v414_v24  ;;  %v495_v45 = vunpack.c.h.bf16 %v415_v25  ;;  %v417_v29 = vld [vmem:[#allocation7 + $0x288] sm:$0xff] }
 0x13a   :  { %1501 = vmatprep.subr.bf16.mxu0 %v1426_v20  ;;  %v1357_v47 = vadd.f32 %v1261_v31, %v1019_v21  ;;  %v350_v27 = vmul.f32 %v5386_v34, %v253_v39  ;;  %v831_v48 = vunpack.c.h.bf16 %v752_v36  ;;  %v833_v49 = vunpack.c.h.bf16 %v753_v37 }
 0x13b   :  { %v1359_v50 = vadd.f32 %v1263_v38, %v1021_v40  ;;  %v590_v51 = vmul.f32 %v5389_v35, %v493_v44  ;;  %v592_v52 = vmul.f32 %v5389_v35, %v495_v45  ;;  %v1169_v28 = vunpack.c.h.bf16 %v1090_v26 }
 0x13c   :  { %v928_v33 = vmul.f32 %v5398_v42, %v831_v48  ;;  %v930_v53 = vmul.f32 %v5398_v42, %v833_v49  ;;  %v1171_v54 = vunpack.c.h.bf16 %v1091_v46  ;;  %v250_v55 = vunpack.c.l.bf16 %v172_v12 }
 0x13d   :  { %v1425_v56 = vpack.c.bf16 %v1359_v50, %v1357_v47  ;;  %v686_v57 = vadd.f32 %v590_v51, %v348_v41  ;;  %v688_v58 = vadd.f32 %v592_v52, %v350_v27  ;;  %v1266_v59 = vmul.f32 %v5401_v43, %v1169_v28  ;;  %v1093_v50 = vld [vmem:[#allocation7 + $0x588] sm:$0xff] }
 0x13e   :  { %v1268_v60 = vmul.f32 %v5401_v43, %v1171_v54  ;;  %v252_v61 = vunpack.c.l.bf16 %v173_v17  ;;  %v347_v62 = vmul.f32 %v5386_v34, %v250_v55  ;;  %v492_v63 = vunpack.c.l.bf16 %v414_v24 }
 0x13f   :  { %1502 = vmatpush1.bf16.msra.mxu0 %v1425_v56  ;;  %v1024_v0 = vadd.f32 %v928_v33, %v686_v57  ;;  %v1026_v1 = vadd.f32 %v930_v53, %v688_v58  ;;  %v494_v2 = vunpack.c.l.bf16 %v415_v25  ;;  %v830_v3 = vunpack.c.l.bf16 %v752_v36  ;;  %v139_v53 = vld [vmem:[#allocation6] sm:$0xff] }
 0x140   :  { %v349_v4 = vmul.f32 %v5386_v34, %v252_v61  ;;  %v589_v5 = vmul.f32 %v5389_v35, %v492_v63  ;;  %v832_v6 = vunpack.c.l.bf16 %v753_v37  ;;  %v1168_v7 = vunpack.c.l.bf16 %v1090_v26  ;;  %v754_v37 = vld [vmem:[#allocation7 + $0x400] sm:$0xff]  ;;  %v755_v26 = vld [vmem:[#allocation7 + $0x408] sm:$0xff] }
 0x141   :  { %v1362_v10 = vadd.f32 %v1266_v59, %v1024_v0  ;;  %v1364_v11 = vadd.f32 %v1268_v60, %v1026_v1  ;;  %v591_v12 = vmul.f32 %v5389_v35, %v494_v2  ;;  %v927_v13 = vmul.f32 %v5398_v42, %v830_v3 }
 0x142   :  { %v685_v15 = vadd.f32 %v589_v5, %v347_v62  ;;  %v929_v16 = vmul.f32 %v5398_v42, %v832_v6  ;;  %v1170_v17 = vunpack.c.l.bf16 %v1091_v46  ;;  %v1265_v18 = vmul.f32 %v5401_v43, %v1168_v7  ;;  %v1092_v46 = vld [vmem:[#allocation7 + $0x580] sm:$0xff]  ;;  %v176_v6 = vld [vmem:[#allocation7 + $0x110] sm:$0xff] }
 0x143   :  { %v1428_v22 = vpack.c.bf16 %v1364_v11, %v1362_v10  ;;  %v687_v23 = vadd.f32 %v591_v12, %v349_v4  ;;  %v1460_v24 = vpack.c.bf16 %v140_v8, %v140_v8  ;;  %v254_v25 = vunpack.c.l.bf16 %v174_v9  ;;  %v177_v11 = vld [vmem:[#allocation7 + $0x118] sm:$0xff]  ;;  %v418_v12 = vld [vmem:[#allocation7 + $0x290] sm:$0xff] }
 0x144   :  { %v1023_v30 = vadd.f32 %v927_v13, %v685_v15  ;;  %v1267_v31 = vmul.f32 %v5401_v43, %v1170_v17  ;;  %v255_v32 = vunpack.c.h.bf16 %v174_v9  ;;  %v256_v36 = vunpack.c.l.bf16 %v175_v14 }
 0x145   :  { %1503 = vmatprep.subr.bf16.mxu0 %v1428_v22  ;;  %v1025_v20 = vadd.f32 %v929_v16, %v687_v23  ;;  %1505 = vmatprep.mubr.bf16.mxu0 %v1460_v24  ;;  %v257_v21 = vunpack.c.h.bf16 %v175_v14  ;;  %v496_v38 = vunpack.c.l.bf16 %v416_v19  ;;  %v497_v39 = vunpack.c.h.bf16 %v416_v19  ;;  %v419_v23 = vld [vmem:[#allocation7 + $0x298] sm:$0xff] }
 0x146   :  { %v1361_v40 = vadd.f32 %v1265_v18, %v1023_v30  ;;  %v352_v41 = vmul.f32 %v5386_v34, %v255_v32  ;;  %v498_v44 = vunpack.c.l.bf16 %v417_v29  ;;  %v499_v45 = vunpack.c.h.bf16 %v417_v29 }
 0x147   :  { %v1363_v47 = vadd.f32 %v1267_v31, %v1025_v20  ;;  %v354_v27 = vmul.f32 %v5386_v34, %v257_v21  ;;  %v594_v48 = vmul.f32 %v5389_v35, %v497_v39  ;;  %v834_v49 = vunpack.c.l.bf16 %v754_v37  ;;  %v756_v31 = vld [vmem:[#allocation7 + $0x410] sm:$0xff]  ;;  %v757_v21 = vld [vmem:[#allocation7 + $0x418] sm:$0xff] }
 0x148   :  { %v596_v51 = vmul.f32 %v5389_v35, %v499_v45  ;;  %v835_v52 = vunpack.c.h.bf16 %v754_v37  ;;  %v836_v28 = vunpack.c.l.bf16 %v755_v26  ;;  %v837_v33 = vunpack.c.h.bf16 %v755_v26 }
 0x149   :  { %v1427_v54 = vpack.c.bf16 %v1363_v47, %v1361_v40  ;;  %v690_v55 = vadd.f32 %v594_v48, %v352_v41  ;;  %v1172_v56 = vunpack.c.l.bf16 %v1092_v46  ;;  %v1173_v57 = vunpack.c.h.bf16 %v1092_v46 }
 0x14a   :  { %v692_v58 = vadd.f32 %v596_v51, %v354_v27  ;;  %v932_v59 = vmul.f32 %v5398_v42, %v835_v52  ;;  %v934_v60 = vmul.f32 %v5398_v42, %v837_v33  ;;  %v1174_v61 = vunpack.c.l.bf16 %v1093_v50  ;;  %v1095_v27 = vld [vmem:[#allocation7 + $0x598] sm:$0xff] }
 0x14b   :  { %1504 = vmatpush1.bf16.msra.mxu0 %v1427_v54  ;;  %v1175_v62 = vunpack.c.h.bf16 %v1093_v50  ;;  %v1270_v63 = vmul.f32 %v5401_v43, %v1173_v57  ;;  %v1459_v0 = vpack.c.bf16 %v139_v53, %v139_v53  ;;  %v351_v1 = vmul.f32 %v5386_v34, %v254_v25 }
 0x14c   :  { %v1028_v2 = vadd.f32 %v932_v59, %v690_v55  ;;  %v1030_v3 = vadd.f32 %v934_v60, %v692_v58  ;;  %v353_v4 = vmul.f32 %v5386_v34, %v256_v36  ;;  %v593_v5 = vmul.f32 %v5389_v35, %v496_v38  ;;  %v1094_v38 = vld [vmem:[#allocation7 + $0x590] sm:$0xff] }
 0x14d   :  { %v1272_v7 = vmul.f32 %v5401_v43, %v1175_v62  ;;  %v595_v8 = vmul.f32 %v5389_v35, %v498_v44  ;;  %v931_v9 = vmul.f32 %v5398_v42, %v834_v49  ;;  %v933_v10 = vmul.f32 %v5398_v42, %v836_v28 }
 0x14e   :  { %v1366_v13 = vadd.f32 %v1270_v63, %v1028_v2  ;;  %1506 = vmatmul.mubr.bf16.vlgmr.msra.gmra.mrb[0].mxu0 %v1459_v0  ;;  %v689_v14 = vadd.f32 %v593_v5, %v351_v1  ;;  %v1269_v15 = vmul.f32 %v5401_v43, %v1172_v56  ;;  %v1271_v16 = vmul.f32 %v5401_v43, %v1174_v61  ;;  %v178_v2 = vld [vmem:[#allocation7 + $0x120] sm:$0xff] }
 0x14f   :  { %v1368_v17 = vadd.f32 %v1272_v7, %v1030_v3  ;;  %v691_v18 = vadd.f32 %v595_v8, %v353_v4  ;;  %v258_v19 = vunpack.c.l.bf16 %v176_v6  ;;  %v259_v22 = vunpack.c.h.bf16 %v176_v6  ;;  %v179_v3 = vld [vmem:[#allocation7 + $0x128] sm:$0xff]  ;;  %v420_v8 = vld [vmem:[#allocation7 + $0x2a0] sm:$0xff] }
 0x150   :  { %v1027_v24 = vadd.f32 %v931_v9, %v689_v14  ;;  %v260_v25 = vunpack.c.l.bf16 %v177_v11  ;;  %v261_v29 = vunpack.c.h.bf16 %v177_v11  ;;  %v500_v30 = vunpack.c.l.bf16 %v418_v12 }
 0x151   :  { %v1430_v32 = vpack.c.bf16 %v1368_v17, %v1366_v13  ;;  %v1029_v36 = vadd.f32 %v933_v10, %v691_v18  ;;  %v356_v37 = vmul.f32 %v5386_v34, %v259_v22  ;;  %v501_v20 = vunpack.c.h.bf16 %v418_v12  ;;  %v421_v13 = vld [vmem:[#allocation7 + $0x2a8] sm:$0xff]  ;;  %v758_v18 = vld [vmem:[#allocation7 + $0x420] sm:$0xff] }
 0x152   :  { %v1365_v39 = vadd.f32 %v1269_v15, %v1027_v24  ;;  %v358_v26 = vmul.f32 %v5386_v34, %v261_v29  ;;  %v502_v40 = vunpack.c.l.bf16 %v419_v23  ;;  %v503_v41 = vunpack.c.h.bf16 %v419_v23 }
 0x153   :  { %1514 = vmatprep.subr.bf16.mxu0 %v1430_v32  ;;  %v1367_v44 = vadd.f32 %v1271_v16, %v1029_v36  ;;  %v598_v45 = vmul.f32 %v5389_v35, %v501_v20  ;;  %v838_v46 = vunpack.c.l.bf16 %v756_v31  ;;  %v839_v47 = vunpack.c.h.bf16 %v756_v31  ;;  %v1096_v36 = vld [vmem:[#allocation7 + $0x5a0] sm:$0xff] }
 0x154   :  { %v600_v48 = vmul.f32 %v5389_v35, %v503_v41  ;;  %v840_v49 = vunpack.c.l.bf16 %v757_v21  ;;  %v841_v50 = vunpack.c.h.bf16 %v757_v21  ;;  %v1176_v51 = vunpack.c.l.bf16 %v1094_v38 }
 0x155   :  { %v1429_v52 = vpack.c.bf16 %v1367_v44, %v1365_v39  ;;  %v694_v28 = vadd.f32 %v598_v45, %v356_v37  ;;  %v936_v33 = vmul.f32 %v5398_v42, %v839_v47  ;;  %v1177_v53 = vunpack.c.h.bf16 %v1094_v38  ;;  %v1097_v39 = vld [vmem:[#allocation7 + $0x5a8] sm:$0xff] }
 0x156   :  { %v696_v54 = vadd.f32 %v600_v48, %v358_v26  ;;  %v938_v55 = vmul.f32 %v5398_v42, %v841_v50  ;;  %v1178_v56 = vunpack.c.l.bf16 %v1095_v27  ;;  %v1179_v57 = vunpack.c.h.bf16 %v1095_v27 }
 0x157   :  { %1515 = vmatpush1.bf16.msra.mxu0 %v1429_v52  ;;  %v1032_v58 = vadd.f32 %v936_v33, %v694_v28  ;;  %v1274_v59 = vmul.f32 %v5401_v43, %v1177_v53  ;;  %v355_v60 = vmul.f32 %v5386_v34, %v258_v19  ;;  %v357_v61 = vmul.f32 %v5386_v34, %v260_v25  ;;  %v759_v25 = vld [vmem:[#allocation7 + $0x428] sm:$0xff] }
 0x158   :  { %v1034_v62 = vadd.f32 %v938_v55, %v696_v54  ;;  %v1276_v63 = vmul.f32 %v5401_v43, %v1179_v57  ;;  %v597_v0 = vmul.f32 %v5389_v35, %v500_v30  ;;  %v599_v1 = vmul.f32 %v5389_v35, %v502_v40 }
 0x159   :  { %v1370_v4 = vadd.f32 %v1274_v59, %v1032_v58  ;;  %v935_v5 = vmul.f32 %v5398_v42, %v838_v46  ;;  %v937_v6 = vmul.f32 %v5398_v42, %v840_v49  ;;  %v1273_v7 = vmul.f32 %v5401_v43, %v1176_v51  ;;  %v180_v58 = vld [vmem:[#allocation7 + $0x130] sm:$0xff] }
 0x15a   :  { %v1372_v9 = vadd.f32 %v1276_v63, %v1034_v62  ;;  %v693_v10 = vadd.f32 %v597_v0, %v355_v60  ;;  %v695_v11 = vadd.f32 %v599_v1, %v357_v61  ;;  %v1275_v12 = vmul.f32 %v5401_v43, %v1178_v56  ;;  %v181_v63 = vld [vmem:[#allocation7 + $0x138] sm:$0xff] }
 0x15b   :  { %v262_v14 = vunpack.c.l.bf16 %v178_v2  ;;  %v263_v15 = vunpack.c.h.bf16 %v178_v2  ;;  %v264_v16 = vunpack.c.l.bf16 %v179_v3  ;;  %v265_v17 = vunpack.c.h.bf16 %v179_v3 }
 0x15c   :  { %v1432_v19 = vpack.c.bf16 %v1372_v9, %v1370_v4  ;;  %v1031_v22 = vadd.f32 %v935_v5, %v693_v10  ;;  %v1033_v23 = vadd.f32 %v937_v6, %v695_v11  ;;  %v504_v24 = vunpack.c.l.bf16 %v420_v8  ;;  %v422_v4 = vld [vmem:[#allocation7 + $0x2b0] sm:$0xff]  ;;  %v423_v9 = vld [vmem:[#allocation7 + $0x2b8] sm:$0xff] }
 0x15d   :  { %v360_v29 = vmul.f32 %v5386_v34, %v263_v15  ;;  %v362_v30 = vmul.f32 %v5386_v34, %v265_v17  ;;  %v505_v31 = vunpack.c.h.bf16 %v420_v8  ;;  %v506_v32 = vunpack.c.l.bf16 %v421_v13 }
 0x15e   :  { %1516 = vmatprep.subr.bf16.mxu0 %v1432_v19  ;;  %v1369_v37 = vadd.f32 %v1273_v7, %v1031_v22  ;;  %v1371_v20 = vadd.f32 %v1275_v12, %v1033_v23  ;;  %v507_v21 = vunpack.c.h.bf16 %v421_v13  ;;  %v842_v38 = vunpack.c.l.bf16 %v758_v18  ;;  %v761_v19 = vld [vmem:[#allocation7 + $0x438] sm:$0xff]  ;;  %v1098_v22 = vld [vmem:[#allocation7 + $0x5b0] sm:$0xff] }
 0x15f   :  { %v602_v26 = vmul.f32 %v5389_v35, %v505_v31  ;;  %v843_v40 = vunpack.c.h.bf16 %v758_v18  ;;  %v844_v41 = vunpack.c.l.bf16 %v759_v25  ;;  %v845_v44 = vunpack.c.h.bf16 %v759_v25 }
 0x160   :  { %v1431_v45 = vpack.c.bf16 %v1371_v20, %v1369_v37  ;;  %v604_v46 = vmul.f32 %v5389_v35, %v507_v21  ;;  %v1180_v47 = vunpack.c.l.bf16 %v1096_v36  ;;  %v1181_v27 = vunpack.c.h.bf16 %v1096_v36  ;;  %v1099_v37 = vld [vmem:[#allocation7 + $0x5b8] sm:$0xff] }
 0x161   :  { %v698_v48 = vadd.f32 %v602_v26, %v360_v29  ;;  %v940_v49 = vmul.f32 %v5398_v42, %v843_v40  ;;  %v942_v50 = vmul.f32 %v5398_v42, %v845_v44  ;;  %v1182_v51 = vunpack.c.l.bf16 %v1097_v39 }
 0x162   :  { %1517 = vmatpush1.bf16.msra.mxu0 %v1431_v45  ;;  %v700_v52 = vadd.f32 %v604_v46, %v362_v30  ;;  %v1183_v28 = vunpack.c.h.bf16 %v1097_v39  ;;  %v1278_v33 = vmul.f32 %v5401_v43, %v1181_v27  ;;  %v359_v53 = vmul.f32 %v5386_v34, %v262_v14  ;;  %v760_v14 = vld [vmem:[#allocation7 + $0x430] sm:$0xff] }
 0x163   :  { %v1036_v54 = vadd.f32 %v940_v49, %v698_v48  ;;  %v361_v55 = vmul.f32 %v5386_v34, %v264_v16  ;;  %v601_v56 = vmul.f32 %v5389_v35, %v504_v24  ;;  %v603_v57 = vmul.f32 %v5389_v35, %v506_v32 }
 0x164   :  { %v1038_v59 = vadd.f32 %v942_v50, %v700_v52  ;;  %v1280_v60 = vmul.f32 %v5401_v43, %v1183_v28  ;;  %v939_v61 = vmul.f32 %v5398_v42, %v842_v38  ;;  %v941_v62 = vmul.f32 %v5398_v42, %v844_v41  ;;  %v182_v52 = vld [vmem:[#allocation7 + $0x140] sm:$0xff] }
 0x165   :  { %v1374_v0 = vadd.f32 %v1278_v33, %v1036_v54  ;;  %v697_v1 = vadd.f32 %v601_v56, %v359_v53  ;;  %v699_v2 = vadd.f32 %v603_v57, %v361_v55  ;;  %v1277_v3 = vmul.f32 %v5401_v43, %v1180_v47  ;;  %v183_v55 = vld [vmem:[#allocation7 + $0x148] sm:$0xff] }
 0x166   :  { %v1376_v5 = vadd.f32 %v1280_v60, %v1038_v59  ;;  %v1279_v6 = vmul.f32 %v5401_v43, %v1182_v51  ;;  %v266_v7 = vunpack.c.l.bf16 %v180_v58  ;;  %v267_v8 = vunpack.c.h.bf16 %v180_v58  ;;  %v424_v60 = vld [vmem:[#allocation7 + $0x2c0] sm:$0xff] }
 0x167   :  { %v1035_v10 = vadd.f32 %v939_v61, %v697_v1  ;;  %v1037_v11 = vadd.f32 %v941_v62, %v699_v2  ;;  %v268_v12 = vunpack.c.l.bf16 %v181_v63  ;;  %v269_v13 = vunpack.c.h.bf16 %v181_v63  ;;  %v425_v1 = vld [vmem:[#allocation7 + $0x2c8] sm:$0xff] }
 0x168   :  { %v1434_v15 = vpack.c.bf16 %v1376_v5, %v1374_v0  ;;  %v364_v16 = vmul.f32 %v5386_v34, %v267_v8  ;;  %v508_v17 = vunpack.c.l.bf16 %v422_v4  ;;  %v509_v18 = vunpack.c.h.bf16 %v422_v4 }
 0x169   :  { %v1373_v23 = vadd.f32 %v1277_v3, %v1035_v10  ;;  %v1375_v24 = vadd.f32 %v1279_v6, %v1037_v11  ;;  %v366_v25 = vmul.f32 %v5386_v34, %v269_v13  ;;  %v510_v29 = vunpack.c.l.bf16 %v423_v9  ;;  %v762_v10 = vld [vmem:[#allocation7 + $0x440] sm:$0xff]  ;;  %v763_v11 = vld [vmem:[#allocation7 + $0x448] sm:$0xff] }
 0x16a   :  { %1518 = vmatprep.subr.bf16.mxu0 %v1434_v15  ;;  %v511_v30 = vunpack.c.h.bf16 %v423_v9  ;;  %v606_v31 = vmul.f32 %v5389_v35, %v509_v18  ;;  %v846_v32 = vunpack.c.l.bf16 %v760_v14  ;;  %v847_v36 = vunpack.c.h.bf16 %v760_v14 }
 0x16b   :  { %v1433_v20 = vpack.c.bf16 %v1375_v24, %v1373_v23  ;;  %v848_v21 = vunpack.c.l.bf16 %v761_v19  ;;  %v849_v38 = vunpack.c.h.bf16 %v761_v19  ;;  %v1184_v39 = vunpack.c.l.bf16 %v1098_v22  ;;  %v1101_v23 = vld [vmem:[#allocation7 + $0x5c8] sm:$0xff] }
 0x16c   :  { %v608_v26 = vmul.f32 %v5389_v35, %v511_v30  ;;  %v702_v40 = vadd.f32 %v606_v31, %v364_v16  ;;  %v944_v41 = vmul.f32 %v5398_v42, %v847_v36  ;;  %v1185_v44 = vunpack.c.h.bf16 %v1098_v22  ;;  %v1100_v16 = vld [vmem:[#allocation7 + $0x5c0] sm:$0xff] }
 0x16d   :  { %1519 = vmatpush1.bf16.msra.mxu0 %v1433_v20  ;;  %v946_v45 = vmul.f32 %v5398_v42, %v849_v38  ;;  %v1186_v46 = vunpack.c.l.bf16 %v1099_v37  ;;  %v1187_v47 = vunpack.c.h.bf16 %v1099_v37  ;;  %v363_v27 = vmul.f32 %v5386_v34, %v266_v7 }
 0x16e   :  { %v704_v48 = vadd.f32 %v608_v26, %v366_v25  ;;  %v1040_v49 = vadd.f32 %v944_v41, %v702_v40  ;;  %v1282_v50 = vmul.f32 %v5401_v43, %v1185_v44  ;;  %v365_v51 = vmul.f32 %v5386_v34, %v268_v12 }
 0x16f   :  { %v1284_v28 = vmul.f32 %v5401_v43, %v1187_v47  ;;  %v605_v33 = vmul.f32 %v5389_v35, %v508_v17  ;;  %v607_v53 = vmul.f32 %v5389_v35, %v510_v29  ;;  %v943_v54 = vmul.f32 %v5398_v42, %v846_v32 }
 0x170   :  { %v1042_v56 = vadd.f32 %v946_v45, %v704_v48  ;;  %v1378_v57 = vadd.f32 %v1282_v50, %v1040_v49  ;;  %v945_v58 = vmul.f32 %v5398_v42, %v848_v21  ;;  %v1281_v59 = vmul.f32 %v5401_v43, %v1184_v39  ;;  %v184_v48 = vld [vmem:[#allocation7 + $0x150] sm:$0xff] }
 0x171   :  { %v701_v61 = vadd.f32 %v605_v33, %v363_v27  ;;  %v703_v62 = vadd.f32 %v607_v53, %v365_v51  ;;  %v1283_v63 = vmul.f32 %v5401_v43, %v1186_v46  ;;  %v270_v0 = vunpack.c.l.bf16 %v182_v52 }
 0x172   :  { %v1380_v2 = vadd.f32 %v1284_v28, %v1042_v56  ;;  %v271_v3 = vunpack.c.h.bf16 %v182_v52  ;;  %v272_v4 = vunpack.c.l.bf16 %v183_v55  ;;  %v273_v5 = vunpack.c.h.bf16 %v183_v55  ;;  %v185_v28 = vld [vmem:[#allocation7 + $0x158] sm:$0xff]  ;;  %v426_v56 = vld [vmem:[#allocation7 + $0x2d0] sm:$0xff] }
 0x173   :  { %v1039_v6 = vadd.f32 %v943_v54, %v701_v61  ;;  %v1041_v7 = vadd.f32 %v945_v58, %v703_v62  ;;  %v512_v8 = vunpack.c.l.bf16 %v424_v60  ;;  %v513_v9 = vunpack.c.h.bf16 %v424_v60  ;;  %v427_v61 = vld [vmem:[#allocation7 + $0x2d8] sm:$0xff] }
 0x174   :  { %v1436_v12 = vpack.c.bf16 %v1380_v2, %v1378_v57  ;;  %v368_v13 = vmul.f32 %v5386_v34, %v271_v3  ;;  %v370_v14 = vmul.f32 %v5386_v34, %v273_v5  ;;  %v514_v15 = vunpack.c.l.bf16 %v425_v1  ;;  %v764_v2 = vld [vmem:[#allocation7 + $0x450] sm:$0xff] }
 0x175   :  { %v1377_v17 = vadd.f32 %v1281_v59, %v1039_v6  ;;  %v1379_v18 = vadd.f32 %v1283_v63, %v1041_v7  ;;  %v515_v19 = vunpack.c.h.bf16 %v425_v1  ;;  %v610_v22 = vmul.f32 %v5389_v35, %v513_v9  ;;  %v765_v7 = vld [vmem:[#allocation7 + $0x458] sm:$0xff] }
 0x176   :  { %1520 = vmatprep.subr.bf16.mxu0 %v1436_v12  ;;  %v850_v24 = vunpack.c.l.bf16 %v762_v10  ;;  %v851_v25 = vunpack.c.h.bf16 %v762_v10  ;;  %v852_v29 = vunpack.c.l.bf16 %v763_v11  ;;  %v853_v30 = vunpack.c.h.bf16 %v763_v11 }
 0x177   :  { %v1435_v31 = vpack.c.bf16 %v1379_v18, %v1377_v17  ;;  %v612_v32 = vmul.f32 %v5389_v35, %v515_v19  ;;  %v706_v36 = vadd.f32 %v610_v22, %v368_v13  ;;  %v1188_v37 = vunpack.c.l.bf16 %v1100_v16  ;;  %v1103_v17 = vld [vmem:[#allocation7 + $0x5d8] sm:$0xff] }
 0x178   :  { %v948_v20 = vmul.f32 %v5398_v42, %v851_v25  ;;  %v950_v21 = vmul.f32 %v5398_v42, %v853_v30  ;;  %v1189_v38 = vunpack.c.h.bf16 %v1100_v16  ;;  %v1190_v39 = vunpack.c.l.bf16 %v1101_v23 }
 0x179   :  { %1521 = vmatpush1.bf16.msra.mxu0 %v1435_v31  ;;  %v708_v26 = vadd.f32 %v612_v32, %v370_v14  ;;  %v1191_v40 = vunpack.c.h.bf16 %v1101_v23  ;;  %v367_v41 = vmul.f32 %v5386_v34, %v270_v0  ;;  %v369_v44 = vmul.f32 %v5386_v34, %v272_v4 }
 0x17a   :  { %v1044_v45 = vadd.f32 %v948_v20, %v706_v36  ;;  %v1286_v46 = vmul.f32 %v5401_v43, %v1189_v38  ;;  %v609_v47 = vmul.f32 %v5389_v35, %v512_v8  ;;  %v611_v27 = vmul.f32 %v5389_v35, %v514_v15  ;;  %v1102_v8 = vld [vmem:[#allocation7 + $0x5d0] sm:$0xff] }
 0x17b   :  { %v1046_v49 = vadd.f32 %v950_v21, %v708_v26  ;;  %v1288_v50 = vmul.f32 %v5401_v43, %v1191_v40  ;;  %v947_v51 = vmul.f32 %v5398_v42, %v850_v24  ;;  %v949_v52 = vmul.f32 %v5398_v42, %v852_v29  ;;  %v186_v26 = vld [vmem:[#allocation7 + $0x160] sm:$0xff] }
 0x17c   :  { %v1382_v33 = vadd.f32 %v1286_v46, %v1044_v45  ;;  %v705_v53 = vadd.f32 %v609_v47, %v367_v41  ;;  %v707_v54 = vadd.f32 %v611_v27, %v369_v44  ;;  %v1285_v55 = vmul.f32 %v5401_v43, %v1188_v37  ;;  %v187_v46 = vld [vmem:[#allocation7 + $0x168] sm:$0xff] }
 0x17d   :  { %v1384_v57 = vadd.f32 %v1288_v50, %v1046_v49  ;;  %v1287_v58 = vmul.f32 %v5401_v43, %v1190_v39  ;;  %v274_v59 = vunpack.c.l.bf16 %v184_v48  ;;  %v275_v60 = vunpack.c.h.bf16 %v184_v48  ;;  %v428_v50 = vld [vmem:[#allocation7 + $0x2e0] sm:$0xff] }
 0x17e   :  { %v1043_v62 = vadd.f32 %v947_v51, %v705_v53  ;;  %v1045_v63 = vadd.f32 %v949_v52, %v707_v54  ;;  %v276_v0 = vunpack.c.l.bf16 %v185_v28  ;;  %v277_v1 = vunpack.c.h.bf16 %v185_v28  ;;  %v429_v53 = vld [vmem:[#allocation7 + $0x2e8] sm:$0xff] }
 0x17f   :  { %v1438_v3 = vpack.c.bf16 %v1384_v57, %v1382_v33  ;;  %v372_v4 = vmul.f32 %v5386_v34, %v275_v60  ;;  %v516_v5 = vunpack.c.l.bf16 %v426_v56  ;;  %v517_v6 = vunpack.c.h.bf16 %v426_v56 }
 0x180   :  { %v1381_v9 = vadd.f32 %v1285_v55, %v1043_v62  ;;  %v1383_v10 = vadd.f32 %v1287_v58, %v1045_v63  ;;  %v374_v11 = vmul.f32 %v5386_v34, %v277_v1  ;;  %v518_v12 = vunpack.c.l.bf16 %v427_v61  ;;  %v766_v62 = vld [vmem:[#allocation7 + $0x460] sm:$0xff]  ;;  %v767_v63 = vld [vmem:[#allocation7 + $0x468] sm:$0xff] }
 0x181   :  { %1522 = vmatprep.subr.bf16.mxu0 %v1438_v3  ;;  %v519_v13 = vunpack.c.h.bf16 %v427_v61  ;;  %v614_v14 = vmul.f32 %v5389_v35, %v517_v6  ;;  %v854_v15 = vunpack.c.l.bf16 %v764_v2  ;;  %v855_v16 = vunpack.c.h.bf16 %v764_v2 }
 0x182   :  { %v1437_v18 = vpack.c.bf16 %v1383_v10, %v1381_v9  ;;  %v856_v19 = vunpack.c.l.bf16 %v765_v7  ;;  %v857_v22 = vunpack.c.h.bf16 %v765_v7  ;;  %v1192_v23 = vunpack.c.l.bf16 %v1102_v8  ;;  %v1105_v9 = vld [vmem:[#allocation7 + $0x5e8] sm:$0xff] }
 0x183   :  { %v616_v24 = vmul.f32 %v5389_v35, %v519_v13  ;;  %v710_v25 = vadd.f32 %v614_v14, %v372_v4  ;;  %v952_v29 = vmul.f32 %v5398_v42, %v855_v16  ;;  %v1193_v30 = vunpack.c.h.bf16 %v1102_v8  ;;  %v1104_v4 = vld [vmem:[#allocation7 + $0x5e0] sm:$0xff] }
 0x184   :  { %1523 = vmatpush1.bf16.msra.mxu0 %v1437_v18  ;;  %v954_v31 = vmul.f32 %v5398_v42, %v857_v22  ;;  %v1194_v32 = vunpack.c.l.bf16 %v1103_v17  ;;  %v1195_v36 = vunpack.c.h.bf16 %v1103_v17  ;;  %v371_v37 = vmul.f32 %v5386_v34, %v274_v59 }
 0x185   :  { %v712_v20 = vadd.f32 %v616_v24, %v374_v11  ;;  %v1048_v21 = vadd.f32 %v952_v29, %v710_v25  ;;  %v1290_v38 = vmul.f32 %v5401_v43, %v1193_v30  ;;  %v373_v39 = vmul.f32 %v5386_v34, %v276_v0 }
 0x186   :  { %v1292_v40 = vmul.f32 %v5401_v43, %v1195_v36  ;;  %v613_v41 = vmul.f32 %v5389_v35, %v516_v5  ;;  %v615_v44 = vmul.f32 %v5389_v35, %v518_v12  ;;  %v951_v45 = vmul.f32 %v5398_v42, %v854_v15 }
 0x187   :  { %v1050_v47 = vadd.f32 %v954_v31, %v712_v20  ;;  %v1386_v27 = vadd.f32 %v1290_v38, %v1048_v21  ;;  %v953_v48 = vmul.f32 %v5398_v42, %v856_v19  ;;  %v1289_v49 = vmul.f32 %v5401_v43, %v1192_v23  ;;  %v188_v20 = vld [vmem:[#allocation7 + $0x170] sm:$0xff] }
 0x188   :  { %v709_v51 = vadd.f32 %v613_v41, %v371_v37  ;;  %v711_v52 = vadd.f32 %v615_v44, %v373_v39  ;;  %v1291_v28 = vmul.f32 %v5401_v43, %v1194_v32  ;;  %v278_v33 = vunpack.c.l.bf16 %v186_v26 }
 0x189   :  { %v1388_v54 = vadd.f32 %v1292_v40, %v1050_v47  ;;  %v279_v55 = vunpack.c.h.bf16 %v186_v26  ;;  %v280_v56 = vunpack.c.l.bf16 %v187_v46  ;;  %v281_v57 = vunpack.c.h.bf16 %v187_v46  ;;  %v189_v40 = vld [vmem:[#allocation7 + $0x178] sm:$0xff]  ;;  %v430_v47 = vld [vmem:[#allocation7 + $0x2f0] sm:$0xff] }
 0x18a   :  { %v1047_v58 = vadd.f32 %v951_v45, %v709_v51  ;;  %v1049_v59 = vadd.f32 %v953_v48, %v711_v52  ;;  %v520_v60 = vunpack.c.l.bf16 %v428_v50  ;;  %v521_v61 = vunpack.c.h.bf16 %v428_v50  ;;  %v431_v51 = vld [vmem:[#allocation7 + $0x2f8] sm:$0xff] }
 0x18b   :  { %v1440_v0 = vpack.c.bf16 %v1388_v54, %v1386_v27  ;;  %v376_v1 = vmul.f32 %v5386_v34, %v279_v55  ;;  %v378_v2 = vmul.f32 %v5386_v34, %v281_v57  ;;  %v522_v3 = vunpack.c.l.bf16 %v429_v53  ;;  %v768_v54 = vld [vmem:[#allocation7 + $0x470] sm:$0xff] }
 0x18c   :  { %v1385_v5 = vadd.f32 %v1289_v49, %v1047_v58  ;;  %v1387_v6 = vadd.f32 %v1291_v28, %v1049_v59  ;;  %v523_v7 = vunpack.c.h.bf16 %v429_v53  ;;  %v618_v8 = vmul.f32 %v5389_v35, %v521_v61  ;;  %v769_v59 = vld [vmem:[#allocation7 + $0x478] sm:$0xff] }
 0x18d   :  { %1524 = vmatprep.subr.bf16.mxu0 %v1440_v0  ;;  %v858_v10 = vunpack.c.l.bf16 %v766_v62  ;;  %v859_v11 = vunpack.c.h.bf16 %v766_v62  ;;  %v860_v12 = vunpack.c.l.bf16 %v767_v63  ;;  %v861_v13 = vunpack.c.h.bf16 %v767_v63 }
 0x18e   :  { %v1439_v14 = vpack.c.bf16 %v1387_v6, %v1385_v5  ;;  %v620_v15 = vmul.f32 %v5389_v35, %v523_v7  ;;  %v714_v16 = vadd.f32 %v618_v8, %v376_v1  ;;  %v1196_v17 = vunpack.c.l.bf16 %v1104_v4  ;;  %v1107_v5 = vld [vmem:[#allocation7 + $0x5f8] sm:$0xff] }
 0x18f   :  { %v956_v18 = vmul.f32 %v5398_v42, %v859_v11  ;;  %v958_v19 = vmul.f32 %v5398_v42, %v861_v13  ;;  %v1197_v22 = vunpack.c.h.bf16 %v1104_v4  ;;  %v1198_v23 = vunpack.c.l.bf16 %v1105_v9 }
 0x190   :  { %1525 = vmatpush1.bf16.msra.mxu0 %v1439_v14  ;;  %v716_v24 = vadd.f32 %v620_v15, %v378_v2  ;;  %v1199_v25 = vunpack.c.h.bf16 %v1105_v9  ;;  %v375_v29 = vmul.f32 %v5386_v34, %v278_v33  ;;  %v377_v30 = vmul.f32 %v5386_v34, %v280_v56 }
 0x191   :  { %v1052_v31 = vadd.f32 %v956_v18, %v714_v16  ;;  %v1294_v32 = vmul.f32 %v5401_v43, %v1197_v22  ;;  %v617_v36 = vmul.f32 %v5389_v35, %v520_v60  ;;  %v619_v37 = vmul.f32 %v5389_v35, %v522_v3  ;;  %v1106_v60 = vld [vmem:[#allocation7 + $0x5f0] sm:$0xff] }
 0x192   :  { %v1054_v21 = vadd.f32 %v958_v19, %v716_v24  ;;  %v1296_v38 = vmul.f32 %v5401_v43, %v1199_v25  ;;  %v955_v39 = vmul.f32 %v5398_v42, %v858_v10  ;;  %v957_v26 = vmul.f32 %v5398_v42, %v860_v12 }
 0x193   :  { %v1390_v41 = vadd.f32 %v1294_v32, %v1052_v31  ;;  %v713_v44 = vadd.f32 %v617_v36, %v375_v29  ;;  %v715_v45 = vadd.f32 %v619_v37, %v377_v30  ;;  %v1293_v46 = vmul.f32 %v5401_v43, %v1196_v17  ;;  %v5786_v31 = vld [vmem:[#allocation6 + $0x10] sm:$0xff]  ;;  %v1567_v32 = vld [vmem:[#allocation10] sm:$0xff]  ;;  %v1568_v36 = vld [vmem:[#allocation10 + $0x8] sm:$0xff] }
 0x194   :  { %v1392_v27 = vadd.f32 %v1296_v38, %v1054_v21  ;;  %v1295_v48 = vmul.f32 %v5401_v43, %v1198_v23  ;;  %v282_v49 = vunpack.c.l.bf16 %v188_v20  ;;  %v283_v50 = vunpack.c.h.bf16 %v188_v20 }
 0x195   :  { %v1051_v52 = vadd.f32 %v955_v39, %v713_v44  ;;  %v1053_v28 = vadd.f32 %v957_v26, %v715_v45  ;;  %v284_v33 = vunpack.c.l.bf16 %v189_v40  ;;  %v285_v53 = vunpack.c.h.bf16 %v189_v40  ;;  %v1728_v39 = vld [vmem:[#allocation10 + $0x100] sm:$0xff]  ;;  %v1729_v26 = vld [vmem:[#allocation10 + $0x108] sm:$0xff] }
 0x196   :  { %v1442_v55 = vpack.c.bf16 %v1392_v27, %v1390_v41  ;;  %v380_v56 = vmul.f32 %v5386_v34, %v283_v50  ;;  %v524_v57 = vunpack.c.l.bf16 %v430_v47  ;;  %v525_v58 = vunpack.c.h.bf16 %v430_v47  ;;  %v1953_v45 = vld [vmem:[#allocation10 + $0x200] sm:$0xff] }
 0x197   :  { %v1389_v61 = vadd.f32 %v1293_v46, %v1051_v52  ;;  %v1391_v62 = vadd.f32 %v1295_v48, %v1053_v28  ;;  %v382_v63 = vmul.f32 %v5386_v34, %v285_v53  ;;  %v526_v0 = vunpack.c.l.bf16 %v431_v51  ;;  %v2178_v53 = vld [vmem:[#allocation10 + $0x300] sm:$0xff] }
 0x198   :  { %1526 = vmatprep.subr.bf16.mxu0 %v1442_v55  ;;  %v527_v1 = vunpack.c.h.bf16 %v431_v51  ;;  %v622_v2 = vmul.f32 %v5389_v35, %v525_v58  ;;  %v862_v3 = vunpack.c.l.bf16 %v768_v54  ;;  %v863_v4 = vunpack.c.h.bf16 %v768_v54  ;;  %v2179_v54 = vld [vmem:[#allocation10 + $0x308] sm:$0xff] }
 0x199   :  { %v1441_v6 = vpack.c.bf16 %v1391_v62, %v1389_v61  ;;  %v864_v7 = vunpack.c.l.bf16 %v769_v59  ;;  %v865_v8 = vunpack.c.h.bf16 %v769_v59  ;;  %v1200_v9 = vunpack.c.l.bf16 %v1106_v60 }
 0x19a   :  { %v624_v10 = vmul.f32 %v5389_v35, %v527_v1  ;;  %v718_v11 = vadd.f32 %v622_v2, %v380_v56  ;;  %v960_v12 = vmul.f32 %v5398_v42, %v863_v4  ;;  %v1201_v13 = vunpack.c.h.bf16 %v1106_v60 }
 0x19b   :  { %1527 = vmatpush1.bf16.msra.mxu0 %v1441_v6  ;;  %v962_v14 = vmul.f32 %v5398_v42, %v865_v8  ;;  %v1202_v15 = vunpack.c.l.bf16 %v1107_v5  ;;  %v1203_v16 = vunpack.c.h.bf16 %v1107_v5  ;;  %v379_v17 = vmul.f32 %v5386_v34, %v282_v49 }
 0x19c   :  { %v720_v18 = vadd.f32 %v624_v10, %v382_v63  ;;  %v1056_v19 = vadd.f32 %v960_v12, %v718_v11  ;;  %v1298_v22 = vmul.f32 %v5401_v43, %v1201_v13  ;;  %v381_v23 = vmul.f32 %v5386_v34, %v284_v33  ;;  %v1954_v33 = vld [vmem:[#allocation10 + $0x208] sm:$0xff] }
 0x19d   :  { %v1300_v24 = vmul.f32 %v5401_v43, %v1203_v16  ;;  %v621_v25 = vmul.f32 %v5389_v35, %v524_v57  ;;  %v623_v29 = vmul.f32 %v5389_v35, %v526_v0  ;;  %v959_v30 = vmul.f32 %v5398_v42, %v862_v3 }
 0x19e   :  { %v1058_v37 = vadd.f32 %v962_v14, %v720_v18  ;;  %v1394_v20 = vadd.f32 %v1298_v22, %v1056_v19  ;;  %v961_v21 = vmul.f32 %v5398_v42, %v864_v7  ;;  %v1297_v38 = vmul.f32 %v5401_v43, %v1200_v9  ;;  %v1569_v19 = vld [vmem:[#allocation10 + $0x10] sm:$0xff] }
 0x19f   :  { %v717_v40 = vadd.f32 %v621_v25, %v379_v17  ;;  %v719_v41 = vadd.f32 %v623_v29, %v381_v23  ;;  %v1299_v44 = vmul.f32 %v5401_v43, %v1202_v15  ;;  %v5204_v47 = vmov 0   ;;  %v1570_v29 = vld [vmem:[#allocation10 + $0x18] sm:$0xff] }
 0x1a0   :  { %v1396_v46 = vadd.f32 %v1300_v24, %v1058_v37  ;;  %1546 = vmatprep.mubr.bf16.mxu0 %v5204_v47  ;;  %v1461_v27 = vpack.c.bf16 %v5786_v31, %v5786_v31  ;;  %v1600_v48 = vunpack.c.h.bf16 %v1567_v32  ;;  %v1602_v49 = vunpack.c.h.bf16 %v1568_v36 }
 0x1a1   :  { %v1055_v50 = vadd.f32 %v959_v30, %v717_v40  ;;  %v1057_v51 = vadd.f32 %v961_v21, %v719_v41  ;;  %v1761_v52 = vunpack.c.h.bf16 %v1728_v39  ;;  %v1763_v28 = vunpack.c.h.bf16 %v1729_v26  ;;  %v1730_v30 = vld [vmem:[#allocation10 + $0x110] sm:$0xff]  ;;  %v1956_v41 = vld [vmem:[#allocation10 + $0x218] sm:$0xff] }
 0x1a2   :  { %v1444_v55 = vpack.c.bf16 %v1396_v46, %v1394_v20  ;;  %v1664_v56 = vmul.f32 %v1600_v48, %v5386_v34  ;;  %v1666_v57 = vmul.f32 %v1602_v49, %v5386_v34  ;;  %v1986_v58 = vunpack.c.h.bf16 %v1953_v45  ;;  %v1731_v20 = vld [vmem:[#allocation10 + $0x118] sm:$0xff]  ;;  %v1955_v40 = vld [vmem:[#allocation10 + $0x210] sm:$0xff] }
 0x1a3   :  { %v1393_v59 = vadd.f32 %v1297_v38, %v1055_v50  ;;  %v1395_v60 = vadd.f32 %v1299_v44, %v1057_v51  ;;  %v1825_v61 = vmul.f32 %v1761_v52, %v5389_v35  ;;  %v1827_v62 = vmul.f32 %v1763_v28, %v5389_v35  ;;  %v2181_v52 = vld [vmem:[#allocation10 + $0x318] sm:$0xff] }
 0x1a4   :  { %1528 = vmatprep.subr.bf16.mxu0 %v1444_v55  ;;  %v1988_v63 = vunpack.c.h.bf16 %v1954_v33  ;;  %v2050_v0 = vmul.f32 %v1986_v58, %v5398_v42  ;;  %v2211_v1 = vunpack.c.h.bf16 %v2178_v53  ;;  %v2213_v2 = vunpack.c.h.bf16 %v2179_v54 }
 0x1a5   :  { %v1443_v3 = vpack.c.bf16 %v1395_v60, %v1393_v59  ;;  %v1889_v4 = vadd.f32 %v1825_v61, %v1664_v56  ;;  %v1891_v5 = vadd.f32 %v1827_v62, %v1666_v57  ;;  %v1599_v6 = vunpack.c.l.bf16 %v1567_v32 }
 0x1a6   :  { %v2052_v7 = vmul.f32 %v1988_v63, %v5398_v42  ;;  %v2275_v8 = vmul.f32 %v2211_v1, %v5401_v43  ;;  %v2277_v9 = vmul.f32 %v2213_v2, %v5401_v43  ;;  %v1601_v10 = vunpack.c.l.bf16 %v1568_v36 }
 0x1a7   :  { %1529 = vmatpush1.bf16.msra.mxu0 %v1443_v3  ;;  %v2114_v11 = vadd.f32 %v2050_v0, %v1889_v4  ;;  %v1663_v12 = vmul.f32 %v1599_v6, %v5386_v34  ;;  %v1760_v13 = vunpack.c.l.bf16 %v1728_v39  ;;  %v1762_v14 = vunpack.c.l.bf16 %v1729_v26 }
 0x1a8   :  { %v2116_v15 = vadd.f32 %v2052_v7, %v1891_v5  ;;  %v1665_v16 = vmul.f32 %v1601_v10, %v5386_v34  ;;  %v1985_v17 = vunpack.c.l.bf16 %v1953_v45  ;;  %v1987_v18 = vunpack.c.l.bf16 %v1954_v33 }
 0x1a9   :  { %v2339_v22 = vadd.f32 %v2275_v8, %v2114_v11  ;;  %v1824_v23 = vmul.f32 %v1760_v13, %v5389_v35  ;;  %v1826_v24 = vmul.f32 %v1762_v14, %v5389_v35  ;;  %v2210_v25 = vunpack.c.l.bf16 %v2178_v53  ;;  %v1571_v11 = vld [vmem:[#allocation10 + $0x20] sm:$0xff] }
 0x1aa   :  { %1547 = vmatmul.mubr.bf16.vlgmr.msra.gmra.mrb[0].mxu0 %v1461_v27  ;;  %v2341_v31 = vadd.f32 %v2277_v9, %v2116_v15  ;;  %v2049_v32 = vmul.f32 %v1985_v17, %v5398_v42  ;;  %v2051_v36 = vmul.f32 %v1987_v18, %v5398_v42  ;;  %v2212_v37 = vunpack.c.l.bf16 %v2179_v54  ;;  %v2180_v27 = vld [vmem:[#allocation10 + $0x310] sm:$0xff] }
 0x1ab   :  { %v1888_v21 = vadd.f32 %v1824_v23, %v1663_v12  ;;  %v1890_v38 = vadd.f32 %v1826_v24, %v1665_v16  ;;  %v2274_v39 = vmul.f32 %v2210_v25, %v5401_v43  ;;  %v1604_v26 = vunpack.c.h.bf16 %v1569_v19  ;;  %v1572_v16 = vld [vmem:[#allocation10 + $0x28] sm:$0xff]  ;;  %v1732_v23 = vld [vmem:[#allocation10 + $0x120] sm:$0xff] }
 0x1ac   :  { %v2403_v44 = vpack.c.bf16 %v2341_v31, %v2339_v22  ;;  %v2276_v45 = vmul.f32 %v2212_v37, %v5401_v43  ;;  %v1606_v46 = vunpack.c.h.bf16 %v1570_v29  ;;  %v1765_v47 = vunpack.c.h.bf16 %v1730_v30  ;;  %v1733_v31 = vld [vmem:[#allocation10 + $0x128] sm:$0xff] }
 0x1ad   :  { %v2113_v48 = vadd.f32 %v2049_v32, %v1888_v21  ;;  %v2115_v49 = vadd.f32 %v2051_v36, %v1890_v38  ;;  %v1668_v50 = vmul.f32 %v1604_v26, %v5386_v34  ;;  %v1767_v51 = vunpack.c.h.bf16 %v1731_v20  ;;  %v1957_v32 = vld [vmem:[#allocation10 + $0x220] sm:$0xff]  ;;  %v1958_v38 = vld [vmem:[#allocation10 + $0x228] sm:$0xff] }
 0x1ae   :  { %2461 = vmatprep.subr.bf16.mxu1 %v2403_v44  ;;  %v1670_v28 = vmul.f32 %v1606_v46, %v5386_v34  ;;  %v1829_v33 = vmul.f32 %v1765_v47, %v5389_v35  ;;  %v1990_v53 = vunpack.c.h.bf16 %v1955_v40  ;;  %v1992_v54 = vunpack.c.h.bf16 %v1956_v41 }
 0x1af   :  { %v2338_v55 = vadd.f32 %v2274_v39, %v2113_v48  ;;  %v2340_v56 = vadd.f32 %v2276_v45, %v2115_v49  ;;  %v1831_v57 = vmul.f32 %v1767_v51, %v5389_v35  ;;  %v2215_v58 = vunpack.c.h.bf16 %v2180_v27  ;;  %v2182_v39 = vld [vmem:[#allocation10 + $0x320] sm:$0xff]  ;;  %v2183_v45 = vld [vmem:[#allocation10 + $0x328] sm:$0xff] }
 0x1b0   :  { %v1893_v59 = vadd.f32 %v1829_v33, %v1668_v50  ;;  %v2054_v60 = vmul.f32 %v1990_v53, %v5398_v42  ;;  %v2056_v61 = vmul.f32 %v1992_v54, %v5398_v42  ;;  %v2217_v62 = vunpack.c.h.bf16 %v2181_v52 }
 0x1b1   :  { %v2402_v63 = vpack.c.bf16 %v2340_v56, %v2338_v55  ;;  %v1895_v0 = vadd.f32 %v1831_v57, %v1670_v28  ;;  %v2279_v1 = vmul.f32 %v2215_v58, %v5401_v43  ;;  %v1603_v2 = vunpack.c.l.bf16 %v1569_v19 }
 0x1b2   :  { %v2118_v3 = vadd.f32 %v2054_v60, %v1893_v59  ;;  %v2281_v4 = vmul.f32 %v2217_v62, %v5401_v43  ;;  %v1605_v5 = vunpack.c.l.bf16 %v1570_v29  ;;  %v1764_v6 = vunpack.c.l.bf16 %v1730_v30 }
 0x1b3   :  { %2462 = vmatpush1.bf16.msra.mxu1 %v2402_v63  ;;  %v2120_v7 = vadd.f32 %v2056_v61, %v1895_v0  ;;  %v1667_v8 = vmul.f32 %v1603_v2, %v5386_v34  ;;  %v1766_v9 = vunpack.c.l.bf16 %v1731_v20  ;;  %v1989_v10 = vunpack.c.l.bf16 %v1955_v40 }
 0x1b4   :  { %v2343_v12 = vadd.f32 %v2279_v1, %v2118_v3  ;;  %v1669_v13 = vmul.f32 %v1605_v5, %v5386_v34  ;;  %v1828_v14 = vmul.f32 %v1764_v6, %v5389_v35  ;;  %v1991_v15 = vunpack.c.l.bf16 %v1956_v41 }
 0x1b5   :  { %v2345_v17 = vadd.f32 %v2281_v4, %v2120_v7  ;;  %v1830_v18 = vmul.f32 %v1766_v9, %v5389_v35  ;;  %v2053_v19 = vmul.f32 %v1989_v10, %v5398_v42  ;;  %v2214_v22 = vunpack.c.l.bf16 %v2180_v27  ;;  %v1573_v7 = vld [vmem:[#allocation10 + $0x30] sm:$0xff] }
 0x1b6   :  { %v1892_v24 = vadd.f32 %v1828_v14, %v1667_v8  ;;  %v2055_v25 = vmul.f32 %v1991_v15, %v5398_v42  ;;  %v2216_v29 = vunpack.c.l.bf16 %v2181_v52  ;;  %v1608_v30 = vunpack.c.h.bf16 %v1571_v11 }
 0x1b7   :  { %v2405_v36 = vpack.c.bf16 %v2345_v17, %v2343_v12  ;;  %v1894_v37 = vadd.f32 %v1830_v18, %v1669_v13  ;;  %v2278_v20 = vmul.f32 %v2214_v22, %v5401_v43  ;;  %v1610_v21 = vunpack.c.h.bf16 %v1572_v16  ;;  %v1574_v12 = vld [vmem:[#allocation10 + $0x38] sm:$0xff]  ;;  %v1734_v13 = vld [vmem:[#allocation10 + $0x130] sm:$0xff] }
 0x1b8   :  { %v2117_v26 = vadd.f32 %v2053_v19, %v1892_v24  ;;  %v2280_v40 = vmul.f32 %v2216_v29, %v5401_v43  ;;  %v1672_v41 = vmul.f32 %v1608_v30, %v5386_v34  ;;  %v1769_v44 = vunpack.c.h.bf16 %v1732_v23  ;;  %v1735_v18 = vld [vmem:[#allocation10 + $0x138] sm:$0xff] }
 0x1b9   :  { %2463 = vmatprep.subr.bf16.mxu1 %v2405_v36  ;;  %v2119_v46 = vadd.f32 %v2055_v25, %v1894_v37  ;;  %v1674_v47 = vmul.f32 %v1610_v21, %v5386_v34  ;;  %v1771_v27 = vunpack.c.h.bf16 %v1733_v31  ;;  %v1994_v48 = vunpack.c.h.bf16 %v1957_v32  ;;  %v1959_v25 = vld [vmem:[#allocation10 + $0x230] sm:$0xff]  ;;  %v1960_v29 = vld [vmem:[#allocation10 + $0x238] sm:$0xff] }
 0x1ba   :  { %v2342_v49 = vadd.f32 %v2278_v20, %v2117_v26  ;;  %v1833_v50 = vmul.f32 %v1769_v44, %v5389_v35  ;;  %v1996_v51 = vunpack.c.h.bf16 %v1958_v38  ;;  %v2219_v52 = vunpack.c.h.bf16 %v2182_v39  ;;  %v2184_v37 = vld [vmem:[#allocation10 + $0x330] sm:$0xff]  ;;  %v2185_v26 = vld [vmem:[#allocation10 + $0x338] sm:$0xff] }
 0x1bb   :  { %v2344_v28 = vadd.f32 %v2280_v40, %v2119_v46  ;;  %v1835_v33 = vmul.f32 %v1771_v27, %v5389_v35  ;;  %v2058_v53 = vmul.f32 %v1994_v48, %v5398_v42  ;;  %v2221_v54 = vunpack.c.h.bf16 %v2183_v45 }
 0x1bc   :  { %v1897_v55 = vadd.f32 %v1833_v50, %v1672_v41  ;;  %v2060_v56 = vmul.f32 %v1996_v51, %v5398_v42  ;;  %v2283_v57 = vmul.f32 %v2219_v52, %v5401_v43  ;;  %v1607_v58 = vunpack.c.l.bf16 %v1571_v11 }
 0x1bd   :  { %v2404_v59 = vpack.c.bf16 %v2344_v28, %v2342_v49  ;;  %v1899_v60 = vadd.f32 %v1835_v33, %v1674_v47  ;;  %v2285_v61 = vmul.f32 %v2221_v54, %v5401_v43  ;;  %v1609_v62 = vunpack.c.l.bf16 %v1572_v16 }
 0x1be   :  { %v2122_v63 = vadd.f32 %v2058_v53, %v1897_v55  ;;  %v1671_v0 = vmul.f32 %v1607_v58, %v5386_v34  ;;  %v1768_v1 = vunpack.c.l.bf16 %v1732_v23  ;;  %v1770_v2 = vunpack.c.l.bf16 %v1733_v31 }
 0x1bf   :  { %2464 = vmatpush1.bf16.msra.mxu1 %v2404_v59  ;;  %v2124_v3 = vadd.f32 %v2060_v56, %v1899_v60  ;;  %v1673_v4 = vmul.f32 %v1609_v62, %v5386_v34  ;;  %v1993_v5 = vunpack.c.l.bf16 %v1957_v32  ;;  %v1995_v6 = vunpack.c.l.bf16 %v1958_v38 }
 0x1c0   :  { %v2347_v8 = vadd.f32 %v2283_v57, %v2122_v63  ;;  %v1832_v9 = vmul.f32 %v1768_v1, %v5389_v35  ;;  %v1834_v10 = vmul.f32 %v1770_v2, %v5389_v35  ;;  %v2218_v11 = vunpack.c.l.bf16 %v2182_v39  ;;  %v1575_v63 = vld [vmem:[#allocation10 + $0x40] sm:$0xff] }
 0x1c1   :  { %v2349_v14 = vadd.f32 %v2285_v61, %v2124_v3  ;;  %v2057_v15 = vmul.f32 %v1993_v5, %v5398_v42  ;;  %v2059_v16 = vmul.f32 %v1995_v6, %v5398_v42  ;;  %v2220_v17 = vunpack.c.l.bf16 %v2183_v45 }
 0x1c2   :  { %v1896_v19 = vadd.f32 %v1832_v9, %v1671_v0  ;;  %v1898_v22 = vadd.f32 %v1834_v10, %v1673_v4  ;;  %v2282_v23 = vmul.f32 %v2218_v11, %v5401_v43  ;;  %v1612_v24 = vunpack.c.h.bf16 %v1573_v7  ;;  %v1576_v4 = vld [vmem:[#allocation10 + $0x48] sm:$0xff]  ;;  %v1736_v9 = vld [vmem:[#allocation10 + $0x140] sm:$0xff] }
 0x1c3   :  { %v2407_v30 = vpack.c.bf16 %v2349_v14, %v2347_v8  ;;  %v2284_v31 = vmul.f32 %v2220_v17, %v5401_v43  ;;  %v1614_v32 = vunpack.c.h.bf16 %v1574_v12  ;;  %v1773_v36 = vunpack.c.h.bf16 %v1734_v13  ;;  %v1737_v14 = vld [vmem:[#allocation10 + $0x148] sm:$0xff] }
 0x1c4   :  { %v2121_v20 = vadd.f32 %v2057_v15, %v1896_v19  ;;  %v2123_v21 = vadd.f32 %v2059_v16, %v1898_v22  ;;  %v1676_v38 = vmul.f32 %v1612_v24, %v5386_v34  ;;  %v1775_v39 = vunpack.c.h.bf16 %v1735_v18  ;;  %v1961_v15 = vld [vmem:[#allocation10 + $0x240] sm:$0xff]  ;;  %v1962_v22 = vld [vmem:[#allocation10 + $0x248] sm:$0xff] }
 0x1c5   :  { %2465 = vmatprep.subr.bf16.mxu1 %v2407_v30  ;;  %v1678_v40 = vmul.f32 %v1614_v32, %v5386_v34  ;;  %v1837_v41 = vmul.f32 %v1773_v36, %v5389_v35  ;;  %v1998_v44 = vunpack.c.h.bf16 %v1959_v25  ;;  %v2000_v45 = vunpack.c.h.bf16 %v1960_v29 }
 0x1c6   :  { %v2346_v46 = vadd.f32 %v2282_v23, %v2121_v20  ;;  %v2348_v47 = vadd.f32 %v2284_v31, %v2123_v21  ;;  %v1839_v27 = vmul.f32 %v1775_v39, %v5389_v35  ;;  %v2223_v48 = vunpack.c.h.bf16 %v2184_v37  ;;  %v2186_v23 = vld [vmem:[#allocation10 + $0x340] sm:$0xff]  ;;  %v2187_v31 = vld [vmem:[#allocation10 + $0x348] sm:$0xff] }
 0x1c7   :  { %v1901_v49 = vadd.f32 %v1837_v41, %v1676_v38  ;;  %v2062_v50 = vmul.f32 %v1998_v44, %v5398_v42  ;;  %v2064_v51 = vmul.f32 %v2000_v45, %v5398_v42  ;;  %v2225_v52 = vunpack.c.h.bf16 %v2185_v26 }
 0x1c8   :  { %v2406_v28 = vpack.c.bf16 %v2348_v47, %v2346_v46  ;;  %v1903_v33 = vadd.f32 %v1839_v27, %v1678_v40  ;;  %v2287_v53 = vmul.f32 %v2223_v48, %v5401_v43  ;;  %v1611_v54 = vunpack.c.l.bf16 %v1573_v7 }
 0x1c9   :  { %v2126_v55 = vadd.f32 %v2062_v50, %v1901_v49  ;;  %v2289_v56 = vmul.f32 %v2225_v52, %v5401_v43  ;;  %v1613_v57 = vunpack.c.l.bf16 %v1574_v12  ;;  %v1772_v58 = vunpack.c.l.bf16 %v1734_v13 }
 0x1ca   :  { %2466 = vmatpush1.bf16.msra.mxu1 %v2406_v28  ;;  %v2128_v59 = vadd.f32 %v2064_v51, %v1903_v33  ;;  %v1675_v60 = vmul.f32 %v1611_v54, %v5386_v34  ;;  %v1774_v61 = vunpack.c.l.bf16 %v1735_v18  ;;  %v1997_v62 = vunpack.c.l.bf16 %v1959_v25 }
 0x1cb   :  { %v2351_v0 = vadd.f32 %v2287_v53, %v2126_v55  ;;  %v1677_v1 = vmul.f32 %v1613_v57, %v5386_v34  ;;  %v1836_v2 = vmul.f32 %v1772_v58, %v5389_v35  ;;  %v1999_v3 = vunpack.c.l.bf16 %v1960_v29 }
 0x1cc   :  { %v2353_v5 = vadd.f32 %v2289_v56, %v2128_v59  ;;  %v1838_v6 = vmul.f32 %v1774_v61, %v5389_v35  ;;  %v2061_v7 = vmul.f32 %v1997_v62, %v5398_v42  ;;  %v2222_v8 = vunpack.c.l.bf16 %v2184_v37  ;;  %v1577_v59 = vld [vmem:[#allocation10 + $0x50] sm:$0xff] }
 0x1cd   :  { %v1900_v10 = vadd.f32 %v1836_v2, %v1675_v60  ;;  %v2063_v11 = vmul.f32 %v1999_v3, %v5398_v42  ;;  %v2224_v12 = vunpack.c.l.bf16 %v2185_v26  ;;  %v1616_v13 = vunpack.c.h.bf16 %v1575_v63 }
 0x1ce   :  { %v2409_v16 = vpack.c.bf16 %v2353_v5, %v2351_v0  ;;  %v1902_v17 = vadd.f32 %v1838_v6, %v1677_v1  ;;  %v2286_v18 = vmul.f32 %v2222_v8, %v5401_v43  ;;  %v1618_v19 = vunpack.c.h.bf16 %v1576_v4  ;;  %v1578_v0 = vld [vmem:[#allocation10 + $0x58] sm:$0xff]  ;;  %v1738_v1 = vld [vmem:[#allocation10 + $0x150] sm:$0xff] }
 0x1cf   :  { %v2125_v24 = vadd.f32 %v2061_v7, %v1900_v10  ;;  %v2288_v25 = vmul.f32 %v2224_v12, %v5401_v43  ;;  %v1680_v29 = vmul.f32 %v1616_v13, %v5386_v34  ;;  %v1777_v30 = vunpack.c.h.bf16 %v1736_v9  ;;  %v1739_v6 = vld [vmem:[#allocation10 + $0x158] sm:$0xff] }
 0x1d0   :  { %2467 = vmatprep.subr.bf16.mxu1 %v2409_v16  ;;  %v2127_v32 = vadd.f32 %v2063_v11, %v1902_v17  ;;  %v1682_v36 = vmul.f32 %v1618_v19, %v5386_v34  ;;  %v1779_v37 = vunpack.c.h.bf16 %v1737_v14  ;;  %v2002_v20 = vunpack.c.h.bf16 %v1961_v15  ;;  %v1963_v11 = vld [vmem:[#allocation10 + $0x250] sm:$0xff]  ;;  %v1964_v12 = vld [vmem:[#allocation10 + $0x258] sm:$0xff] }
 0x1d1   :  { %v2350_v21 = vadd.f32 %v2286_v18, %v2125_v24  ;;  %v1841_v38 = vmul.f32 %v1777_v30, %v5389_v35  ;;  %v2004_v39 = vunpack.c.h.bf16 %v1962_v22  ;;  %v2227_v26 = vunpack.c.h.bf16 %v2186_v23  ;;  %v2188_v17 = vld [vmem:[#allocation10 + $0x350] sm:$0xff]  ;;  %v2189_v24 = vld [vmem:[#allocation10 + $0x358] sm:$0xff] }
 0x1d2   :  { %v2352_v40 = vadd.f32 %v2288_v25, %v2127_v32  ;;  %v1843_v41 = vmul.f32 %v1779_v37, %v5389_v35  ;;  %v2066_v44 = vmul.f32 %v2002_v20, %v5398_v42  ;;  %v2229_v45 = vunpack.c.h.bf16 %v2187_v31 }
 0x1d3   :  { %v1905_v46 = vadd.f32 %v1841_v38, %v1680_v29  ;;  %v2068_v47 = vmul.f32 %v2004_v39, %v5398_v42  ;;  %v2291_v27 = vmul.f32 %v2227_v26, %v5401_v43  ;;  %v1615_v48 = vunpack.c.l.bf16 %v1575_v63 }
 0x1d4   :  { %v2408_v49 = vpack.c.bf16 %v2352_v40, %v2350_v21  ;;  %v1907_v50 = vadd.f32 %v1843_v41, %v1682_v36  ;;  %v2293_v51 = vmul.f32 %v2229_v45, %v5401_v43  ;;  %v1617_v52 = vunpack.c.l.bf16 %v1576_v4 }
 0x1d5   :  { %v2130_v28 = vadd.f32 %v2066_v44, %v1905_v46  ;;  %v1679_v33 = vmul.f32 %v1615_v48, %v5386_v34  ;;  %v1776_v53 = vunpack.c.l.bf16 %v1736_v9  ;;  %v1778_v54 = vunpack.c.l.bf16 %v1737_v14 }
 0x1d6   :  { %2468 = vmatpush1.bf16.msra.mxu1 %v2408_v49  ;;  %v2132_v55 = vadd.f32 %v2068_v47, %v1907_v50  ;;  %v1681_v56 = vmul.f32 %v1617_v52, %v5386_v34  ;;  %v2001_v57 = vunpack.c.l.bf16 %v1961_v15  ;;  %v2003_v58 = vunpack.c.l.bf16 %v1962_v22 }
 0x1d7   :  { %v2355_v60 = vadd.f32 %v2291_v27, %v2130_v28  ;;  %v1840_v61 = vmul.f32 %v1776_v53, %v5389_v35  ;;  %v1842_v62 = vmul.f32 %v1778_v54, %v5389_v35  ;;  %v2226_v63 = vunpack.c.l.bf16 %v2186_v23  ;;  %v1579_v28 = vld [vmem:[#allocation10 + $0x60] sm:$0xff] }
 0x1d8   :  { %v2357_v2 = vadd.f32 %v2293_v51, %v2132_v55  ;;  %v2065_v3 = vmul.f32 %v2001_v57, %v5398_v42  ;;  %v2067_v4 = vmul.f32 %v2003_v58, %v5398_v42  ;;  %v2228_v5 = vunpack.c.l.bf16 %v2187_v31 }
 0x1d9   :  { %v1904_v7 = vadd.f32 %v1840_v61, %v1679_v33  ;;  %v1906_v8 = vadd.f32 %v1842_v62, %v1681_v56  ;;  %v2290_v9 = vmul.f32 %v2226_v63, %v5401_v43  ;;  %v1620_v10 = vunpack.c.h.bf16 %v1577_v59  ;;  %v1580_v56 = vld [vmem:[#allocation10 + $0x68] sm:$0xff]  ;;  %v1740_v61 = vld [vmem:[#allocation10 + $0x160] sm:$0xff] }
 0x1da   :  { %v2411_v13 = vpack.c.bf16 %v2357_v2, %v2355_v60  ;;  %v2292_v14 = vmul.f32 %v2228_v5, %v5401_v43  ;;  %v1622_v15 = vunpack.c.h.bf16 %v1578_v0  ;;  %v1781_v16 = vunpack.c.h.bf16 %v1738_v1  ;;  %v1741_v2 = vld [vmem:[#allocation10 + $0x168] sm:$0xff] }
 0x1db   :  { %v2129_v18 = vadd.f32 %v2065_v3, %v1904_v7  ;;  %v2131_v19 = vadd.f32 %v2067_v4, %v1906_v8  ;;  %v1684_v22 = vmul.f32 %v1620_v10, %v5386_v34  ;;  %v1783_v23 = vunpack.c.h.bf16 %v1739_v6  ;;  %v1965_v3 = vld [vmem:[#allocation10 + $0x260] sm:$0xff]  ;;  %v1966_v8 = vld [vmem:[#allocation10 + $0x268] sm:$0xff] }
 0x1dc   :  { %2469 = vmatprep.subr.bf16.mxu1 %v2411_v13  ;;  %v1686_v25 = vmul.f32 %v1622_v15, %v5386_v34  ;;  %v1845_v29 = vmul.f32 %v1781_v16, %v5389_v35  ;;  %v2006_v30 = vunpack.c.h.bf16 %v1963_v11  ;;  %v2008_v31 = vunpack.c.h.bf16 %v1964_v12 }
 0x1dd   :  { %v2354_v32 = vadd.f32 %v2290_v9, %v2129_v18  ;;  %v2356_v36 = vadd.f32 %v2292_v14, %v2131_v19  ;;  %v1847_v37 = vmul.f32 %v1783_v23, %v5389_v35  ;;  %v2231_v20 = vunpack.c.h.bf16 %v2188_v17  ;;  %v2190_v9 = vld [vmem:[#allocation10 + $0x360] sm:$0xff]  ;;  %v2191_v14 = vld [vmem:[#allocation10 + $0x368] sm:$0xff] }
 0x1de   :  { %v1909_v21 = vadd.f32 %v1845_v29, %v1684_v22  ;;  %v2070_v38 = vmul.f32 %v2006_v30, %v5398_v42  ;;  %v2072_v39 = vmul.f32 %v2008_v31, %v5398_v42  ;;  %v2233_v26 = vunpack.c.h.bf16 %v2189_v24 }
 0x1df   :  { %v2410_v40 = vpack.c.bf16 %v2356_v36, %v2354_v32  ;;  %v1911_v41 = vadd.f32 %v1847_v37, %v1686_v25  ;;  %v2295_v44 = vmul.f32 %v2231_v20, %v5401_v43  ;;  %v1619_v45 = vunpack.c.l.bf16 %v1577_v59 }
 0x1e0   :  { %v2134_v46 = vadd.f32 %v2070_v38, %v1909_v21  ;;  %v2297_v47 = vmul.f32 %v2233_v26, %v5401_v43  ;;  %v1621_v27 = vunpack.c.l.bf16 %v1578_v0  ;;  %v1780_v48 = vunpack.c.l.bf16 %v1738_v1 }
 0x1e1   :  { %2470 = vmatpush1.bf16.msra.mxu1 %v2410_v40  ;;  %v2136_v49 = vadd.f32 %v2072_v39, %v1911_v41  ;;  %v1683_v50 = vmul.f32 %v1619_v45, %v5386_v34  ;;  %v1782_v51 = vunpack.c.l.bf16 %v1739_v6  ;;  %v2005_v52 = vunpack.c.l.bf16 %v1963_v11 }
 0x1e2   :  { %v2359_v33 = vadd.f32 %v2295_v44, %v2134_v46  ;;  %v1685_v53 = vmul.f32 %v1621_v27, %v5386_v34  ;;  %v1844_v54 = vmul.f32 %v1780_v48, %v5389_v35  ;;  %v2007_v55 = vunpack.c.l.bf16 %v1964_v12 }
 0x1e3   :  { %v2361_v57 = vadd.f32 %v2297_v47, %v2136_v49  ;;  %v1846_v58 = vmul.f32 %v1782_v51, %v5389_v35  ;;  %v2069_v59 = vmul.f32 %v2005_v52, %v5398_v42  ;;  %v2230_v60 = vunpack.c.l.bf16 %v2188_v17  ;;  %v1581_v49 = vld [vmem:[#allocation10 + $0x70] sm:$0xff] }
 0x1e4   :  { %v1908_v62 = vadd.f32 %v1844_v54, %v1683_v50  ;;  %v2071_v63 = vmul.f32 %v2007_v55, %v5398_v42  ;;  %v2232_v0 = vunpack.c.l.bf16 %v2189_v24  ;;  %v1624_v1 = vunpack.c.h.bf16 %v1579_v28 }
 0x1e5   :  { %v2413_v4 = vpack.c.bf16 %v2361_v57, %v2359_v33  ;;  %v1910_v5 = vadd.f32 %v1846_v58, %v1685_v53  ;;  %v2294_v6 = vmul.f32 %v2230_v60, %v5401_v43  ;;  %v1626_v7 = vunpack.c.h.bf16 %v1580_v56  ;;  %v1582_v33 = vld [vmem:[#allocation10 + $0x78] sm:$0xff]  ;;  %v1742_v53 = vld [vmem:[#allocation10 + $0x170] sm:$0xff] }
 0x1e6   :  { %v2133_v10 = vadd.f32 %v2069_v59, %v1908_v62  ;;  %v2296_v11 = vmul.f32 %v2232_v0, %v5401_v43  ;;  %v1688_v12 = vmul.f32 %v1624_v1, %v5386_v34  ;;  %v1785_v13 = vunpack.c.h.bf16 %v1740_v61  ;;  %v1743_v58 = vld [vmem:[#allocation10 + $0x178] sm:$0xff] }
 0x1e7   :  { %2471 = vmatprep.subr.bf16.mxu1 %v2413_v4  ;;  %v2135_v15 = vadd.f32 %v2071_v63, %v1910_v5  ;;  %v1690_v16 = vmul.f32 %v1626_v7, %v5386_v34  ;;  %v1787_v17 = vunpack.c.h.bf16 %v1741_v2  ;;  %v2010_v18 = vunpack.c.h.bf16 %v1965_v3  ;;  %v1967_v63 = vld [vmem:[#allocation10 + $0x270] sm:$0xff]  ;;  %v1968_v0 = vld [vmem:[#allocation10 + $0x278] sm:$0xff] }
 0x1e8   :  { %v2358_v19 = vadd.f32 %v2294_v6, %v2133_v10  ;;  %v1849_v22 = vmul.f32 %v1785_v13, %v5389_v35  ;;  %v2012_v23 = vunpack.c.h.bf16 %v1966_v8  ;;  %v2235_v24 = vunpack.c.h.bf16 %v2190_v9  ;;  %v2192_v5 = vld [vmem:[#allocation10 + $0x370] sm:$0xff]  ;;  %v2193_v10 = vld [vmem:[#allocation10 + $0x378] sm:$0xff] }
 0x1e9   :  { %v2360_v25 = vadd.f32 %v2296_v11, %v2135_v15  ;;  %v1851_v29 = vmul.f32 %v1787_v17, %v5389_v35  ;;  %v2074_v30 = vmul.f32 %v2010_v18, %v5398_v42  ;;  %v2237_v31 = vunpack.c.h.bf16 %v2191_v14 }
 0x1ea   :  { %v1913_v32 = vadd.f32 %v1849_v22, %v1688_v12  ;;  %v2076_v36 = vmul.f32 %v2012_v23, %v5398_v42  ;;  %v2299_v37 = vmul.f32 %v2235_v24, %v5401_v43  ;;  %v1623_v20 = vunpack.c.l.bf16 %v1579_v28 }
 0x1eb   :  { %v2412_v21 = vpack.c.bf16 %v2360_v25, %v2358_v19  ;;  %v1915_v38 = vadd.f32 %v1851_v29, %v1690_v16  ;;  %v2301_v39 = vmul.f32 %v2237_v31, %v5401_v43  ;;  %v1625_v26 = vunpack.c.l.bf16 %v1580_v56 }
 0x1ec   :  { %v2138_v40 = vadd.f32 %v2074_v30, %v1913_v32  ;;  %v1687_v41 = vmul.f32 %v1623_v20, %v5386_v34  ;;  %v1784_v44 = vunpack.c.l.bf16 %v1740_v61  ;;  %v1786_v45 = vunpack.c.l.bf16 %v1741_v2 }
 0x1ed   :  { %2472 = vmatpush1.bf16.msra.mxu1 %v2412_v21  ;;  %v2140_v46 = vadd.f32 %v2076_v36, %v1915_v38  ;;  %v1689_v47 = vmul.f32 %v1625_v26, %v5386_v34  ;;  %v2009_v27 = vunpack.c.l.bf16 %v1965_v3  ;;  %v2011_v48 = vunpack.c.l.bf16 %v1966_v8 }
 0x1ee   :  { %v2363_v50 = vadd.f32 %v2299_v37, %v2138_v40  ;;  %v1848_v51 = vmul.f32 %v1784_v44, %v5389_v35  ;;  %v1850_v52 = vmul.f32 %v1786_v45, %v5389_v35  ;;  %v2234_v28 = vunpack.c.l.bf16 %v2190_v9  ;;  %v1583_v40 = vld [vmem:[#allocation10 + $0x80] sm:$0xff] }
 0x1ef   :  { %v2365_v54 = vadd.f32 %v2301_v39, %v2140_v46  ;;  %v2073_v55 = vmul.f32 %v2009_v27, %v5398_v42  ;;  %v2075_v56 = vmul.f32 %v2011_v48, %v5398_v42  ;;  %v2236_v57 = vunpack.c.l.bf16 %v2191_v14 }
 0x1f0   :  { %v1912_v59 = vadd.f32 %v1848_v51, %v1687_v41  ;;  %v1914_v60 = vadd.f32 %v1850_v52, %v1689_v47  ;;  %v2298_v61 = vmul.f32 %v2234_v28, %v5401_v43  ;;  %v1628_v62 = vunpack.c.h.bf16 %v1581_v49  ;;  %v1584_v47 = vld [vmem:[#allocation10 + $0x88] sm:$0xff]  ;;  %v1744_v51 = vld [vmem:[#allocation10 + $0x180] sm:$0xff] }
 0x1f1   :  { %v2415_v1 = vpack.c.bf16 %v2365_v54, %v2363_v50  ;;  %v2300_v2 = vmul.f32 %v2236_v57, %v5401_v43  ;;  %v1630_v3 = vunpack.c.h.bf16 %v1582_v33  ;;  %v1789_v4 = vunpack.c.h.bf16 %v1742_v53  ;;  %v1745_v54 = vld [vmem:[#allocation10 + $0x188] sm:$0xff] }
 0x1f2   :  { %v2137_v6 = vadd.f32 %v2073_v55, %v1912_v59  ;;  %v2139_v7 = vadd.f32 %v2075_v56, %v1914_v60  ;;  %v1692_v8 = vmul.f32 %v1628_v62, %v5386_v34  ;;  %v1791_v9 = vunpack.c.h.bf16 %v1743_v58  ;;  %v1969_v55 = vld [vmem:[#allocation10 + $0x280] sm:$0xff]  ;;  %v1970_v60 = vld [vmem:[#allocation10 + $0x288] sm:$0xff] }
 0x1f3   :  { %2473 = vmatprep.subr.bf16.mxu1 %v2415_v1  ;;  %v1694_v11 = vmul.f32 %v1630_v3, %v5386_v34  ;;  %v1853_v12 = vmul.f32 %v1789_v4, %v5389_v35  ;;  %v2014_v13 = vunpack.c.h.bf16 %v1967_v63  ;;  %v2016_v14 = vunpack.c.h.bf16 %v1968_v0 }
 0x1f4   :  { %v2362_v15 = vadd.f32 %v2298_v61, %v2137_v6  ;;  %v2364_v16 = vadd.f32 %v2300_v2, %v2139_v7  ;;  %v1855_v17 = vmul.f32 %v1791_v9, %v5389_v35  ;;  %v2239_v18 = vunpack.c.h.bf16 %v2192_v5  ;;  %v2194_v61 = vld [vmem:[#allocation10 + $0x380] sm:$0xff]  ;;  %v2195_v2 = vld [vmem:[#allocation10 + $0x388] sm:$0xff] }
 0x1f5   :  { %v1917_v19 = vadd.f32 %v1853_v12, %v1692_v8  ;;  %v2078_v22 = vmul.f32 %v2014_v13, %v5398_v42  ;;  %v2080_v23 = vmul.f32 %v2016_v14, %v5398_v42  ;;  %v2241_v24 = vunpack.c.h.bf16 %v2193_v10 }
 0x1f6   :  { %v2414_v25 = vpack.c.bf16 %v2364_v16, %v2362_v15  ;;  %v1919_v29 = vadd.f32 %v1855_v17, %v1694_v11  ;;  %v2303_v30 = vmul.f32 %v2239_v18, %v5401_v43  ;;  %v1627_v31 = vunpack.c.l.bf16 %v1581_v49 }
 0x1f7   :  { %v2142_v32 = vadd.f32 %v2078_v22, %v1917_v19  ;;  %v2305_v36 = vmul.f32 %v2241_v24, %v5401_v43  ;;  %v1629_v37 = vunpack.c.l.bf16 %v1582_v33  ;;  %v1788_v20 = vunpack.c.l.bf16 %v1742_v53 }
 0x1f8   :  { %2474 = vmatpush1.bf16.msra.mxu1 %v2414_v25  ;;  %v2144_v21 = vadd.f32 %v2080_v23, %v1919_v29  ;;  %v1691_v38 = vmul.f32 %v1627_v31, %v5386_v34  ;;  %v1790_v39 = vunpack.c.l.bf16 %v1743_v58  ;;  %v2013_v26 = vunpack.c.l.bf16 %v1967_v63 }
 0x1f9   :  { %v2367_v41 = vadd.f32 %v2303_v30, %v2142_v32  ;;  %v1693_v44 = vmul.f32 %v1629_v37, %v5386_v34  ;;  %v1852_v45 = vmul.f32 %v1788_v20, %v5389_v35  ;;  %v2015_v46 = vunpack.c.l.bf16 %v1968_v0 }
 0x1fa   :  { %v2369_v27 = vadd.f32 %v2305_v36, %v2144_v21  ;;  %v1854_v48 = vmul.f32 %v1790_v39, %v5389_v35  ;;  %v2077_v49 = vmul.f32 %v2013_v26, %v5398_v42  ;;  %v2238_v50 = vunpack.c.l.bf16 %v2192_v5  ;;  %v1585_v21 = vld [vmem:[#allocation10 + $0x90] sm:$0xff] }
 0x1fb   :  { %v1916_v52 = vadd.f32 %v1852_v45, %v1691_v38  ;;  %v2079_v28 = vmul.f32 %v2015_v46, %v5398_v42  ;;  %v2240_v33 = vunpack.c.l.bf16 %v2193_v10  ;;  %v1632_v53 = vunpack.c.h.bf16 %v1583_v40 }
 0x1fc   :  { %v2417_v56 = vpack.c.bf16 %v2369_v27, %v2367_v41  ;;  %v1918_v57 = vadd.f32 %v1854_v48, %v1693_v44  ;;  %v2302_v58 = vmul.f32 %v2238_v50, %v5401_v43  ;;  %v1634_v59 = vunpack.c.h.bf16 %v1584_v47  ;;  %v1586_v41 = vld [vmem:[#allocation10 + $0x98] sm:$0xff]  ;;  %v1746_v44 = vld [vmem:[#allocation10 + $0x190] sm:$0xff] }
 0x1fd   :  { %v2141_v62 = vadd.f32 %v2077_v49, %v1916_v52  ;;  %v2304_v63 = vmul.f32 %v2240_v33, %v5401_v43  ;;  %v1696_v0 = vmul.f32 %v1632_v53, %v5386_v34  ;;  %v1793_v1 = vunpack.c.h.bf16 %v1744_v51  ;;  %v1747_v48 = vld [vmem:[#allocation10 + $0x198] sm:$0xff] }
 0x1fe   :  { %2475 = vmatprep.subr.bf16.mxu1 %v2417_v56  ;;  %v2143_v3 = vadd.f32 %v2079_v28, %v1918_v57  ;;  %v1698_v4 = vmul.f32 %v1634_v59, %v5386_v34  ;;  %v1795_v5 = vunpack.c.h.bf16 %v1745_v54  ;;  %v2018_v6 = vunpack.c.h.bf16 %v1969_v55  ;;  %v1971_v28 = vld [vmem:[#allocation10 + $0x290] sm:$0xff]  ;;  %v1972_v33 = vld [vmem:[#allocation10 + $0x298] sm:$0xff] }
 0x1ff   :  { %v2366_v7 = vadd.f32 %v2302_v58, %v2141_v62  ;;  %v1857_v8 = vmul.f32 %v1793_v1, %v5389_v35  ;;  %v2020_v9 = vunpack.c.h.bf16 %v1970_v60  ;;  %v2243_v10 = vunpack.c.h.bf16 %v2194_v61  ;;  %v2196_v57 = vld [vmem:[#allocation10 + $0x390] sm:$0xff]  ;;  %v2197_v62 = vld [vmem:[#allocation10 + $0x398] sm:$0xff] }
 0x200   :  { %v2368_v11 = vadd.f32 %v2304_v63, %v2143_v3  ;;  %v1859_v12 = vmul.f32 %v1795_v5, %v5389_v35  ;;  %v2082_v13 = vmul.f32 %v2018_v6, %v5398_v42  ;;  %v2245_v14 = vunpack.c.h.bf16 %v2195_v2 }
 0x201   :  { %v1921_v15 = vadd.f32 %v1857_v8, %v1696_v0  ;;  %v2084_v16 = vmul.f32 %v2020_v9, %v5398_v42  ;;  %v2307_v17 = vmul.f32 %v2243_v10, %v5401_v43  ;;  %v1631_v18 = vunpack.c.l.bf16 %v1583_v40 }
 0x202   :  { %v2416_v19 = vpack.c.bf16 %v2368_v11, %v2366_v7  ;;  %v1923_v22 = vadd.f32 %v1859_v12, %v1698_v4  ;;  %v2309_v23 = vmul.f32 %v2245_v14, %v5401_v43  ;;  %v1633_v24 = vunpack.c.l.bf16 %v1584_v47 }
 0x203   :  { %v2146_v25 = vadd.f32 %v2082_v13, %v1921_v15  ;;  %v1695_v29 = vmul.f32 %v1631_v18, %v5386_v34  ;;  %v1792_v30 = vunpack.c.l.bf16 %v1744_v51  ;;  %v1794_v31 = vunpack.c.l.bf16 %v1745_v54 }
 0x204   :  { %2476 = vmatpush1.bf16.msra.mxu1 %v2416_v19  ;;  %v2148_v32 = vadd.f32 %v2084_v16, %v1923_v22  ;;  %v1697_v36 = vmul.f32 %v1633_v24, %v5386_v34  ;;  %v2017_v37 = vunpack.c.l.bf16 %v1969_v55  ;;  %v2019_v20 = vunpack.c.l.bf16 %v1970_v60 }
 0x205   :  { %v2371_v38 = vadd.f32 %v2307_v17, %v2146_v25  ;;  %v1856_v39 = vmul.f32 %v1792_v30, %v5389_v35  ;;  %v1858_v26 = vmul.f32 %v1794_v31, %v5389_v35  ;;  %v2242_v40 = vunpack.c.l.bf16 %v2194_v61  ;;  %v1445_v25 = vld [vmem:[#allocation9] sm:$0x3] }
 0x206   :  { %v2373_v45 = vadd.f32 %v2309_v23, %v2148_v32  ;;  %v2081_v46 = vmul.f32 %v2017_v37, %v5398_v42  ;;  %v2083_v47 = vmul.f32 %v2019_v20, %v5398_v42  ;;  %v2244_v27 = vunpack.c.l.bf16 %v2195_v2 }
 0x207   :  { %v1920_v49 = vadd.f32 %v1856_v39, %v1695_v29  ;;  %v1922_v50 = vadd.f32 %v1858_v26, %v1697_v36  ;;  %v2306_v51 = vmul.f32 %v2242_v40, %v5401_v43  ;;  %v1636_v52 = vunpack.c.h.bf16 %v1585_v21  ;;  %v1448_v36 = vld [vmem:[#allocation9 + $0x2] sm:$0x3]  ;;  %v1452_v39 = vld [vmem:[#allocation9 + $0x4] sm:$0x3]  ;;  %v1456_v26 = vld [vmem:[#allocation9 + $0x6] sm:$0x3] }
 0x208   :  { %v2419_v53 = vpack.c.bf16 %v2373_v45, %v2371_v38  ;;  %v2308_v54 = vmul.f32 %v2244_v27, %v5401_v43  ;;  %v1638_v55 = vunpack.c.h.bf16 %v1586_v41  ;;  %v1797_v56 = vunpack.c.h.bf16 %v1746_v44 }
 0x209   :  { %v2145_v58 = vadd.f32 %v2081_v46, %v1920_v49  ;;  %v2147_v59 = vadd.f32 %v2083_v47, %v1922_v50  ;;  %v1700_v60 = vmul.f32 %v1636_v52, %v5386_v34  ;;  %v1799_v61 = vunpack.c.h.bf16 %v1747_v48  ;;  %v1587_v46 = vld [vmem:[#allocation10 + $0xa0] sm:$0xff]  ;;  %v1588_v50 = vld [vmem:[#allocation10 + $0xa8] sm:$0xff] }
 0x20a   :  { %2477 = vmatprep.subr.bf16.mxu1 %v2419_v53  ;;  %v1702_v63 = vmul.f32 %v1638_v55, %v5386_v34  ;;  %v1861_v0 = vmul.f32 %v1797_v56, %v5389_v35  ;;  %v2022_v1 = vunpack.c.h.bf16 %v1971_v28  ;;  %v2024_v2 = vunpack.c.h.bf16 %v1972_v33  ;;  %v1749_v52 = vld [vmem:[#allocation10 + $0x1a8] sm:$0xff] }
 0x20b   :  { %v2370_v3 = vadd.f32 %v2306_v51, %v2145_v58  ;;  %v2372_v4 = vadd.f32 %v2308_v54, %v2147_v59  ;;  %v1863_v5 = vmul.f32 %v1799_v61, %v5389_v35  ;;  %v2247_v6 = vunpack.c.h.bf16 %v2196_v57  ;;  %v1748_v51 = vld [vmem:[#allocation10 + $0x1a0] sm:$0xff] }
 0x20c   :  { %v1925_v7 = vadd.f32 %v1861_v0, %v1700_v60  ;;  %v2086_v8 = vmul.f32 %v2022_v1, %v5398_v42  ;;  %v2088_v9 = vmul.f32 %v2024_v2, %v5398_v42  ;;  %v2249_v10 = vunpack.c.h.bf16 %v2197_v62  ;;  %v1973_v59 = vld [vmem:[#allocation10 + $0x2a0] sm:$0xff] }
 0x20d   :  { %v2418_v11 = vpack.c.bf16 %v2372_v4, %v2370_v3  ;;  %v1927_v12 = vadd.f32 %v1863_v5, %v1702_v63  ;;  %v2311_v13 = vmul.f32 %v2247_v6, %v5401_v43  ;;  %v1635_v14 = vunpack.c.l.bf16 %v1585_v21  ;;  %v1974_v4 = vld [vmem:[#allocation10 + $0x2a8] sm:$0xff] }
 0x20e   :  { %v2150_v15 = vadd.f32 %v2086_v8, %v1925_v7  ;;  %v2313_v16 = vmul.f32 %v2249_v10, %v5401_v43  ;;  %v1637_v17 = vunpack.c.l.bf16 %v1586_v41  ;;  %v1796_v18 = vunpack.c.l.bf16 %v1746_v44  ;;  %v2199_v10 = vld [vmem:[#allocation10 + $0x3a8] sm:$0xff] }
 0x20f   :  { %2478 = vmatpush1.bf16.msra.mxu1 %v2418_v11  ;;  %v2152_v19 = vadd.f32 %v2088_v9, %v1927_v12  ;;  %v1699_v22 = vmul.f32 %v1635_v14, %v5386_v34  ;;  %v1798_v23 = vunpack.c.l.bf16 %v1747_v48  ;;  %v2021_v24 = vunpack.c.l.bf16 %v1971_v28  ;;  %v2198_v9 = vld [vmem:[#allocation10 + $0x3a0] sm:$0xff] }
 0x210   :  { %v2375_v29 = vadd.f32 %v2311_v13, %v2150_v15  ;;  %v1701_v30 = vmul.f32 %v1637_v17, %v5386_v34  ;;  %v1860_v31 = vmul.f32 %v1796_v18, %v5389_v35  ;;  %v2023_v32 = vunpack.c.l.bf16 %v1972_v33 }
 0x211   :  { %v2377_v37 = vadd.f32 %v2313_v16, %v2152_v19  ;;  %v1862_v20 = vmul.f32 %v1798_v23, %v5389_v35  ;;  %v2085_v21 = vmul.f32 %v2021_v24, %v5398_v42  ;;  %v2246_v38 = vunpack.c.l.bf16 %v2196_v57 }
 0x212   :  { %v1924_v40 = vadd.f32 %v1860_v31, %v1699_v22  ;;  %v2087_v41 = vmul.f32 %v2023_v32, %v5398_v42  ;;  %v2248_v44 = vunpack.c.l.bf16 %v2197_v62  ;;  %v1446_v45 = vmul.f32 %v1445_v25, %v5386_v34 }
 0x213   :  { %v2421_v47 = vpack.c.bf16 %v2377_v37, %v2375_v29  ;;  %v1926_v27 = vadd.f32 %v1862_v20, %v1701_v30  ;;  %v2310_v48 = vmul.f32 %v2246_v38, %v5401_v43  ;;  %v1449_v49 = vmul.f32 %v1448_v36, %v5389_v35 }
 0x214   :  { %v2149_v28 = vadd.f32 %v2085_v21, %v1924_v40  ;;  %v2312_v33 = vmul.f32 %v2248_v44, %v5401_v43  ;;  %v1453_v53 = vmul.f32 %v1452_v39, %v5398_v42  ;;  %v1457_v54 = vmul.f32 %v1456_v26, %v5401_v43  ;;  %v1589_v26 = vld [vmem:[#allocation10 + $0xb0] sm:$0xff] }
 0x215   :  { %2479 = vmatprep.subr.bf16.mxu1 %v2421_v47  ;;  %v2151_v55 = vadd.f32 %v2087_v41, %v1926_v27  ;;  %v1450_v56 = vadd.f32 %v1449_v49, %v1446_v45  ;;  %v1463_v57 = vlaneseq  ;;  %v1640_v58 = vunpack.c.h.bf16 %v1587_v46 }
 0x216   :  { %v2374_v60 = vadd.f32 %v2310_v48, %v2149_v28  ;;  %v1642_v61 = vunpack.c.h.bf16 %v1588_v50  ;;  %v1801_v62 = vunpack.c.h.bf16 %v1748_v51  ;;  %v1803_v63 = vunpack.c.h.bf16 %v1749_v52 }
 0x217   :  { %v2376_v0 = vadd.f32 %v2312_v33, %v2151_v55  ;;  %v1454_v1 = vadd.f32 %v1453_v53, %v1450_v56  ;;  %v5957_v2 = vshrl.u32 %v1463_v57, 7  ;;  %v1704_v3 = vmul.f32 %v1640_v58, %v5386_v34  ;;  %v1751_v53 = vld [vmem:[#allocation10 + $0x1b8] sm:$0xff] }
 0x218   :  { %v1706_v5 = vmul.f32 %v1642_v61, %v5386_v34  ;;  %v1865_v6 = vmul.f32 %v1801_v62, %v5389_v35  ;;  %v1867_v7 = vmul.f32 %v1803_v63, %v5389_v35  ;;  %v2026_v8 = vunpack.c.h.bf16 %v1973_v59  ;;  %v1976_v55 = vld [vmem:[#allocation10 + $0x2b8] sm:$0xff] }
 0x219   :  { %v2420_v11 = vpack.c.bf16 %v2376_v0, %v2374_v60  ;;  %v5963_v12 = vadd.f32 %v1457_v54, %v1454_v1  ;;  %v5966_v13 = vsub.s32 0, %v5957_v2  ;;  %v2028_v16 = vunpack.c.h.bf16 %v1974_v4  ;;  %v1975_v54 = vld [vmem:[#allocation10 + $0x2b0] sm:$0xff]  ;;  %v2201_v1 = vld [vmem:[#allocation10 + $0x3b8] sm:$0xff] }
 0x21a   :  { %v1929_v14 = vadd.f32 %v1865_v6, %v1704_v3  ;;  %v1931_v15 = vadd.f32 %v1867_v7, %v1706_v5  ;;  %v2090_v17 = vmul.f32 %v2026_v8, %v5398_v42  ;;  %v5972_v19 = vsub.s32 1, %v5957_v2  ;;  %v2200_v60 = vld [vmem:[#allocation10 + $0x3b0] sm:$0xff] }
 0x21b   :  { %2480 = vmatpush1.bf16.msra.mxu1 %v2420_v11  ;;  %v1466_v18 = vrot.slane %v5963_v12, %v5966_v13  ;;  %v2251_v22 = vunpack.c.h.bf16 %v2198_v9  ;;  %v2253_v23 = vunpack.c.h.bf16 %v2199_v10  ;;  %v2092_v24 = vmul.f32 %v2028_v16, %v5398_v42 }
 0x21c   :  { %v2154_v25 = vadd.f32 %v2090_v17, %v1929_v14  ;;  %v1639_v29 = vunpack.c.l.bf16 %v1587_v46  ;;  %v1641_v30 = vunpack.c.l.bf16 %v1588_v50  ;;  %v1800_v36 = vunpack.c.l.bf16 %v1748_v51  ;;  %v1590_v46 = vld [vmem:[#allocation10 + $0xb8] sm:$0xff]  ;;  %v1750_v50 = vld [vmem:[#allocation10 + $0x1b0] sm:$0xff] }
 0x21d   :  { %v2315_v31 = vmul.f32 %v2251_v22, %v5401_v43  ;;  %v2317_v32 = vmul.f32 %v2253_v23, %v5401_v43  ;;  %v1802_v37 = vunpack.c.l.bf16 %v1749_v52  ;;  %v2156_v20 = vadd.f32 %v2092_v24, %v1931_v15 }
 0x21e   :  { %v1703_v21 = vmul.f32 %v1639_v29, %v5386_v34  ;;  %v1705_v38 = vmul.f32 %v1641_v30, %v5386_v34  ;;  %v2025_v39 = vunpack.c.l.bf16 %v1973_v59  ;;  %v1864_v41 = vmul.f32 %v1800_v36, %v5389_v35 }
 0x21f   :  { %v2379_v40 = vadd.f32 %v2315_v31, %v2154_v25  ;;  %v1866_v44 = vmul.f32 %v1802_v37, %v5389_v35  ;;  %v2027_v45 = vunpack.c.l.bf16 %v1974_v4  ;;  %v2381_v47 = vadd.f32 %v2317_v32, %v2156_v20 }
 0x220   :  { %v2089_v27 = vmul.f32 %v2025_v39, %v5398_v42  ;;  %v2250_v48 = vunpack.c.l.bf16 %v2198_v9  ;;  %v2252_v49 = vunpack.c.l.bf16 %v2199_v10  ;;  %v1928_v51 = vadd.f32 %v1864_v41, %v1703_v21  ;;  %v1591_v41 = vld [vmem:[#allocation10 + $0xc0] sm:$0xff] }
 0x221   :  { %v1930_v52 = vadd.f32 %v1866_v44, %v1705_v38  ;;  %v2091_v28 = vmul.f32 %v2027_v45, %v5398_v42  ;;  %v1644_v33 = vunpack.c.h.bf16 %v1589_v26  ;;  %v2423_v56 = vpack.c.bf16 %v2381_v47, %v2379_v40  ;;  %v1592_v44 = vld [vmem:[#allocation10 + $0xc8] sm:$0xff] }
 0x222   :  { %v2314_v57 = vmul.f32 %v2250_v48, %v5401_v43  ;;  %v2316_v58 = vmul.f32 %v2252_v49, %v5401_v43  ;;  %v1646_v59 = vunpack.c.h.bf16 %v1590_v46  ;;  %v2153_v61 = vadd.f32 %v2089_v27, %v1928_v51  ;;  %v1752_v27 = vld [vmem:[#allocation10 + $0x1c0] sm:$0xff] }
 0x223   :  { %v2155_v62 = vadd.f32 %v2091_v28, %v1930_v52  ;;  %v1708_v63 = vmul.f32 %v1644_v33, %v5386_v34  ;;  %v1805_v0 = vunpack.c.h.bf16 %v1750_v50  ;;  %2481 = vmatprep.subr.bf16.mxu1 %v2423_v56  ;;  %v1807_v4 = vunpack.c.h.bf16 %v1751_v53  ;;  %v1753_v52 = vld [vmem:[#allocation10 + $0x1c8] sm:$0xff] }
 0x224   :  { %v1710_v3 = vmul.f32 %v1646_v59, %v5386_v34  ;;  %v2030_v5 = vunpack.c.h.bf16 %v1975_v54  ;;  %v2032_v6 = vunpack.c.h.bf16 %v1976_v55  ;;  %v2378_v7 = vadd.f32 %v2314_v57, %v2153_v61  ;;  %v1978_v56 = vld [vmem:[#allocation10 + $0x2c8] sm:$0xff] }
 0x225   :  { %v2380_v8 = vadd.f32 %v2316_v58, %v2155_v62  ;;  %v1869_v9 = vmul.f32 %v1805_v0, %v5389_v35  ;;  %v2255_v10 = vunpack.c.h.bf16 %v2200_v60  ;;  %v1871_v11 = vmul.f32 %v1807_v4, %v5389_v35  ;;  %v2203_v62 = vld [vmem:[#allocation10 + $0x3c8] sm:$0xff] }
 0x226   :  { %v2094_v14 = vmul.f32 %v2030_v5, %v5398_v42  ;;  %v2096_v15 = vmul.f32 %v2032_v6, %v5398_v42  ;;  %v2257_v16 = vunpack.c.h.bf16 %v2201_v1  ;;  %v1643_v24 = vunpack.c.l.bf16 %v1589_v26 }
 0x227   :  { %v2422_v17 = vpack.c.bf16 %v2380_v8, %v2378_v7  ;;  %v1933_v22 = vadd.f32 %v1869_v9, %v1708_v63  ;;  %v2319_v23 = vmul.f32 %v2255_v10, %v5401_v43  ;;  %v1935_v25 = vadd.f32 %v1871_v11, %v1710_v3 }
 0x228   :  { %v2321_v29 = vmul.f32 %v2257_v16, %v5401_v43  ;;  %v1645_v30 = vunpack.c.l.bf16 %v1590_v46  ;;  %v1804_v31 = vunpack.c.l.bf16 %v1750_v50  ;;  %v1707_v36 = vmul.f32 %v1643_v24, %v5386_v34 }
 0x229   :  { %2482 = vmatpush1.bf16.msra.mxu1 %v2422_v17  ;;  %v2158_v32 = vadd.f32 %v2094_v14, %v1933_v22  ;;  %v1806_v37 = vunpack.c.l.bf16 %v1751_v53  ;;  %v2029_v20 = vunpack.c.l.bf16 %v1975_v54  ;;  %v2160_v21 = vadd.f32 %v2096_v15, %v1935_v25 }
 0x22a   :  { %v1709_v38 = vmul.f32 %v1645_v30, %v5386_v34  ;;  %v1868_v39 = vmul.f32 %v1804_v31, %v5389_v35  ;;  %v2031_v40 = vunpack.c.l.bf16 %v1976_v55  ;;  %v2254_v47 = vunpack.c.l.bf16 %v2200_v60  ;;  %v1977_v55 = vld [vmem:[#allocation10 + $0x2c0] sm:$0xff] }
 0x22b   :  { %v2383_v26 = vadd.f32 %v2319_v23, %v2158_v32  ;;  %v1870_v45 = vmul.f32 %v1806_v37, %v5389_v35  ;;  %v2093_v46 = vmul.f32 %v2029_v20, %v5398_v42  ;;  %v2385_v48 = vadd.f32 %v2321_v29, %v2160_v21  ;;  %v2202_v60 = vld [vmem:[#allocation10 + $0x3c0] sm:$0xff] }
 0x22c   :  { %v1932_v49 = vadd.f32 %v1868_v39, %v1707_v36  ;;  %v2095_v50 = vmul.f32 %v2031_v40, %v5398_v42  ;;  %v2256_v51 = vunpack.c.l.bf16 %v2201_v1  ;;  %v2318_v33 = vmul.f32 %v2254_v47, %v5401_v43 }
 0x22d   :  { %v1934_v28 = vadd.f32 %v1870_v45, %v1709_v38  ;;  %v1648_v53 = vunpack.c.h.bf16 %v1591_v41  ;;  %v1650_v54 = vunpack.c.h.bf16 %v1592_v44  ;;  %v2425_v57 = vpack.c.bf16 %v2385_v48, %v2383_v26  ;;  %v1593_v38 = vld [vmem:[#allocation10 + $0xd0] sm:$0xff]  ;;  %v1594_v45 = vld [vmem:[#allocation10 + $0xd8] sm:$0xff] }
 0x22e   :  { %v2157_v58 = vadd.f32 %v2093_v46, %v1932_v49  ;;  %v2320_v59 = vmul.f32 %v2256_v51, %v5401_v43  ;;  %v1809_v61 = vunpack.c.h.bf16 %v1752_v27  ;;  %v1811_v3 = vunpack.c.h.bf16 %v1753_v52  ;;  %v1754_v46 = vld [vmem:[#allocation10 + $0x1d0] sm:$0xff]  ;;  %v1755_v49 = vld [vmem:[#allocation10 + $0x1d8] sm:$0xff] }
 0x22f   :  { %v2159_v63 = vadd.f32 %v2095_v50, %v1934_v28  ;;  %v1712_v0 = vmul.f32 %v1648_v53, %v5386_v34  ;;  %v1714_v1 = vmul.f32 %v1650_v54, %v5386_v34  ;;  %2483 = vmatprep.subr.bf16.mxu1 %v2425_v57  ;;  %v2034_v6 = vunpack.c.h.bf16 %v1977_v55  ;;  %v1980_v57 = vld [vmem:[#allocation10 + $0x2d8] sm:$0xff] }
 0x230   :  { %v2382_v4 = vadd.f32 %v2318_v33, %v2157_v58  ;;  %v1873_v5 = vmul.f32 %v1809_v61, %v5389_v35  ;;  %v2036_v7 = vunpack.c.h.bf16 %v1978_v56  ;;  %v1875_v9 = vmul.f32 %v1811_v3, %v5389_v35  ;;  %v1979_v33 = vld [vmem:[#allocation10 + $0x2d0] sm:$0xff] }
 0x231   :  { %v2384_v8 = vadd.f32 %v2320_v59, %v2159_v63  ;;  %v2259_v10 = vunpack.c.h.bf16 %v2202_v60  ;;  %v2261_v11 = vunpack.c.h.bf16 %v2203_v62  ;;  %v2098_v15 = vmul.f32 %v2034_v6, %v5398_v42  ;;  %v2204_v58 = vld [vmem:[#allocation10 + $0x3d0] sm:$0xff] }
 0x232   :  { %v1937_v14 = vadd.f32 %v1873_v5, %v1712_v0  ;;  %v2100_v16 = vmul.f32 %v2036_v7, %v5398_v42  ;;  %v1647_v17 = vunpack.c.l.bf16 %v1591_v41  ;;  %v1939_v23 = vadd.f32 %v1875_v9, %v1714_v1  ;;  %v2205_v0 = vld [vmem:[#allocation10 + $0x3d8] sm:$0xff] }
 0x233   :  { %v2424_v22 = vpack.c.bf16 %v2384_v8, %v2382_v4  ;;  %v2323_v24 = vmul.f32 %v2259_v10, %v5401_v43  ;;  %v2325_v25 = vmul.f32 %v2261_v11, %v5401_v43  ;;  %v1649_v30 = vunpack.c.l.bf16 %v1592_v44 }
 0x234   :  { %v2162_v29 = vadd.f32 %v2098_v15, %v1937_v14  ;;  %v1711_v31 = vmul.f32 %v1647_v17, %v5386_v34  ;;  %v1808_v32 = vunpack.c.l.bf16 %v1752_v27  ;;  %v2164_v36 = vadd.f32 %v2100_v16, %v1939_v23 }
 0x235   :  { %2484 = vmatpush1.bf16.msra.mxu1 %v2424_v22  ;;  %v1810_v37 = vunpack.c.l.bf16 %v1753_v52  ;;  %v2033_v20 = vunpack.c.l.bf16 %v1977_v55  ;;  %v2035_v21 = vunpack.c.l.bf16 %v1978_v56  ;;  %v1713_v40 = vmul.f32 %v1649_v30, %v5386_v34 }
 0x236   :  { %v2387_v39 = vadd.f32 %v2323_v24, %v2162_v29  ;;  %v1872_v41 = vmul.f32 %v1808_v32, %v5389_v35  ;;  %v2258_v26 = vunpack.c.l.bf16 %v2202_v60  ;;  %v2389_v47 = vadd.f32 %v2325_v25, %v2164_v36 }
 0x237   :  { %v1874_v44 = vmul.f32 %v1810_v37, %v5389_v35  ;;  %v2097_v48 = vmul.f32 %v2033_v20, %v5398_v42  ;;  %v2099_v27 = vmul.f32 %v2035_v21, %v5398_v42  ;;  %v2260_v51 = vunpack.c.l.bf16 %v2203_v62  ;;  %v1595_v37 = vld [vmem:[#allocation10 + $0xe0] sm:$0xff] }
 0x238   :  { %v1936_v50 = vadd.f32 %v1872_v41, %v1711_v31  ;;  %v2322_v52 = vmul.f32 %v2258_v26, %v5401_v43  ;;  %v1652_v28 = vunpack.c.h.bf16 %v1593_v38  ;;  %v2427_v53 = vpack.c.bf16 %v2389_v47, %v2387_v39 }
 0x239   :  { %v1938_v54 = vadd.f32 %v1874_v44, %v1713_v40  ;;  %v1654_v55 = vunpack.c.h.bf16 %v1594_v45  ;;  %v1813_v56 = vunpack.c.h.bf16 %v1754_v46  ;;  %v2324_v61 = vmul.f32 %v2260_v51, %v5401_v43  ;;  %v1596_v44 = vld [vmem:[#allocation10 + $0xe8] sm:$0xff]  ;;  %v1981_v51 = vld [vmem:[#allocation10 + $0x2e0] sm:$0xff] }
 0x23a   :  { %v2161_v59 = vadd.f32 %v2097_v48, %v1936_v50  ;;  %v1716_v60 = vmul.f32 %v1652_v28, %v5386_v34  ;;  %v1815_v63 = vunpack.c.h.bf16 %v1755_v49  ;;  %2485 = vmatprep.subr.bf16.mxu1 %v2427_v53  ;;  %v2038_v4 = vunpack.c.h.bf16 %v1979_v33  ;;  %v1757_v50 = vld [vmem:[#allocation10 + $0x1e8] sm:$0xff] }
 0x23b   :  { %v2163_v1 = vadd.f32 %v2099_v27, %v1938_v54  ;;  %v1718_v62 = vmul.f32 %v1654_v55, %v5386_v34  ;;  %v1877_v3 = vmul.f32 %v1813_v56, %v5389_v35  ;;  %v2040_v7 = vunpack.c.h.bf16 %v1980_v57  ;;  %v1982_v54 = vld [vmem:[#allocation10 + $0x2e8] sm:$0xff]  ;;  %v2206_v55 = vld [vmem:[#allocation10 + $0x3e0] sm:$0xff] }
 0x23c   :  { %v2386_v5 = vadd.f32 %v2322_v52, %v2161_v59  ;;  %v1879_v6 = vmul.f32 %v1815_v63, %v5389_v35  ;;  %v2263_v8 = vunpack.c.h.bf16 %v2204_v58  ;;  %v2102_v11 = vmul.f32 %v2038_v4, %v5398_v42 }
 0x23d   :  { %v2388_v9 = vadd.f32 %v2324_v61, %v2163_v1  ;;  %v1941_v10 = vadd.f32 %v1877_v3, %v1716_v60  ;;  %v2265_v14 = vunpack.c.h.bf16 %v2205_v0  ;;  %v2104_v16 = vmul.f32 %v2040_v7, %v5398_v42  ;;  %v2207_v1 = vld [vmem:[#allocation10 + $0x3e8] sm:$0xff] }
 0x23e   :  { %v1943_v15 = vadd.f32 %v1879_v6, %v1718_v62  ;;  %v2327_v17 = vmul.f32 %v2263_v8, %v5401_v43  ;;  %v1651_v22 = vunpack.c.l.bf16 %v1593_v38  ;;  %v1653_v29 = vunpack.c.l.bf16 %v1594_v45  ;;  %v1756_v45 = vld [vmem:[#allocation10 + $0x1e0] sm:$0xff] }
 0x23f   :  { %v2426_v23 = vpack.c.bf16 %v2388_v9, %v2386_v5  ;;  %v2166_v24 = vadd.f32 %v2102_v11, %v1941_v10  ;;  %v2329_v25 = vmul.f32 %v2265_v14, %v5401_v43  ;;  %v1812_v32 = vunpack.c.l.bf16 %v1754_v46 }
 0x240   :  { %v2168_v30 = vadd.f32 %v2104_v16, %v1943_v15  ;;  %v1715_v31 = vmul.f32 %v1651_v22, %v5386_v34  ;;  %v1814_v36 = vunpack.c.l.bf16 %v1755_v49  ;;  %v1717_v21 = vmul.f32 %v1653_v29, %v5386_v34 }
 0x241   :  { %2486 = vmatpush1.bf16.msra.mxu1 %v2426_v23  ;;  %v2391_v20 = vadd.f32 %v2327_v17, %v2166_v24  ;;  %v2037_v39 = vunpack.c.l.bf16 %v1979_v33  ;;  %v2039_v40 = vunpack.c.l.bf16 %v1980_v57  ;;  %v1876_v38 = vmul.f32 %v1812_v32, %v5389_v35 }
 0x242   :  { %v2393_v41 = vadd.f32 %v2329_v25, %v2168_v30  ;;  %v1878_v26 = vmul.f32 %v1814_v36, %v5389_v35  ;;  %v2262_v47 = vunpack.c.l.bf16 %v2204_v58  ;;  %v2264_v27 = vunpack.c.l.bf16 %v2205_v0 }
 0x243   :  { %v2101_v48 = vmul.f32 %v2037_v39, %v5398_v42  ;;  %v2103_v46 = vmul.f32 %v2039_v40, %v5398_v42  ;;  %v1656_v49 = vunpack.c.h.bf16 %v1595_v37  ;;  %v1940_v28 = vadd.f32 %v1876_v38, %v1715_v31  ;;  %v1598_v38 = vld [vmem:[#allocation10 + $0xf8] sm:$0xff] }
 0x244   :  { %v2429_v52 = vpack.c.bf16 %v2393_v41, %v2391_v20  ;;  %v1942_v33 = vadd.f32 %v1878_v26, %v1717_v21  ;;  %v2326_v53 = vmul.f32 %v2262_v47, %v5401_v43  ;;  %v2328_v56 = vmul.f32 %v2264_v27, %v5401_v43  ;;  %v1597_v21 = vld [vmem:[#allocation10 + $0xf0] sm:$0xff] }
 0x245   :  { %v1658_v57 = vunpack.c.h.bf16 %v1596_v44  ;;  %v1720_v58 = vmul.f32 %v1656_v49, %v5386_v34  ;;  %v1817_v59 = vunpack.c.h.bf16 %v1756_v45  ;;  %v2165_v61 = vadd.f32 %v2101_v48, %v1940_v28  ;;  %v1758_v48 = vld [vmem:[#allocation10 + $0x1f0] sm:$0xff]  ;;  %v1984_v28 = vld [vmem:[#allocation10 + $0x2f8] sm:$0xff] }
 0x246   :  { %2487 = vmatprep.subr.bf16.mxu1 %v2429_v52  ;;  %v2167_v60 = vadd.f32 %v2103_v46, %v1942_v33  ;;  %v1819_v63 = vunpack.c.h.bf16 %v1757_v50  ;;  %v2042_v0 = vunpack.c.h.bf16 %v1981_v51  ;;  %v2044_v4 = vunpack.c.h.bf16 %v1982_v54  ;;  %v1983_v52 = vld [vmem:[#allocation10 + $0x2f0] sm:$0xff] }
 0x247   :  { %v1722_v62 = vmul.f32 %v1658_v57, %v5386_v34  ;;  %v1881_v3 = vmul.f32 %v1817_v59, %v5389_v35  ;;  %v2267_v5 = vunpack.c.h.bf16 %v2206_v55  ;;  %v2390_v6 = vadd.f32 %v2326_v53, %v2165_v61  ;;  %v2208_v57 = vld [vmem:[#allocation10 + $0x3f0] sm:$0xff] }
 0x248   :  { %v2392_v7 = vadd.f32 %v2328_v56, %v2167_v60  ;;  %v1883_v8 = vmul.f32 %v1819_v63, %v5389_v35  ;;  %v2106_v9 = vmul.f32 %v2042_v0, %v5398_v42  ;;  %v2108_v11 = vmul.f32 %v2044_v4, %v5398_v42  ;;  %v2209_v60 = vld [vmem:[#allocation10 + $0x3f8] sm:$0xff] }
 0x249   :  { %v1945_v10 = vadd.f32 %v1881_v3, %v1720_v58  ;;  %v2269_v14 = vunpack.c.h.bf16 %v2207_v1  ;;  %v2331_v15 = vmul.f32 %v2267_v5, %v5401_v43  ;;  %v1655_v22 = vunpack.c.l.bf16 %v1595_v37 }
 0x24a   :  { %v2428_v16 = vpack.c.bf16 %v2392_v7, %v2390_v6  ;;  %v1947_v17 = vadd.f32 %v1883_v8, %v1722_v62  ;;  %v1657_v23 = vunpack.c.l.bf16 %v1596_v44  ;;  %v1816_v29 = vunpack.c.l.bf16 %v1756_v45 }
 0x24b   :  { %v2170_v24 = vadd.f32 %v2106_v9, %v1945_v10  ;;  %v2333_v25 = vmul.f32 %v2269_v14, %v5401_v43  ;;  %v1818_v30 = vunpack.c.l.bf16 %v1757_v50  ;;  %v1719_v32 = vmul.f32 %v1655_v22, %v5386_v34 }
 0x24c   :  { %2488 = vmatpush1.bf16.msra.mxu1 %v2428_v16  ;;  %v2172_v31 = vadd.f32 %v2108_v11, %v1947_v17  ;;  %v1721_v36 = vmul.f32 %v1657_v23, %v5386_v34  ;;  %v2041_v20 = vunpack.c.l.bf16 %v1981_v51  ;;  %v1880_v40 = vmul.f32 %v1816_v29, %v5389_v35  ;;  %v1759_v51 = vld [vmem:[#allocation10 + $0x1f8] sm:$0xff] }
 0x24d   :  { %v2395_v39 = vadd.f32 %v2331_v15, %v2170_v24  ;;  %v1882_v41 = vmul.f32 %v1818_v30, %v5389_v35  ;;  %v2043_v37 = vunpack.c.l.bf16 %v1982_v54  ;;  %v2266_v44 = vunpack.c.l.bf16 %v2206_v55 }
 0x24e   :  { %v2397_v26 = vadd.f32 %v2333_v25, %v2172_v31  ;;  %v2105_v47 = vmul.f32 %v2041_v20, %v5398_v42  ;;  %v2268_v45 = vunpack.c.l.bf16 %v2207_v1  ;;  %v1944_v46 = vadd.f32 %v1880_v40, %v1719_v32  ;;  %v2514_v40 = vld [vmem:[#allocation13] sm:$0xff] }
 0x24f   :  { %v1946_v27 = vadd.f32 %v1882_v41, %v1721_v36  ;;  %v2107_v49 = vmul.f32 %v2043_v37, %v5398_v42  ;;  %v1660_v50 = vunpack.c.h.bf16 %v1597_v21  ;;  %v2330_v53 = vmul.f32 %v2266_v44, %v5401_v43 }
 0x250   :  { %v2431_v33 = vpack.c.bf16 %v2397_v26, %v2395_v39  ;;  %v2332_v54 = vmul.f32 %v2268_v45, %v5401_v43  ;;  %v1662_v56 = vunpack.c.h.bf16 %v1598_v38  ;;  %v2169_v58 = vadd.f32 %v2105_v47, %v1944_v46  ;;  %v2517_v26 = vld [vmem:[#allocation13 + $0x14] sm:$0xff]  ;;  %v2931_v46 = vld [vmem:[#allocation13 + $0x280] sm:$0xff] }
 0x251   :  { %v2171_v59 = vadd.f32 %v2107_v49, %v1946_v27  ;;  %v1724_v55 = vmul.f32 %v1660_v50, %v5386_v34  ;;  %v1821_v61 = vunpack.c.h.bf16 %v1758_v48  ;;  %v1823_v0 = vunpack.c.h.bf16 %v1759_v51 }
 0x252   :  { %2489 = vmatprep.subr.bf16.mxu1 %v2431_v33  ;;  %v1726_v63 = vmul.f32 %v1662_v56, %v5386_v34  ;;  %v2046_v1 = vunpack.c.h.bf16 %v1983_v52  ;;  %v2048_v62 = vunpack.c.h.bf16 %v1984_v28  ;;  %v2394_v3 = vadd.f32 %v2330_v53, %v2169_v58  ;;  %v3508_v56 = vld [vmem:[#allocation13 + $0x500] sm:$0xff] }
 0x253   :  { %v2396_v4 = vadd.f32 %v2332_v54, %v2171_v59  ;;  %v1885_v5 = vmul.f32 %v1821_v61, %v5389_v35  ;;  %v2271_v6 = vunpack.c.h.bf16 %v2208_v57  ;;  %v1887_v7 = vmul.f32 %v1823_v0, %v5389_v35  ;;  %v3511_v61 = vld [vmem:[#allocation13 + $0x514] sm:$0xff] }
 0x254   :  { %v2110_v8 = vmul.f32 %v2046_v1, %v5398_v42  ;;  %v2112_v9 = vmul.f32 %v2048_v62, %v5398_v42  ;;  %v2273_v10 = vunpack.c.h.bf16 %v2209_v60  ;;  %v1659_v16 = vunpack.c.l.bf16 %v1597_v21  ;;  %v4085_v62 = vld [vmem:[#allocation13 + $0x780] sm:$0xff] }
 0x255   :  { %v2430_v11 = vpack.c.bf16 %v2396_v4, %v2394_v3  ;;  %v1949_v14 = vadd.f32 %v1885_v5, %v1724_v55  ;;  %v2335_v15 = vmul.f32 %v2271_v6, %v5401_v43  ;;  %v1951_v17 = vadd.f32 %v1887_v7, %v1726_v63  ;;  %v4088_v7 = vld [vmem:[#allocation13 + $0x794] sm:$0xff] }
 0x256   :  { %v2337_v22 = vmul.f32 %v2273_v10, %v5401_v43  ;;  %v1661_v23 = vunpack.c.l.bf16 %v1598_v38  ;;  %v1820_v24 = vunpack.c.l.bf16 %v1758_v48  ;;  %v1723_v29 = vmul.f32 %v1659_v16, %v5386_v34 }
 0x257   :  { %2490 = vmatpush1.bf16.msra.mxu1 %v2430_v11  ;;  %v2174_v25 = vadd.f32 %v2110_v8, %v1949_v14  ;;  %v1822_v30 = vunpack.c.l.bf16 %v1759_v51  ;;  %v2045_v31 = vunpack.c.l.bf16 %v1983_v52  ;;  %v2176_v32 = vadd.f32 %v2112_v9, %v1951_v17  ;;  %v2934_v52 = vld [vmem:[#allocation13 + $0x294] sm:$0xff] }
 0x258   :  { %v1725_v36 = vmul.f32 %v1661_v23, %v5386_v34  ;;  %v1884_v20 = vmul.f32 %v1820_v24, %v5389_v35  ;;  %v2047_v39 = vunpack.c.l.bf16 %v1984_v28  ;;  %v2270_v38 = vunpack.c.l.bf16 %v2208_v57 }
 0x259   :  { %v2399_v41 = vadd.f32 %v2335_v15, %v2174_v25  ;;  %v1886_v21 = vmul.f32 %v1822_v30, %v5389_v35  ;;  %v2109_v37 = vmul.f32 %v2045_v31, %v5398_v42  ;;  %v2401_v47 = vadd.f32 %v2337_v22, %v2176_v32 }
 0x25a   :  { %v1948_v44 = vadd.f32 %v1884_v20, %v1723_v29  ;;  %v2111_v45 = vmul.f32 %v2047_v39, %v5398_v42  ;;  %v2272_v48 = vunpack.c.l.bf16 %v2209_v60  ;;  %v2334_v49 = vmul.f32 %v2270_v38, %v5401_v43 }
 0x25b   :  { %v1950_v27 = vadd.f32 %v1886_v21, %v1725_v36  ;;  %v2610_v50 = vunpack.c.l.bf16 %v2514_v40  ;;  %v2611_v51 = vunpack.c.h.bf16 %v2514_v40  ;;  %v2433_v28 = vpack.c.bf16 %v2401_v47, %v2399_v41  ;;  %v2515_v41 = vld [vmem:[#allocation13 + $0x8] sm:$0xff]  ;;  %v2518_v47 = vld [vmem:[#allocation13 + $0x1c] sm:$0xff] }
 0x25c   :  { %v2173_v33 = vadd.f32 %v2109_v37, %v1948_v44  ;;  %v2336_v53 = vmul.f32 %v2272_v48, %v5401_v43  ;;  %v2615_v54 = vunpack.c.l.bf16 %v2517_v26  ;;  %v2616_v58 = vunpack.c.h.bf16 %v2517_v26 }
 0x25d   :  { %v2175_v57 = vadd.f32 %v2111_v45, %v1950_v27  ;;  %v2771_v59 = vmul.f32 %v2611_v51, %v5386_v34  ;;  %v3027_v55 = vunpack.c.l.bf16 %v2931_v46  ;;  %2491 = vmatprep.subr.bf16.mxu1 %v2433_v28  ;;  %v3028_v63 = vunpack.c.h.bf16 %v2931_v46  ;;  %v2932_v27 = vld [vmem:[#allocation13 + $0x288] sm:$0xff]  ;;  %v2935_v28 = vld [vmem:[#allocation13 + $0x29c] sm:$0xff] }
 0x25e   :  { %v2398_v60 = vadd.f32 %v2334_v49, %v2173_v33  ;;  %v3032_v0 = vunpack.c.l.bf16 %v2934_v52  ;;  %v3033_v1 = vunpack.c.h.bf16 %v2934_v52  ;;  %v2776_v4 = vmul.f32 %v2616_v58, %v5386_v34 }
 0x25f   :  { %v2400_v3 = vadd.f32 %v2336_v53, %v2175_v57  ;;  %v3604_v5 = vunpack.c.l.bf16 %v3508_v56  ;;  %v3605_v6 = vunpack.c.h.bf16 %v3508_v56  ;;  %v3188_v8 = vmul.f32 %v3028_v63, %v5389_v35  ;;  %v3509_v57 = vld [vmem:[#allocation13 + $0x508] sm:$0xff] }
 0x260   :  { %v3193_v9 = vmul.f32 %v3033_v1, %v5389_v35  ;;  %v3609_v10 = vunpack.c.l.bf16 %v3511_v61  ;;  %v3610_v11 = vunpack.c.h.bf16 %v3511_v61  ;;  %v4181_v16 = vunpack.c.l.bf16 %v4085_v62  ;;  %v4086_v63 = vld [vmem:[#allocation13 + $0x788] sm:$0xff] }
 0x261   :  { %v2432_v14 = vpack.c.bf16 %v2400_v3, %v2398_v60  ;;  %v3765_v15 = vmul.f32 %v3605_v6, %v5398_v42  ;;  %v4182_v17 = vunpack.c.h.bf16 %v4085_v62  ;;  %v3348_v22 = vadd.f32 %v3188_v8, %v2771_v59  ;;  %v3512_v60 = vld [vmem:[#allocation13 + $0x51c] sm:$0xff] }
 0x262   :  { %v3353_v23 = vadd.f32 %v3193_v9, %v2776_v4  ;;  %v3770_v24 = vmul.f32 %v3610_v11, %v5398_v42  ;;  %v4186_v25 = vunpack.c.l.bf16 %v4088_v7  ;;  %v4187_v29 = vunpack.c.h.bf16 %v4088_v7  ;;  %v4089_v4 = vld [vmem:[#allocation13 + $0x79c] sm:$0xff] }
 0x263   :  { %2492 = vmatpush1.bf16.msra.mxu1 %v2432_v14  ;;  %v4342_v30 = vmul.f32 %v4182_v17, %v5401_v43  ;;  %v2770_v31 = vmul.f32 %v2610_v50, %v5386_v34  ;;  %v2775_v32 = vmul.f32 %v2615_v54, %v5386_v34  ;;  %v3925_v36 = vadd.f32 %v3765_v15, %v3348_v22 }
 0x264   :  { %v3930_v20 = vadd.f32 %v3770_v24, %v3353_v23  ;;  %v3187_v39 = vmul.f32 %v3027_v55, %v5389_v35  ;;  %v3192_v40 = vmul.f32 %v3032_v0, %v5389_v35  ;;  %v1470_v21 = vrot.slane %v5963_v12, %v5972_v19 }
 0x265   :  { %v4347_v37 = vmul.f32 %v4187_v29, %v5401_v43  ;;  %v3764_v38 = vmul.f32 %v3604_v5, %v5398_v42  ;;  %v3769_v26 = vmul.f32 %v3609_v10, %v5398_v42  ;;  %v4502_v44 = vadd.f32 %v4342_v30, %v3925_v36 }
 0x266   :  { %v3347_v45 = vadd.f32 %v3187_v39, %v2770_v31  ;;  %v3352_v48 = vadd.f32 %v3192_v40, %v2775_v32  ;;  %v4341_v46 = vmul.f32 %v4181_v16, %v5401_v43  ;;  %v4346_v50 = vmul.f32 %v4186_v25, %v5401_v43 }
 0x267   :  { %v4507_v49 = vadd.f32 %v4347_v37, %v3930_v20  ;;  %v2612_v51 = vunpack.c.l.bf16 %v2515_v41  ;;  %v2613_v52 = vunpack.c.h.bf16 %v2515_v41  ;;  %v2617_v54 = vunpack.c.l.bf16 %v2518_v47  ;;  %v2520_v20 = vld [vmem:[#allocation13 + $0x28] sm:$0xff] }
 0x268   :  { %v3924_v33 = vadd.f32 %v3764_v38, %v3347_v45  ;;  %v3929_v53 = vadd.f32 %v3769_v26, %v3352_v48  ;;  %v2618_v56 = vunpack.c.h.bf16 %v2518_v47  ;;  %v3029_v55 = vunpack.c.l.bf16 %v2932_v27  ;;  %v2523_v38 = vld [vmem:[#allocation13 + $0x3c] sm:$0xff]  ;;  %v2937_v48 = vld [vmem:[#allocation13 + $0x2a8] sm:$0xff] }
 0x269   :  { %v4662_v58 = vpack.c.bf16 %v4507_v49, %v4502_v44  ;;  %v2773_v59 = vmul.f32 %v2613_v52, %v5386_v34  ;;  %v3030_v61 = vunpack.c.h.bf16 %v2932_v27  ;;  %v3034_v62 = vunpack.c.l.bf16 %v2935_v28 }
 0x26a   :  { %v6084_v0 = vadd.f32 %v4341_v46, %v3924_v33  ;;  %v2778_v1 = vmul.f32 %v2618_v56, %v5386_v34  ;;  %v3035_v3 = vunpack.c.h.bf16 %v2935_v28  ;;  %v6087_v5 = vadd.f32 %v4346_v50, %v3929_v53 }
 0x26b   :  { %4783 = vmatprep.subr.bf16.mxu1 %v4662_v58  ;;  %v3190_v6 = vmul.f32 %v3030_v61, %v5389_v35  ;;  %v3606_v7 = vunpack.c.l.bf16 %v3509_v57  ;;  %v3607_v8 = vunpack.c.h.bf16 %v3509_v57  ;;  %v3611_v10 = vunpack.c.l.bf16 %v3512_v60  ;;  %v4091_v61 = vld [vmem:[#allocation13 + $0x7a8] sm:$0xff] }
 0x26c   :  { %v3195_v9 = vmul.f32 %v3035_v3, %v5389_v35  ;;  %v3612_v11 = vunpack.c.h.bf16 %v3512_v60  ;;  %v4183_v14 = vunpack.c.l.bf16 %v4086_v63  ;;  %v4184_v17 = vunpack.c.h.bf16 %v4086_v63 }
 0x26d   :  { %v3350_v15 = vadd.f32 %v3190_v6, %v2773_v59  ;;  %v3767_v16 = vmul.f32 %v3607_v8, %v5398_v42  ;;  %v4188_v22 = vunpack.c.l.bf16 %v4089_v4  ;;  %v4189_v25 = vunpack.c.h.bf16 %v4089_v4  ;;  %v4094_v8 = vld [vmem:[#allocation13 + $0x7bc] sm:$0xff] }
 0x26e   :  { %v3355_v23 = vadd.f32 %v3195_v9, %v2778_v1  ;;  %v3772_v24 = vmul.f32 %v3612_v11, %v5398_v42  ;;  %v2772_v29 = vmul.f32 %v2612_v51, %v5386_v34  ;;  %v4344_v31 = vmul.f32 %v4184_v17, %v5401_v43  ;;  %v2940_v51 = vld [vmem:[#allocation13 + $0x2bc] sm:$0xff] }
 0x26f   :  { %v3927_v30 = vadd.f32 %v3767_v16, %v3350_v15  ;;  %v2777_v32 = vmul.f32 %v2617_v54, %v5386_v34  ;;  %v3189_v36 = vmul.f32 %v3029_v55, %v5389_v35  ;;  %v4349_v40 = vmul.f32 %v4189_v25, %v5401_v43  ;;  %v3514_v54 = vld [vmem:[#allocation13 + $0x528] sm:$0xff]  ;;  %v3517_v55 = vld [vmem:[#allocation13 + $0x53c] sm:$0xff] }
 0x270   :  { %v3932_v39 = vadd.f32 %v3772_v24, %v3355_v23  ;;  %v3194_v41 = vmul.f32 %v3034_v62, %v5389_v35  ;;  %v3766_v37 = vmul.f32 %v3606_v7, %v5398_v42  ;;  %v3771_v44 = vmul.f32 %v3611_v10, %v5398_v42 }
 0x271   :  { %v4504_v26 = vadd.f32 %v4344_v31, %v3927_v30  ;;  %v3349_v47 = vadd.f32 %v3189_v36, %v2772_v29  ;;  %v4343_v45 = vmul.f32 %v4183_v14, %v5401_v43  ;;  %v4348_v49 = vmul.f32 %v4188_v22, %v5401_v43 }
 0x272   :  { %v4509_v46 = vadd.f32 %v4349_v40, %v3932_v39  ;;  %v3354_v27 = vadd.f32 %v3194_v41, %v2777_v32  ;;  %v2620_v50 = vunpack.c.l.bf16 %v2520_v20  ;;  %v2621_v28 = vunpack.c.h.bf16 %v2520_v20 }
 0x273   :  { %v3926_v52 = vadd.f32 %v3766_v37, %v3349_v47  ;;  %v2625_v33 = vunpack.c.l.bf16 %v2523_v38  ;;  %v2626_v53 = vunpack.c.h.bf16 %v2523_v38  ;;  %v3037_v58 = vunpack.c.l.bf16 %v2937_v48  ;;  %v6115_v37 = vld [vmem:[#allocation13 + $0x30] sm:$0xff] }
 0x274   :  { %v4664_v56 = vpack.c.bf16 %v4509_v46, %v4504_v26  ;;  %v3931_v57 = vadd.f32 %v3771_v44, %v3354_v27  ;;  %v3038_v59 = vunpack.c.h.bf16 %v2937_v48  ;;  %v2781_v63 = vmul.f32 %v2621_v28, %v5386_v34 }
 0x275   :  { %v4503_v60 = vadd.f32 %v4343_v45, %v3926_v52  ;;  %v2786_v1 = vmul.f32 %v2626_v53, %v5386_v34  ;;  %v3042_v62 = vunpack.c.l.bf16 %v2940_v51  ;;  %v3043_v4 = vunpack.c.h.bf16 %v2940_v51 }
 0x276   :  { %4824 = vmatprep.subr.bf16.mxu0 %v4664_v56  ;;  %v4508_v3 = vadd.f32 %v4348_v49, %v3931_v57  ;;  %v3198_v6 = vmul.f32 %v3038_v59, %v5389_v35  ;;  %v3614_v7 = vunpack.c.l.bf16 %v3514_v54  ;;  %v3615_v9 = vunpack.c.h.bf16 %v3514_v54  ;;  %v2938_v59 = vld [vmem:[#allocation13 + $0x2b0] sm:$0xff] }
 0x277   :  { %v3619_v10 = vunpack.c.l.bf16 %v3517_v55  ;;  %v3620_v11 = vunpack.c.h.bf16 %v3517_v55  ;;  %v4191_v14 = vunpack.c.l.bf16 %v4091_v61  ;;  %v3203_v16 = vmul.f32 %v3043_v4, %v5389_v35  ;;  %v3515_v4 = vld [vmem:[#allocation13 + $0x530] sm:$0xff] }
 0x278   :  { %v4663_v15 = vpack.c.bf16 %v4508_v3, %v4503_v60  ;;  %v3358_v17 = vadd.f32 %v3198_v6, %v2781_v63  ;;  %v4192_v22 = vunpack.c.h.bf16 %v4091_v61  ;;  %v3775_v23 = vmul.f32 %v3615_v9, %v5398_v42 }
 0x279   :  { %v3780_v24 = vmul.f32 %v3620_v11, %v5398_v42  ;;  %v4196_v25 = vunpack.c.l.bf16 %v4094_v8  ;;  %v4197_v29 = vunpack.c.h.bf16 %v4094_v8  ;;  %v3363_v30 = vadd.f32 %v3203_v16, %v2786_v1  ;;  %v2941_v1 = vld [vmem:[#allocation13 + $0x2c4] sm:$0xff] }
 0x27a   :  { %4825 = vmatpush1.bf16.msra.mxu0 %v4663_v15  ;;  %v4352_v31 = vmul.f32 %v4192_v22, %v5401_v43  ;;  %v2780_v32 = vmul.f32 %v2620_v50, %v5386_v34  ;;  %v2785_v36 = vmul.f32 %v2625_v33, %v5386_v34  ;;  %v3935_v20 = vadd.f32 %v3775_v23, %v3358_v17  ;;  %v2524_v50 = vld [vmem:[#allocation13 + $0x44] sm:$0xff]  ;;  %v4092_v17 = vld [vmem:[#allocation13 + $0x7b0] sm:$0xff] }
 0x27b   :  { %v4357_v39 = vmul.f32 %v4197_v29, %v5401_v43  ;;  %v3197_v40 = vmul.f32 %v3037_v58, %v5389_v35  ;;  %v3202_v41 = vmul.f32 %v3042_v62, %v5389_v35  ;;  %v3940_v38 = vadd.f32 %v3780_v24, %v3363_v30 }
 0x27c   :  { %v3774_v26 = vmul.f32 %v3614_v7, %v5398_v42  ;;  %v3779_v47 = vmul.f32 %v3619_v10, %v5398_v42  ;;  %v4351_v44 = vmul.f32 %v4191_v14, %v5401_v43  ;;  %v6120_v48 = vadd.f32 %v4352_v31, %v3935_v20  ;;  %v3518_v10 = vld [vmem:[#allocation13 + $0x544] sm:$0xff] }
 0x27d   :  { %v1548_v45 = vpop.f32.mrb[0].mxu0  ;;  %v3357_v46 = vadd.f32 %v3197_v40, %v2780_v32  ;;  %v3362_v27 = vadd.f32 %v3202_v41, %v2785_v36  ;;  %v4356_v49 = vmul.f32 %v4196_v25, %v5401_v43  ;;  %v6128_v28 = vadd.f32 %v4357_v39, %v3940_v38  ;;  %v4095_v25 = vld [vmem:[#allocation13 + $0x7c4] sm:$0xff] }
 0x27e   :  { %v6126_v51 = vadd.f32 %v1548_v45, %v1466_v18  ;;  %v1550_v52 = vpop.f32.mrb[1].mxu0  ;;  %v2623_v33 = vunpack.c.h.bf16 %v6115_v37  ;;  %v4661_v56 = vpack.c.bf16 %v6087_v5, %v6084_v0  ;;  %v2622_v61 = vunpack.c.l.bf16 %v6115_v37 }
 0x27f   :  { %v6134_v53 = vadd.f32 %v1550_v52, %v1470_v21  ;;  %v1552_v54 = vpop.f32.mrb[2].mxu0  ;;  %v3934_v57 = vadd.f32 %v3774_v26, %v3357_v46  ;;  %v3939_v58 = vadd.f32 %v3779_v47, %v3362_v27  ;;  %v2627_v60 = vunpack.c.l.bf16 %v2524_v50  ;;  %v2526_v52 = vld [vmem:[#allocation13 + $0x50] sm:$0xff] }
 0x280   :  { %v1557_v18 = vmin.f32 %v6126_v51, 0.0  ;;  %v1553_v55 = vpop.f32.mrb[3].mxu0  ;;  %v2628_v63 = vunpack.c.h.bf16 %v2524_v50  ;;  %v4667_v12 = vpack.c.bf16 %v6128_v28, %v6120_v48  ;;  %v2783_v7 = vmul.f32 %v2623_v33, %v5386_v34  ;;  %v2529_v33 = vld [vmem:[#allocation13 + $0x64] sm:$0xff] }
 0x281   :  { %v1558_v62 = vmin.f32 %v6134_v53, 0.0  ;;  %v6143_v21 = vadd.f32 %v4351_v44, %v3934_v57  ;;  %v6145_v3 = vadd.f32 %v4356_v49, %v3939_v58  ;;  %v3039_v9 = vunpack.c.l.bf16 %v2938_v59 }
 0x282   :  { %v1559_v6 = vmul.f32 1.442695, %v1557_v18  ;;  %v2788_v8 = vmul.f32 %v2628_v63, %v5386_v34  ;;  %v3040_v15 = vunpack.c.h.bf16 %v2938_v59  ;;  %v3044_v16 = vunpack.c.l.bf16 %v2941_v1  ;;  %v2943_v18 = vld [vmem:[#allocation13 + $0x2d0] sm:$0xff] }
 0x283   :  { %v1561_v11 = vmul.f32 1.442695, %v1558_v62  ;;  %v4666_v14 = vpack.c.bf16 %v6145_v3, %v6143_v21  ;;  %v3045_v22 = vunpack.c.h.bf16 %v2941_v1  ;;  %v3616_v23 = vunpack.c.l.bf16 %v3515_v4  ;;  %v2946_v1 = vld [vmem:[#allocation13 + $0x2e4] sm:$0xff] }
 0x284   :  { %4982 = vpow2.f32 %v1559_v6  ;;  %v3617_v24 = vunpack.c.h.bf16 %v3515_v4  ;;  %v3200_v29 = vmul.f32 %v3040_v15, %v5389_v35  ;;  %v3621_v30 = vunpack.c.l.bf16 %v3518_v10  ;;  %v3520_v15 = vld [vmem:[#allocation13 + $0x550] sm:$0xff] }
 0x285   :  { %4984 = vpow2.f32 %v1561_v11  ;;  %v3622_v31 = vunpack.c.h.bf16 %v3518_v10  ;;  %v3205_v32 = vmul.f32 %v3045_v22, %v5389_v35  ;;  %v4193_v20 = vunpack.c.l.bf16 %v4092_v17 }
 0x286   :  { %v3777_v36 = vmul.f32 %v3617_v24, %v5398_v42  ;;  %v4194_v39 = vunpack.c.h.bf16 %v4092_v17  ;;  %v3360_v40 = vadd.f32 %v3200_v29, %v2783_v7  ;;  %v4198_v37 = vunpack.c.l.bf16 %v4095_v25 }
 0x287   :  { %v3782_v41 = vmul.f32 %v3622_v31, %v5398_v42  ;;  %v4199_v38 = vunpack.c.h.bf16 %v4095_v25  ;;  %vm1555_vm0 = vcmp.gt.f32.partialorder %v6126_v51, 0.0  ;;  %v3365_v26 = vadd.f32 %v3205_v32, %v2788_v8  ;;  %v3523_v25 = vld [vmem:[#allocation13 + $0x564] sm:$0xff] }
 0x288   :  { %v4354_v47 = vmul.f32 %v4194_v39, %v5401_v43  ;;  %v2782_v44 = vmul.f32 %v2622_v61, %v5386_v34  ;;  %v2787_v45 = vmul.f32 %v2627_v60, %v5386_v34  ;;  %vm1556_vm1 = vcmp.gt.f32.partialorder %v6134_v53, 0.0 }
 0x289   :  { %v3937_v46 = vadd.f32 %v3777_v36, %v3360_v40  ;;  %v4359_v27 = vmul.f32 %v4199_v38, %v5401_v43  ;;  %v3199_v49 = vmul.f32 %v3039_v9, %v5389_v35  ;;  %v3204_v50 = vmul.f32 %v3044_v16, %v5389_v35 }
 0x28a   :  { %v3942_v54 = vadd.f32 %v3782_v41, %v3365_v26  ;;  %v3776_v57 = vmul.f32 %v3616_v23, %v5398_v42  ;;  %v3781_v58 = vmul.f32 %v3621_v30, %v5398_v42  ;;  %v4353_v59 = vmul.f32 %v4193_v20, %v5401_v43 }
 0x28b   :  { %v4514_v55 = vadd.f32 %v4354_v47, %v3937_v46  ;;  %v3359_v61 = vadd.f32 %v3199_v49, %v2782_v44  ;;  %v3364_v60 = vadd.f32 %v3204_v50, %v2787_v45  ;;  %v4358_v63 = vmul.f32 %v4198_v37, %v5401_v43  ;;  %v4097_v37 = vld [vmem:[#allocation13 + $0x7d0] sm:$0xff]  ;;  %v4100_v45 = vld [vmem:[#allocation13 + $0x7e4] sm:$0xff] }
 0x28c   :  { %v4519_v62 = vadd.f32 %v4359_v27, %v3942_v54  ;;  %v2630_v4 = vunpack.c.l.bf16 %v2526_v52  ;;  %v2631_v6 = vunpack.c.h.bf16 %v2526_v52  ;;  %v2635_v7 = vunpack.c.l.bf16 %v2529_v33 }
 0x28d   :  { %v3936_v8 = vadd.f32 %v3776_v57, %v3359_v61  ;;  %v3941_v9 = vadd.f32 %v3781_v58, %v3364_v60  ;;  %v2636_v10 = vunpack.c.h.bf16 %v2529_v33  ;;  %v3047_v11 = vunpack.c.l.bf16 %v2943_v18 }
 0x28e   :  { %v4983_v16 = vpop.eup %4982  ;;  %v4669_v17 = vpack.c.bf16 %v4519_v62, %v4514_v55  ;;  %v2791_v22 = vmul.f32 %v2631_v6, %v5386_v34  ;;  %v3048_v23 = vunpack.c.h.bf16 %v2943_v18  ;;  %v3052_v24 = vunpack.c.l.bf16 %v2946_v1 }
 0x28f   :  { %v4985_v29 = vpop.eup %4984  ;;  %v4932_v30 = vadd.f32 -1.0, %v4983_v16  ;;  %v4513_v31 = vadd.f32 %v4353_v59, %v3936_v8  ;;  %v4518_v32 = vadd.f32 %v4358_v63, %v3941_v9  ;;  %v2796_v36 = vmul.f32 %v2636_v10, %v5386_v34  ;;  %v2527_v8 = vld [vmem:[#allocation13 + $0x58] sm:$0xff]  ;;  %v2530_v9 = vld [vmem:[#allocation13 + $0x6c] sm:$0xff] }
 0x290   :  { %v4933_v20 = vadd.f32 -1.0, %v4985_v29  ;;  %4826 = vmatprep.subr.bf16.mxu0 %v4669_v17  ;;  %v3053_v39 = vunpack.c.h.bf16 %v2946_v1  ;;  %v3208_v40 = vmul.f32 %v3048_v23, %v5389_v35  ;;  %v3624_v41 = vunpack.c.l.bf16 %v3520_v15  ;;  %v2944_v16 = vld [vmem:[#allocation13 + $0x2d8] sm:$0xff] }
 0x291   :  { %v1565_v38 = vsel %vm1555_vm0, %v6126_v51, %v4932_v30  ;;  %v4668_v26 = vpack.c.bf16 %v4518_v32, %v4513_v31  ;;  %v3625_v47 = vunpack.c.h.bf16 %v3520_v15  ;;  %v3629_v44 = vunpack.c.l.bf16 %v3523_v25 }
 0x292   :  { %v1566_v46 = vsel %vm1556_vm1, %v6134_v53, %v4933_v20  ;;  %v2448_v27 = vpack.c.bf16 %v1565_v38, %v1565_v38  ;;  %v3213_v49 = vmul.f32 %v3053_v39, %v5389_v35  ;;  %v3368_v50 = vadd.f32 %v3208_v40, %v2791_v22  ;;  %v3524_v20 = vld [vmem:[#allocation13 + $0x56c] sm:$0xff]  ;;  %v4098_v40 = vld [vmem:[#allocation13 + $0x7d8] sm:$0xff] }
 0x293   :  { %v2449_v52 = vpack.c.bf16 %v1566_v46, %v1566_v46  ;;  %4827 = vmatpush1.bf16.msra.mxu0 %v4668_v26  ;;  %v3630_v33 = vunpack.c.h.bf16 %v3523_v25  ;;  %v3785_v54 = vmul.f32 %v3625_v47, %v5398_v42  ;;  %v4201_v57 = vunpack.c.l.bf16 %v4097_v37  ;;  %v4101_v47 = vld [vmem:[#allocation13 + $0x7ec] sm:$0xff] }
 0x294   :  { %v3373_v58 = vadd.f32 %v3213_v49, %v2796_v36  ;;  %v4202_v51 = vunpack.c.h.bf16 %v4097_v37  ;;  %v4206_v59 = vunpack.c.l.bf16 %v4100_v45  ;;  %v4207_v18 = vunpack.c.h.bf16 %v4100_v45  ;;  %v3521_v36 = vld [vmem:[#allocation13 + $0x558] sm:$0xff] }
 0x295   :  { %2493 = vmatprep.mubr.bf16.mxu1 %v2449_v52  ;;  %v3790_v55 = vmul.f32 %v3630_v33, %v5398_v42  ;;  %v3945_v61 = vadd.f32 %v3785_v54, %v3368_v50  ;;  %v2790_v53 = vmul.f32 %v2630_v4, %v5386_v34  ;;  %v2795_v60 = vmul.f32 %v2635_v7, %v5386_v34 }
 0x296   :  { %2494 = vmatmul.mubr.bf16.vlgmr.msra.gmra.mrb[0].mxu1 %v2448_v27  ;;  %v4362_v63 = vmul.f32 %v4202_v51, %v5401_v43  ;;  %v4367_v1 = vmul.f32 %v4207_v18, %v5401_v43  ;;  %v3207_v62 = vmul.f32 %v3047_v11, %v5389_v35  ;;  %v3212_v6 = vmul.f32 %v3052_v24, %v5389_v35  ;;  %v2947_v24 = vld [vmem:[#allocation13 + $0x2ec] sm:$0xff] }
 0x297   :  { %4784 = vmatpush1.bf16.msra.mxu1 %v4661_v56  ;;  %v3950_v10 = vadd.f32 %v3790_v55, %v3373_v58  ;;  %v3784_v4 = vmul.f32 %v3624_v41, %v5398_v42  ;;  %v3789_v7 = vmul.f32 %v3629_v44, %v5398_v42  ;;  %v4361_v15 = vmul.f32 %v4201_v57, %v5401_v43 }
 0x298   :  { %4785 = vmatprep.subr.bf16.mxu1 %v4667_v12  ;;  %v4522_v11 = vadd.f32 %v4362_v63, %v3945_v61  ;;  %v3367_v17 = vadd.f32 %v3207_v62, %v2790_v53  ;;  %v3372_v22 = vadd.f32 %v3212_v6, %v2795_v60  ;;  %v4366_v23 = vmul.f32 %v4206_v59, %v5401_v43  ;;  %v2532_v60 = vld [vmem:[#allocation13 + $0x78] sm:$0xff] }
 0x299   :  { %v4527_v0 = vadd.f32 %v4367_v1, %v3950_v10  ;;  %v2632_v5 = vunpack.c.l.bf16 %v2527_v8  ;;  %v2633_v56 = vunpack.c.h.bf16 %v2527_v8  ;;  %v2637_v25 = vunpack.c.l.bf16 %v2530_v9  ;;  %v2535_v8 = vld [vmem:[#allocation13 + $0x8c] sm:$0xff] }
 0x29a   :  { %v3944_v29 = vadd.f32 %v3784_v4, %v3367_v17  ;;  %v3949_v30 = vadd.f32 %v3789_v7, %v3372_v22  ;;  %v2638_v31 = vunpack.c.h.bf16 %v2530_v9  ;;  %v3049_v32 = vunpack.c.l.bf16 %v2944_v16 }
 0x29b   :  { %4786 = vmatpush1.bf16.msra.mxu1 %v4666_v14  ;;  %v4672_v48 = vpack.c.bf16 %v4527_v0, %v4522_v11  ;;  %v2793_v28 = vmul.f32 %v2633_v56, %v5386_v34  ;;  %v3050_v12 = vunpack.c.h.bf16 %v2944_v16  ;;  %v3054_v39 = vunpack.c.l.bf16 %v2947_v24 }
 0x29c   :  { %v4521_v41 = vadd.f32 %v4361_v15, %v3944_v29  ;;  %v4526_v37 = vadd.f32 %v4366_v23, %v3949_v30  ;;  %v2798_v38 = vmul.f32 %v2638_v31, %v5386_v34  ;;  %v3055_v26 = vunpack.c.h.bf16 %v2947_v24  ;;  %v2949_v15 = vld [vmem:[#allocation13 + $0x2f8] sm:$0xff]  ;;  %v2952_v23 = vld [vmem:[#allocation13 + $0x30c] sm:$0xff] }
 0x29d   :  { %4787 = vmatprep.subr.bf16.mxu1 %v4672_v48  ;;  %v3210_v44 = vmul.f32 %v3050_v12, %v5389_v35  ;;  %v3626_v45 = vunpack.c.l.bf16 %v3521_v36  ;;  %v3627_v46 = vunpack.c.h.bf16 %v3521_v36  ;;  %v3631_v27 = vunpack.c.l.bf16 %v3524_v20  ;;  %v3529_v36 = vld [vmem:[#allocation13 + $0x58c] sm:$0xff] }
 0x29e   :  { %v4671_v21 = vpack.c.bf16 %v4526_v37, %v4521_v41  ;;  %v3215_v3 = vmul.f32 %v3055_v26, %v5389_v35  ;;  %v3632_v14 = vunpack.c.h.bf16 %v3524_v20  ;;  %v4203_v49 = vunpack.c.l.bf16 %v4098_v40  ;;  %v4103_v20 = vld [vmem:[#allocation13 + $0x7f8] sm:$0xff]  ;;  %v4106_v26 = vld [vmem:[#allocation13 + $0x80c] sm:$0xff] }
 0x29f   :  { %v3370_v50 = vadd.f32 %v3210_v44, %v2793_v28  ;;  %v3787_v52 = vmul.f32 %v3627_v46, %v5398_v42  ;;  %v4204_v33 = vunpack.c.h.bf16 %v4098_v40  ;;  %v4208_v54 = vunpack.c.l.bf16 %v4101_v47 }
 0x2a0   :  { %4788 = vmatpush1.bf16.msra.mxu1 %v4671_v21  ;;  %v3375_v57 = vadd.f32 %v3215_v3, %v2798_v38  ;;  %v3792_v58 = vmul.f32 %v3632_v14, %v5398_v42  ;;  %v4209_v51 = vunpack.c.h.bf16 %v4101_v47  ;;  %v2792_v59 = vmul.f32 %v2632_v5, %v5386_v34 }
 0x2a1   :  { %v3947_v18 = vadd.f32 %v3787_v52, %v3370_v50  ;;  %v4364_v55 = vmul.f32 %v4204_v33, %v5401_v43  ;;  %v2797_v61 = vmul.f32 %v2637_v25, %v5386_v34  ;;  %v3209_v53 = vmul.f32 %v3049_v32, %v5389_v35  ;;  %v3526_v25 = vld [vmem:[#allocation13 + $0x578] sm:$0xff] }
 0x2a2   :  { %v3952_v63 = vadd.f32 %v3792_v58, %v3375_v57  ;;  %v4369_v1 = vmul.f32 %v4209_v51, %v5401_v43  ;;  %v3214_v62 = vmul.f32 %v3054_v39, %v5389_v35  ;;  %v3786_v6 = vmul.f32 %v3626_v45, %v5398_v42 }
 0x2a3   :  { %v4524_v9 = vadd.f32 %v4364_v55, %v3947_v18  ;;  %v3369_v10 = vadd.f32 %v3209_v53, %v2792_v59  ;;  %v3791_v4 = vmul.f32 %v3631_v27, %v5398_v42  ;;  %v4363_v7 = vmul.f32 %v4203_v49, %v5401_v43  ;;  %v2533_v53 = vld [vmem:[#allocation13 + $0x80] sm:$0xff] }
 0x2a4   :  { %v4529_v16 = vadd.f32 %v4369_v1, %v3952_v63  ;;  %v3374_v11 = vadd.f32 %v3214_v62, %v2797_v61  ;;  %v4368_v17 = vmul.f32 %v4208_v54, %v5401_v43  ;;  %v2640_v22 = vunpack.c.l.bf16 %v2532_v60 }
 0x2a5   :  { %v3946_v24 = vadd.f32 %v3786_v6, %v3369_v10  ;;  %v2641_v0 = vunpack.c.h.bf16 %v2532_v60  ;;  %v2645_v5 = vunpack.c.l.bf16 %v2535_v8  ;;  %v2646_v56 = vunpack.c.h.bf16 %v2535_v8  ;;  %v2536_v60 = vld [vmem:[#allocation13 + $0x94] sm:$0xff]  ;;  %v2950_v8 = vld [vmem:[#allocation13 + $0x300] sm:$0xff] }
 0x2a6   :  { %v4674_v29 = vpack.c.bf16 %v4529_v16, %v4524_v9  ;;  %v3951_v30 = vadd.f32 %v3791_v4, %v3374_v11  ;;  %v3057_v31 = vunpack.c.l.bf16 %v2949_v15  ;;  %v3058_v32 = vunpack.c.h.bf16 %v2949_v15  ;;  %v2953_v15 = vld [vmem:[#allocation13 + $0x314] sm:$0xff] }
 0x2a7   :  { %v4523_v48 = vadd.f32 %v4363_v7, %v3946_v24  ;;  %v2801_v28 = vmul.f32 %v2641_v0, %v5386_v34  ;;  %v2806_v12 = vmul.f32 %v2646_v56, %v5386_v34  ;;  %v3062_v39 = vunpack.c.l.bf16 %v2952_v23  ;;  %v3527_v56 = vld [vmem:[#allocation13 + $0x580] sm:$0xff] }
 0x2a8   :  { %4828 = vmatprep.subr.bf16.mxu0 %v4674_v29  ;;  %v4528_v40 = vadd.f32 %v4368_v17, %v3951_v30  ;;  %v3063_v41 = vunpack.c.h.bf16 %v2952_v23  ;;  %v3218_v37 = vmul.f32 %v3058_v32, %v5389_v35  ;;  %v3634_v38 = vunpack.c.l.bf16 %v3526_v25 }
 0x2a9   :  { %v3635_v47 = vunpack.c.h.bf16 %v3526_v25  ;;  %v3639_v44 = vunpack.c.l.bf16 %v3529_v36  ;;  %v3640_v45 = vunpack.c.h.bf16 %v3529_v36  ;;  %v4211_v46 = vunpack.c.l.bf16 %v4103_v20  ;;  %v3530_v25 = vld [vmem:[#allocation13 + $0x594] sm:$0xff]  ;;  %v4104_v36 = vld [vmem:[#allocation13 + $0x800] sm:$0xff] }
 0x2aa   :  { %v4673_v27 = vpack.c.bf16 %v4528_v40, %v4523_v48  ;;  %v3223_v21 = vmul.f32 %v3063_v41, %v5389_v35  ;;  %v3378_v3 = vadd.f32 %v3218_v37, %v2801_v28  ;;  %v4212_v14 = vunpack.c.h.bf16 %v4103_v20 }
 0x2ab   :  { %v3795_v49 = vmul.f32 %v3635_v47, %v5398_v42  ;;  %v3800_v50 = vmul.f32 %v3640_v45, %v5398_v42  ;;  %v4216_v52 = vunpack.c.l.bf16 %v4106_v26  ;;  %v4217_v33 = vunpack.c.h.bf16 %v4106_v26 }
 0x2ac   :  { %4829 = vmatpush1.bf16.msra.mxu0 %v4673_v27  ;;  %v3383_v54 = vadd.f32 %v3223_v21, %v2806_v12  ;;  %v4372_v57 = vmul.f32 %v4212_v14, %v5401_v43  ;;  %v2800_v58 = vmul.f32 %v2640_v22, %v5386_v34  ;;  %v2805_v51 = vmul.f32 %v2645_v5, %v5386_v34 }
 0x2ad   :  { %v3955_v59 = vadd.f32 %v3795_v49, %v3378_v3  ;;  %v4377_v18 = vmul.f32 %v4217_v33, %v5401_v43  ;;  %v3217_v55 = vmul.f32 %v3057_v31, %v5389_v35  ;;  %v3222_v61 = vmul.f32 %v3062_v39, %v5389_v35  ;;  %v4107_v39 = vld [vmem:[#allocation13 + $0x814] sm:$0xff] }
 0x2ae   :  { %v3960_v63 = vadd.f32 %v3800_v50, %v3383_v54  ;;  %v3794_v1 = vmul.f32 %v3634_v38, %v5398_v42  ;;  %v3799_v62 = vmul.f32 %v3639_v44, %v5398_v42  ;;  %v4371_v6 = vmul.f32 %v4211_v46, %v5401_v43 }
 0x2af   :  { %v4532_v9 = vadd.f32 %v4372_v57, %v3955_v59  ;;  %v3377_v10 = vadd.f32 %v3217_v55, %v2800_v58  ;;  %v3382_v4 = vadd.f32 %v3222_v61, %v2805_v51  ;;  %v4376_v7 = vmul.f32 %v4216_v52, %v5401_v43  ;;  %v2538_v51 = vld [vmem:[#allocation13 + $0xa0] sm:$0xff] }
 0x2b0   :  { %v4537_v16 = vadd.f32 %v4377_v18, %v3960_v63  ;;  %v2642_v11 = vunpack.c.l.bf16 %v2533_v53  ;;  %v2643_v17 = vunpack.c.h.bf16 %v2533_v53  ;;  %v2647_v22 = vunpack.c.l.bf16 %v2536_v60  ;;  %v2541_v53 = vld [vmem:[#allocation13 + $0xb4] sm:$0xff] }
 0x2b1   :  { %v3954_v23 = vadd.f32 %v3794_v1, %v3377_v10  ;;  %v3959_v24 = vadd.f32 %v3799_v62, %v3382_v4  ;;  %v2648_v0 = vunpack.c.h.bf16 %v2536_v60  ;;  %v3059_v5 = vunpack.c.l.bf16 %v2950_v8 }
 0x2b2   :  { %v4677_v29 = vpack.c.bf16 %v4537_v16, %v4532_v9  ;;  %v2803_v30 = vmul.f32 %v2643_v17, %v5386_v34  ;;  %v3060_v31 = vunpack.c.h.bf16 %v2950_v8  ;;  %v3064_v32 = vunpack.c.l.bf16 %v2953_v15 }
 0x2b3   :  { %v4531_v20 = vadd.f32 %v4371_v6, %v3954_v23  ;;  %v4536_v48 = vadd.f32 %v4376_v7, %v3959_v24  ;;  %v2808_v28 = vmul.f32 %v2648_v0, %v5386_v34  ;;  %v3065_v12 = vunpack.c.h.bf16 %v2953_v15  ;;  %v2955_v6 = vld [vmem:[#allocation13 + $0x320] sm:$0xff]  ;;  %v2958_v7 = vld [vmem:[#allocation13 + $0x334] sm:$0xff] }
 0x2b4   :  { %4789 = vmatprep.subr.bf16.mxu1 %v4677_v29  ;;  %v3220_v40 = vmul.f32 %v3060_v31, %v5389_v35  ;;  %v3636_v41 = vunpack.c.l.bf16 %v3527_v56  ;;  %v3637_v37 = vunpack.c.h.bf16 %v3527_v56  ;;  %v3641_v38 = vunpack.c.l.bf16 %v3530_v25  ;;  %v3535_v56 = vld [vmem:[#allocation13 + $0x5b4] sm:$0xff] }
 0x2b5   :  { %v4676_v26 = vpack.c.bf16 %v4536_v48, %v4531_v20  ;;  %v3225_v47 = vmul.f32 %v3065_v12, %v5389_v35  ;;  %v3642_v44 = vunpack.c.h.bf16 %v3530_v25  ;;  %v4213_v45 = vunpack.c.l.bf16 %v4104_v36  ;;  %v4109_v25 = vld [vmem:[#allocation13 + $0x820] sm:$0xff]  ;;  %v4112_v12 = vld [vmem:[#allocation13 + $0x834] sm:$0xff] }
 0x2b6   :  { %v3380_v46 = vadd.f32 %v3220_v40, %v2803_v30  ;;  %v3797_v27 = vmul.f32 %v3637_v37, %v5398_v42  ;;  %v4214_v21 = vunpack.c.h.bf16 %v4104_v36  ;;  %v4218_v3 = vunpack.c.l.bf16 %v4107_v39 }
 0x2b7   :  { %4790 = vmatpush1.bf16.msra.mxu1 %v4676_v26  ;;  %v3385_v14 = vadd.f32 %v3225_v47, %v2808_v28  ;;  %v3802_v49 = vmul.f32 %v3642_v44, %v5398_v42  ;;  %v4219_v50 = vunpack.c.h.bf16 %v4107_v39  ;;  %v2802_v52 = vmul.f32 %v2642_v11, %v5386_v34 }
 0x2b8   :  { %v3957_v33 = vadd.f32 %v3797_v27, %v3380_v46  ;;  %v4374_v54 = vmul.f32 %v4214_v21, %v5401_v43  ;;  %v2807_v57 = vmul.f32 %v2647_v22, %v5386_v34  ;;  %v3219_v58 = vmul.f32 %v3059_v5, %v5389_v35  ;;  %v3532_v22 = vld [vmem:[#allocation13 + $0x5a0] sm:$0xff] }
 0x2b9   :  { %v3962_v59 = vadd.f32 %v3802_v49, %v3385_v14  ;;  %v4379_v18 = vmul.f32 %v4219_v50, %v5401_v43  ;;  %v3224_v55 = vmul.f32 %v3064_v32, %v5389_v35  ;;  %v3796_v61 = vmul.f32 %v3636_v41, %v5398_v42 }
 0x2ba   :  { %v4534_v60 = vadd.f32 %v4374_v54, %v3957_v33  ;;  %v3379_v63 = vadd.f32 %v3219_v58, %v2802_v52  ;;  %v3801_v1 = vmul.f32 %v3641_v38, %v5398_v42  ;;  %v4373_v62 = vmul.f32 %v4213_v45, %v5401_v43  ;;  %v2539_v58 = vld [vmem:[#allocation13 + $0xa8] sm:$0xff] }
 0x2bb   :  { %v4539_v8 = vadd.f32 %v4379_v18, %v3962_v59  ;;  %v3384_v9 = vadd.f32 %v3224_v55, %v2807_v57  ;;  %v4378_v10 = vmul.f32 %v4218_v3, %v5401_v43  ;;  %v2650_v4 = vunpack.c.l.bf16 %v2538_v51 }
 0x2bc   :  { %v3956_v15 = vadd.f32 %v3796_v61, %v3379_v63  ;;  %v2651_v16 = vunpack.c.h.bf16 %v2538_v51  ;;  %v2655_v11 = vunpack.c.l.bf16 %v2541_v53  ;;  %v2656_v17 = vunpack.c.h.bf16 %v2541_v53  ;;  %v2542_v51 = vld [vmem:[#allocation13 + $0xbc] sm:$0xff]  ;;  %v2956_v53 = vld [vmem:[#allocation13 + $0x328] sm:$0xff] }
 0x2bd   :  { %v4679_v23 = vpack.c.bf16 %v4539_v8, %v4534_v60  ;;  %v3961_v24 = vadd.f32 %v3801_v1, %v3384_v9  ;;  %v3067_v0 = vunpack.c.l.bf16 %v2955_v6  ;;  %v3068_v5 = vunpack.c.h.bf16 %v2955_v6  ;;  %v2959_v6 = vld [vmem:[#allocation13 + $0x33c] sm:$0xff] }
 0x2be   :  { %v4533_v29 = vadd.f32 %v4373_v62, %v3956_v15  ;;  %v2811_v30 = vmul.f32 %v2651_v16, %v5386_v34  ;;  %v2816_v31 = vmul.f32 %v2656_v17, %v5386_v34  ;;  %v3072_v32 = vunpack.c.l.bf16 %v2958_v7  ;;  %v3533_v17 = vld [vmem:[#allocation13 + $0x5a8] sm:$0xff] }
 0x2bf   :  { %4830 = vmatprep.subr.bf16.mxu0 %v4679_v23  ;;  %v4538_v36 = vadd.f32 %v4378_v10, %v3961_v24  ;;  %v3073_v20 = vunpack.c.h.bf16 %v2958_v7  ;;  %v3228_v48 = vmul.f32 %v3068_v5, %v5389_v35  ;;  %v3644_v28 = vunpack.c.l.bf16 %v3532_v22 }
 0x2c0   :  { %v3645_v39 = vunpack.c.h.bf16 %v3532_v22  ;;  %v3649_v40 = vunpack.c.l.bf16 %v3535_v56  ;;  %v3650_v41 = vunpack.c.h.bf16 %v3535_v56  ;;  %v4221_v37 = vunpack.c.l.bf16 %v4109_v25  ;;  %v3536_v22 = vld [vmem:[#allocation13 + $0x5bc] sm:$0xff]  ;;  %v4110_v56 = vld [vmem:[#allocation13 + $0x828] sm:$0xff] }
 0x2c1   :  { %v4678_v38 = vpack.c.bf16 %v4538_v36, %v4533_v29  ;;  %v3233_v26 = vmul.f32 %v3073_v20, %v5389_v35  ;;  %v3388_v47 = vadd.f32 %v3228_v48, %v2811_v30  ;;  %v4222_v44 = vunpack.c.h.bf16 %v4109_v25 }
 0x2c2   :  { %v3805_v45 = vmul.f32 %v3645_v39, %v5398_v42  ;;  %v3810_v46 = vmul.f32 %v3650_v41, %v5398_v42  ;;  %v4226_v27 = vunpack.c.l.bf16 %v4112_v12  ;;  %v4227_v21 = vunpack.c.h.bf16 %v4112_v12 }
 0x2c3   :  { %4831 = vmatpush1.bf16.msra.mxu0 %v4678_v38  ;;  %v3393_v3 = vadd.f32 %v3233_v26, %v2816_v31  ;;  %v4382_v14 = vmul.f32 %v4222_v44, %v5401_v43  ;;  %v2810_v49 = vmul.f32 %v2650_v4, %v5386_v34  ;;  %v2815_v50 = vmul.f32 %v2655_v11, %v5386_v34 }
 0x2c4   :  { %v3965_v52 = vadd.f32 %v3805_v45, %v3388_v47  ;;  %v4387_v33 = vmul.f32 %v4227_v21, %v5401_v43  ;;  %v3227_v54 = vmul.f32 %v3067_v0, %v5389_v35  ;;  %v3232_v57 = vmul.f32 %v3072_v32, %v5389_v35  ;;  %v4113_v32 = vld [vmem:[#allocation13 + $0x83c] sm:$0xff] }
 0x2c5   :  { %v3970_v59 = vadd.f32 %v3810_v46, %v3393_v3  ;;  %v3804_v18 = vmul.f32 %v3644_v28, %v5398_v42  ;;  %v3809_v55 = vmul.f32 %v3649_v40, %v5398_v42  ;;  %v4381_v61 = vmul.f32 %v4221_v37, %v5401_v43 }
 0x2c6   :  { %v4542_v60 = vadd.f32 %v4382_v14, %v3965_v52  ;;  %v3387_v63 = vadd.f32 %v3227_v54, %v2810_v49  ;;  %v3392_v1 = vadd.f32 %v3232_v57, %v2815_v50  ;;  %v4386_v62 = vmul.f32 %v4226_v27, %v5401_v43  ;;  %v2544_v50 = vld [vmem:[#allocation13 + $0xc8] sm:$0xff] }
 0x2c7   :  { %v4547_v8 = vadd.f32 %v4387_v33, %v3970_v59  ;;  %v2652_v9 = vunpack.c.l.bf16 %v2539_v58  ;;  %v2653_v10 = vunpack.c.h.bf16 %v2539_v58  ;;  %v2657_v4 = vunpack.c.l.bf16 %v2542_v51  ;;  %v2547_v58 = vld [vmem:[#allocation13 + $0xdc] sm:$0xff] }
 0x2c8   :  { %v3964_v7 = vadd.f32 %v3804_v18, %v3387_v63  ;;  %v3969_v15 = vadd.f32 %v3809_v55, %v3392_v1  ;;  %v2658_v16 = vunpack.c.h.bf16 %v2542_v51  ;;  %v3069_v11 = vunpack.c.l.bf16 %v2956_v53 }
 0x2c9   :  { %v4682_v23 = vpack.c.bf16 %v4547_v8, %v4542_v60  ;;  %v2813_v24 = vmul.f32 %v2653_v10, %v5386_v34  ;;  %v3070_v0 = vunpack.c.h.bf16 %v2956_v53  ;;  %v3074_v5 = vunpack.c.l.bf16 %v2959_v6 }
 0x2ca   :  { %v4541_v25 = vadd.f32 %v4381_v61, %v3964_v7  ;;  %v4546_v29 = vadd.f32 %v4386_v62, %v3969_v15  ;;  %v2818_v30 = vmul.f32 %v2658_v16, %v5386_v34  ;;  %v3075_v31 = vunpack.c.h.bf16 %v2959_v6  ;;  %v2961_v61 = vld [vmem:[#allocation13 + $0x348] sm:$0xff]  ;;  %v2964_v62 = vld [vmem:[#allocation13 + $0x35c] sm:$0xff] }
 0x2cb   :  { %4791 = vmatprep.subr.bf16.mxu1 %v4682_v23  ;;  %v3230_v36 = vmul.f32 %v3070_v0, %v5389_v35  ;;  %v3646_v20 = vunpack.c.l.bf16 %v3533_v17  ;;  %v3647_v48 = vunpack.c.h.bf16 %v3533_v17  ;;  %v3651_v28 = vunpack.c.l.bf16 %v3536_v22  ;;  %v3541_v17 = vld [vmem:[#allocation13 + $0x5dc] sm:$0xff] }
 0x2cc   :  { %v4681_v12 = vpack.c.bf16 %v4546_v29, %v4541_v25  ;;  %v3235_v39 = vmul.f32 %v3075_v31, %v5389_v35  ;;  %v3652_v40 = vunpack.c.h.bf16 %v3536_v22  ;;  %v4223_v41 = vunpack.c.l.bf16 %v4110_v56  ;;  %v4115_v22 = vld [vmem:[#allocation13 + $0x848] sm:$0xff]  ;;  %v4118_v31 = vld [vmem:[#allocation13 + $0x85c] sm:$0xff] }
 0x2cd   :  { %v3390_v37 = vadd.f32 %v3230_v36, %v2813_v24  ;;  %v3807_v38 = vmul.f32 %v3647_v48, %v5398_v42  ;;  %v4224_v26 = vunpack.c.h.bf16 %v4110_v56  ;;  %v4228_v47 = vunpack.c.l.bf16 %v4113_v32 }
 0x2ce   :  { %4792 = vmatpush1.bf16.msra.mxu1 %v4681_v12  ;;  %v3395_v44 = vadd.f32 %v3235_v39, %v2818_v30  ;;  %v3812_v45 = vmul.f32 %v3652_v40, %v5398_v42  ;;  %v4229_v46 = vunpack.c.h.bf16 %v4113_v32  ;;  %v2812_v27 = vmul.f32 %v2652_v9, %v5386_v34 }
 0x2cf   :  { %v3967_v21 = vadd.f32 %v3807_v38, %v3390_v37  ;;  %v4384_v3 = vmul.f32 %v4224_v26, %v5401_v43  ;;  %v2817_v14 = vmul.f32 %v2657_v4, %v5386_v34  ;;  %v3229_v49 = vmul.f32 %v3069_v11, %v5389_v35  ;;  %v3538_v4 = vld [vmem:[#allocation13 + $0x5c8] sm:$0xff] }
 0x2d0   :  { %v3972_v52 = vadd.f32 %v3812_v45, %v3395_v44  ;;  %v4389_v33 = vmul.f32 %v4229_v46, %v5401_v43  ;;  %v3234_v54 = vmul.f32 %v3074_v5, %v5389_v35  ;;  %v3806_v57 = vmul.f32 %v3646_v20, %v5398_v42 }
 0x2d1   :  { %v4544_v51 = vadd.f32 %v4384_v3, %v3967_v21  ;;  %v3389_v59 = vadd.f32 %v3229_v49, %v2812_v27  ;;  %v3811_v18 = vmul.f32 %v3651_v28, %v5398_v42  ;;  %v4383_v55 = vmul.f32 %v4223_v41, %v5401_v43  ;;  %v2545_v49 = vld [vmem:[#allocation13 + $0xd0] sm:$0xff] }
 0x2d2   :  { %v4549_v53 = vadd.f32 %v4389_v33, %v3972_v52  ;;  %v3394_v60 = vadd.f32 %v3234_v54, %v2817_v14  ;;  %v4388_v63 = vmul.f32 %v4228_v47, %v5401_v43  ;;  %v2660_v1 = vunpack.c.l.bf16 %v2544_v50 }
 0x2d3   :  { %v3966_v6 = vadd.f32 %v3806_v57, %v3389_v59  ;;  %v2661_v8 = vunpack.c.h.bf16 %v2544_v50  ;;  %v2665_v9 = vunpack.c.l.bf16 %v2547_v58  ;;  %v2666_v10 = vunpack.c.h.bf16 %v2547_v58  ;;  %v2548_v50 = vld [vmem:[#allocation13 + $0xe4] sm:$0xff]  ;;  %v2962_v58 = vld [vmem:[#allocation13 + $0x350] sm:$0xff] }
 0x2d4   :  { %v4684_v7 = vpack.c.bf16 %v4549_v53, %v4544_v51  ;;  %v3971_v15 = vadd.f32 %v3811_v18, %v3394_v60  ;;  %v3077_v16 = vunpack.c.l.bf16 %v2961_v61  ;;  %v3078_v11 = vunpack.c.h.bf16 %v2961_v61  ;;  %v2965_v61 = vld [vmem:[#allocation13 + $0x364] sm:$0xff] }
 0x2d5   :  { %v4543_v23 = vadd.f32 %v4383_v55, %v3966_v6  ;;  %v2821_v24 = vmul.f32 %v2661_v8, %v5386_v34  ;;  %v2826_v0 = vmul.f32 %v2666_v10, %v5386_v34  ;;  %v3082_v5 = vunpack.c.l.bf16 %v2964_v62  ;;  %v3539_v10 = vld [vmem:[#allocation13 + $0x5d0] sm:$0xff] }
 0x2d6   :  { %4832 = vmatprep.subr.bf16.mxu0 %v4684_v7  ;;  %v4548_v56 = vadd.f32 %v4388_v63, %v3971_v15  ;;  %v3083_v25 = vunpack.c.h.bf16 %v2964_v62  ;;  %v3238_v29 = vmul.f32 %v3078_v11, %v5389_v35  ;;  %v3654_v30 = vunpack.c.l.bf16 %v3538_v4 }
 0x2d7   :  { %v3655_v32 = vunpack.c.h.bf16 %v3538_v4  ;;  %v3659_v36 = vunpack.c.l.bf16 %v3541_v17  ;;  %v3660_v20 = vunpack.c.h.bf16 %v3541_v17  ;;  %v4231_v48 = vunpack.c.l.bf16 %v4115_v22  ;;  %v3542_v4 = vld [vmem:[#allocation13 + $0x5e4] sm:$0xff]  ;;  %v4116_v17 = vld [vmem:[#allocation13 + $0x850] sm:$0xff] }
 0x2d8   :  { %v4683_v28 = vpack.c.bf16 %v4548_v56, %v4543_v23  ;;  %v3243_v12 = vmul.f32 %v3083_v25, %v5389_v35  ;;  %v3398_v39 = vadd.f32 %v3238_v29, %v2821_v24  ;;  %v4232_v40 = vunpack.c.h.bf16 %v4115_v22 }
 0x2d9   :  { %v3815_v41 = vmul.f32 %v3655_v32, %v5398_v42  ;;  %v3820_v37 = vmul.f32 %v3660_v20, %v5398_v42  ;;  %v4236_v38 = vunpack.c.l.bf16 %v4118_v31  ;;  %v4237_v26 = vunpack.c.h.bf16 %v4118_v31 }
 0x2da   :  { %4833 = vmatpush1.bf16.msra.mxu0 %v4683_v28  ;;  %v3403_v47 = vadd.f32 %v3243_v12, %v2826_v0  ;;  %v4392_v44 = vmul.f32 %v4232_v40, %v5401_v43  ;;  %v2820_v45 = vmul.f32 %v2660_v1, %v5386_v34  ;;  %v2825_v46 = vmul.f32 %v2665_v9, %v5386_v34 }
 0x2db   :  { %v3975_v27 = vadd.f32 %v3815_v41, %v3398_v39  ;;  %v4397_v21 = vmul.f32 %v4237_v26, %v5401_v43  ;;  %v3237_v3 = vmul.f32 %v3077_v16, %v5389_v35  ;;  %v3242_v14 = vmul.f32 %v3082_v5, %v5389_v35  ;;  %v4119_v5 = vld [vmem:[#allocation13 + $0x864] sm:$0xff] }
 0x2dc   :  { %v3980_v52 = vadd.f32 %v3820_v37, %v3403_v47  ;;  %v3814_v33 = vmul.f32 %v3654_v30, %v5398_v42  ;;  %v3819_v54 = vmul.f32 %v3659_v36, %v5398_v42  ;;  %v4391_v57 = vmul.f32 %v4231_v48, %v5401_v43 }
 0x2dd   :  { %v4552_v51 = vadd.f32 %v4392_v44, %v3975_v27  ;;  %v3397_v59 = vadd.f32 %v3237_v3, %v2820_v45  ;;  %v3402_v18 = vadd.f32 %v3242_v14, %v2825_v46  ;;  %v4396_v55 = vmul.f32 %v4236_v38, %v5401_v43  ;;  %v2550_v46 = vld [vmem:[#allocation13 + $0xf0] sm:$0xff] }
 0x2de   :  { %v4557_v53 = vadd.f32 %v4397_v21, %v3980_v52  ;;  %v2662_v60 = vunpack.c.l.bf16 %v2545_v49  ;;  %v2663_v63 = vunpack.c.h.bf16 %v2545_v49  ;;  %v2667_v1 = vunpack.c.l.bf16 %v2548_v50  ;;  %v2553_v49 = vld [vmem:[#allocation13 + $0x104] sm:$0xff] }
 0x2df   :  { %v3974_v62 = vadd.f32 %v3814_v33, %v3397_v59  ;;  %v3979_v6 = vadd.f32 %v3819_v54, %v3402_v18  ;;  %v2668_v8 = vunpack.c.h.bf16 %v2548_v50  ;;  %v3079_v9 = vunpack.c.l.bf16 %v2962_v58 }
 0x2e0   :  { %v4687_v7 = vpack.c.bf16 %v4557_v53, %v4552_v51  ;;  %v2823_v15 = vmul.f32 %v2663_v63, %v5386_v34  ;;  %v3080_v16 = vunpack.c.h.bf16 %v2962_v58  ;;  %v3084_v11 = vunpack.c.l.bf16 %v2965_v61 }
 0x2e1   :  { %v4551_v22 = vadd.f32 %v4391_v57, %v3974_v62  ;;  %v4556_v23 = vadd.f32 %v4396_v55, %v3979_v6  ;;  %v2828_v24 = vmul.f32 %v2668_v8, %v5386_v34  ;;  %v3085_v0 = vunpack.c.h.bf16 %v2965_v61  ;;  %v2967_v57 = vld [vmem:[#allocation13 + $0x370] sm:$0xff]  ;;  %v2970_v55 = vld [vmem:[#allocation13 + $0x384] sm:$0xff] }
 0x2e2   :  { %4793 = vmatprep.subr.bf16.mxu1 %v4687_v7  ;;  %v3240_v56 = vmul.f32 %v3080_v16, %v5389_v35  ;;  %v3656_v25 = vunpack.c.l.bf16 %v3539_v10  ;;  %v3657_v29 = vunpack.c.h.bf16 %v3539_v10  ;;  %v3661_v30 = vunpack.c.l.bf16 %v3542_v4  ;;  %v3547_v10 = vld [vmem:[#allocation13 + $0x604] sm:$0xff] }
 0x2e3   :  { %v4686_v31 = vpack.c.bf16 %v4556_v23, %v4551_v22  ;;  %v3245_v32 = vmul.f32 %v3085_v0, %v5389_v35  ;;  %v3662_v36 = vunpack.c.h.bf16 %v3542_v4  ;;  %v4233_v20 = vunpack.c.l.bf16 %v4116_v17  ;;  %v4121_v4 = vld [vmem:[#allocation13 + $0x870] sm:$0xff]  ;;  %v4124_v0 = vld [vmem:[#allocation13 + $0x884] sm:$0xff] }
 0x2e4   :  { %v3400_v48 = vadd.f32 %v3240_v56, %v2823_v15  ;;  %v3817_v28 = vmul.f32 %v3657_v29, %v5398_v42  ;;  %v4234_v12 = vunpack.c.h.bf16 %v4116_v17  ;;  %v4238_v39 = vunpack.c.l.bf16 %v4119_v5 }
 0x2e5   :  { %4794 = vmatpush1.bf16.msra.mxu1 %v4686_v31  ;;  %v3405_v40 = vadd.f32 %v3245_v32, %v2828_v24  ;;  %v3822_v41 = vmul.f32 %v3662_v36, %v5398_v42  ;;  %v4239_v37 = vunpack.c.h.bf16 %v4119_v5  ;;  %v2822_v38 = vmul.f32 %v2662_v60, %v5386_v34 }
 0x2e6   :  { %v3977_v26 = vadd.f32 %v3817_v28, %v3400_v48  ;;  %v4394_v47 = vmul.f32 %v4234_v12, %v5401_v43  ;;  %v2827_v44 = vmul.f32 %v2667_v1, %v5386_v34  ;;  %v3239_v45 = vmul.f32 %v3079_v9, %v5389_v35  ;;  %v3544_v1 = vld [vmem:[#allocation13 + $0x5f0] sm:$0xff] }
 0x2e7   :  { %v3982_v27 = vadd.f32 %v3822_v41, %v3405_v40  ;;  %v4399_v21 = vmul.f32 %v4239_v37, %v5401_v43  ;;  %v3244_v3 = vmul.f32 %v3084_v11, %v5389_v35  ;;  %v3816_v14 = vmul.f32 %v3656_v25, %v5398_v42 }
 0x2e8   :  { %v4554_v50 = vadd.f32 %v4394_v47, %v3977_v26  ;;  %v3399_v52 = vadd.f32 %v3239_v45, %v2822_v38  ;;  %v3821_v33 = vmul.f32 %v3661_v30, %v5398_v42  ;;  %v4393_v54 = vmul.f32 %v4233_v20, %v5401_v43  ;;  %v2551_v45 = vld [vmem:[#allocation13 + $0xf8] sm:$0xff] }
 0x2e9   :  { %v4559_v58 = vadd.f32 %v4399_v21, %v3982_v27  ;;  %v3404_v51 = vadd.f32 %v3244_v3, %v2827_v44  ;;  %v4398_v59 = vmul.f32 %v4238_v39, %v5401_v43  ;;  %v2670_v18 = vunpack.c.l.bf16 %v2550_v46 }
 0x2ea   :  { %v3976_v61 = vadd.f32 %v3816_v14, %v3399_v52  ;;  %v2671_v53 = vunpack.c.h.bf16 %v2550_v46  ;;  %v2675_v60 = vunpack.c.l.bf16 %v2553_v49  ;;  %v2676_v63 = vunpack.c.h.bf16 %v2553_v49  ;;  %v2554_v46 = vld [vmem:[#allocation13 + $0x10c] sm:$0xff]  ;;  %v2968_v49 = vld [vmem:[#allocation13 + $0x378] sm:$0xff] }
 0x2eb   :  { %v4689_v62 = vpack.c.bf16 %v4559_v58, %v4554_v50  ;;  %v3981_v6 = vadd.f32 %v3821_v33, %v3404_v51  ;;  %v3087_v8 = vunpack.c.l.bf16 %v2967_v57  ;;  %v3088_v9 = vunpack.c.h.bf16 %v2967_v57  ;;  %v2971_v57 = vld [vmem:[#allocation13 + $0x38c] sm:$0xff] }
 0x2ec   :  { %v4553_v7 = vadd.f32 %v4393_v54, %v3976_v61  ;;  %v2831_v15 = vmul.f32 %v2671_v53, %v5386_v34  ;;  %v2836_v16 = vmul.f32 %v2676_v63, %v5386_v34  ;;  %v3092_v11 = vunpack.c.l.bf16 %v2970_v55  ;;  %v3545_v63 = vld [vmem:[#allocation13 + $0x5f8] sm:$0xff] }
 0x2ed   :  { %4834 = vmatprep.subr.bf16.mxu0 %v4689_v62  ;;  %v4558_v17 = vadd.f32 %v4398_v59, %v3981_v6  ;;  %v3093_v22 = vunpack.c.h.bf16 %v2970_v55  ;;  %v3248_v23 = vmul.f32 %v3088_v9, %v5389_v35  ;;  %v3664_v24 = vunpack.c.l.bf16 %v3544_v1 }
 0x2ee   :  { %v3665_v5 = vunpack.c.h.bf16 %v3544_v1  ;;  %v3669_v56 = vunpack.c.l.bf16 %v3547_v10  ;;  %v3670_v25 = vunpack.c.h.bf16 %v3547_v10  ;;  %v4241_v29 = vunpack.c.l.bf16 %v4121_v4  ;;  %v3548_v1 = vld [vmem:[#allocation13 + $0x60c] sm:$0xff]  ;;  %v4122_v10 = vld [vmem:[#allocation13 + $0x878] sm:$0xff] }
 0x2ef   :  { %v4688_v30 = vpack.c.bf16 %v4558_v17, %v4553_v7  ;;  %v3253_v31 = vmul.f32 %v3093_v22, %v5389_v35  ;;  %v3408_v32 = vadd.f32 %v3248_v23, %v2831_v15  ;;  %v4242_v36 = vunpack.c.h.bf16 %v4121_v4 }
 0x2f0   :  { %v3825_v20 = vmul.f32 %v3665_v5, %v5398_v42  ;;  %v3830_v48 = vmul.f32 %v3670_v25, %v5398_v42  ;;  %v4246_v28 = vunpack.c.l.bf16 %v4124_v0  ;;  %v4247_v12 = vunpack.c.h.bf16 %v4124_v0 }
 0x2f1   :  { %4835 = vmatpush1.bf16.msra.mxu0 %v4688_v30  ;;  %v3413_v39 = vadd.f32 %v3253_v31, %v2836_v16  ;;  %v4402_v40 = vmul.f32 %v4242_v36, %v5401_v43  ;;  %v2830_v41 = vmul.f32 %v2670_v18, %v5386_v34  ;;  %v2835_v37 = vmul.f32 %v2675_v60, %v5386_v34 }
 0x2f2   :  { %v3985_v38 = vadd.f32 %v3825_v20, %v3408_v32  ;;  %v4407_v26 = vmul.f32 %v4247_v12, %v5401_v43  ;;  %v3247_v47 = vmul.f32 %v3087_v8, %v5389_v35  ;;  %v3252_v44 = vmul.f32 %v3092_v11, %v5389_v35  ;;  %v4125_v11 = vld [vmem:[#allocation13 + $0x88c] sm:$0xff] }
 0x2f3   :  { %v3990_v27 = vadd.f32 %v3830_v48, %v3413_v39  ;;  %v3824_v21 = vmul.f32 %v3664_v24, %v5398_v42  ;;  %v3829_v3 = vmul.f32 %v3669_v56, %v5398_v42  ;;  %v4401_v14 = vmul.f32 %v4241_v29, %v5401_v43 }
 0x2f4   :  { %v4562_v50 = vadd.f32 %v4402_v40, %v3985_v38  ;;  %v3407_v52 = vadd.f32 %v3247_v47, %v2830_v41  ;;  %v3412_v33 = vadd.f32 %v3252_v44, %v2835_v37  ;;  %v4406_v54 = vmul.f32 %v4246_v28, %v5401_v43  ;;  %v2556_v37 = vld [vmem:[#allocation13 + $0x118] sm:$0xff] }
 0x2f5   :  { %v4567_v58 = vadd.f32 %v4407_v26, %v3990_v27  ;;  %v2672_v51 = vunpack.c.l.bf16 %v2551_v45  ;;  %v2673_v59 = vunpack.c.h.bf16 %v2551_v45  ;;  %v2677_v18 = vunpack.c.l.bf16 %v2554_v46  ;;  %v2559_v45 = vld [vmem:[#allocation13 + $0x12c] sm:$0xff] }
 0x2f6   :  { %v3984_v55 = vadd.f32 %v3824_v21, %v3407_v52  ;;  %v3989_v61 = vadd.f32 %v3829_v3, %v3412_v33  ;;  %v2678_v53 = vunpack.c.h.bf16 %v2554_v46  ;;  %v3089_v60 = vunpack.c.l.bf16 %v2968_v49 }
 0x2f7   :  { %v4692_v62 = vpack.c.bf16 %v4567_v58, %v4562_v50  ;;  %v2833_v6 = vmul.f32 %v2673_v59, %v5386_v34  ;;  %v3090_v8 = vunpack.c.h.bf16 %v2968_v49  ;;  %v3094_v9 = vunpack.c.l.bf16 %v2971_v57 }
 0x2f8   :  { %v4561_v4 = vadd.f32 %v4401_v14, %v3984_v55  ;;  %v4566_v7 = vadd.f32 %v4406_v54, %v3989_v61  ;;  %v2838_v15 = vmul.f32 %v2678_v53, %v5386_v34  ;;  %v3095_v16 = vunpack.c.h.bf16 %v2971_v57  ;;  %v2973_v14 = vld [vmem:[#allocation13 + $0x398] sm:$0xff]  ;;  %v2976_v54 = vld [vmem:[#allocation13 + $0x3ac] sm:$0xff] }
 0x2f9   :  { %4795 = vmatprep.subr.bf16.mxu1 %v4692_v62  ;;  %v3250_v17 = vmul.f32 %v3090_v8, %v5389_v35  ;;  %v3666_v22 = vunpack.c.l.bf16 %v3545_v63  ;;  %v3667_v23 = vunpack.c.h.bf16 %v3545_v63  ;;  %v3671_v24 = vunpack.c.l.bf16 %v3548_v1  ;;  %v3553_v63 = vld [vmem:[#allocation13 + $0x62c] sm:$0xff] }
 0x2fa   :  { %v4691_v0 = vpack.c.bf16 %v4566_v7, %v4561_v4  ;;  %v3255_v5 = vmul.f32 %v3095_v16, %v5389_v35  ;;  %v3672_v56 = vunpack.c.h.bf16 %v3548_v1  ;;  %v4243_v25 = vunpack.c.l.bf16 %v4122_v10  ;;  %v4127_v1 = vld [vmem:[#allocation13 + $0x898] sm:$0xff]  ;;  %v4130_v16 = vld [vmem:[#allocation13 + $0x8ac] sm:$0xff] }
 0x2fb   :  { %v3410_v29 = vadd.f32 %v3250_v17, %v2833_v6  ;;  %v3827_v30 = vmul.f32 %v3667_v23, %v5398_v42  ;;  %v4244_v31 = vunpack.c.h.bf16 %v4122_v10  ;;  %v4248_v32 = vunpack.c.l.bf16 %v4125_v11 }
 0x2fc   :  { %4796 = vmatpush1.bf16.msra.mxu1 %v4691_v0  ;;  %v3415_v36 = vadd.f32 %v3255_v5, %v2838_v15  ;;  %v3832_v20 = vmul.f32 %v3672_v56, %v5398_v42  ;;  %v4249_v48 = vunpack.c.h.bf16 %v4125_v11  ;;  %v2832_v28 = vmul.f32 %v2672_v51, %v5386_v34 }
 0x2fd   :  { %v3987_v12 = vadd.f32 %v3827_v30, %v3410_v29  ;;  %v4404_v39 = vmul.f32 %v4244_v31, %v5401_v43  ;;  %v2837_v40 = vmul.f32 %v2677_v18, %v5386_v34  ;;  %v3249_v41 = vmul.f32 %v3089_v60, %v5389_v35  ;;  %v3550_v18 = vld [vmem:[#allocation13 + $0x618] sm:$0xff] }
 0x2fe   :  { %v3992_v38 = vadd.f32 %v3832_v20, %v3415_v36  ;;  %v4409_v26 = vmul.f32 %v4249_v48, %v5401_v43  ;;  %v3254_v47 = vmul.f32 %v3094_v9, %v5389_v35  ;;  %v3826_v44 = vmul.f32 %v3666_v22, %v5398_v42 }
 0x2ff   :  { %v4564_v46 = vadd.f32 %v4404_v39, %v3987_v12  ;;  %v3409_v27 = vadd.f32 %v3249_v41, %v2832_v28  ;;  %v3831_v21 = vmul.f32 %v3671_v24, %v5398_v42  ;;  %v4403_v3 = vmul.f32 %v4243_v25, %v5401_v43  ;;  %v2557_v41 = vld [vmem:[#allocation13 + $0x120] sm:$0xff] }
 0x300   :  { %v4569_v49 = vadd.f32 %v4409_v26, %v3992_v38  ;;  %v3414_v50 = vadd.f32 %v3254_v47, %v2837_v40  ;;  %v4408_v52 = vmul.f32 %v4248_v32, %v5401_v43  ;;  %v2680_v33 = vunpack.c.l.bf16 %v2556_v37 }
 0x301   :  { %v3986_v57 = vadd.f32 %v3826_v44, %v3409_v27  ;;  %v2681_v58 = vunpack.c.h.bf16 %v2556_v37  ;;  %v2685_v51 = vunpack.c.l.bf16 %v2559_v45  ;;  %v2686_v59 = vunpack.c.h.bf16 %v2559_v45  ;;  %v2560_v37 = vld [vmem:[#allocation13 + $0x134] sm:$0xff]  ;;  %v2974_v45 = vld [vmem:[#allocation13 + $0x3a0] sm:$0xff] }
 0x302   :  { %v4694_v55 = vpack.c.bf16 %v4569_v49, %v4564_v46  ;;  %v3991_v61 = vadd.f32 %v3831_v21, %v3414_v50  ;;  %v3097_v53 = vunpack.c.l.bf16 %v2973_v14  ;;  %v3098_v60 = vunpack.c.h.bf16 %v2973_v14  ;;  %v2977_v14 = vld [vmem:[#allocation13 + $0x3b4] sm:$0xff] }
 0x303   :  { %v4563_v62 = vadd.f32 %v4403_v3, %v3986_v57  ;;  %v2841_v6 = vmul.f32 %v2681_v58, %v5386_v34  ;;  %v2846_v8 = vmul.f32 %v2686_v59, %v5386_v34  ;;  %v3102_v9 = vunpack.c.l.bf16 %v2976_v54  ;;  %v3551_v59 = vld [vmem:[#allocation13 + $0x620] sm:$0xff] }
 0x304   :  { %4836 = vmatprep.subr.bf16.mxu0 %v4694_v55  ;;  %v4568_v10 = vadd.f32 %v4408_v52, %v3991_v61  ;;  %v3103_v4 = vunpack.c.h.bf16 %v2976_v54  ;;  %v3258_v7 = vmul.f32 %v3098_v60, %v5389_v35  ;;  %v3674_v15 = vunpack.c.l.bf16 %v3550_v18 }
 0x305   :  { %v3675_v11 = vunpack.c.h.bf16 %v3550_v18  ;;  %v3679_v17 = vunpack.c.l.bf16 %v3553_v63  ;;  %v3680_v22 = vunpack.c.h.bf16 %v3553_v63  ;;  %v4251_v23 = vunpack.c.l.bf16 %v4127_v1  ;;  %v3554_v18 = vld [vmem:[#allocation13 + $0x634] sm:$0xff]  ;;  %v4128_v63 = vld [vmem:[#allocation13 + $0x8a0] sm:$0xff] }
 0x306   :  { %v4693_v24 = vpack.c.bf16 %v4568_v10, %v4563_v62  ;;  %v3263_v0 = vmul.f32 %v3103_v4, %v5389_v35  ;;  %v3418_v5 = vadd.f32 %v3258_v7, %v2841_v6  ;;  %v4252_v56 = vunpack.c.h.bf16 %v4127_v1 }
 0x307   :  { %v3835_v25 = vmul.f32 %v3675_v11, %v5398_v42  ;;  %v3840_v29 = vmul.f32 %v3680_v22, %v5398_v42  ;;  %v4256_v30 = vunpack.c.l.bf16 %v4130_v16  ;;  %v4257_v31 = vunpack.c.h.bf16 %v4130_v16 }
 0x308   :  { %4837 = vmatpush1.bf16.msra.mxu0 %v4693_v24  ;;  %v3423_v32 = vadd.f32 %v3263_v0, %v2846_v8  ;;  %v4412_v36 = vmul.f32 %v4252_v56, %v5401_v43  ;;  %v2840_v20 = vmul.f32 %v2680_v33, %v5386_v34  ;;  %v2845_v48 = vmul.f32 %v2685_v51, %v5386_v34 }
 0x309   :  { %v3995_v28 = vadd.f32 %v3835_v25, %v3418_v5  ;;  %v4417_v12 = vmul.f32 %v4257_v31, %v5401_v43  ;;  %v3257_v39 = vmul.f32 %v3097_v53, %v5389_v35  ;;  %v3262_v40 = vmul.f32 %v3102_v9, %v5389_v35  ;;  %v4131_v9 = vld [vmem:[#allocation13 + $0x8b4] sm:$0xff] }
 0x30a   :  { %v4000_v38 = vadd.f32 %v3840_v29, %v3423_v32  ;;  %v3834_v26 = vmul.f32 %v3674_v15, %v5398_v42  ;;  %v3839_v47 = vmul.f32 %v3679_v17, %v5398_v42  ;;  %v4411_v44 = vmul.f32 %v4251_v23, %v5401_v43 }
 0x30b   :  { %v4572_v46 = vadd.f32 %v4412_v36, %v3995_v28  ;;  %v3417_v27 = vadd.f32 %v3257_v39, %v2840_v20  ;;  %v3422_v21 = vadd.f32 %v3262_v40, %v2845_v48  ;;  %v4416_v3 = vmul.f32 %v4256_v30, %v5401_v43  ;;  %v2562_v48 = vld [vmem:[#allocation13 + $0x140] sm:$0xff] }
 0x30c   :  { %v4577_v49 = vadd.f32 %v4417_v12, %v4000_v38  ;;  %v2682_v50 = vunpack.c.l.bf16 %v2557_v41  ;;  %v2683_v52 = vunpack.c.h.bf16 %v2557_v41  ;;  %v2687_v33 = vunpack.c.l.bf16 %v2560_v37  ;;  %v2565_v41 = vld [vmem:[#allocation13 + $0x154] sm:$0xff] }
 0x30d   :  { %v3994_v54 = vadd.f32 %v3834_v26, %v3417_v27  ;;  %v3999_v57 = vadd.f32 %v3839_v47, %v3422_v21  ;;  %v2688_v58 = vunpack.c.h.bf16 %v2560_v37  ;;  %v3099_v51 = vunpack.c.l.bf16 %v2974_v45 }
 0x30e   :  { %v4697_v55 = vpack.c.bf16 %v4577_v49, %v4572_v46  ;;  %v2843_v61 = vmul.f32 %v2683_v52, %v5386_v34  ;;  %v3100_v53 = vunpack.c.h.bf16 %v2974_v45  ;;  %v3104_v60 = vunpack.c.l.bf16 %v2977_v14 }
 0x30f   :  { %v4571_v1 = vadd.f32 %v4411_v44, %v3994_v54  ;;  %v4576_v62 = vadd.f32 %v4416_v3, %v3999_v57  ;;  %v2848_v6 = vmul.f32 %v2688_v58, %v5386_v34  ;;  %v3105_v8 = vunpack.c.h.bf16 %v2977_v14  ;;  %v2979_v44 = vld [vmem:[#allocation13 + $0x3c0] sm:$0xff]  ;;  %v2982_v3 = vld [vmem:[#allocation13 + $0x3d4] sm:$0xff] }
 0x310   :  { %4797 = vmatprep.subr.bf16.mxu1 %v4697_v55  ;;  %v3260_v10 = vmul.f32 %v3100_v53, %v5389_v35  ;;  %v3676_v4 = vunpack.c.l.bf16 %v3551_v59  ;;  %v3677_v7 = vunpack.c.h.bf16 %v3551_v59  ;;  %v3681_v15 = vunpack.c.l.bf16 %v3554_v18  ;;  %v3559_v59 = vld [vmem:[#allocation13 + $0x654] sm:$0xff] }
 0x311   :  { %v4696_v16 = vpack.c.bf16 %v4576_v62, %v4571_v1  ;;  %v3265_v11 = vmul.f32 %v3105_v8, %v5389_v35  ;;  %v3682_v17 = vunpack.c.h.bf16 %v3554_v18  ;;  %v4253_v22 = vunpack.c.l.bf16 %v4128_v63  ;;  %v4133_v18 = vld [vmem:[#allocation13 + $0x8c0] sm:$0xff]  ;;  %v4136_v8 = vld [vmem:[#allocation13 + $0x8d4] sm:$0xff] }
 0x312   :  { %v3420_v23 = vadd.f32 %v3260_v10, %v2843_v61  ;;  %v3837_v24 = vmul.f32 %v3677_v7, %v5398_v42  ;;  %v4254_v0 = vunpack.c.h.bf16 %v4128_v63  ;;  %v4258_v5 = vunpack.c.l.bf16 %v4131_v9 }
 0x313   :  { %4798 = vmatpush1.bf16.msra.mxu1 %v4696_v16  ;;  %v3425_v56 = vadd.f32 %v3265_v11, %v2848_v6  ;;  %v3842_v25 = vmul.f32 %v3682_v17, %v5398_v42  ;;  %v4259_v29 = vunpack.c.h.bf16 %v4131_v9  ;;  %v2842_v30 = vmul.f32 %v2682_v50, %v5386_v34 }
 0x314   :  { %v3997_v31 = vadd.f32 %v3837_v24, %v3420_v23  ;;  %v4414_v32 = vmul.f32 %v4254_v0, %v5401_v43  ;;  %v2847_v36 = vmul.f32 %v2687_v33, %v5386_v34  ;;  %v3259_v20 = vmul.f32 %v3099_v51, %v5389_v35  ;;  %v3556_v33 = vld [vmem:[#allocation13 + $0x640] sm:$0xff] }
 0x315   :  { %v4002_v28 = vadd.f32 %v3842_v25, %v3425_v56  ;;  %v4419_v12 = vmul.f32 %v4259_v29, %v5401_v43  ;;  %v3264_v39 = vmul.f32 %v3104_v60, %v5389_v35  ;;  %v3836_v40 = vmul.f32 %v3676_v4, %v5398_v42 }
 0x316   :  { %v4574_v37 = vadd.f32 %v4414_v32, %v3997_v31  ;;  %v3419_v38 = vadd.f32 %v3259_v20, %v2842_v30  ;;  %v3841_v26 = vmul.f32 %v3681_v15, %v5398_v42  ;;  %v4413_v47 = vmul.f32 %v4253_v22, %v5401_v43  ;;  %v2563_v20 = vld [vmem:[#allocation13 + $0x148] sm:$0xff] }
 0x317   :  { %v4579_v45 = vadd.f32 %v4419_v12, %v4002_v28  ;;  %v3424_v46 = vadd.f32 %v3264_v39, %v2847_v36  ;;  %v4418_v27 = vmul.f32 %v4258_v5, %v5401_v43  ;;  %v2690_v21 = vunpack.c.l.bf16 %v2562_v48 }
 0x318   :  { %v3996_v14 = vadd.f32 %v3836_v40, %v3419_v38  ;;  %v2691_v49 = vunpack.c.h.bf16 %v2562_v48  ;;  %v2695_v50 = vunpack.c.l.bf16 %v2565_v41  ;;  %v2696_v52 = vunpack.c.h.bf16 %v2565_v41  ;;  %v2566_v48 = vld [vmem:[#allocation13 + $0x15c] sm:$0xff]  ;;  %v2980_v41 = vld [vmem:[#allocation13 + $0x3c8] sm:$0xff] }
 0x319   :  { %v4699_v54 = vpack.c.bf16 %v4579_v45, %v4574_v37  ;;  %v4001_v57 = vadd.f32 %v3841_v26, %v3424_v46  ;;  %v3107_v58 = vunpack.c.l.bf16 %v2979_v44  ;;  %v3108_v51 = vunpack.c.h.bf16 %v2979_v44  ;;  %v2983_v44 = vld [vmem:[#allocation13 + $0x3dc] sm:$0xff] }
 0x31a   :  { %v4573_v55 = vadd.f32 %v4413_v47, %v3996_v14  ;;  %v2851_v61 = vmul.f32 %v2691_v49, %v5386_v34  ;;  %v2856_v53 = vmul.f32 %v2696_v52, %v5386_v34  ;;  %v3112_v60 = vunpack.c.l.bf16 %v2982_v3  ;;  %v3557_v52 = vld [vmem:[#allocation13 + $0x648] sm:$0xff] }
 0x31b   :  { %4838 = vmatprep.subr.bf16.mxu0 %v4699_v54  ;;  %v4578_v63 = vadd.f32 %v4418_v27, %v4001_v57  ;;  %v3113_v1 = vunpack.c.h.bf16 %v2982_v3  ;;  %v3268_v62 = vmul.f32 %v3108_v51, %v5389_v35  ;;  %v3684_v6 = vunpack.c.l.bf16 %v3556_v33 }
 0x31c   :  { %v3685_v9 = vunpack.c.h.bf16 %v3556_v33  ;;  %v3689_v10 = vunpack.c.l.bf16 %v3559_v59  ;;  %v3690_v4 = vunpack.c.h.bf16 %v3559_v59  ;;  %v4261_v7 = vunpack.c.l.bf16 %v4133_v18  ;;  %v3560_v33 = vld [vmem:[#allocation13 + $0x65c] sm:$0xff]  ;;  %v4134_v59 = vld [vmem:[#allocation13 + $0x8c8] sm:$0xff] }
 0x31d   :  { %v4698_v15 = vpack.c.bf16 %v4578_v63, %v4573_v55  ;;  %v3273_v16 = vmul.f32 %v3113_v1, %v5389_v35  ;;  %v3428_v11 = vadd.f32 %v3268_v62, %v2851_v61  ;;  %v4262_v17 = vunpack.c.h.bf16 %v4133_v18 }
 0x31e   :  { %v3845_v22 = vmul.f32 %v3685_v9, %v5398_v42  ;;  %v3850_v23 = vmul.f32 %v3690_v4, %v5398_v42  ;;  %v4266_v24 = vunpack.c.l.bf16 %v4136_v8  ;;  %v4267_v0 = vunpack.c.h.bf16 %v4136_v8 }
 0x31f   :  { %4839 = vmatpush1.bf16.msra.mxu0 %v4698_v15  ;;  %v3433_v5 = vadd.f32 %v3273_v16, %v2856_v53  ;;  %v4422_v56 = vmul.f32 %v4262_v17, %v5401_v43  ;;  %v2850_v25 = vmul.f32 %v2690_v21, %v5386_v34  ;;  %v2855_v29 = vmul.f32 %v2695_v50, %v5386_v34 }
 0x320   :  { %v4005_v30 = vadd.f32 %v3845_v22, %v3428_v11  ;;  %v4427_v31 = vmul.f32 %v4267_v0, %v5401_v43  ;;  %v3267_v32 = vmul.f32 %v3107_v58, %v5389_v35  ;;  %v3272_v36 = vmul.f32 %v3112_v60, %v5389_v35  ;;  %v4137_v60 = vld [vmem:[#allocation13 + $0x8dc] sm:$0xff] }
 0x321   :  { %v4010_v28 = vadd.f32 %v3850_v23, %v3433_v5  ;;  %v3844_v12 = vmul.f32 %v3684_v6, %v5398_v42  ;;  %v3849_v39 = vmul.f32 %v3689_v10, %v5398_v42  ;;  %v4421_v40 = vmul.f32 %v4261_v7, %v5401_v43 }
 0x322   :  { %v4582_v37 = vadd.f32 %v4422_v56, %v4005_v30  ;;  %v3427_v38 = vadd.f32 %v3267_v32, %v2850_v25  ;;  %v3432_v26 = vadd.f32 %v3272_v36, %v2855_v29  ;;  %v4426_v47 = vmul.f32 %v4266_v24, %v5401_v43  ;;  %v2568_v29 = vld [vmem:[#allocation13 + $0x168] sm:$0xff] }
 0x323   :  { %v4587_v45 = vadd.f32 %v4427_v31, %v4010_v28  ;;  %v2692_v46 = vunpack.c.l.bf16 %v2563_v20  ;;  %v2693_v27 = vunpack.c.h.bf16 %v2563_v20  ;;  %v2697_v21 = vunpack.c.l.bf16 %v2566_v48  ;;  %v2571_v20 = vld [vmem:[#allocation13 + $0x17c] sm:$0xff] }
 0x324   :  { %v4004_v3 = vadd.f32 %v3844_v12, %v3427_v38  ;;  %v4009_v14 = vadd.f32 %v3849_v39, %v3432_v26  ;;  %v2698_v49 = vunpack.c.h.bf16 %v2566_v48  ;;  %v3109_v50 = vunpack.c.l.bf16 %v2980_v41 }
 0x325   :  { %v4702_v54 = vpack.c.bf16 %v4587_v45, %v4582_v37  ;;  %v2853_v57 = vmul.f32 %v2693_v27, %v5386_v34  ;;  %v3110_v58 = vunpack.c.h.bf16 %v2980_v41  ;;  %v3114_v51 = vunpack.c.l.bf16 %v2983_v44 }
 0x326   :  { %v4581_v18 = vadd.f32 %v4421_v40, %v4004_v3  ;;  %v4586_v55 = vadd.f32 %v4426_v47, %v4009_v14  ;;  %v2858_v61 = vmul.f32 %v2698_v49, %v5386_v34  ;;  %v3115_v53 = vunpack.c.h.bf16 %v2983_v44  ;;  %v2985_v40 = vld [vmem:[#allocation13 + $0x3e8] sm:$0xff]  ;;  %v2988_v47 = vld [vmem:[#allocation13 + $0x3fc] sm:$0xff] }
 0x327   :  { %4799 = vmatprep.subr.bf16.mxu1 %v4702_v54  ;;  %v3270_v63 = vmul.f32 %v3110_v58, %v5389_v35  ;;  %v3686_v1 = vunpack.c.l.bf16 %v3557_v52  ;;  %v3687_v62 = vunpack.c.h.bf16 %v3557_v52  ;;  %v3691_v6 = vunpack.c.l.bf16 %v3560_v33  ;;  %v3565_v52 = vld [vmem:[#allocation13 + $0x67c] sm:$0xff] }
 0x328   :  { %v4701_v8 = vpack.c.bf16 %v4586_v55, %v4581_v18  ;;  %v3275_v9 = vmul.f32 %v3115_v53, %v5389_v35  ;;  %v3692_v10 = vunpack.c.h.bf16 %v3560_v33  ;;  %v4263_v4 = vunpack.c.l.bf16 %v4134_v59  ;;  %v4139_v33 = vld [vmem:[#allocation13 + $0x8e8] sm:$0xff]  ;;  %v4142_v53 = vld [vmem:[#allocation13 + $0x8fc] sm:$0xff] }
 0x329   :  { %v3430_v7 = vadd.f32 %v3270_v63, %v2853_v57  ;;  %v3847_v15 = vmul.f32 %v3687_v62, %v5398_v42  ;;  %v4264_v16 = vunpack.c.h.bf16 %v4134_v59  ;;  %v4268_v11 = vunpack.c.l.bf16 %v4137_v60 }
 0x32a   :  { %4800 = vmatpush1.bf16.msra.mxu1 %v4701_v8  ;;  %v3435_v17 = vadd.f32 %v3275_v9, %v2858_v61  ;;  %v3852_v22 = vmul.f32 %v3692_v10, %v5398_v42  ;;  %v4269_v23 = vunpack.c.h.bf16 %v4137_v60  ;;  %v2852_v24 = vmul.f32 %v2692_v46, %v5386_v34 }
 0x32b   :  { %v4007_v0 = vadd.f32 %v3847_v15, %v3430_v7  ;;  %v4424_v5 = vmul.f32 %v4264_v16, %v5401_v43  ;;  %v2857_v56 = vmul.f32 %v2697_v21, %v5386_v34  ;;  %v3269_v25 = vmul.f32 %v3109_v50, %v5389_v35  ;;  %v3562_v21 = vld [vmem:[#allocation13 + $0x668] sm:$0xff] }
 0x32c   :  { %v4012_v30 = vadd.f32 %v3852_v22, %v3435_v17  ;;  %v4429_v31 = vmul.f32 %v4269_v23, %v5401_v43  ;;  %v3274_v32 = vmul.f32 %v3114_v51, %v5389_v35  ;;  %v3846_v36 = vmul.f32 %v3686_v1, %v5398_v42 }
 0x32d   :  { %v4584_v48 = vadd.f32 %v4424_v5, %v4007_v0  ;;  %v3429_v28 = vadd.f32 %v3269_v25, %v2852_v24  ;;  %v3851_v12 = vmul.f32 %v3691_v6, %v5398_v42  ;;  %v4423_v39 = vmul.f32 %v4263_v4, %v5401_v43  ;;  %v2569_v25 = vld [vmem:[#allocation13 + $0x170] sm:$0xff] }
 0x32e   :  { %v4589_v41 = vadd.f32 %v4429_v31, %v4012_v30  ;;  %v3434_v37 = vadd.f32 %v3274_v32, %v2857_v56  ;;  %v4428_v38 = vmul.f32 %v4268_v11, %v5401_v43  ;;  %v2700_v26 = vunpack.c.l.bf16 %v2568_v29 }
 0x32f   :  { %v4006_v44 = vadd.f32 %v3846_v36, %v3429_v28  ;;  %v2701_v45 = vunpack.c.h.bf16 %v2568_v29  ;;  %v2705_v46 = vunpack.c.l.bf16 %v2571_v20  ;;  %v2706_v27 = vunpack.c.h.bf16 %v2571_v20  ;;  %v2572_v29 = vld [vmem:[#allocation13 + $0x184] sm:$0xff]  ;;  %v2986_v20 = vld [vmem:[#allocation13 + $0x3f0] sm:$0xff] }
 0x330   :  { %v4704_v3 = vpack.c.bf16 %v4589_v41, %v4584_v48  ;;  %v4011_v14 = vadd.f32 %v3851_v12, %v3434_v37  ;;  %v3117_v49 = vunpack.c.l.bf16 %v2985_v40  ;;  %v3118_v50 = vunpack.c.h.bf16 %v2985_v40  ;;  %v2989_v40 = vld [vmem:[#allocation13 + $0x404] sm:$0xff] }
 0x331   :  { %v4583_v54 = vadd.f32 %v4423_v39, %v4006_v44  ;;  %v2861_v57 = vmul.f32 %v2701_v45, %v5386_v34  ;;  %v2866_v58 = vmul.f32 %v2706_v27, %v5386_v34  ;;  %v3122_v51 = vunpack.c.l.bf16 %v2988_v47  ;;  %v3563_v27 = vld [vmem:[#allocation13 + $0x670] sm:$0xff] }
 0x332   :  { %4840 = vmatprep.subr.bf16.mxu0 %v4704_v3  ;;  %v4588_v59 = vadd.f32 %v4428_v38, %v4011_v14  ;;  %v3123_v18 = vunpack.c.h.bf16 %v2988_v47  ;;  %v3278_v55 = vmul.f32 %v3118_v50, %v5389_v35  ;;  %v3694_v61 = vunpack.c.l.bf16 %v3562_v21 }
 0x333   :  { %v3695_v60 = vunpack.c.h.bf16 %v3562_v21  ;;  %v3699_v63 = vunpack.c.l.bf16 %v3565_v52  ;;  %v3700_v1 = vunpack.c.h.bf16 %v3565_v52  ;;  %v4271_v62 = vunpack.c.l.bf16 %v4139_v33  ;;  %v3566_v21 = vld [vmem:[#allocation13 + $0x684] sm:$0xff]  ;;  %v4140_v52 = vld [vmem:[#allocation13 + $0x8f0] sm:$0xff] }
 0x334   :  { %v4703_v6 = vpack.c.bf16 %v4588_v59, %v4583_v54  ;;  %v3283_v8 = vmul.f32 %v3123_v18, %v5389_v35  ;;  %v3438_v9 = vadd.f32 %v3278_v55, %v2861_v57  ;;  %v4272_v10 = vunpack.c.h.bf16 %v4139_v33 }
 0x335   :  { %v3855_v4 = vmul.f32 %v3695_v60, %v5398_v42  ;;  %v3860_v7 = vmul.f32 %v3700_v1, %v5398_v42  ;;  %v4276_v15 = vunpack.c.l.bf16 %v4142_v53  ;;  %v4277_v16 = vunpack.c.h.bf16 %v4142_v53 }
 0x336   :  { %4841 = vmatpush1.bf16.msra.mxu0 %v4703_v6  ;;  %v3443_v11 = vadd.f32 %v3283_v8, %v2866_v58  ;;  %v4432_v17 = vmul.f32 %v4272_v10, %v5401_v43  ;;  %v2860_v22 = vmul.f32 %v2700_v26, %v5386_v34  ;;  %v2865_v23 = vmul.f32 %v2705_v46, %v5386_v34 }
 0x337   :  { %v4015_v24 = vadd.f32 %v3855_v4, %v3438_v9  ;;  %v4437_v0 = vmul.f32 %v4277_v16, %v5401_v43  ;;  %v3277_v5 = vmul.f32 %v3117_v49, %v5389_v35  ;;  %v3282_v56 = vmul.f32 %v3122_v51, %v5389_v35  ;;  %v4143_v51 = vld [vmem:[#allocation13 + $0x904] sm:$0xff] }
 0x338   :  { %v4020_v30 = vadd.f32 %v3860_v7, %v3443_v11  ;;  %v3854_v31 = vmul.f32 %v3694_v61, %v5398_v42  ;;  %v3859_v32 = vmul.f32 %v3699_v63, %v5398_v42  ;;  %v4431_v36 = vmul.f32 %v4271_v62, %v5401_v43 }
 0x339   :  { %v4592_v48 = vadd.f32 %v4432_v17, %v4015_v24  ;;  %v3437_v28 = vadd.f32 %v3277_v5, %v2860_v22  ;;  %v3442_v12 = vadd.f32 %v3282_v56, %v2865_v23  ;;  %v4436_v39 = vmul.f32 %v4276_v15, %v5401_v43  ;;  %v2434_v23 = vld [vmem:[#allocation12] sm:$0x3] }
 0x33a   :  { %v4597_v41 = vadd.f32 %v4437_v0, %v4020_v30  ;;  %v2702_v37 = vunpack.c.l.bf16 %v2569_v25  ;;  %v2703_v38 = vunpack.c.h.bf16 %v2569_v25  ;;  %v2707_v26 = vunpack.c.l.bf16 %v2572_v29  ;;  %v2437_v25 = vld [vmem:[#allocation12 + $0x2] sm:$0x3]  ;;  %v2445_v30 = vld [vmem:[#allocation12 + $0x6] sm:$0x3] }
 0x33b   :  { %v4014_v47 = vadd.f32 %v3854_v31, %v3437_v28  ;;  %v4019_v44 = vadd.f32 %v3859_v32, %v3442_v12  ;;  %v2708_v45 = vunpack.c.h.bf16 %v2572_v29  ;;  %v3119_v46 = vunpack.c.l.bf16 %v2986_v20  ;;  %v2441_v29 = vld [vmem:[#allocation12 + $0x4] sm:$0x3] }
 0x33c   :  { %v4707_v3 = vpack.c.bf16 %v4597_v41, %v4592_v48  ;;  %v2863_v14 = vmul.f32 %v2703_v38, %v5386_v34  ;;  %v3120_v49 = vunpack.c.h.bf16 %v2986_v20  ;;  %v3124_v50 = vunpack.c.l.bf16 %v2989_v40  ;;  %v2574_v48 = vld [vmem:[#allocation13 + $0x190] sm:$0xff]  ;;  %v2577_v41 = vld [vmem:[#allocation13 + $0x1a4] sm:$0xff] }
 0x33d   :  { %v4591_v33 = vadd.f32 %v4431_v36, %v4014_v47  ;;  %v4596_v54 = vadd.f32 %v4436_v39, %v4019_v44  ;;  %v2868_v57 = vmul.f32 %v2708_v45, %v5386_v34  ;;  %v3125_v58 = vunpack.c.h.bf16 %v2989_v40  ;;  %v2991_v44 = vld [vmem:[#allocation13 + $0x410] sm:$0xff] }
 0x33e   :  { %4801 = vmatprep.subr.bf16.mxu1 %v4707_v3  ;;  %v3280_v59 = vmul.f32 %v3120_v49, %v5389_v35  ;;  %v3696_v18 = vunpack.c.l.bf16 %v3563_v27  ;;  %v3697_v55 = vunpack.c.h.bf16 %v3563_v27  ;;  %v3701_v61 = vunpack.c.l.bf16 %v3566_v21  ;;  %v2994_v3 = vld [vmem:[#allocation13 + $0x424] sm:$0xff] }
 0x33f   :  { %v4706_v53 = vpack.c.bf16 %v4596_v54, %v4591_v33  ;;  %v3285_v60 = vmul.f32 %v3125_v58, %v5389_v35  ;;  %v3702_v63 = vunpack.c.h.bf16 %v3566_v21  ;;  %v4273_v1 = vunpack.c.l.bf16 %v4140_v52  ;;  %v3568_v33 = vld [vmem:[#allocation13 + $0x690] sm:$0xff] }
 0x340   :  { %v3440_v62 = vadd.f32 %v3280_v59, %v2863_v14  ;;  %v3857_v6 = vmul.f32 %v3697_v55, %v5398_v42  ;;  %v4274_v8 = vunpack.c.h.bf16 %v4140_v52  ;;  %v4278_v9 = vunpack.c.l.bf16 %v4143_v51  ;;  %v3571_v59 = vld [vmem:[#allocation13 + $0x6a4] sm:$0xff] }
 0x341   :  { %4802 = vmatpush1.bf16.msra.mxu1 %v4706_v53  ;;  %v3445_v10 = vadd.f32 %v3285_v60, %v2868_v57  ;;  %v3862_v4 = vmul.f32 %v3702_v63, %v5398_v42  ;;  %v4279_v7 = vunpack.c.h.bf16 %v4143_v51  ;;  %v2862_v15 = vmul.f32 %v2702_v37, %v5386_v34  ;;  %v4145_v60 = vld [vmem:[#allocation13 + $0x910] sm:$0xff] }
 0x342   :  { %v4017_v16 = vadd.f32 %v3857_v6, %v3440_v62  ;;  %v4434_v11 = vmul.f32 %v4274_v8, %v5401_v43  ;;  %v2867_v17 = vmul.f32 %v2707_v26, %v5386_v34  ;;  %v3279_v22 = vmul.f32 %v3119_v46, %v5389_v35  ;;  %v4148_v8 = vld [vmem:[#allocation13 + $0x924] sm:$0xff] }
 0x343   :  { %v4022_v24 = vadd.f32 %v3862_v4, %v3445_v10  ;;  %v4439_v0 = vmul.f32 %v4279_v7, %v5401_v43  ;;  %v3284_v5 = vmul.f32 %v3124_v50, %v5389_v35  ;;  %v3856_v56 = vmul.f32 %v3696_v18, %v5398_v42 }
 0x344   :  { %v4594_v31 = vadd.f32 %v4434_v11, %v4017_v16  ;;  %v3439_v32 = vadd.f32 %v3279_v22, %v2862_v15  ;;  %v3861_v36 = vmul.f32 %v3701_v61, %v5398_v42  ;;  %v4433_v20 = vmul.f32 %v4273_v1, %v5401_v43 }
 0x345   :  { %v4599_v28 = vadd.f32 %v4439_v0, %v4022_v24  ;;  %v3444_v12 = vadd.f32 %v3284_v5, %v2867_v17  ;;  %v4438_v39 = vmul.f32 %v4278_v9, %v5401_v43  ;;  %v2435_v40 = vmul.f32 %v2434_v23, %v5386_v34 }
 0x346   :  { %v4016_v37 = vadd.f32 %v3856_v56, %v3439_v32  ;;  %v2438_v38 = vmul.f32 %v2437_v25, %v5389_v35  ;;  %v2442_v26 = vmul.f32 %v2441_v29, %v5398_v42  ;;  %v2446_v47 = vmul.f32 %v2445_v30, %v5401_v43 }
 0x347   :  { %v4709_v45 = vpack.c.bf16 %v4599_v28, %v4594_v31  ;;  %v4021_v46 = vadd.f32 %v3861_v36, %v3444_v12  ;;  %v2710_v27 = vunpack.c.l.bf16 %v2574_v48  ;;  %v2711_v21 = vunpack.c.h.bf16 %v2574_v48 }
 0x348   :  { %v4593_v14 = vadd.f32 %v4433_v20, %v4016_v37  ;;  %v2439_v49 = vadd.f32 %v2438_v38, %v2435_v40  ;;  %v2715_v50 = vunpack.c.l.bf16 %v2577_v41  ;;  %v2716_v52 = vunpack.c.h.bf16 %v2577_v41  ;;  %v2575_v20 = vld [vmem:[#allocation13 + $0x198] sm:$0xff]  ;;  %v2578_v40 = vld [vmem:[#allocation13 + $0x1ac] sm:$0xff] }
 0x349   :  { %4842 = vmatprep.subr.bf16.mxu0 %v4709_v45  ;;  %v4598_v54 = vadd.f32 %v4438_v39, %v4021_v46  ;;  %v2871_v57 = vmul.f32 %v2711_v21, %v5386_v34  ;;  %v3127_v58 = vunpack.c.l.bf16 %v2991_v44  ;;  %v3128_v51 = vunpack.c.h.bf16 %v2991_v44  ;;  %v2992_v41 = vld [vmem:[#allocation13 + $0x418] sm:$0xff]  ;;  %v2995_v21 = vld [vmem:[#allocation13 + $0x42c] sm:$0xff] }
 0x34a   :  { %v2443_v18 = vadd.f32 %v2442_v26, %v2439_v49  ;;  %v2876_v55 = vmul.f32 %v2716_v52, %v5386_v34  ;;  %v3132_v61 = vunpack.c.l.bf16 %v2994_v3  ;;  %v3133_v53 = vunpack.c.h.bf16 %v2994_v3  ;;  %v3569_v52 = vld [vmem:[#allocation13 + $0x698] sm:$0xff] }
 0x34b   :  { %v4708_v63 = vpack.c.bf16 %v4598_v54, %v4593_v14  ;;  %v3288_v1 = vmul.f32 %v3128_v51, %v5389_v35  ;;  %v3704_v62 = vunpack.c.l.bf16 %v3568_v33  ;;  %v3705_v6 = vunpack.c.h.bf16 %v3568_v33  ;;  %v3572_v51 = vld [vmem:[#allocation13 + $0x6ac] sm:$0xff] }
 0x34c   :  { %v6445_v9 = vadd.f32 %v2446_v47, %v2443_v18  ;;  %v3293_v10 = vmul.f32 %v3133_v53, %v5389_v35  ;;  %v3709_v4 = vunpack.c.l.bf16 %v3571_v59  ;;  %v3710_v7 = vunpack.c.h.bf16 %v3571_v59  ;;  %v4146_v59 = vld [vmem:[#allocation13 + $0x918] sm:$0xff] }
 0x34d   :  { %4843 = vmatpush1.bf16.msra.mxu0 %v4708_v63  ;;  %v3448_v15 = vadd.f32 %v3288_v1, %v2871_v57  ;;  %v3865_v16 = vmul.f32 %v3705_v6, %v5398_v42  ;;  %v4281_v11 = vunpack.c.l.bf16 %v4145_v60  ;;  %v4282_v17 = vunpack.c.h.bf16 %v4145_v60  ;;  %v4149_v6 = vld [vmem:[#allocation13 + $0x92c] sm:$0xff] }
 0x34e   :  { %v2454_v22 = vrot.slane %v6445_v9, %v5966_v13  ;;  %v3453_v23 = vadd.f32 %v3293_v10, %v2876_v55  ;;  %v3870_v24 = vmul.f32 %v3710_v7, %v5398_v42  ;;  %v4286_v0 = vunpack.c.l.bf16 %v4148_v8 }
 0x34f   :  { %v4025_v5 = vadd.f32 %v3865_v16, %v3448_v15  ;;  %v4287_v56 = vunpack.c.h.bf16 %v4148_v8  ;;  %v4442_v25 = vmul.f32 %v4282_v17, %v5401_v43  ;;  %v2458_v29 = vrot.slane %v6445_v9, %v5972_v19 }
 0x350   :  { %v4030_v30 = vadd.f32 %v3870_v24, %v3453_v23  ;;  %v2870_v31 = vmul.f32 %v2710_v27, %v5386_v34  ;;  %v2875_v32 = vmul.f32 %v2715_v50, %v5386_v34  ;;  %v3287_v36 = vmul.f32 %v3127_v58, %v5389_v35 }
 0x351   :  { %v4447_v48 = vmul.f32 %v4287_v56, %v5401_v43  ;;  %v4602_v28 = vadd.f32 %v4442_v25, %v4025_v5  ;;  %v3292_v12 = vmul.f32 %v3132_v61, %v5389_v35  ;;  %v3864_v39 = vmul.f32 %v3704_v62, %v5398_v42 }
 0x352   :  { %v3447_v37 = vadd.f32 %v3287_v36, %v2870_v31  ;;  %v3869_v38 = vmul.f32 %v3709_v4, %v5398_v42  ;;  %v4441_v26 = vmul.f32 %v4281_v11, %v5401_v43  ;;  %v4446_v47 = vmul.f32 %v4286_v0, %v5401_v43 }
 0x353   :  { %v4607_v44 = vadd.f32 %v4447_v48, %v4030_v30  ;;  %v3452_v45 = vadd.f32 %v3292_v12, %v2875_v32  ;;  %v2712_v46 = vunpack.c.l.bf16 %v2575_v20  ;;  %v2713_v27 = vunpack.c.h.bf16 %v2575_v20  ;;  %v2583_v12 = vld [vmem:[#allocation13 + $0x1cc] sm:$0xff] }
 0x354   :  { %v4024_v3 = vadd.f32 %v3864_v39, %v3447_v37  ;;  %v2717_v14 = vunpack.c.l.bf16 %v2578_v40  ;;  %v2718_v49 = vunpack.c.h.bf16 %v2578_v40  ;;  %v3129_v50 = vunpack.c.l.bf16 %v2992_v41 }
 0x355   :  { %v4712_v33 = vpack.c.bf16 %v4607_v44, %v4602_v28  ;;  %v4029_v54 = vadd.f32 %v3869_v38, %v3452_v45  ;;  %v2873_v57 = vmul.f32 %v2713_v27, %v5386_v34  ;;  %v3130_v58 = vunpack.c.h.bf16 %v2992_v41  ;;  %v2580_v28 = vld [vmem:[#allocation13 + $0x1b8] sm:$0xff] }
 0x356   :  { %v4601_v18 = vadd.f32 %v4441_v26, %v4024_v3  ;;  %v2878_v55 = vmul.f32 %v2718_v49, %v5386_v34  ;;  %v3134_v61 = vunpack.c.l.bf16 %v2995_v21  ;;  %v3135_v53 = vunpack.c.h.bf16 %v2995_v21  ;;  %v2997_v38 = vld [vmem:[#allocation13 + $0x438] sm:$0xff] }
 0x357   :  { %4803 = vmatprep.subr.bf16.mxu1 %v4712_v33  ;;  %v4606_v60 = vadd.f32 %v4446_v47, %v4029_v54  ;;  %v3290_v63 = vmul.f32 %v3130_v58, %v5389_v35  ;;  %v3706_v1 = vunpack.c.l.bf16 %v3569_v52  ;;  %v3707_v62 = vunpack.c.h.bf16 %v3569_v52  ;;  %v3574_v49 = vld [vmem:[#allocation13 + $0x6b8] sm:$0xff] }
 0x358   :  { %v3295_v8 = vmul.f32 %v3135_v53, %v5389_v35  ;;  %v3711_v10 = vunpack.c.l.bf16 %v3572_v51  ;;  %v3712_v4 = vunpack.c.h.bf16 %v3572_v51  ;;  %v4283_v7 = vunpack.c.l.bf16 %v4146_v59 }
 0x359   :  { %v4711_v15 = vpack.c.bf16 %v4606_v60, %v4601_v18  ;;  %v3450_v16 = vadd.f32 %v3290_v63, %v2873_v57  ;;  %v3867_v11 = vmul.f32 %v3707_v62, %v5398_v42  ;;  %v4284_v17 = vunpack.c.h.bf16 %v4146_v59  ;;  %v3577_v57 = vld [vmem:[#allocation13 + $0x6cc] sm:$0xff] }
 0x35a   :  { %v3455_v23 = vadd.f32 %v3295_v8, %v2878_v55  ;;  %v3872_v24 = vmul.f32 %v3712_v4, %v5398_v42  ;;  %v4288_v0 = vunpack.c.l.bf16 %v4149_v6  ;;  %v4289_v5 = vunpack.c.h.bf16 %v4149_v6  ;;  %v4151_v55 = vld [vmem:[#allocation13 + $0x938] sm:$0xff] }
 0x35b   :  { %4804 = vmatpush1.bf16.msra.mxu1 %v4711_v15  ;;  %v4027_v56 = vadd.f32 %v3867_v11, %v3450_v16  ;;  %v4444_v25 = vmul.f32 %v4284_v17, %v5401_v43  ;;  %v2872_v30 = vmul.f32 %v2712_v46, %v5386_v34  ;;  %v2877_v31 = vmul.f32 %v2717_v14, %v5386_v34  ;;  %v3000_v46 = vld [vmem:[#allocation13 + $0x44c] sm:$0xff] }
 0x35c   :  { %v4032_v32 = vadd.f32 %v3872_v24, %v3455_v23  ;;  %v4449_v36 = vmul.f32 %v4289_v5, %v5401_v43  ;;  %v3289_v20 = vmul.f32 %v3129_v50, %v5389_v35  ;;  %v3294_v48 = vmul.f32 %v3134_v61, %v5389_v35 }
 0x35d   :  { %v4604_v39 = vadd.f32 %v4444_v25, %v4027_v56  ;;  %v3866_v40 = vmul.f32 %v3706_v1, %v5398_v42  ;;  %v3871_v41 = vmul.f32 %v3711_v10, %v5398_v42  ;;  %v4443_v37 = vmul.f32 %v4283_v7, %v5401_v43  ;;  %v4154_v1 = vld [vmem:[#allocation13 + $0x94c] sm:$0xff] }
 0x35e   :  { %v4609_v26 = vadd.f32 %v4449_v36, %v4032_v32  ;;  %v3449_v47 = vadd.f32 %v3289_v20, %v2872_v30  ;;  %v3454_v44 = vadd.f32 %v3294_v48, %v2877_v31  ;;  %v4448_v45 = vmul.f32 %v4288_v0, %v5401_v43 }
 0x35f   :  { %v2720_v27 = vunpack.c.l.bf16 %v2580_v28  ;;  %v2721_v21 = vunpack.c.h.bf16 %v2580_v28  ;;  %v2725_v3 = vunpack.c.l.bf16 %v2583_v12  ;;  %v2726_v14 = vunpack.c.h.bf16 %v2583_v12 }
 0x360   :  { %v4714_v50 = vpack.c.bf16 %v4609_v26, %v4604_v39  ;;  %v4026_v52 = vadd.f32 %v3866_v40, %v3449_v47  ;;  %v4031_v33 = vadd.f32 %v3871_v41, %v3454_v44  ;;  %v3137_v54 = vunpack.c.l.bf16 %v2997_v38  ;;  %v2581_v39 = vld [vmem:[#allocation13 + $0x1c0] sm:$0xff] }
 0x361   :  { %v2881_v58 = vmul.f32 %v2721_v21, %v5386_v34  ;;  %v2886_v51 = vmul.f32 %v2726_v14, %v5386_v34  ;;  %v3138_v59 = vunpack.c.h.bf16 %v2997_v38  ;;  %v3142_v18 = vunpack.c.l.bf16 %v3000_v46 }
 0x362   :  { %4844 = vmatprep.subr.bf16.mxu0 %v4714_v50  ;;  %v4603_v61 = vadd.f32 %v4443_v37, %v4026_v52  ;;  %v4608_v53 = vadd.f32 %v4448_v45, %v4031_v33  ;;  %v3143_v60 = vunpack.c.h.bf16 %v3000_v46  ;;  %v3714_v63 = vunpack.c.l.bf16 %v3574_v49  ;;  %v2998_v52 = vld [vmem:[#allocation13 + $0x440] sm:$0xff] }
 0x363   :  { %v3298_v62 = vmul.f32 %v3138_v59, %v5389_v35  ;;  %v3715_v6 = vunpack.c.h.bf16 %v3574_v49  ;;  %v3719_v8 = vunpack.c.l.bf16 %v3577_v57  ;;  %v3720_v10 = vunpack.c.h.bf16 %v3577_v57 }
 0x364   :  { %v4713_v4 = vpack.c.bf16 %v4608_v53, %v4603_v61  ;;  %v3303_v7 = vmul.f32 %v3143_v60, %v5389_v35  ;;  %v4291_v15 = vunpack.c.l.bf16 %v4151_v55  ;;  %v4292_v16 = vunpack.c.h.bf16 %v4151_v55  ;;  %v3575_v61 = vld [vmem:[#allocation13 + $0x6c0] sm:$0xff] }
 0x365   :  { %v3458_v11 = vadd.f32 %v3298_v62, %v2881_v58  ;;  %v3875_v17 = vmul.f32 %v3715_v6, %v5398_v42  ;;  %v3880_v23 = vmul.f32 %v3720_v10, %v5398_v42  ;;  %v4296_v24 = vunpack.c.l.bf16 %v4154_v1  ;;  %v3001_v58 = vld [vmem:[#allocation13 + $0x454] sm:$0xff]  ;;  %v4152_v10 = vld [vmem:[#allocation13 + $0x940] sm:$0xff] }
 0x366   :  { %4845 = vmatpush1.bf16.msra.mxu0 %v4713_v4  ;;  %v3463_v0 = vadd.f32 %v3303_v7, %v2886_v51  ;;  %v4297_v5 = vunpack.c.h.bf16 %v4154_v1  ;;  %v4452_v56 = vmul.f32 %v4292_v16, %v5401_v43  ;;  %v2880_v25 = vmul.f32 %v2720_v27, %v5386_v34  ;;  %v2584_v27 = vld [vmem:[#allocation13 + $0x1d4] sm:$0xff] }
 0x367   :  { %v4035_v30 = vadd.f32 %v3875_v17, %v3458_v11  ;;  %v2885_v31 = vmul.f32 %v2725_v3, %v5386_v34  ;;  %v3297_v32 = vmul.f32 %v3137_v54, %v5389_v35  ;;  %v3302_v36 = vmul.f32 %v3142_v18, %v5389_v35  ;;  %v4155_v16 = vld [vmem:[#allocation13 + $0x954] sm:$0xff] }
 0x368   :  { %v4040_v20 = vadd.f32 %v3880_v23, %v3463_v0  ;;  %v4457_v48 = vmul.f32 %v4297_v5, %v5401_v43  ;;  %v3874_v28 = vmul.f32 %v3714_v63, %v5398_v42  ;;  %v3879_v12 = vmul.f32 %v3719_v8, %v5398_v42  ;;  %v3578_v63 = vld [vmem:[#allocation13 + $0x6d4] sm:$0xff] }
 0x369   :  { %v2495_v40 = vpop.f32.mrb[0].mxu1  ;;  %v4612_v41 = vadd.f32 %v4452_v56, %v4035_v30  ;;  %v3457_v37 = vadd.f32 %v3297_v32, %v2880_v25  ;;  %v3462_v38 = vadd.f32 %v3302_v36, %v2885_v31  ;;  %v4451_v26 = vmul.f32 %v4291_v15, %v5401_v43 }
 0x36a   :  { %v6498_v47 = vadd.f32 %v2495_v40, %v2454_v22  ;;  %v2497_v44 = vpop.f32.mrb[1].mxu1  ;;  %v4617_v45 = vadd.f32 %v4457_v48, %v4040_v20  ;;  %v4456_v46 = vmul.f32 %v4296_v24, %v5401_v43  ;;  %v2723_v50 = vunpack.c.h.bf16 %v2581_v39 }
 0x36b   :  { %v6504_v21 = vadd.f32 %v2497_v44, %v2458_v29  ;;  %v2499_v3 = vpop.f32.mrb[2].mxu1  ;;  %v4034_v14 = vadd.f32 %v3874_v28, %v3457_v37  ;;  %v4039_v49 = vadd.f32 %v3879_v12, %v3462_v38  ;;  %v2722_v57 = vunpack.c.l.bf16 %v2581_v39  ;;  %v2586_v37 = vld [vmem:[#allocation13 + $0x1e0] sm:$0xff] }
 0x36c   :  { %v2504_v33 = vmin.f32 %v6498_v47, 0.0  ;;  %v2500_v54 = vpop.f32.mrb[3].mxu1  ;;  %v4717_v22 = vpack.c.bf16 %v4617_v45, %v4612_v41  ;;  %v2727_v55 = vunpack.c.l.bf16 %v2584_v27  ;;  %v2728_v29 = vunpack.c.h.bf16 %v2584_v27  ;;  %v3003_v27 = vld [vmem:[#allocation13 + $0x460] sm:$0xff] }
 0x36d   :  { %v2505_v51 = vmin.f32 %v6504_v21, 0.0  ;;  %v4611_v59 = vadd.f32 %v4451_v26, %v4034_v14  ;;  %v4616_v18 = vadd.f32 %v4456_v46, %v4039_v49  ;;  %v2883_v53 = vmul.f32 %v2723_v50, %v5386_v34  ;;  %v2589_v46 = vld [vmem:[#allocation13 + $0x1f4] sm:$0xff] }
 0x36e   :  { %v2506_v9 = vmul.f32 1.442695, %v2504_v33  ;;  %4805 = vmatprep.subr.bf16.mxu1 %v4717_v22  ;;  %v3139_v60 = vunpack.c.l.bf16 %v2998_v52  ;;  %v3140_v6 = vunpack.c.h.bf16 %v2998_v52  ;;  %v3144_v8 = vunpack.c.l.bf16 %v3001_v58 }
 0x36f   :  { %v2508_v1 = vmul.f32 1.442695, %v2505_v51  ;;  %v4716_v62 = vpack.c.bf16 %v4616_v18, %v4611_v59  ;;  %v2888_v4 = vmul.f32 %v2728_v29, %v5386_v34  ;;  %v3145_v7 = vunpack.c.h.bf16 %v3001_v58 }
 0x370   :  { %4986 = vpow2.f32 %v2506_v9  ;;  %v3716_v15 = vunpack.c.l.bf16 %v3575_v61  ;;  %v3300_v11 = vmul.f32 %v3140_v6, %v5389_v35  ;;  %v3717_v17 = vunpack.c.h.bf16 %v3575_v61 }
 0x371   :  { %4988 = vpow2.f32 %v2508_v1  ;;  %4806 = vmatpush1.bf16.msra.mxu1 %v4716_v62  ;;  %v3721_v23 = vunpack.c.l.bf16 %v3578_v63  ;;  %v3305_v24 = vmul.f32 %v3145_v7, %v5389_v35  ;;  %v3722_v0 = vunpack.c.h.bf16 %v3578_v63  ;;  %v3583_v63 = vld [vmem:[#allocation13 + $0x6f4] sm:$0xff] }
 0x372   :  { %v4293_v5 = vunpack.c.l.bf16 %v4152_v10  ;;  %v4294_v56 = vunpack.c.h.bf16 %v4152_v10  ;;  %v3460_v25 = vadd.f32 %v3300_v11, %v2883_v53  ;;  %v3877_v30 = vmul.f32 %v3717_v17, %v5398_v42  ;;  %v4157_v11 = vld [vmem:[#allocation13 + $0x960] sm:$0xff] }
 0x373   :  { %v4298_v31 = vunpack.c.l.bf16 %v4155_v16  ;;  %v4299_v32 = vunpack.c.h.bf16 %v4155_v16  ;;  %vm2502_vm2 = vcmp.gt.f32.partialorder %v6498_v47, 0.0  ;;  %v3465_v36 = vadd.f32 %v3305_v24, %v2888_v4 }
 0x374   :  { %v3882_v20 = vmul.f32 %v3722_v0, %v5398_v42  ;;  %v4454_v48 = vmul.f32 %v4294_v56, %v5401_v43  ;;  %v2882_v28 = vmul.f32 %v2722_v57, %v5386_v34  ;;  %v4037_v12 = vadd.f32 %v3877_v30, %v3460_v25  ;;  %v3006_v57 = vld [vmem:[#allocation13 + $0x474] sm:$0xff] }
 0x375   :  { %v4459_v39 = vmul.f32 %v4299_v32, %v5401_v43  ;;  %v2887_v40 = vmul.f32 %v2727_v55, %v5386_v34  ;;  %v3299_v41 = vmul.f32 %v3139_v60, %v5389_v35  ;;  %v3304_v26 = vmul.f32 %v3144_v8, %v5389_v35  ;;  %v3580_v55 = vld [vmem:[#allocation13 + $0x6e0] sm:$0xff] }
 0x376   :  { %v4042_v38 = vadd.f32 %v3882_v20, %v3465_v36  ;;  %v3876_v44 = vmul.f32 %v3716_v15, %v5398_v42  ;;  %v3881_v45 = vmul.f32 %v3721_v23, %v5398_v42  ;;  %v4614_v3 = vadd.f32 %v4454_v48, %v4037_v12 }
 0x377   :  { %v3459_v14 = vadd.f32 %v3299_v41, %v2882_v28  ;;  %v4453_v49 = vmul.f32 %v4293_v5, %v5401_v43  ;;  %v4458_v50 = vmul.f32 %v4298_v31, %v5401_v43  ;;  %v3464_v33 = vadd.f32 %v3304_v26, %v2887_v40  ;;  %v4160_v5 = vld [vmem:[#allocation13 + $0x974] sm:$0xff]  ;;  %v2587_v26 = vld [vmem:[#allocation13 + $0x1e8] sm:$0xff] }
 0x378   :  { %v4619_v52 = vadd.f32 %v4459_v39, %v4042_v38  ;;  %v2730_v54 = vunpack.c.l.bf16 %v2586_v37  ;;  %v2731_v22 = vunpack.c.h.bf16 %v2586_v37  ;;  %v2735_v51 = vunpack.c.l.bf16 %v2589_v46 }
 0x379   :  { %v4036_v58 = vadd.f32 %v3876_v44, %v3459_v14  ;;  %v2736_v59 = vunpack.c.h.bf16 %v2589_v46  ;;  %v3147_v18 = vunpack.c.l.bf16 %v3003_v27  ;;  %v4041_v29 = vadd.f32 %v3881_v45, %v3464_v33  ;;  %v3004_v33 = vld [vmem:[#allocation13 + $0x468] sm:$0xff] }
 0x37a   :  { %v4987_v61 = vpop.eup %4986  ;;  %v4719_v9 = vpack.c.bf16 %v4619_v52, %v4614_v3  ;;  %v2891_v53 = vmul.f32 %v2731_v22, %v5386_v34  ;;  %v3148_v60 = vunpack.c.h.bf16 %v3003_v27  ;;  %v3152_v10 = vunpack.c.l.bf16 %v3006_v57  ;;  %v2590_v3 = vld [vmem:[#allocation13 + $0x1fc] sm:$0xff] }
 0x37b   :  { %v6526_v1 = vpop.eup %4988  ;;  %v4934_v62 = vadd.f32 -1.0, %v4987_v61  ;;  %v4613_v6 = vadd.f32 %v4453_v49, %v4036_v58  ;;  %v2896_v8 = vmul.f32 %v2736_v59, %v5386_v34  ;;  %v4618_v4 = vadd.f32 %v4458_v50, %v4041_v29 }
 0x37c   :  { %4846 = vmatprep.subr.bf16.mxu0 %v4719_v9  ;;  %v3153_v7 = vunpack.c.h.bf16 %v3006_v57  ;;  %v3308_v15 = vmul.f32 %v3148_v60, %v5389_v35  ;;  %v3724_v16 = vunpack.c.l.bf16 %v3580_v55  ;;  %v3725_v23 = vunpack.c.h.bf16 %v3580_v55  ;;  %v3581_v9 = vld [vmem:[#allocation13 + $0x6e8] sm:$0xff] }
 0x37d   :  { %v2512_v17 = vsel %vm2502_vm2, %v6498_v47, %v4934_v62  ;;  %v3729_v24 = vunpack.c.l.bf16 %v3583_v63  ;;  %v3730_v0 = vunpack.c.h.bf16 %v3583_v63  ;;  %v4718_v25 = vpack.c.bf16 %v4618_v4, %v4613_v6  ;;  %v3584_v62 = vld [vmem:[#allocation13 + $0x6fc] sm:$0xff]  ;;  %v4158_v6 = vld [vmem:[#allocation13 + $0x968] sm:$0xff] }
 0x37e   :  { %v6533_v56 = vpack.c.bf16 %v2512_v17, %v2512_v17  ;;  %v3313_v30 = vmul.f32 %v3153_v7, %v5389_v35  ;;  %v3468_v31 = vadd.f32 %v3308_v15, %v2891_v53  ;;  %v3885_v32 = vmul.f32 %v3725_v23, %v5398_v42  ;;  %v4161_v23 = vld [vmem:[#allocation13 + $0x97c] sm:$0xff] }
 0x37f   :  { %v3890_v36 = vmul.f32 %v3730_v0, %v5398_v42  ;;  %v4301_v20 = vunpack.c.l.bf16 %v4157_v11  ;;  %v4302_v48 = vunpack.c.h.bf16 %v4157_v11  ;;  %4847 = vmatpush1.bf16.msra.mxu0 %v4718_v25  ;;  %v4306_v12 = vunpack.c.l.bf16 %v4160_v5 }
 0x380   :  { %v3473_v28 = vadd.f32 %v3313_v30, %v2896_v8  ;;  %v4307_v47 = vunpack.c.h.bf16 %v4160_v5  ;;  %v2890_v39 = vmul.f32 %v2730_v54, %v5386_v34  ;;  %v4045_v40 = vadd.f32 %v3885_v32, %v3468_v31 }
 0x381   :  { %v4462_v41 = vmul.f32 %v4302_v48, %v5401_v43  ;;  %v2895_v37 = vmul.f32 %v2735_v51, %v5386_v34  ;;  %v3307_v38 = vmul.f32 %v3147_v18, %v5389_v35  ;;  %v3312_v46 = vmul.f32 %v3152_v10, %v5389_v35  ;;  %v3007_v51 = vld [vmem:[#allocation13 + $0x47c] sm:$0xff] }
 0x382   :  { %v4050_v44 = vadd.f32 %v3890_v36, %v3473_v28  ;;  %v4467_v45 = vmul.f32 %v4307_v47, %v5401_v43  ;;  %v3884_v27 = vmul.f32 %v3724_v16, %v5398_v42  ;;  %v3889_v50 = vmul.f32 %v3729_v24, %v5398_v42 }
 0x383   :  { %v4622_v14 = vadd.f32 %v4462_v41, %v4045_v40  ;;  %v3467_v49 = vadd.f32 %v3307_v38, %v2890_v39  ;;  %v4461_v52 = vmul.f32 %v4301_v20, %v5401_v43  ;;  %v3472_v22 = vadd.f32 %v3312_v46, %v2895_v37  ;;  %v2595_v46 = vld [vmem:[#allocation13 + $0x21c] sm:$0xff] }
 0x384   :  { %v4627_v54 = vadd.f32 %v4467_v45, %v4050_v44  ;;  %v4466_v57 = vmul.f32 %v4306_v12, %v5401_v43  ;;  %v2732_v58 = vunpack.c.l.bf16 %v2587_v26  ;;  %v2733_v18 = vunpack.c.h.bf16 %v2587_v26  ;;  %v2592_v45 = vld [vmem:[#allocation13 + $0x208] sm:$0xff] }
 0x385   :  { %v4044_v59 = vadd.f32 %v3884_v27, %v3467_v49  ;;  %v2737_v55 = vunpack.c.l.bf16 %v2590_v3  ;;  %v2738_v61 = vunpack.c.h.bf16 %v2590_v3  ;;  %v4049_v53 = vadd.f32 %v3889_v50, %v3472_v22  ;;  %v3009_v50 = vld [vmem:[#allocation13 + $0x488] sm:$0xff] }
 0x386   :  { %v4722_v29 = vpack.c.bf16 %v4627_v54, %v4622_v14  ;;  %v3149_v60 = vunpack.c.l.bf16 %v3004_v33  ;;  %v3150_v63 = vunpack.c.h.bf16 %v3004_v33  ;;  %v2893_v10 = vmul.f32 %v2733_v18, %v5386_v34 }
 0x387   :  { %v4621_v8 = vadd.f32 %v4461_v52, %v4044_v59  ;;  %v2898_v4 = vmul.f32 %v2738_v61, %v5386_v34  ;;  %v3154_v7 = vunpack.c.l.bf16 %v3007_v51  ;;  %v4626_v15 = vadd.f32 %v4466_v57, %v4049_v53  ;;  %v3012_v57 = vld [vmem:[#allocation13 + $0x49c] sm:$0xff]  ;;  %v3586_v53 = vld [vmem:[#allocation13 + $0x708] sm:$0xff] }
 0x388   :  { %4807 = vmatprep.subr.bf16.mxu1 %v4722_v29  ;;  %v3155_v16 = vunpack.c.h.bf16 %v3007_v51  ;;  %v3310_v11 = vmul.f32 %v3150_v63, %v5389_v35  ;;  %v3726_v17 = vunpack.c.l.bf16 %v3581_v9  ;;  %v3727_v24 = vunpack.c.h.bf16 %v3581_v9 }
 0x389   :  { %v3731_v0 = vunpack.c.l.bf16 %v3584_v62  ;;  %v3732_v5 = vunpack.c.h.bf16 %v3584_v62  ;;  %v4303_v25 = vunpack.c.l.bf16 %v4158_v6  ;;  %v4721_v30 = vpack.c.bf16 %v4626_v15, %v4621_v8 }
 0x38a   :  { %v3315_v31 = vmul.f32 %v3155_v16, %v5389_v35  ;;  %v3470_v32 = vadd.f32 %v3310_v11, %v2893_v10  ;;  %v4304_v36 = vunpack.c.h.bf16 %v4158_v6  ;;  %v3887_v20 = vmul.f32 %v3727_v24, %v5398_v42  ;;  %v4163_v10 = vld [vmem:[#allocation13 + $0x988] sm:$0xff]  ;;  %v4166_v11 = vld [vmem:[#allocation13 + $0x99c] sm:$0xff] }
 0x38b   :  { %v3892_v48 = vmul.f32 %v3732_v5, %v5398_v42  ;;  %v4308_v28 = vunpack.c.l.bf16 %v4161_v23  ;;  %v4309_v12 = vunpack.c.h.bf16 %v4161_v23  ;;  %4808 = vmatpush1.bf16.msra.mxu1 %v4721_v30  ;;  %v2892_v40 = vmul.f32 %v2732_v58, %v5386_v34 }
 0x38c   :  { %v3475_v47 = vadd.f32 %v3315_v31, %v2898_v4  ;;  %v4464_v39 = vmul.f32 %v4304_v36, %v5401_v43  ;;  %v2897_v41 = vmul.f32 %v2737_v55, %v5386_v34  ;;  %v4047_v37 = vadd.f32 %v3887_v20, %v3470_v32 }
 0x38d   :  { %v4469_v38 = vmul.f32 %v4309_v12, %v5401_v43  ;;  %v3309_v26 = vmul.f32 %v3149_v60, %v5389_v35  ;;  %v3314_v44 = vmul.f32 %v3154_v7, %v5389_v35  ;;  %v3886_v3 = vmul.f32 %v3726_v17, %v5398_v42  ;;  %v3589_v60 = vld [vmem:[#allocation13 + $0x71c] sm:$0xff] }
 0x38e   :  { %v4052_v27 = vadd.f32 %v3892_v48, %v3475_v47  ;;  %v3891_v14 = vmul.f32 %v3731_v0, %v5398_v42  ;;  %v4463_v49 = vmul.f32 %v4303_v25, %v5401_v43  ;;  %v4624_v52 = vadd.f32 %v4464_v39, %v4047_v37 }
 0x38f   :  { %v3469_v33 = vadd.f32 %v3309_v26, %v2892_v40  ;;  %v3474_v54 = vadd.f32 %v3314_v44, %v2897_v41  ;;  %v4468_v22 = vmul.f32 %v4308_v28, %v5401_v43  ;;  %v2740_v51 = vunpack.c.l.bf16 %v2592_v45  ;;  %v2593_v26 = vld [vmem:[#allocation13 + $0x210] sm:$0xff] }
 0x390   :  { %v4629_v58 = vadd.f32 %v4469_v38, %v4052_v27  ;;  %v2741_v59 = vunpack.c.h.bf16 %v2592_v45  ;;  %v2745_v18 = vunpack.c.l.bf16 %v2595_v46  ;;  %v2746_v9 = vunpack.c.h.bf16 %v2595_v46 }
 0x391   :  { %v4046_v55 = vadd.f32 %v3886_v3, %v3469_v33  ;;  %v4051_v61 = vadd.f32 %v3891_v14, %v3474_v54  ;;  %v3157_v29 = vunpack.c.l.bf16 %v3009_v50  ;;  %v3158_v6 = vunpack.c.h.bf16 %v3009_v50  ;;  %v2596_v3 = vld [vmem:[#allocation13 + $0x224] sm:$0xff]  ;;  %v3010_v33 = vld [vmem:[#allocation13 + $0x490] sm:$0xff] }
 0x392   :  { %v4724_v63 = vpack.c.bf16 %v4629_v58, %v4624_v52  ;;  %v2901_v62 = vmul.f32 %v2741_v59, %v5386_v34  ;;  %v3162_v8 = vunpack.c.l.bf16 %v3012_v57  ;;  %v2906_v15 = vmul.f32 %v2746_v9, %v5386_v34  ;;  %v3587_v9 = vld [vmem:[#allocation13 + $0x710] sm:$0xff] }
 0x393   :  { %v4623_v4 = vadd.f32 %v4463_v49, %v4046_v55  ;;  %v4628_v7 = vadd.f32 %v4468_v22, %v4051_v61  ;;  %v3163_v16 = vunpack.c.h.bf16 %v3012_v57  ;;  %v3318_v17 = vmul.f32 %v3158_v6, %v5389_v35  ;;  %v4164_v6 = vld [vmem:[#allocation13 + $0x990] sm:$0xff] }
 0x394   :  { %4848 = vmatprep.subr.bf16.mxu0 %v4724_v63  ;;  %v3734_v23 = vunpack.c.l.bf16 %v3586_v53  ;;  %v3735_v24 = vunpack.c.h.bf16 %v3586_v53  ;;  %v3739_v0 = vunpack.c.l.bf16 %v3589_v60  ;;  %v3740_v30 = vunpack.c.h.bf16 %v3589_v60 }
 0x395   :  { %v4723_v5 = vpack.c.bf16 %v4628_v7, %v4623_v4  ;;  %v3323_v25 = vmul.f32 %v3163_v16, %v5389_v35  ;;  %v4311_v31 = vunpack.c.l.bf16 %v4163_v10  ;;  %v3478_v32 = vadd.f32 %v3318_v17, %v2901_v62  ;;  %v3590_v62 = vld [vmem:[#allocation13 + $0x724] sm:$0xff] }
 0x396   :  { %v3895_v36 = vmul.f32 %v3735_v24, %v5398_v42  ;;  %v4312_v20 = vunpack.c.h.bf16 %v4163_v10  ;;  %v4316_v48 = vunpack.c.l.bf16 %v4166_v11  ;;  %v3900_v12 = vmul.f32 %v3740_v30, %v5398_v42 }
 0x397   :  { %4849 = vmatpush1.bf16.msra.mxu0 %v4723_v5  ;;  %v3483_v28 = vadd.f32 %v3323_v25, %v2906_v15  ;;  %v4317_v47 = vunpack.c.h.bf16 %v4166_v11  ;;  %v2900_v39 = vmul.f32 %v2740_v51, %v5386_v34  ;;  %v2905_v37 = vmul.f32 %v2745_v18, %v5386_v34  ;;  %v3013_v51 = vld [vmem:[#allocation13 + $0x4a4] sm:$0xff] }
 0x398   :  { %v4055_v40 = vadd.f32 %v3895_v36, %v3478_v32  ;;  %v4472_v41 = vmul.f32 %v4312_v20, %v5401_v43  ;;  %v3317_v38 = vmul.f32 %v3157_v29, %v5389_v35  ;;  %v3322_v46 = vmul.f32 %v3162_v8, %v5389_v35 }
 0x399   :  { %v4060_v44 = vadd.f32 %v3900_v12, %v3483_v28  ;;  %v4477_v45 = vmul.f32 %v4317_v47, %v5401_v43  ;;  %v3894_v27 = vmul.f32 %v3734_v23, %v5398_v42  ;;  %v3899_v50 = vmul.f32 %v3739_v0, %v5398_v42  ;;  %v4167_v23 = vld [vmem:[#allocation13 + $0x9a4] sm:$0xff] }
 0x39a   :  { %v4632_v14 = vadd.f32 %v4472_v41, %v4055_v40  ;;  %v3477_v49 = vadd.f32 %v3317_v38, %v2900_v39  ;;  %v4471_v52 = vmul.f32 %v4311_v31, %v5401_v43  ;;  %v3482_v22 = vadd.f32 %v3322_v46, %v2905_v37  ;;  %v2601_v46 = vld [vmem:[#allocation13 + $0x244] sm:$0xff] }
 0x39b   :  { %v4637_v54 = vadd.f32 %v4477_v45, %v4060_v44  ;;  %v4476_v57 = vmul.f32 %v4316_v48, %v5401_v43  ;;  %v2742_v58 = vunpack.c.l.bf16 %v2593_v26  ;;  %v2743_v18 = vunpack.c.h.bf16 %v2593_v26  ;;  %v2598_v45 = vld [vmem:[#allocation13 + $0x230] sm:$0xff] }
 0x39c   :  { %v4054_v59 = vadd.f32 %v3894_v27, %v3477_v49  ;;  %v2747_v55 = vunpack.c.l.bf16 %v2596_v3  ;;  %v2748_v61 = vunpack.c.h.bf16 %v2596_v3  ;;  %v4059_v53 = vadd.f32 %v3899_v50, %v3482_v22  ;;  %v3015_v50 = vld [vmem:[#allocation13 + $0x4b0] sm:$0xff] }
 0x39d   :  { %v4727_v29 = vpack.c.bf16 %v4637_v54, %v4632_v14  ;;  %v3159_v60 = vunpack.c.l.bf16 %v3010_v33  ;;  %v3160_v63 = vunpack.c.h.bf16 %v3010_v33  ;;  %v2903_v10 = vmul.f32 %v2743_v18, %v5386_v34 }
 0x39e   :  { %v4631_v8 = vadd.f32 %v4471_v52, %v4054_v59  ;;  %v2908_v4 = vmul.f32 %v2748_v61, %v5386_v34  ;;  %v3164_v7 = vunpack.c.l.bf16 %v3013_v51  ;;  %v4636_v15 = vadd.f32 %v4476_v57, %v4059_v53  ;;  %v3018_v57 = vld [vmem:[#allocation13 + $0x4c4] sm:$0xff]  ;;  %v3592_v53 = vld [vmem:[#allocation13 + $0x730] sm:$0xff] }
 0x39f   :  { %4809 = vmatprep.subr.bf16.mxu1 %v4727_v29  ;;  %v3165_v16 = vunpack.c.h.bf16 %v3013_v51  ;;  %v3320_v11 = vmul.f32 %v3160_v63, %v5389_v35  ;;  %v3736_v17 = vunpack.c.l.bf16 %v3587_v9  ;;  %v3737_v24 = vunpack.c.h.bf16 %v3587_v9 }
 0x3a0   :  { %v3741_v0 = vunpack.c.l.bf16 %v3590_v62  ;;  %v3742_v5 = vunpack.c.h.bf16 %v3590_v62  ;;  %v4313_v25 = vunpack.c.l.bf16 %v4164_v6  ;;  %v4726_v30 = vpack.c.bf16 %v4636_v15, %v4631_v8 }
 0x3a1   :  { %v3325_v31 = vmul.f32 %v3165_v16, %v5389_v35  ;;  %v3480_v32 = vadd.f32 %v3320_v11, %v2903_v10  ;;  %v4314_v36 = vunpack.c.h.bf16 %v4164_v6  ;;  %v3897_v20 = vmul.f32 %v3737_v24, %v5398_v42  ;;  %v4169_v10 = vld [vmem:[#allocation13 + $0x9b0] sm:$0xff]  ;;  %v4172_v11 = vld [vmem:[#allocation13 + $0x9c4] sm:$0xff] }
 0x3a2   :  { %v3902_v48 = vmul.f32 %v3742_v5, %v5398_v42  ;;  %v4318_v28 = vunpack.c.l.bf16 %v4167_v23  ;;  %v4319_v12 = vunpack.c.h.bf16 %v4167_v23  ;;  %4810 = vmatpush1.bf16.msra.mxu1 %v4726_v30  ;;  %v2902_v40 = vmul.f32 %v2742_v58, %v5386_v34 }
 0x3a3   :  { %v3485_v47 = vadd.f32 %v3325_v31, %v2908_v4  ;;  %v4474_v39 = vmul.f32 %v4314_v36, %v5401_v43  ;;  %v2907_v41 = vmul.f32 %v2747_v55, %v5386_v34  ;;  %v4057_v37 = vadd.f32 %v3897_v20, %v3480_v32 }
 0x3a4   :  { %v4479_v38 = vmul.f32 %v4319_v12, %v5401_v43  ;;  %v3319_v26 = vmul.f32 %v3159_v60, %v5389_v35  ;;  %v3324_v44 = vmul.f32 %v3164_v7, %v5389_v35  ;;  %v3896_v3 = vmul.f32 %v3736_v17, %v5398_v42  ;;  %v3595_v60 = vld [vmem:[#allocation13 + $0x744] sm:$0xff] }
 0x3a5   :  { %v4062_v27 = vadd.f32 %v3902_v48, %v3485_v47  ;;  %v3901_v14 = vmul.f32 %v3741_v0, %v5398_v42  ;;  %v4473_v49 = vmul.f32 %v4313_v25, %v5401_v43  ;;  %v4634_v52 = vadd.f32 %v4474_v39, %v4057_v37 }
 0x3a6   :  { %v3479_v33 = vadd.f32 %v3319_v26, %v2902_v40  ;;  %v3484_v54 = vadd.f32 %v3324_v44, %v2907_v41  ;;  %v4478_v22 = vmul.f32 %v4318_v28, %v5401_v43  ;;  %v2750_v51 = vunpack.c.l.bf16 %v2598_v45  ;;  %v2599_v26 = vld [vmem:[#allocation13 + $0x238] sm:$0xff] }
 0x3a7   :  { %v4639_v58 = vadd.f32 %v4479_v38, %v4062_v27  ;;  %v2751_v59 = vunpack.c.h.bf16 %v2598_v45  ;;  %v2755_v18 = vunpack.c.l.bf16 %v2601_v46  ;;  %v2756_v9 = vunpack.c.h.bf16 %v2601_v46 }
 0x3a8   :  { %v4056_v55 = vadd.f32 %v3896_v3, %v3479_v33  ;;  %v4061_v61 = vadd.f32 %v3901_v14, %v3484_v54  ;;  %v3167_v29 = vunpack.c.l.bf16 %v3015_v50  ;;  %v3168_v6 = vunpack.c.h.bf16 %v3015_v50  ;;  %v2602_v3 = vld [vmem:[#allocation13 + $0x24c] sm:$0xff]  ;;  %v3016_v33 = vld [vmem:[#allocation13 + $0x4b8] sm:$0xff] }
 0x3a9   :  { %v4729_v63 = vpack.c.bf16 %v4639_v58, %v4634_v52  ;;  %v2911_v62 = vmul.f32 %v2751_v59, %v5386_v34  ;;  %v3172_v8 = vunpack.c.l.bf16 %v3018_v57  ;;  %v2916_v15 = vmul.f32 %v2756_v9, %v5386_v34  ;;  %v3593_v9 = vld [vmem:[#allocation13 + $0x738] sm:$0xff] }
 0x3aa   :  { %v4633_v4 = vadd.f32 %v4473_v49, %v4056_v55  ;;  %v4638_v7 = vadd.f32 %v4478_v22, %v4061_v61  ;;  %v3173_v16 = vunpack.c.h.bf16 %v3018_v57  ;;  %v3328_v17 = vmul.f32 %v3168_v6, %v5389_v35  ;;  %v4170_v6 = vld [vmem:[#allocation13 + $0x9b8] sm:$0xff] }
 0x3ab   :  { %4850 = vmatprep.subr.bf16.mxu0 %v4729_v63  ;;  %v3744_v23 = vunpack.c.l.bf16 %v3592_v53  ;;  %v3745_v24 = vunpack.c.h.bf16 %v3592_v53  ;;  %v3749_v0 = vunpack.c.l.bf16 %v3595_v60  ;;  %v3750_v30 = vunpack.c.h.bf16 %v3595_v60 }
 0x3ac   :  { %v4728_v5 = vpack.c.bf16 %v4638_v7, %v4633_v4  ;;  %v3333_v25 = vmul.f32 %v3173_v16, %v5389_v35  ;;  %v4321_v31 = vunpack.c.l.bf16 %v4169_v10  ;;  %v3488_v32 = vadd.f32 %v3328_v17, %v2911_v62  ;;  %v3596_v62 = vld [vmem:[#allocation13 + $0x74c] sm:$0xff] }
 0x3ad   :  { %v3905_v36 = vmul.f32 %v3745_v24, %v5398_v42  ;;  %v4322_v20 = vunpack.c.h.bf16 %v4169_v10  ;;  %v4326_v48 = vunpack.c.l.bf16 %v4172_v11  ;;  %v3910_v12 = vmul.f32 %v3750_v30, %v5398_v42 }
 0x3ae   :  { %4851 = vmatpush1.bf16.msra.mxu0 %v4728_v5  ;;  %v3493_v28 = vadd.f32 %v3333_v25, %v2916_v15  ;;  %v4327_v47 = vunpack.c.h.bf16 %v4172_v11  ;;  %v2910_v39 = vmul.f32 %v2750_v51, %v5386_v34  ;;  %v2915_v37 = vmul.f32 %v2755_v18, %v5386_v34  ;;  %v3019_v51 = vld [vmem:[#allocation13 + $0x4cc] sm:$0xff] }
 0x3af   :  { %v4065_v40 = vadd.f32 %v3905_v36, %v3488_v32  ;;  %v4482_v41 = vmul.f32 %v4322_v20, %v5401_v43  ;;  %v3327_v38 = vmul.f32 %v3167_v29, %v5389_v35  ;;  %v3332_v46 = vmul.f32 %v3172_v8, %v5389_v35 }
 0x3b0   :  { %v4070_v44 = vadd.f32 %v3910_v12, %v3493_v28  ;;  %v4487_v45 = vmul.f32 %v4327_v47, %v5401_v43  ;;  %v3904_v27 = vmul.f32 %v3744_v23, %v5398_v42  ;;  %v3909_v50 = vmul.f32 %v3749_v0, %v5398_v42  ;;  %v4173_v23 = vld [vmem:[#allocation13 + $0x9cc] sm:$0xff] }
 0x3b1   :  { %v4642_v14 = vadd.f32 %v4482_v41, %v4065_v40  ;;  %v3487_v49 = vadd.f32 %v3327_v38, %v2910_v39  ;;  %v4481_v52 = vmul.f32 %v4321_v31, %v5401_v43  ;;  %v3492_v22 = vadd.f32 %v3332_v46, %v2915_v37  ;;  %v2607_v46 = vld [vmem:[#allocation13 + $0x26c] sm:$0xff] }
 0x3b2   :  { %v4647_v54 = vadd.f32 %v4487_v45, %v4070_v44  ;;  %v4486_v57 = vmul.f32 %v4326_v48, %v5401_v43  ;;  %v2752_v58 = vunpack.c.l.bf16 %v2599_v26  ;;  %v2753_v18 = vunpack.c.h.bf16 %v2599_v26  ;;  %v2604_v45 = vld [vmem:[#allocation13 + $0x258] sm:$0xff] }
 0x3b3   :  { %v4064_v59 = vadd.f32 %v3904_v27, %v3487_v49  ;;  %v2757_v55 = vunpack.c.l.bf16 %v2602_v3  ;;  %v2758_v61 = vunpack.c.h.bf16 %v2602_v3  ;;  %v4069_v53 = vadd.f32 %v3909_v50, %v3492_v22  ;;  %v3021_v50 = vld [vmem:[#allocation13 + $0x4d8] sm:$0xff] }
 0x3b4   :  { %v4732_v29 = vpack.c.bf16 %v4647_v54, %v4642_v14  ;;  %v3169_v60 = vunpack.c.l.bf16 %v3016_v33  ;;  %v3170_v63 = vunpack.c.h.bf16 %v3016_v33  ;;  %v2913_v10 = vmul.f32 %v2753_v18, %v5386_v34 }
 0x3b5   :  { %v4641_v8 = vadd.f32 %v4481_v52, %v4064_v59  ;;  %v2918_v4 = vmul.f32 %v2758_v61, %v5386_v34  ;;  %v3174_v7 = vunpack.c.l.bf16 %v3019_v51  ;;  %v4646_v15 = vadd.f32 %v4486_v57, %v4069_v53  ;;  %v3024_v57 = vld [vmem:[#allocation13 + $0x4ec] sm:$0xff]  ;;  %v3598_v53 = vld [vmem:[#allocation13 + $0x758] sm:$0xff] }
 0x3b6   :  { %4811 = vmatprep.subr.bf16.mxu1 %v4732_v29  ;;  %v3175_v16 = vunpack.c.h.bf16 %v3019_v51  ;;  %v3330_v11 = vmul.f32 %v3170_v63, %v5389_v35  ;;  %v3746_v17 = vunpack.c.l.bf16 %v3593_v9  ;;  %v3747_v24 = vunpack.c.h.bf16 %v3593_v9 }
 0x3b7   :  { %v3751_v0 = vunpack.c.l.bf16 %v3596_v62  ;;  %v3752_v5 = vunpack.c.h.bf16 %v3596_v62  ;;  %v4323_v25 = vunpack.c.l.bf16 %v4170_v6  ;;  %v4731_v30 = vpack.c.bf16 %v4646_v15, %v4641_v8 }
 0x3b8   :  { %v3335_v31 = vmul.f32 %v3175_v16, %v5389_v35  ;;  %v3490_v32 = vadd.f32 %v3330_v11, %v2913_v10  ;;  %v4324_v36 = vunpack.c.h.bf16 %v4170_v6  ;;  %v3907_v20 = vmul.f32 %v3747_v24, %v5398_v42  ;;  %v4175_v10 = vld [vmem:[#allocation13 + $0x9d8] sm:$0xff]  ;;  %v4178_v11 = vld [vmem:[#allocation13 + $0x9ec] sm:$0xff] }
 0x3b9   :  { %v3912_v48 = vmul.f32 %v3752_v5, %v5398_v42  ;;  %v4328_v28 = vunpack.c.l.bf16 %v4173_v23  ;;  %v4329_v12 = vunpack.c.h.bf16 %v4173_v23  ;;  %4812 = vmatpush1.bf16.msra.mxu1 %v4731_v30  ;;  %v2912_v40 = vmul.f32 %v2752_v58, %v5386_v34 }
 0x3ba   :  { %v3495_v47 = vadd.f32 %v3335_v31, %v2918_v4  ;;  %v4484_v39 = vmul.f32 %v4324_v36, %v5401_v43  ;;  %v2917_v41 = vmul.f32 %v2757_v55, %v5386_v34  ;;  %v4067_v37 = vadd.f32 %v3907_v20, %v3490_v32 }
 0x3bb   :  { %v4489_v38 = vmul.f32 %v4329_v12, %v5401_v43  ;;  %v3329_v26 = vmul.f32 %v3169_v60, %v5389_v35  ;;  %v3334_v44 = vmul.f32 %v3174_v7, %v5389_v35  ;;  %v3906_v3 = vmul.f32 %v3746_v17, %v5398_v42  ;;  %v3601_v60 = vld [vmem:[#allocation13 + $0x76c] sm:$0xff] }
 0x3bc   :  { %v4072_v27 = vadd.f32 %v3912_v48, %v3495_v47  ;;  %v3911_v14 = vmul.f32 %v3751_v0, %v5398_v42  ;;  %v4483_v49 = vmul.f32 %v4323_v25, %v5401_v43  ;;  %v4644_v52 = vadd.f32 %v4484_v39, %v4067_v37 }
 0x3bd   :  { %v3489_v33 = vadd.f32 %v3329_v26, %v2912_v40  ;;  %v3494_v54 = vadd.f32 %v3334_v44, %v2917_v41  ;;  %v4488_v22 = vmul.f32 %v4328_v28, %v5401_v43  ;;  %v2760_v51 = vunpack.c.l.bf16 %v2604_v45  ;;  %v2605_v26 = vld [vmem:[#allocation13 + $0x260] sm:$0xff] }
 0x3be   :  { %v4649_v58 = vadd.f32 %v4489_v38, %v4072_v27  ;;  %v2761_v59 = vunpack.c.h.bf16 %v2604_v45  ;;  %v2765_v18 = vunpack.c.l.bf16 %v2607_v46  ;;  %v2766_v9 = vunpack.c.h.bf16 %v2607_v46 }
 0x3bf   :  { %v4066_v55 = vadd.f32 %v3906_v3, %v3489_v33  ;;  %v4071_v61 = vadd.f32 %v3911_v14, %v3494_v54  ;;  %v3177_v29 = vunpack.c.l.bf16 %v3021_v50  ;;  %v3178_v6 = vunpack.c.h.bf16 %v3021_v50  ;;  %v2608_v3 = vld [vmem:[#allocation13 + $0x274] sm:$0xff]  ;;  %v3022_v33 = vld [vmem:[#allocation13 + $0x4e0] sm:$0xff] }
 0x3c0   :  { %v4734_v63 = vpack.c.bf16 %v4649_v58, %v4644_v52  ;;  %v2921_v62 = vmul.f32 %v2761_v59, %v5386_v34  ;;  %v3182_v8 = vunpack.c.l.bf16 %v3024_v57  ;;  %v2926_v15 = vmul.f32 %v2766_v9, %v5386_v34  ;;  %v3599_v9 = vld [vmem:[#allocation13 + $0x760] sm:$0xff] }
 0x3c1   :  { %v4643_v4 = vadd.f32 %v4483_v49, %v4066_v55  ;;  %v4648_v7 = vadd.f32 %v4488_v22, %v4071_v61  ;;  %v3183_v16 = vunpack.c.h.bf16 %v3024_v57  ;;  %v3338_v17 = vmul.f32 %v3178_v6, %v5389_v35  ;;  %v4176_v6 = vld [vmem:[#allocation13 + $0x9e0] sm:$0xff] }
 0x3c2   :  { %4852 = vmatprep.subr.bf16.mxu0 %v4734_v63  ;;  %v3754_v23 = vunpack.c.l.bf16 %v3598_v53  ;;  %v3755_v24 = vunpack.c.h.bf16 %v3598_v53  ;;  %v3759_v0 = vunpack.c.l.bf16 %v3601_v60  ;;  %v3760_v30 = vunpack.c.h.bf16 %v3601_v60 }
 0x3c3   :  { %v4733_v5 = vpack.c.bf16 %v4648_v7, %v4643_v4  ;;  %v3343_v25 = vmul.f32 %v3183_v16, %v5389_v35  ;;  %v4331_v31 = vunpack.c.l.bf16 %v4175_v10  ;;  %v3498_v32 = vadd.f32 %v3338_v17, %v2921_v62  ;;  %v3602_v62 = vld [vmem:[#allocation13 + $0x774] sm:$0xff] }
 0x3c4   :  { %v3915_v36 = vmul.f32 %v3755_v24, %v5398_v42  ;;  %v4332_v20 = vunpack.c.h.bf16 %v4175_v10  ;;  %v4336_v48 = vunpack.c.l.bf16 %v4178_v11  ;;  %v3920_v12 = vmul.f32 %v3760_v30, %v5398_v42 }
 0x3c5   :  { %4853 = vmatpush1.bf16.msra.mxu0 %v4733_v5  ;;  %v3503_v28 = vadd.f32 %v3343_v25, %v2926_v15  ;;  %v4337_v47 = vunpack.c.h.bf16 %v4178_v11  ;;  %v2920_v39 = vmul.f32 %v2760_v51, %v5386_v34  ;;  %v2925_v37 = vmul.f32 %v2765_v18, %v5386_v34  ;;  %v3025_v51 = vld [vmem:[#allocation13 + $0x4f4] sm:$0xff] }
 0x3c6   :  { %v4075_v40 = vadd.f32 %v3915_v36, %v3498_v32  ;;  %v4492_v41 = vmul.f32 %v4332_v20, %v5401_v43  ;;  %v3337_v38 = vmul.f32 %v3177_v29, %v5389_v35  ;;  %v3342_v46 = vmul.f32 %v3182_v8, %v5389_v35 }
 0x3c7   :  { %v4080_v44 = vadd.f32 %v3920_v12, %v3503_v28  ;;  %v4497_v45 = vmul.f32 %v4337_v47, %v5401_v43  ;;  %v3914_v27 = vmul.f32 %v3754_v23, %v5398_v42  ;;  %v3919_v50 = vmul.f32 %v3759_v0, %v5398_v42  ;;  %v4179_v23 = vld [vmem:[#allocation13 + $0x9f4] sm:$0xff] }
 0x3c8   :  { %v4652_v14 = vadd.f32 %v4492_v41, %v4075_v40  ;;  %v3497_v49 = vadd.f32 %v3337_v38, %v2920_v39  ;;  %v4491_v52 = vmul.f32 %v4331_v31, %v5401_v43  ;;  %v3502_v22 = vadd.f32 %v3342_v46, %v2925_v37 }
 0x3c9   :  { %v4657_v54 = vadd.f32 %v4497_v45, %v4080_v44  ;;  %v4496_v57 = vmul.f32 %v4336_v48, %v5401_v43  ;;  %v2762_v58 = vunpack.c.l.bf16 %v2605_v26  ;;  %v2763_v18 = vunpack.c.h.bf16 %v2605_v26  ;;  %v2564_v45 = vld [vmem:[#allocation13 + $0x150] ss:$20 sps:$4 sm:$0xff]  }
 0x3ca   :  { %v4074_v59 = vadd.f32 %v3914_v27, %v3497_v49  ;;  %v2767_v55 = vunpack.c.l.bf16 %v2608_v3  ;;  %v2768_v61 = vunpack.c.h.bf16 %v2608_v3  ;;  %v4079_v53 = vadd.f32 %v3919_v50, %v3502_v22  ;;  %v2981_v49 = vld [vmem:[#allocation13 + $0x3d0] ss:$20 sps:$4 sm:$0xff]  }
 0x3cb   :  { %v4737_v29 = vpack.c.bf16 %v4657_v54, %v4652_v14  ;;  %v3179_v60 = vunpack.c.l.bf16 %v3022_v33  ;;  %v3180_v63 = vunpack.c.h.bf16 %v3022_v33  ;;  %v2923_v10 = vmul.f32 %v2763_v18, %v5386_v34 }
 0x3cc   :  { %v4651_v8 = vadd.f32 %v4491_v52, %v4074_v59  ;;  %v2928_v4 = vmul.f32 %v2768_v61, %v5386_v34  ;;  %v3184_v7 = vunpack.c.l.bf16 %v3025_v51  ;;  %v4656_v15 = vadd.f32 %v4496_v57, %v4079_v53 }
 0x3cd   :  { %4813 = vmatprep.subr.bf16.mxu1 %v4737_v29  ;;  %v3185_v16 = vunpack.c.h.bf16 %v3025_v51  ;;  %v3340_v11 = vmul.f32 %v3180_v63, %v5389_v35  ;;  %v3756_v17 = vunpack.c.l.bf16 %v3599_v9  ;;  %vm2503_vm3 = vcmp.gt.f32.partialorder %v6504_v21, 0.0  ;;  %v4135_v29 = vld [vmem:[#allocation13 + $0x8d0] ss:$20 sps:$4 sm:$0xff]  }
 0x3ce   :  { %v3757_v24 = vunpack.c.h.bf16 %v3599_v9  ;;  %v3761_v0 = vunpack.c.l.bf16 %v3602_v62  ;;  %v3762_v5 = vunpack.c.h.bf16 %v3602_v62  ;;  %v4333_v25 = vunpack.c.l.bf16 %v4176_v6  ;;  %v3558_v9 = vld [vmem:[#allocation13 + $0x650] ss:$20 sps:$4 sm:$0xff]  }
 0x3cf   :  { %v4736_v30 = vpack.c.bf16 %v4656_v15, %v4651_v8  ;;  %v3345_v31 = vmul.f32 %v3185_v16, %v5389_v35  ;;  %v3500_v32 = vadd.f32 %v3340_v11, %v2923_v10  ;;  %v4334_v36 = vunpack.c.h.bf16 %v4176_v6  ;;  %v2516_v6 = vld [vmem:[#allocation13 + $0x10] ss:$20 sps:$4 sm:$0xff]  }
 0x3d0   :  { %v3917_v20 = vmul.f32 %v3757_v24, %v5398_v42  ;;  %v3922_v48 = vmul.f32 %v3762_v5, %v5398_v42  ;;  %v4338_v28 = vunpack.c.l.bf16 %v4179_v23  ;;  %v4339_v12 = vunpack.c.h.bf16 %v4179_v23  ;;  %v3510_v5 = vld [vmem:[#allocation13 + $0x510] ss:$20 sps:$4 sm:$0xff]  }
 0x3d1   :  { %4814 = vmatpush1.bf16.msra.mxu1 %v4736_v30  ;;  %v3505_v47 = vadd.f32 %v3345_v31, %v2928_v4  ;;  %v4494_v39 = vmul.f32 %v4334_v36, %v5401_v43  ;;  %v2922_v40 = vmul.f32 %v2762_v58, %v5386_v34  ;;  %v2927_v41 = vmul.f32 %v2767_v55, %v5386_v34  ;;  %v4087_v36 = vld [vmem:[#allocation13 + $0x790] ss:$20 sps:$4 sm:$0xff]  }
 0x3d2   :  { %v4077_v37 = vadd.f32 %v3917_v20, %v3500_v32  ;;  %v4499_v38 = vmul.f32 %v4339_v12, %v5401_v43  ;;  %v3339_v26 = vmul.f32 %v3179_v60, %v5389_v35  ;;  %v3344_v44 = vmul.f32 %v3184_v7, %v5389_v35 }
 0x3d3   :  { %v4082_v46 = vadd.f32 %v3922_v48, %v3505_v47  ;;  %v3916_v27 = vmul.f32 %v3756_v17, %v5398_v42  ;;  %v3921_v3 = vmul.f32 %v3761_v0, %v5398_v42  ;;  %v4493_v14 = vmul.f32 %v4333_v25, %v5401_v43  ;;  %v2933_v17 = vld [vmem:[#allocation13 + $0x290] ss:$20 sps:$4 sm:$0xff]  }
 0x3d4   :  { %v4654_v50 = vadd.f32 %v4494_v39, %v4077_v37  ;;  %v3499_v52 = vadd.f32 %v3339_v26, %v2922_v40  ;;  %v3504_v33 = vadd.f32 %v3344_v44, %v2927_v41  ;;  %v4498_v54 = vmul.f32 %v4338_v28, %v5401_v43 }
 0x3d5   :  { %v4659_v22 = vadd.f32 %v4499_v38, %v4082_v46  ;;  %v4935_v57 = vadd.f32 -1.0, %v6526_v1  ;;  %v2694_v58 = vunpack.c.l.bf16 %v2564_v45  ;;  %v2699_v51 = vunpack.c.h.bf16 %v2564_v45  ;;  %v2570_v45 = vld [vmem:[#allocation13 + $0x178] ss:$20 sps:$4 sm:$0xff]  }
 0x3d6   :  { %v4076_v59 = vadd.f32 %v3916_v27, %v3499_v52  ;;  %v4081_v18 = vadd.f32 %v3921_v3, %v3504_v33  ;;  %v3111_v55 = vunpack.c.l.bf16 %v2981_v49  ;;  %v3116_v61 = vunpack.c.h.bf16 %v2981_v49  ;;  %v2987_v49 = vld [vmem:[#allocation13 + $0x3f8] ss:$20 sps:$4 sm:$0xff]  }
 0x3d7   :  { %v4739_v53 = vpack.c.bf16 %v4659_v22, %v4654_v50  ;;  %v2513_v60 = vsel %vm2503_vm3, %v6504_v21, %v4935_v57  ;;  %v2854_v63 = vmul.f32 %v2694_v58, %v5386_v34  ;;  %v2859_v62 = vmul.f32 %v2699_v51, %v5386_v34  ;;  %v3564_v22 = vld [vmem:[#allocation13 + $0x678] ss:$20 sps:$4 sm:$0xff]  }
 0x3d8   :  { %v4653_v8 = vadd.f32 %v4493_v14, %v4076_v59  ;;  %v4658_v1 = vadd.f32 %v4498_v54, %v4081_v18  ;;  %v4756_v10 = vpack.c.bf16 %v2513_v60, %v2513_v60  ;;  %v3271_v4 = vmul.f32 %v3111_v55, %v5389_v35 }
 0x3d9   :  { %4854 = vmatprep.subr.bf16.mxu0 %v4739_v53  ;;  %v3276_v7 = vmul.f32 %v3116_v61, %v5389_v35  ;;  %v3688_v15 = vunpack.c.l.bf16 %v3558_v9  ;;  %v3693_v16 = vunpack.c.h.bf16 %v3558_v9  ;;  %v4265_v11 = vunpack.c.l.bf16 %v4135_v29 }
 0x3da   :  { %v4738_v23 = vpack.c.bf16 %v4658_v1, %v4653_v8  ;;  %4815 = vmatprep.mubr.bf16.mxu1 %v4756_v10  ;;  %4856 = vmatprep.mubr.bf16.mxu0 %v4756_v10  ;;  %v3431_v21 = vadd.f32 %v3271_v4, %v2854_v63  ;;  %v4270_v24 = vunpack.c.h.bf16 %v4135_v29  ;;  %v2614_v0 = vunpack.c.l.bf16 %v2516_v6  ;;  %v4141_v29 = vld [vmem:[#allocation13 + $0x8f8] ss:$20 sps:$4 sm:$0xff]  }
 0x3db   :  { %v3436_v25 = vadd.f32 %v3276_v7, %v2859_v62  ;;  %v3848_v30 = vmul.f32 %v3688_v15, %v5398_v42  ;;  %v3853_v31 = vmul.f32 %v3693_v16, %v5398_v42  ;;  %v4425_v32 = vmul.f32 %v4265_v11, %v5401_v43  ;;  %4816 = vmatmul.mubr.bf16.vlgmr.msra.gmra.mrb[4].mxu1 %v6533_v56 }
 0x3dc   :  { %4855 = vmatpush1.bf16.msra.mxu0 %v4738_v23  ;;  %v4430_v20 = vmul.f32 %v4270_v24, %v5401_v43  ;;  %v2619_v48 = vunpack.c.h.bf16 %v2516_v6  ;;  %v2774_v28 = vmul.f32 %v2614_v0, %v5386_v34  ;;  %v3031_v12 = vunpack.c.l.bf16 %v2933_v17  ;;  %4897 = vmatprep.mubr.bf16.mxu1 %v4756_v10  ;;  %v2522_v6 = vld [vmem:[#allocation13 + $0x38] ss:$20 sps:$4 sm:$0xff]  }
 0x3dd   :  { %v4008_v47 = vadd.f32 %v3848_v30, %v3431_v21  ;;  %v4013_v39 = vadd.f32 %v3853_v31, %v3436_v25  ;;  %v3036_v40 = vunpack.c.h.bf16 %v2933_v17  ;;  %v3608_v41 = vunpack.c.l.bf16 %v3510_v5  ;;  %v2939_v17 = vld [vmem:[#allocation13 + $0x2b8] ss:$20 sps:$4 sm:$0xff]  }
 0x3de   :  { %v2779_v37 = vmul.f32 %v2619_v48, %v5386_v34  ;;  %v3191_v38 = vmul.f32 %v3031_v12, %v5389_v35  ;;  %v3613_v26 = vunpack.c.h.bf16 %v3510_v5  ;;  %v4185_v44 = vunpack.c.l.bf16 %v4087_v36  ;;  %v3516_v5 = vld [vmem:[#allocation13 + $0x538] ss:$20 sps:$4 sm:$0xff]  }
 0x3df   :  { %v4585_v46 = vadd.f32 %v4425_v32, %v4008_v47  ;;  %v4590_v27 = vadd.f32 %v4430_v20, %v4013_v39  ;;  %4857 = vmatmul.mubr.bf16.vlgmr.msra.gmra.mrb[4].mxu0 %v6533_v56  ;;  %v3196_v3 = vmul.f32 %v3036_v40, %v5389_v35  ;;  %v3768_v14 = vmul.f32 %v3608_v41, %v5398_v42 }
 0x3e0   :  { %v3351_v50 = vadd.f32 %v3191_v38, %v2774_v28  ;;  %v3773_v52 = vmul.f32 %v3613_v26, %v5398_v42  ;;  %v4190_v33 = vunpack.c.h.bf16 %v4087_v36  ;;  %v4345_v54 = vmul.f32 %v4185_v44, %v5401_v43  ;;  %v4093_v36 = vld [vmem:[#allocation13 + $0x7b8] ss:$20 sps:$4 sm:$0xff]  }
 0x3e1   :  { %v4705_v57 = vpack.c.bf16 %v4590_v27, %v4585_v46  ;;  %v3356_v58 = vadd.f32 %v3196_v3, %v2779_v37  ;;  %v2704_v51 = vunpack.c.l.bf16 %v2570_v45  ;;  %v2709_v59 = vunpack.c.h.bf16 %v2570_v45  ;;  %v2576_v37 = vld [vmem:[#allocation13 + $0x1a0] ss:$20 sps:$4 sm:$0xff]  }
 0x3e2   :  { %v3928_v18 = vadd.f32 %v3768_v14, %v3351_v50  ;;  %v4350_v55 = vmul.f32 %v4190_v33, %v5401_v43  ;;  %v3121_v61 = vunpack.c.l.bf16 %v2987_v49  ;;  %v3126_v9 = vunpack.c.h.bf16 %v2987_v49  ;;  %v2993_v46 = vld [vmem:[#allocation13 + $0x420] ss:$20 sps:$4 sm:$0xff]  }
 0x3e3   :  { %4936 = vmatprep.subr.bf16.mxu1 %v4705_v57  ;;  %v3933_v53 = vadd.f32 %v3773_v52, %v3356_v58  ;;  %v2864_v60 = vmul.f32 %v2704_v51, %v5386_v34  ;;  %v2869_v63 = vmul.f32 %v2709_v59, %v5386_v34  ;;  %v3698_v62 = vunpack.c.l.bf16 %v3564_v22  ;;  %v3570_v50 = vld [vmem:[#allocation13 + $0x6a0] ss:$20 sps:$4 sm:$0xff]  }
 0x3e4   :  { %v4505_v8 = vadd.f32 %v4345_v54, %v3928_v18  ;;  %v3281_v1 = vmul.f32 %v3121_v61, %v5389_v35  ;;  %v3286_v10 = vmul.f32 %v3126_v9, %v5389_v35  ;;  %v3703_v4 = vunpack.c.h.bf16 %v3564_v22  ;;  %v4147_v18 = vld [vmem:[#allocation13 + $0x920] ss:$20 sps:$4 sm:$0xff]  }
 0x3e5   :  { %v4510_v7 = vadd.f32 %v4350_v55, %v3933_v53  ;;  %v3858_v15 = vmul.f32 %v3698_v62, %v5398_v42  ;;  %v4275_v16 = vunpack.c.l.bf16 %v4141_v29  ;;  %v4280_v11 = vunpack.c.h.bf16 %v4141_v29 }
 0x3e6   :  { %v3441_v23 = vadd.f32 %v3281_v1, %v2864_v60  ;;  %v3446_v21 = vadd.f32 %v3286_v10, %v2869_v63  ;;  %v3863_v24 = vmul.f32 %v3703_v4, %v5398_v42  ;;  %v2624_v0 = vunpack.c.l.bf16 %v2522_v6 }
 0x3e7   :  { %v4665_v25 = vpack.c.bf16 %v4510_v7, %v4505_v8  ;;  %v4435_v30 = vmul.f32 %v4275_v16, %v5401_v43  ;;  %v4440_v31 = vmul.f32 %v4280_v11, %v5401_v43  ;;  %v2629_v32 = vunpack.c.h.bf16 %v2522_v6  ;;  %v2528_v6 = vld [vmem:[#allocation13 + $0x60] ss:$20 sps:$4 sm:$0xff]  }
 0x3e8   :  { %v4018_v20 = vadd.f32 %v3858_v15, %v3441_v23  ;;  %v4023_v48 = vadd.f32 %v3863_v24, %v3446_v21  ;;  %v2784_v28 = vmul.f32 %v2624_v0, %v5386_v34  ;;  %v3041_v12 = vunpack.c.l.bf16 %v2939_v17  ;;  %v2945_v7 = vld [vmem:[#allocation13 + $0x2e0] ss:$20 sps:$4 sm:$0xff]  }
 0x3e9   :  { %4937 = vmatpush3.bf16.msra.mxu1 %v4665_v25  ;;  %v2789_v47 = vmul.f32 %v2629_v32, %v5386_v34  ;;  %v3046_v39 = vunpack.c.h.bf16 %v2939_v17  ;;  %v3618_v40 = vunpack.c.l.bf16 %v3516_v5  ;;  %v3623_v41 = vunpack.c.h.bf16 %v3516_v5  ;;  %v3522_v5 = vld [vmem:[#allocation13 + $0x560] ss:$20 sps:$4 sm:$0xff]  }
 0x3ea   :  { %v4595_v38 = vadd.f32 %v4435_v30, %v4018_v20  ;;  %v4600_v26 = vadd.f32 %v4440_v31, %v4023_v48  ;;  %v3201_v44 = vmul.f32 %v3041_v12, %v5389_v35  ;;  %v4195_v45 = vunpack.c.l.bf16 %v4093_v36 }
 0x3eb   :  { %v3206_v27 = vmul.f32 %v3046_v39, %v5389_v35  ;;  %v3778_v3 = vmul.f32 %v3618_v40, %v5398_v42  ;;  %v3783_v14 = vmul.f32 %v3623_v41, %v5398_v42  ;;  %v4200_v49 = vunpack.c.h.bf16 %v4093_v36  ;;  %v4099_v36 = vld [vmem:[#allocation13 + $0x7e0] ss:$20 sps:$4 sm:$0xff]  }
 0x3ec   :  { %v4710_v52 = vpack.c.bf16 %v4600_v26, %v4595_v38  ;;  %v3361_v33 = vadd.f32 %v3201_v44, %v2784_v28  ;;  %v4355_v54 = vmul.f32 %v4195_v45, %v5401_v43  ;;  %v2714_v22 = vunpack.c.l.bf16 %v2576_v37 }
 0x3ed   :  { %v3366_v57 = vadd.f32 %v3206_v27, %v2789_v47  ;;  %v4360_v58 = vmul.f32 %v4200_v49, %v5401_v43  ;;  %v2719_v51 = vunpack.c.h.bf16 %v2576_v37  ;;  %v3131_v59 = vunpack.c.l.bf16 %v2993_v46  ;;  %v2582_v47 = vld [vmem:[#allocation13 + $0x1c8] ss:$20 sps:$4 sm:$0xff]  }
 0x3ee   :  { %4938 = vmatprep.subr.bf16.mxu1 %v4710_v52  ;;  %v3938_v55 = vadd.f32 %v3778_v3, %v3361_v33  ;;  %v2874_v61 = vmul.f32 %v2714_v22, %v5386_v34  ;;  %v3136_v9 = vunpack.c.h.bf16 %v2993_v46  ;;  %v3708_v29 = vunpack.c.l.bf16 %v3570_v50  ;;  %v2999_v46 = vld [vmem:[#allocation13 + $0x448] ss:$20 sps:$4 sm:$0xff]  }
 0x3ef   :  { %v3943_v53 = vadd.f32 %v3783_v14, %v3366_v57  ;;  %v2879_v60 = vmul.f32 %v2719_v51, %v5386_v34  ;;  %v3291_v63 = vmul.f32 %v3131_v59, %v5389_v35  ;;  %v3713_v62 = vunpack.c.h.bf16 %v3570_v50  ;;  %v3576_v50 = vld [vmem:[#allocation13 + $0x6c8] ss:$20 sps:$4 sm:$0xff]  }
 0x3f0   :  { %v4515_v8 = vadd.f32 %v4355_v54, %v3938_v55  ;;  %v3296_v1 = vmul.f32 %v3136_v9, %v5389_v35  ;;  %v3868_v10 = vmul.f32 %v3708_v29, %v5398_v42  ;;  %v4285_v4 = vunpack.c.l.bf16 %v4147_v18  ;;  %v4153_v57 = vld [vmem:[#allocation13 + $0x948] ss:$20 sps:$4 sm:$0xff]  }
 0x3f1   :  { %v4520_v15 = vadd.f32 %v4360_v58, %v3943_v53  ;;  %v3451_v16 = vadd.f32 %v3291_v63, %v2874_v61  ;;  %v3873_v11 = vmul.f32 %v3713_v62, %v5398_v42  ;;  %v4290_v17 = vunpack.c.h.bf16 %v4147_v18  ;;  %v2534_v53 = vld [vmem:[#allocation13 + $0x88] ss:$20 sps:$4 sm:$0xff]  }
 0x3f2   :  { %v3456_v23 = vadd.f32 %v3296_v1, %v2879_v60  ;;  %v4445_v21 = vmul.f32 %v4285_v4, %v5401_v43  ;;  %v2634_v24 = vunpack.c.l.bf16 %v2528_v6  ;;  %v2639_v0 = vunpack.c.h.bf16 %v2528_v6 }
 0x3f3   :  { %v4670_v25 = vpack.c.bf16 %v4520_v15, %v4515_v8  ;;  %v4028_v30 = vadd.f32 %v3868_v10, %v3451_v16  ;;  %v4450_v31 = vmul.f32 %v4290_v17, %v5401_v43  ;;  %v3051_v32 = vunpack.c.l.bf16 %v2945_v7  ;;  %v2951_v8 = vld [vmem:[#allocation13 + $0x308] ss:$20 sps:$4 sm:$0xff]  }
 0x3f4   :  { %v4033_v20 = vadd.f32 %v3873_v11, %v3456_v23  ;;  %v2794_v48 = vmul.f32 %v2634_v24, %v5386_v34  ;;  %v2799_v28 = vmul.f32 %v2639_v0, %v5386_v34  ;;  %v3056_v12 = vunpack.c.h.bf16 %v2945_v7  ;;  %v3528_v23 = vld [vmem:[#allocation13 + $0x588] ss:$20 sps:$4 sm:$0xff]  }
 0x3f5   :  { %4939 = vmatpush3.bf16.msra.mxu1 %v4670_v25  ;;  %v4605_v39 = vadd.f32 %v4445_v21, %v4028_v30  ;;  %v3211_v40 = vmul.f32 %v3051_v32, %v5389_v35  ;;  %v3628_v41 = vunpack.c.l.bf16 %v3522_v5  ;;  %v3633_v37 = vunpack.c.h.bf16 %v3522_v5  ;;  %v4105_v25 = vld [vmem:[#allocation13 + $0x808] ss:$20 sps:$4 sm:$0xff]  }
 0x3f6   :  { %v4610_v38 = vadd.f32 %v4450_v31, %v4033_v20  ;;  %v3216_v26 = vmul.f32 %v3056_v12, %v5389_v35  ;;  %v4205_v44 = vunpack.c.l.bf16 %v4099_v36  ;;  %v4210_v45 = vunpack.c.h.bf16 %v4099_v36 }
 0x3f7   :  { %v3371_v27 = vadd.f32 %v3211_v40, %v2794_v48  ;;  %v3788_v3 = vmul.f32 %v3628_v41, %v5398_v42  ;;  %v3793_v14 = vmul.f32 %v3633_v37, %v5398_v42  ;;  %v2724_v49 = vunpack.c.l.bf16 %v2582_v47 }
 0x3f8   :  { %v4715_v52 = vpack.c.bf16 %v4610_v38, %v4605_v39  ;;  %v3376_v33 = vadd.f32 %v3216_v26, %v2799_v28  ;;  %v4365_v54 = vmul.f32 %v4205_v44, %v5401_v43  ;;  %v4370_v22 = vmul.f32 %v4210_v45, %v5401_v43 }
 0x3f9   :  { %v3948_v58 = vadd.f32 %v3788_v3, %v3371_v27  ;;  %v2729_v51 = vunpack.c.h.bf16 %v2582_v47  ;;  %v2884_v59 = vmul.f32 %v2724_v49, %v5386_v34  ;;  %v3141_v18 = vunpack.c.l.bf16 %v2999_v46  ;;  %v2588_v47 = vld [vmem:[#allocation13 + $0x1f0] ss:$20 sps:$4 sm:$0xff]  }
 0x3fa   :  { %4940 = vmatprep.subr.bf16.mxu1 %v4715_v52  ;;  %v3953_v55 = vadd.f32 %v3793_v14, %v3376_v33  ;;  %v3146_v61 = vunpack.c.h.bf16 %v2999_v46  ;;  %v3718_v9 = vunpack.c.l.bf16 %v3576_v50  ;;  %v3723_v29 = vunpack.c.h.bf16 %v3576_v50  ;;  %v3005_v46 = vld [vmem:[#allocation13 + $0x470] ss:$20 sps:$4 sm:$0xff]  }
 0x3fb   :  { %v4525_v60 = vadd.f32 %v4365_v54, %v3948_v58  ;;  %v2889_v63 = vmul.f32 %v2729_v51, %v5386_v34  ;;  %v3301_v62 = vmul.f32 %v3141_v18, %v5389_v35  ;;  %v4295_v6 = vunpack.c.l.bf16 %v4153_v57  ;;  %v3582_v50 = vld [vmem:[#allocation13 + $0x6f0] ss:$20 sps:$4 sm:$0xff]  }
 0x3fc   :  { %v4530_v1 = vadd.f32 %v4370_v22, %v3953_v55  ;;  %v3306_v10 = vmul.f32 %v3146_v61, %v5389_v35  ;;  %v3878_v4 = vmul.f32 %v3718_v9, %v5398_v42  ;;  %v3883_v7 = vmul.f32 %v3723_v29, %v5398_v42  ;;  %v2540_v55 = vld [vmem:[#allocation13 + $0xb0] ss:$20 sps:$4 sm:$0xff]  }
 0x3fd   :  { %v3461_v15 = vadd.f32 %v3301_v62, %v2884_v59  ;;  %v4300_v16 = vunpack.c.h.bf16 %v4153_v57  ;;  %v4455_v11 = vmul.f32 %v4295_v6, %v5401_v43  ;;  %v2644_v17 = vunpack.c.l.bf16 %v2534_v53  ;;  %v4159_v57 = vld [vmem:[#allocation13 + $0x970] ss:$20 sps:$4 sm:$0xff]  }
 0x3fe   :  { %v4675_v21 = vpack.c.bf16 %v4530_v1, %v4525_v60  ;;  %v3466_v24 = vadd.f32 %v3306_v10, %v2889_v63  ;;  %v2649_v0 = vunpack.c.h.bf16 %v2534_v53  ;;  %v3061_v5 = vunpack.c.l.bf16 %v2951_v8 }
 0x3ff   :  { %v4038_v30 = vadd.f32 %v3878_v4, %v3461_v15  ;;  %v4460_v31 = vmul.f32 %v4300_v16, %v5401_v43  ;;  %v2804_v32 = vmul.f32 %v2644_v17, %v5386_v34  ;;  %v3066_v36 = vunpack.c.h.bf16 %v2951_v8  ;;  %v2957_v8 = vld [vmem:[#allocation13 + $0x330] ss:$20 sps:$4 sm:$0xff]  }
 0x400   :  { %4941 = vmatpush3.bf16.msra.mxu1 %v4675_v21  ;;  %v4043_v20 = vadd.f32 %v3883_v7, %v3466_v24  ;;  %v2809_v48 = vmul.f32 %v2649_v0, %v5386_v34  ;;  %v3221_v28 = vmul.f32 %v3061_v5, %v5389_v35  ;;  %v3638_v12 = vunpack.c.l.bf16 %v3528_v23  ;;  %v3534_v15 = vld [vmem:[#allocation13 + $0x5b0] ss:$20 sps:$4 sm:$0xff]  }
 0x401   :  { %v4615_v39 = vadd.f32 %v4455_v11, %v4038_v30  ;;  %v3226_v40 = vmul.f32 %v3066_v36, %v5389_v35  ;;  %v3643_v41 = vunpack.c.h.bf16 %v3528_v23  ;;  %v4215_v37 = vunpack.c.l.bf16 %v4105_v25  ;;  %v4111_v21 = vld [vmem:[#allocation13 + $0x830] ss:$20 sps:$4 sm:$0xff]  }
 0x402   :  { %v4620_v38 = vadd.f32 %v4460_v31, %v4043_v20  ;;  %v3381_v26 = vadd.f32 %v3221_v28, %v2804_v32  ;;  %v3798_v44 = vmul.f32 %v3638_v12, %v5398_v42  ;;  %v4220_v45 = vunpack.c.h.bf16 %v4105_v25 }
 0x403   :  { %v3386_v27 = vadd.f32 %v3226_v40, %v2809_v48  ;;  %v3803_v3 = vmul.f32 %v3643_v41, %v5398_v42  ;;  %v4375_v14 = vmul.f32 %v4215_v37, %v5401_v43  ;;  %v2734_v49 = vunpack.c.l.bf16 %v2588_v47 }
 0x404   :  { %v4720_v52 = vpack.c.bf16 %v4620_v38, %v4615_v39  ;;  %v3958_v33 = vadd.f32 %v3798_v44, %v3381_v26  ;;  %v4380_v54 = vmul.f32 %v4220_v45, %v5401_v43  ;;  %v2739_v22 = vunpack.c.h.bf16 %v2588_v47  ;;  %v2594_v47 = vld [vmem:[#allocation13 + $0x218] ss:$20 sps:$4 sm:$0xff]  }
 0x405   :  { %v3963_v58 = vadd.f32 %v3803_v3, %v3386_v27  ;;  %v2894_v51 = vmul.f32 %v2734_v49, %v5386_v34  ;;  %v3151_v59 = vunpack.c.l.bf16 %v3005_v46  ;;  %v3156_v18 = vunpack.c.h.bf16 %v3005_v46  ;;  %v3011_v38 = vld [vmem:[#allocation13 + $0x498] ss:$20 sps:$4 sm:$0xff]  }
 0x406   :  { %4942 = vmatprep.subr.bf16.mxu1 %v4720_v52  ;;  %v4535_v61 = vadd.f32 %v4375_v14, %v3958_v33  ;;  %v2899_v9 = vmul.f32 %v2739_v22, %v5386_v34  ;;  %v3728_v29 = vunpack.c.l.bf16 %v3582_v50  ;;  %v3733_v53 = vunpack.c.h.bf16 %v3582_v50  ;;  %v3588_v27 = vld [vmem:[#allocation13 + $0x718] ss:$20 sps:$4 sm:$0xff]  }
 0x407   :  { %v4540_v60 = vadd.f32 %v4380_v54, %v3963_v58  ;;  %v3311_v63 = vmul.f32 %v3151_v59, %v5389_v35  ;;  %v3316_v62 = vmul.f32 %v3156_v18, %v5389_v35  ;;  %v4305_v6 = vunpack.c.l.bf16 %v4159_v57 }
 0x408   :  { %v3888_v1 = vmul.f32 %v3728_v29, %v5398_v42  ;;  %v3893_v10 = vmul.f32 %v3733_v53, %v5398_v42  ;;  %v4310_v4 = vunpack.c.h.bf16 %v4159_v57  ;;  %v2654_v7 = vunpack.c.l.bf16 %v2540_v55  ;;  %v4165_v57 = vld [vmem:[#allocation13 + $0x998] ss:$20 sps:$4 sm:$0xff]  }
 0x409   :  { %v4680_v16 = vpack.c.bf16 %v4540_v60, %v4535_v61  ;;  %v3471_v11 = vadd.f32 %v3311_v63, %v2894_v51  ;;  %v3476_v17 = vadd.f32 %v3316_v62, %v2899_v9  ;;  %v4465_v23 = vmul.f32 %v4305_v6, %v5401_v43 }
 0x40a   :  { %v4470_v24 = vmul.f32 %v4310_v4, %v5401_v43  ;;  %v2659_v0 = vunpack.c.h.bf16 %v2540_v55  ;;  %v2814_v5 = vmul.f32 %v2654_v7, %v5386_v34  ;;  %v3071_v25 = vunpack.c.l.bf16 %v2957_v8  ;;  %v2546_v55 = vld [vmem:[#allocation13 + $0xd8] ss:$20 sps:$4 sm:$0xff]  }
 0x40b   :  { %4943 = vmatpush3.bf16.msra.mxu1 %v4680_v16  ;;  %v4048_v30 = vadd.f32 %v3888_v1, %v3471_v11  ;;  %v4053_v31 = vadd.f32 %v3893_v10, %v3476_v17  ;;  %v3076_v32 = vunpack.c.h.bf16 %v2957_v8  ;;  %v3648_v36 = vunpack.c.l.bf16 %v3534_v15  ;;  %v2963_v8 = vld [vmem:[#allocation13 + $0x358] ss:$20 sps:$4 sm:$0xff]  }
 0x40c   :  { %v2819_v20 = vmul.f32 %v2659_v0, %v5386_v34  ;;  %v3231_v48 = vmul.f32 %v3071_v25, %v5389_v35  ;;  %v3653_v28 = vunpack.c.h.bf16 %v3534_v15  ;;  %v4225_v12 = vunpack.c.l.bf16 %v4111_v21  ;;  %v3540_v15 = vld [vmem:[#allocation13 + $0x5d8] ss:$20 sps:$4 sm:$0xff]  }
 0x40d   :  { %v4625_v39 = vadd.f32 %v4465_v23, %v4048_v30  ;;  %v4630_v40 = vadd.f32 %v4470_v24, %v4053_v31  ;;  %v3236_v41 = vmul.f32 %v3076_v32, %v5389_v35  ;;  %v3808_v37 = vmul.f32 %v3648_v36, %v5398_v42 }
 0x40e   :  { %v3391_v26 = vadd.f32 %v3231_v48, %v2814_v5  ;;  %v3813_v44 = vmul.f32 %v3653_v28, %v5398_v42  ;;  %v4230_v45 = vunpack.c.h.bf16 %v4111_v21  ;;  %v4385_v46 = vmul.f32 %v4225_v12, %v5401_v43  ;;  %v4117_v21 = vld [vmem:[#allocation13 + $0x858] ss:$20 sps:$4 sm:$0xff]  }
 0x40f   :  { %v4725_v3 = vpack.c.bf16 %v4630_v40, %v4625_v39  ;;  %v3396_v14 = vadd.f32 %v3236_v41, %v2819_v20  ;;  %v2744_v49 = vunpack.c.l.bf16 %v2594_v47  ;;  %v2749_v50 = vunpack.c.h.bf16 %v2594_v47  ;;  %v2600_v20 = vld [vmem:[#allocation13 + $0x240] ss:$20 sps:$4 sm:$0xff]  }
 0x410   :  { %v3968_v52 = vadd.f32 %v3808_v37, %v3391_v26  ;;  %v4390_v33 = vmul.f32 %v4230_v45, %v5401_v43  ;;  %v3161_v54 = vunpack.c.l.bf16 %v3011_v38  ;;  %v3166_v22 = vunpack.c.h.bf16 %v3011_v38  ;;  %v3017_v39 = vld [vmem:[#allocation13 + $0x4c0] ss:$20 sps:$4 sm:$0xff]  }
 0x411   :  { %4944 = vmatprep.subr.bf16.mxu1 %v4725_v3  ;;  %v3973_v58 = vadd.f32 %v3813_v44, %v3396_v14  ;;  %v2904_v51 = vmul.f32 %v2744_v49, %v5386_v34  ;;  %v2909_v59 = vmul.f32 %v2749_v50, %v5386_v34  ;;  %v3738_v18 = vunpack.c.l.bf16 %v3588_v27  ;;  %v3594_v26 = vld [vmem:[#allocation13 + $0x740] ss:$20 sps:$4 sm:$0xff]  }
 0x412   :  { %v4545_v61 = vadd.f32 %v4385_v46, %v3968_v52  ;;  %v3321_v9 = vmul.f32 %v3161_v54, %v5389_v35  ;;  %v3326_v29 = vmul.f32 %v3166_v22, %v5389_v35  ;;  %v3743_v53 = vunpack.c.h.bf16 %v3588_v27  ;;  %v4171_v52 = vld [vmem:[#allocation13 + $0x9c0] ss:$20 sps:$4 sm:$0xff]  }
 0x413   :  { %v4550_v60 = vadd.f32 %v4390_v33, %v3973_v58  ;;  %v3898_v63 = vmul.f32 %v3738_v18, %v5398_v42  ;;  %v4315_v62 = vunpack.c.l.bf16 %v4165_v57  ;;  %v4320_v6 = vunpack.c.h.bf16 %v4165_v57 }
 0x414   :  { %v3481_v1 = vadd.f32 %v3321_v9, %v2904_v51  ;;  %v3486_v10 = vadd.f32 %v3326_v29, %v2909_v59  ;;  %v3903_v4 = vmul.f32 %v3743_v53, %v5398_v42  ;;  %v2664_v7 = vunpack.c.l.bf16 %v2546_v55 }
 0x415   :  { %v4685_v16 = vpack.c.bf16 %v4550_v60, %v4545_v61  ;;  %v4475_v11 = vmul.f32 %v4315_v62, %v5401_v43  ;;  %v4480_v17 = vmul.f32 %v4320_v6, %v5401_v43  ;;  %v2669_v23 = vunpack.c.h.bf16 %v2546_v55  ;;  %v2552_v55 = vld [vmem:[#allocation13 + $0x100] ss:$20 sps:$4 sm:$0xff]  }
 0x416   :  { %v4058_v24 = vadd.f32 %v3898_v63, %v3481_v1  ;;  %v4063_v0 = vadd.f32 %v3903_v4, %v3486_v10  ;;  %v2824_v5 = vmul.f32 %v2664_v7, %v5386_v34  ;;  %v3081_v25 = vunpack.c.l.bf16 %v2963_v8  ;;  %v2969_v60 = vld [vmem:[#allocation13 + $0x380] ss:$20 sps:$4 sm:$0xff]  }
 0x417   :  { %4945 = vmatpush3.bf16.msra.mxu1 %v4685_v16  ;;  %v2829_v30 = vmul.f32 %v2669_v23, %v5386_v34  ;;  %v3086_v31 = vunpack.c.h.bf16 %v2963_v8  ;;  %v3658_v32 = vunpack.c.l.bf16 %v3540_v15  ;;  %v3663_v36 = vunpack.c.h.bf16 %v3540_v15  ;;  %v3546_v15 = vld [vmem:[#allocation13 + $0x600] ss:$20 sps:$4 sm:$0xff]  }
 0x418   :  { %v4635_v48 = vadd.f32 %v4475_v11, %v4058_v24  ;;  %v4640_v28 = vadd.f32 %v4480_v17, %v4063_v0  ;;  %v3241_v12 = vmul.f32 %v3081_v25, %v5389_v35  ;;  %v4235_v47 = vunpack.c.l.bf16 %v4117_v21 }
 0x419   :  { %v3246_v40 = vmul.f32 %v3086_v31, %v5389_v35  ;;  %v3818_v41 = vmul.f32 %v3658_v32, %v5398_v42  ;;  %v3823_v37 = vmul.f32 %v3663_v36, %v5398_v42  ;;  %v4240_v38 = vunpack.c.h.bf16 %v4117_v21  ;;  %v4123_v21 = vld [vmem:[#allocation13 + $0x880] ss:$20 sps:$4 sm:$0xff]  }
 0x41a   :  { %v4730_v44 = vpack.c.bf16 %v4640_v28, %v4635_v48  ;;  %v3401_v45 = vadd.f32 %v3241_v12, %v2824_v5  ;;  %v4395_v46 = vmul.f32 %v4235_v47, %v5401_v43  ;;  %v2754_v27 = vunpack.c.l.bf16 %v2600_v20 }
 0x41b   :  { %v3406_v3 = vadd.f32 %v3246_v40, %v2829_v30  ;;  %v4400_v14 = vmul.f32 %v4240_v38, %v5401_v43  ;;  %v2759_v49 = vunpack.c.h.bf16 %v2600_v20  ;;  %v3171_v50 = vunpack.c.l.bf16 %v3017_v39  ;;  %v2606_v30 = vld [vmem:[#allocation13 + $0x268] ss:$20 sps:$4 sm:$0xff]  }
 0x41c   :  { %4946 = vmatprep.subr.bf16.mxu1 %v4730_v44  ;;  %v3978_v33 = vadd.f32 %v3818_v41, %v3401_v45  ;;  %v2914_v54 = vmul.f32 %v2754_v27, %v5386_v34  ;;  %v3176_v22 = vunpack.c.h.bf16 %v3017_v39  ;;  %v3748_v57 = vunpack.c.l.bf16 %v3594_v26  ;;  %v3023_v39 = vld [vmem:[#allocation13 + $0x4e8] ss:$20 sps:$4 sm:$0xff]  }
 0x41d   :  { %v3983_v58 = vadd.f32 %v3823_v37, %v3406_v3  ;;  %v2919_v51 = vmul.f32 %v2759_v49, %v5386_v34  ;;  %v3331_v59 = vmul.f32 %v3171_v50, %v5389_v35  ;;  %v3753_v18 = vunpack.c.h.bf16 %v3594_v26  ;;  %v3600_v26 = vld [vmem:[#allocation13 + $0x768] ss:$20 sps:$4 sm:$0xff]  }
 0x41e   :  { %v4555_v61 = vadd.f32 %v4395_v46, %v3978_v33  ;;  %v3336_v9 = vmul.f32 %v3176_v22, %v5389_v35  ;;  %v3908_v29 = vmul.f32 %v3748_v57, %v5398_v42  ;;  %v4325_v53 = vunpack.c.l.bf16 %v4171_v52  ;;  %v4177_v3 = vld [vmem:[#allocation13 + $0x9e8] ss:$20 sps:$4 sm:$0xff]  }
 0x41f   :  { %v4560_v63 = vadd.f32 %v4400_v14, %v3983_v58  ;;  %v3491_v62 = vadd.f32 %v3331_v59, %v2914_v54  ;;  %v3913_v6 = vmul.f32 %v3753_v18, %v5398_v42  ;;  %v4330_v8 = vunpack.c.h.bf16 %v4171_v52  ;;  %v2558_v58 = vld [vmem:[#allocation13 + $0x128] ss:$20 sps:$4 sm:$0xff]  }
 0x420   :  { %v3496_v1 = vadd.f32 %v3336_v9, %v2919_v51  ;;  %v4485_v10 = vmul.f32 %v4325_v53, %v5401_v43  ;;  %v2674_v4 = vunpack.c.l.bf16 %v2552_v55  ;;  %v2679_v7 = vunpack.c.h.bf16 %v2552_v55 }
 0x421   :  { %v4690_v16 = vpack.c.bf16 %v4560_v63, %v4555_v61  ;;  %v4068_v11 = vadd.f32 %v3908_v29, %v3491_v62  ;;  %v4490_v17 = vmul.f32 %v4330_v8, %v5401_v43  ;;  %v3091_v23 = vunpack.c.l.bf16 %v2969_v60  ;;  %v2975_v61 = vld [vmem:[#allocation13 + $0x3a8] ss:$20 sps:$4 sm:$0xff]  }
 0x422   :  { %v4073_v24 = vadd.f32 %v3913_v6, %v3496_v1  ;;  %v2834_v0 = vmul.f32 %v2674_v4, %v5386_v34  ;;  %v2839_v5 = vmul.f32 %v2679_v7, %v5386_v34  ;;  %v3096_v25 = vunpack.c.h.bf16 %v2969_v60  ;;  %v3552_v1 = vld [vmem:[#allocation13 + $0x628] ss:$20 sps:$4 sm:$0xff]  }
 0x423   :  { %4947 = vmatpush3.bf16.msra.mxu1 %v4690_v16  ;;  %v4645_v31 = vadd.f32 %v4485_v10, %v4068_v11  ;;  %v3251_v32 = vmul.f32 %v3091_v23, %v5389_v35  ;;  %v3668_v36 = vunpack.c.l.bf16 %v3546_v15  ;;  %v3673_v20 = vunpack.c.h.bf16 %v3546_v15  ;;  %v4129_v16 = vld [vmem:[#allocation13 + $0x8a8] ss:$20 sps:$4 sm:$0xff]  }
 0x424   :  { %v4650_v48 = vadd.f32 %v4490_v17, %v4073_v24  ;;  %v3256_v28 = vmul.f32 %v3096_v25, %v5389_v35  ;;  %v4245_v12 = vunpack.c.l.bf16 %v4123_v21  ;;  %v4250_v47 = vunpack.c.h.bf16 %v4123_v21 }
 0x425   :  { %v3411_v40 = vadd.f32 %v3251_v32, %v2834_v0  ;;  %v3828_v41 = vmul.f32 %v3668_v36, %v5398_v42  ;;  %v3833_v37 = vmul.f32 %v3673_v20, %v5398_v42  ;;  %v2764_v38 = vunpack.c.l.bf16 %v2606_v30 }
 0x426   :  { %v4735_v44 = vpack.c.bf16 %v4650_v48, %v4645_v31  ;;  %v3416_v45 = vadd.f32 %v3256_v28, %v2839_v5  ;;  %v4405_v46 = vmul.f32 %v4245_v12, %v5401_v43  ;;  %v4410_v27 = vmul.f32 %v4250_v47, %v5401_v43 }
 0x427   :  { %v3988_v14 = vadd.f32 %v3828_v41, %v3411_v40  ;;  %v2769_v49 = vunpack.c.h.bf16 %v2606_v30  ;;  %v2924_v50 = vmul.f32 %v2764_v38, %v5386_v34  ;;  %v3181_v52 = vunpack.c.l.bf16 %v3023_v39 }
 0x428   :  { %4948 = vmatprep.subr.bf16.mxu1 %v4735_v44  ;;  %v3993_v33 = vadd.f32 %v3833_v37, %v3416_v45  ;;  %v3186_v54 = vunpack.c.h.bf16 %v3023_v39  ;;  %v3758_v22 = vunpack.c.l.bf16 %v3600_v26  ;;  %v3763_v57 = vunpack.c.h.bf16 %v3600_v26 }
 0x429   :  { %v4565_v51 = vadd.f32 %v4405_v46, %v3988_v14  ;;  %v2929_v59 = vmul.f32 %v2769_v49, %v5386_v34  ;;  %v3341_v18 = vmul.f32 %v3181_v52, %v5389_v35  ;;  %v4335_v55 = vunpack.c.l.bf16 %v4177_v3 }
 0x42a   :  { %v4570_v9 = vadd.f32 %v4410_v27, %v3993_v33  ;;  %v3346_v29 = vmul.f32 %v3186_v54, %v5389_v35  ;;  %v3918_v53 = vmul.f32 %v3758_v22, %v5398_v42  ;;  %v3923_v60 = vmul.f32 %v3763_v57, %v5398_v42  ;;  %v4741_v27 = vld [vmem:[#allocation15] sm:$0x1f]  ;;  %v4752_v54 = vld [vmem:[#allocation15 + $0xf] sm:$0x1f] }
 0x42b   :  { %v3501_v63 = vadd.f32 %v3341_v18, %v2924_v50  ;;  %v4340_v62 = vunpack.c.h.bf16 %v4177_v3  ;;  %v4495_v6 = vmul.f32 %v4335_v55, %v5401_v43  ;;  %v2684_v8 = vunpack.c.l.bf16 %v2558_v58  ;;  %v4744_v3 = vld [vmem:[#allocation15 + $0x5] sm:$0x1f]  ;;  %v4748_v50 = vld [vmem:[#allocation15 + $0xa] sm:$0x1f] }
 0x42c   :  { %v4695_v10 = vpack.c.bf16 %v4570_v9, %v4565_v51  ;;  %v3506_v4 = vadd.f32 %v3346_v29, %v2929_v59  ;;  %v2689_v7 = vunpack.c.h.bf16 %v2558_v58  ;;  %v3101_v15 = vunpack.c.l.bf16 %v2975_v61 }
 0x42d   :  { %v4078_v11 = vadd.f32 %v3918_v53, %v3501_v63  ;;  %v4500_v17 = vmul.f32 %v4340_v62, %v5401_v43  ;;  %v2844_v23 = vmul.f32 %v2684_v8, %v5386_v34  ;;  %v3106_v21 = vunpack.c.h.bf16 %v2975_v61 }
 0x42e   :  { %4949 = vmatpush3.bf16.msra.mxu1 %v4695_v10  ;;  %v4083_v24 = vadd.f32 %v3923_v60, %v3506_v4  ;;  %v2849_v0 = vmul.f32 %v2689_v7, %v5386_v34  ;;  %v3261_v5 = vmul.f32 %v3101_v15, %v5389_v35  ;;  %v3678_v25 = vunpack.c.l.bf16 %v3552_v1 }
 0x42f   :  { %v4655_v30 = vadd.f32 %v4495_v6, %v4078_v11  ;;  %v3266_v31 = vmul.f32 %v3106_v21, %v5389_v35  ;;  %v3683_v32 = vunpack.c.h.bf16 %v3552_v1  ;;  %v4255_v36 = vunpack.c.l.bf16 %v4129_v16 }
 0x430   :  { %v4660_v20 = vadd.f32 %v4500_v17, %v4083_v24  ;;  %v3421_v48 = vadd.f32 %v3261_v5, %v2844_v23  ;;  %v3838_v28 = vmul.f32 %v3678_v25, %v5398_v42  ;;  %v4260_v12 = vunpack.c.h.bf16 %v4129_v16 }
 0x431   :  { %v3426_v47 = vadd.f32 %v3266_v31, %v2849_v0  ;;  %v3843_v39 = vmul.f32 %v3683_v32, %v5398_v42  ;;  %v4415_v40 = vmul.f32 %v4255_v36, %v5401_v43  ;;  %v4742_v14 = vmul.f32 %v4741_v27, %v5386_v34 }
 0x432   :  { %v4740_v41 = vpack.c.bf16 %v4660_v20, %v4655_v30  ;;  %v3998_v37 = vadd.f32 %v3838_v28, %v3421_v48  ;;  %v4420_v38 = vmul.f32 %v4260_v12, %v5401_v43  ;;  %v4745_v49 = vmul.f32 %v4744_v3, %v5389_v35 }
 0x433   :  { %v4003_v26 = vadd.f32 %v3843_v39, %v3426_v47  ;;  %v4749_v33 = vmul.f32 %v4748_v50, %v5398_v42  ;;  %v4753_v57 = vmul.f32 %v4752_v54, %v5401_v43  ;;  %v4768_v59 = vsub.s32 2, %v5957_v2 }
 0x434   :  { %4950 = vmatprep.subr.bf16.mxu1 %v4740_v41  ;;  %v4575_v44 = vadd.f32 %v4415_v40, %v3998_v37  ;;  %v4746_v52 = vadd.f32 %v4745_v49, %v4742_v14  ;;  %v4772_v18 = vsub.s32 3, %v5957_v2 }
 0x435   :  { %v4580_v45 = vadd.f32 %v4420_v38, %v4003_v26 }
 0x436   :  { %v4750_v22 = vadd.f32 %v4749_v33, %v4746_v52 }
 0x437   :  { %v4700_v46 = vpack.c.bf16 %v4580_v45, %v4575_v44 }
 0x438   :  { %v4754_v58 = vadd.f32 %v4753_v57, %v4750_v22 }
 0x439   :  { %4951 = vmatpush3.bf16.msra.mxu1 %v4700_v46 }
 0x43a   :  { %v4761_v51 = vrot.slane %v4754_v58, %v5966_v13  ;;  %v4769_v35 = vrot.slane %v4754_v58, %v4768_v59  ;;  %v4773_v29 = vrot.slane %v4754_v58, %v4772_v18 }
 0x43c   :  { %4898 = vmatmul.mubr.bf16.vlgmr.msra.gmra.mrb[8].mxu1 %v6533_v56  ;;  %v4765_v56 = vrot.slane %v4754_v58, %v5972_v19  ;;  %v4776_v19 = vsub.s32 4, %v5957_v2 }
 0x43e   :  { %v4777_v1 = vrot.slane %v4754_v58, %v4776_v19 }
 0x4ae   :  { %v4817_v34 = vpop.f32.mrb[4].mxu1 }
 0x4af   :  { %v4818_v55 = vadd.f32 %v4817_v34, %v4761_v51  ;;  %v4819_v61 = vpop.f32.mrb[5].mxu1 }
 0x4b0   :  { %v4820_v9 = vadd.f32 %v4819_v61, %v4765_v56  ;;  %v4821_v42 = vpop.f32.mrb[6].mxu1 }
 0x4b1   :  { %4905 = vst [vmem:[#allocation16] sm:$0xff] %v4818_v55  ;;  %v4822_v53 = vpop.f32.mrb[7].mxu1 }
 0x4b2   :  { %v4858_v60 = vpop.f32.mrb[4].mxu0  ;;  %4906 = vst [vmem:[#allocation16 + $0x8] sm:$0xff] %v4820_v9 }
 0x4b3   :  { %v4859_v43 = vadd.f32 %v4858_v60, %v4769_v35  ;;  %v4860_v63 = vpop.f32.mrb[5].mxu0 }
 0x4b4   :  { %v4861_v13 = vadd.f32 %v4860_v63, %v4773_v29  ;;  %v4862_v62 = vpop.f32.mrb[6].mxu0 }
 0x4b5   :  { %4907 = vst [vmem:[#allocation16 + $0x10] sm:$0xff] %v4859_v43  ;;  %v4863_v6 = vpop.f32.mrb[7].mxu0 }
 0x4b6   :  { %4908 = vst [vmem:[#allocation16 + $0x18] sm:$0xff] %v4861_v13 }
 0x50f   :  { %v4952_v8 = vpop.f32.mrb[8].mxu1 }
 0x510   :  { %v4953_v10 = vpop.f32.mrb[9].mxu1 }
 0x511   :  { %v4954_v4 = vadd.f32 %v4953_v10, %v4952_v8  ;;  %v4955_v7 = vpop.f32.mrb[10].mxu1 }
 0x512   :  { %v4956_v15 = vpop.f32.mrb[11].mxu1 }
 0x513   :  { %v4900_v16 = vadd.f32 %v4954_v4, %v4777_v1 }
 0x515   :  { %4909 = vst [vmem:[#allocation16 + $0x20] sm:$0xff] %v4900_v16 }
 0x516   :  { %5165 = shalt.err (!%p5162_p7)
}
 0x517   :  { %s5166_s12 = scalar_lea.hbm %s6825_s8, 640 }
 0x518   :  { %p5167_p8 = scmp.ne.s32.totalorder %s6825_s8, %s5166_s12  ;;  %p5170_p9 = scmp.lt.u32.totalorder %s5166_s12, %s6825_s8 }
 0x51a   :  { %p5172_p10 = pnand %p5170_p9, %p5167_p8 }
 0x51c   :  { %5175 = shalt.err (!%p5172_p10)
}
 0x51d   :  { %4919 = dma.vmem_to_hbm [thread:$0]  %s4917_s6, 640, %s6825_s8, [#allocation4]  }
 0x51e   :  { %5186 = dma.done.wait [#allocation4], 640  }
 0x51f   :  { %5187 = vsyncadd [#allocation4], 4294966656 }
 0x520   :  { %4923 = vsyncpa [#allocation3], 1 }
 0x521   :  { %4924 = vsyncpa [#allocation8], 1 }
 0x522   :  { %4925 = vsyncpa [#allocation11], 1 }
 0x523   :  { %4926 = vsyncpa [#allocation14], 1 }
 0x524   :  { %4927 = vsyncpa [#allocation4], 1 }
 0x525   :  { %4928 = vsyncpa [#allocation5], 1 }

</bundles_post_ra>
